<compile_context>
chip_gen: v6e
topology: v6e:2x2x1
jax: 0.10.0
libtpu: 0.0.40
codegen_flags: <defaults>
</compile_context>

<pallas_src>
import functools

import jax
import jax.numpy as jnp
from jax.experimental import pallas as pl
from jax.experimental.pallas import tpu as pltpu

# Tile maxima (good for v6e/v7x 2x256x256 MXU; still efficient on v5e's 4x128x128).
TM_MAX = 256
TN_MAX = 256
TK_MAX = 256

VMEM_LIMIT_BYTES = 32 * 1024 * 1024  # safe on v5e/v6e (128 MiB) and v7x (64 MiB)


def _round_up(x, m):
    return ((x + m - 1) // m) * m


def _tile_kn(K, N):
    tk = min(TK_MAX, _round_up(K, 128))
    tn = min(TN_MAX, _round_up(N, 128))
    return tk, tn, _round_up(K, tk), _round_up(N, tn)


# ----------------------------------------------------------------------------
# Pallas kernels
# ----------------------------------------------------------------------------
def _mm_kernel(x_ref, w_ref, b_ref, o_ref, *, relu):
    """out(i,j) accumulates over k directly in the output block (f32)."""
    k = pl.program_id(2)

    @pl.when(k == 0)
    def _():
        o_ref[...] = jnp.zeros_like(o_ref)

    o_ref[...] += jnp.dot(x_ref[...], w_ref[...],
                          preferred_element_type=jnp.float32)

    @pl.when(k == pl.num_programs(2) - 1)
    def _():
        out = o_ref[...] + b_ref[...]
        if relu:
            out = jnp.maximum(out, 0.0)
        o_ref[...] = out


def _mm_res_kernel(x_ref, w_ref, b_ref, r_ref, o_ref, *, relu):
    k = pl.program_id(2)

    @pl.when(k == 0)
    def _():
        o_ref[...] = jnp.zeros_like(o_ref)

    o_ref[...] += jnp.dot(x_ref[...], w_ref[...],
                          preferred_element_type=jnp.float32)

    @pl.when(k == pl.num_programs(2) - 1)
    def _():
        out = o_ref[...] + b_ref[...] + r_ref[...]
        if relu:
            out = jnp.maximum(out, 0.0)
        o_ref[...] = out


def _avgpool_kernel(x_ref, o_ref):
    # x: (N, H*W, C) -> o: (N, C), mean over the spatial axis.
    o_ref[...] = jnp.mean(x_ref[...], axis=1)


# ----------------------------------------------------------------------------
# Pallas wrappers
# ----------------------------------------------------------------------------
def matmul_bias(x, wp, bp, n_out, *, relu=False, residual=None):
    """out = [relu]( x @ w + b [+ residual] ).

    x        : (M, K) activations (any float dtype; cast to bf16 for the MXU).
    wp       : (Kp, Np) bf16 weights, pre-padded/cast at init time.
    bp       : (1, Np)  f32 bias, pre-padded at init time.
    n_out    : number of valid output columns (<= Np).
    residual : optional (M, n_out) f32 tensor fused into the epilogue.
    """
    M, K = x.shape
    Kp, Np = wp.shape

    tm = min(TM_MAX, _round_up(M, 8))
    tn = min(TN_MAX, Np)
    tk = min(TK_MAX, Kp)
    Mp = _round_up(M, tm)

    if x.dtype != jnp.bfloat16:
        x = x.astype(jnp.bfloat16)
    xp = jnp.pad(x, ((0, Mp - M), (0, Kp - K)))

    grid = (Mp // tm, Np // tn, Kp // tk)

    in_specs = [
        pl.BlockSpec((tm, tk), lambda i, j, k: (i, k)),
        pl.BlockSpec((tk, tn), lambda i, j, k: (k, j)),
        pl.BlockSpec((1, tn), lambda i, j, k: (0, j)),
    ]
    args = [xp, wp, bp]

    if residual is not None:
        rp = jnp.pad(residual.astype(jnp.float32),
                     ((0, Mp - M), (0, Np - residual.shape[1])))
        in_specs.append(pl.BlockSpec((tm, tn), lambda i, j, k: (i, j)))
        args.append(rp)
        kernel = functools.partial(_mm_res_kernel, relu=relu)
    else:
        kernel = functools.partial(_mm_kernel, relu=relu)

    out = pl.pallas_call(
        kernel,
        out_shape=jax.ShapeDtypeStruct((Mp, Np), jnp.float32),
        grid=grid,
        in_specs=in_specs,
        out_specs=pl.BlockSpec((tm, tn), lambda i, j, k: (i, j)),
        compiler_params=pltpu.CompilerParams(
            dimension_semantics=("parallel", "parallel", "arbitrary"),
            vmem_limit_bytes=VMEM_LIMIT_BYTES,
        ),
    )(*args)
    return out[:M, :n_out]


def global_avgpool(x_nhwc):
    """AdaptiveAvgPool2d((1,1)) + flatten : (N,H,W,C) -> (N,C)."""
    N, H, W, C = x_nhwc.shape
    x3 = x_nhwc.reshape(N, H * W, C).astype(jnp.float32)
    return pl.pallas_call(
        _avgpool_kernel,
        out_shape=jax.ShapeDtypeStruct((N, C), jnp.float32),
        in_specs=[pl.BlockSpec(memory_space=pltpu.MemorySpace.VMEM)],
        out_specs=pl.BlockSpec(memory_space=pltpu.MemorySpace.VMEM),
    )(x3)


# ----------------------------------------------------------------------------
# Conv = im2col (glue, bf16) + Pallas matmul (hot path)
# ----------------------------------------------------------------------------
def _im2col(x_nhwc, kh, kw, stride, pad):
    N, H, W, C = x_nhwc.shape
    xp = jnp.pad(x_nhwc, ((0, 0), (pad, pad), (pad, pad), (0, 0)))
    Ho = (H + 2 * pad - kh) // stride + 1
    Wo = (W + 2 * pad - kw) // stride + 1
    cols = []
    for i in range(kh):
        for j in range(kw):
            cols.append(xp[:, i:i + stride * Ho:stride,
                           j:j + stride * Wo:stride, :])
    cols = jnp.concatenate(cols, axis=-1)          # (N, Ho, Wo, kh*kw*C)
    return cols.reshape(N * Ho * Wo, kh * kw * C), (N, Ho, Wo)


def conv2d(x_nhwc, p, kh, kw, stride, pad, *, relu=False, residual=None):
    # Cast to bf16 before im2col so the materialized cols tensor is half-size.
    cols, (N, Ho, Wo) = _im2col(x_nhwc.astype(jnp.bfloat16), kh, kw, stride, pad)
    res2d = None
    if residual is not None:
        res2d = residual.reshape(N * Ho * Wo, residual.shape[-1])
    out = matmul_bias(cols, p["w"], p["b"], p["cout"],
                      relu=relu, residual=res2d)
    return out.reshape(N, Ho, Wo, p["cout"])


# ----------------------------------------------------------------------------
# Parameter init (deterministic, synthetic). Weights are padded to tile-aligned
# (Kp, Np) and cast to bf16 HERE, so the forward path never re-pads them.
# ----------------------------------------------------------------------------
def _init_conv(key, kh, kw, cin, cout):
    wk, bk = jax.random.split(key)
    K = kh * kw * cin
    w = jax.random.normal(wk, (K, cout), jnp.float32) / jnp.sqrt(K)
    b = jax.random.normal(bk, (1, cout), jnp.float32) * 0.01
    _, _, Kp, Np = _tile_kn(K, cout)
    wp = jnp.pad(w, ((0, Kp - K), (0, Np - cout))).astype(jnp.bfloat16)
    bp = jnp.pad(b, ((0, 0), (0, Np - cout)))
    return {"w": wp, "b": bp, "cout": cout}


def init_resnet(key, layers, num_classes):
    params = {}
    params["conv1"] = _init_conv(jax.random.fold_in(key, 0), 7, 7, 3, 64)

    in_planes = 64
    plane_cfg = [64, 128, 256, 512]
    stride_cfg = [1, 2, 2, 2]
    blocks = []
    idx = 1
    for planes, layer_stride, nblocks in zip(plane_cfg, stride_cfg, layers):
        strides = [layer_stride] + [1] * (nblocks - 1)
        for s in strides:
            p = {"stride": s}
            p["conv1"] = _init_conv(jax.random.fold_in(key, idx), 3, 3, in_planes, planes)
            idx += 1
            p["conv2"] = _init_conv(jax.random.fold_in(key, idx), 3, 3, planes, planes)
            idx += 1
            if s != 1 or in_planes != planes:
                p["shortcut"] = _init_conv(jax.random.fold_in(key, idx), 1, 1, in_planes, planes)
                idx += 1
            blocks.append(p)
            in_planes = planes  # expansion = 1
    params["blocks"] = blocks

    # FC: weights padded to 128 output lanes for lane-dense stores (sliced after).
    params["fc"] = _init_conv(jax.random.fold_in(key, 1000), 1, 1, 512, num_classes)
    return params


# ----------------------------------------------------------------------------
# Forward pass
# ----------------------------------------------------------------------------
def basic_block_forward(x, p):
    s = p["stride"]
    out = conv2d(x, p["conv1"], 3, 3, s, 1, relu=True)
    if "shortcut" in p:
        sc = conv2d(x, p["shortcut"], 1, 1, s, 0, relu=False)
    else:
        sc = x
    # second conv with fused residual add + relu (epilogue of the matmul kernel)
    return conv2d(out, p["conv2"], 3, 3, 1, 1, relu=True, residual=sc)


def resnet_forward(x_nchw, params):
    x = jnp.transpose(x_nchw, (0, 2, 3, 1)).astype(jnp.float32)  # NCHW -> NHWC
    x = conv2d(x, params["conv1"], 7, 7, 2, 3, relu=True)        # conv1 + relu
    for p in params["blocks"]:                                   # layer1..layer4
        x = basic_block_forward(x, p)
    x = global_avgpool(x)                                        # avgpool + flatten
    return matmul_bias(x, params["fc"]["w"], params["fc"]["b"],
                       params["fc"]["cout"])                     # fc


# ----------------------------------------------------------------------------
if __name__ == "__main__":
    key = jax.random.PRNGKey(0)
    num_classes = 10
    layers = [1, 1, 1, 1]           # one BasicBlock per stage (tiny ResNet)

    params = init_resnet(jax.random.fold_in(key, 7), layers, num_classes)
    x = jax.random.normal(jax.random.fold_in(key, 11), (2, 3, 32, 32), jnp.float32)

    fwd = jax.jit(lambda inp: resnet_forward(inp, params))
    out = fwd(x)
    out = jax.block_until_ready(out)

    assert out.shape == (2, num_classes), out.shape
    assert jnp.all(jnp.isfinite(out))
    print("KERNEL_OK")
</pallas_src>

<mosaic_0001>
module attributes {stable_mosaic.version = 11 : i64} {
  func.func @_mm_kernel(%arg0: i32, %arg1: i32, %arg2: i32, %arg3: memref<256x256xbf16, #tpu.memory_space<vmem>>, %arg4: memref<256x128xbf16, #tpu.memory_space<vmem>>, %arg5: memref<1x128xf32, #tpu.memory_space<vmem>>, %arg6: memref<256x128xf32, #tpu.memory_space<vmem>>) attributes {dimension_semantics = [#tpu.dimension_semantics<parallel>, #tpu.dimension_semantics<parallel>, #tpu.dimension_semantics<arbitrary>], iteration_bounds = array<i64: 2, 1, 1>, scalar_prefetch = 0 : i64, scratch_operands = 0 : i64, tpu.core_type = #tpu.core_type<tc>, window_params = [{transform_indices = @transform_0, window_bounds = array<i64: 256, 256>}, {transform_indices = @transform_1, window_bounds = array<i64: 256, 128>}, {transform_indices = @transform_2, window_bounds = array<i64: 1, 128>}, {transform_indices = @transform_3, window_bounds = array<i64: 256, 128>}]} {
    %c0_i32 = arith.constant 0 : i32
    %0 = arith.cmpi eq, %arg2, %c0_i32 : i32
    %1 = arith.extui %0 : i1 to i32
    %c0_i32_0 = arith.constant 0 : i32
    %2 = arith.cmpi ne, %1, %c0_i32_0 : i32
    scf.if %2 {
      %cst_10 = arith.constant 0.000000e+00 : f32
      %12 = vector.broadcast %cst_10 : f32 to vector<256x128xf32>
      %c0_11 = arith.constant 0 : index
      %c0_12 = arith.constant 0 : index
      %13 = vector.load %arg6[%c0_11, %c0_12] : memref<256x128xf32, #tpu.memory_space<vmem>>, vector<256x128xf32>
      tpu.vector_store %arg6[%c0_11, %c0_12], %12 {strides = array<i32>} : memref<256x128xf32, #tpu.memory_space<vmem>>, vector<256x128xf32>,
    } else {
    }
    %c0 = arith.constant 0 : index
    %c0_1 = arith.constant 0 : index
    %3 = vector.load %arg6[%c0, %c0_1] : memref<256x128xf32, #tpu.memory_space<vmem>>, vector<256x128xf32>
    %c0_2 = arith.constant 0 : index
    %c0_3 = arith.constant 0 : index
    %4 = vector.load %arg3[%c0_2, %c0_3] : memref<256x256xbf16, #tpu.memory_space<vmem>>, vector<256x256xbf16>
    %c0_4 = arith.constant 0 : index
    %c0_5 = arith.constant 0 : index
    %5 = vector.load %arg4[%c0_4, %c0_5] : memref<256x128xbf16, #tpu.memory_space<vmem>>, vector<256x128xbf16>
    %cst = arith.constant dense<0.000000e+00> : vector<256x128xf32>
    %6 = tpu.matmul %4, %5, %cst {dimension_numbers = #tpu.dot_dimension_numbers<[1], [0], [0], [1], [0, 0, 1, 1], [], []>} : vector<256x256xbf16>, vector<256x128xbf16>, vector<256x128xf32> -> vector<256x128xf32>
    %7 = arith.addf %3, %6 : vector<256x128xf32>
    %c0_6 = arith.constant 0 : index
    %c0_7 = arith.constant 0 : index
    %8 = vector.load %arg6[%c0_6, %c0_7] : memref<256x128xf32, #tpu.memory_space<vmem>>, vector<256x128xf32>
    tpu.vector_store %arg6[%c0_6, %c0_7], %7 {strides = array<i32>} : memref<256x128xf32, #tpu.memory_space<vmem>>, vector<256x128xf32>,
    %c0_i32_8 = arith.constant 0 : i32
    %9 = arith.cmpi eq, %arg2, %c0_i32_8 : i32
    %10 = arith.extui %9 : i1 to i32
    %c0_i32_9 = arith.constant 0 : i32
    %11 = arith.cmpi ne, %10, %c0_i32_9 : i32
    scf.if %11 {
      %c0_10 = arith.constant 0 : index
      %c0_11 = arith.constant 0 : index
      %12 = vector.load %arg6[%c0_10, %c0_11] : memref<256x128xf32, #tpu.memory_space<vmem>>, vector<256x128xf32>
      %c0_12 = arith.constant 0 : index
      %c0_13 = arith.constant 0 : index
      %13 = vector.load %arg5[%c0_12, %c0_13] : memref<1x128xf32, #tpu.memory_space<vmem>>, vector<1x128xf32>
      %14 = vector.broadcast %13 : vector<1x128xf32> to vector<256x128xf32>
      %15 = arith.addf %12, %14 : vector<256x128xf32>
      %cst_14 = arith.constant 0.000000e+00 : f32
      %16 = vector.broadcast %cst_14 : f32 to vector<256x128xf32>
      %17 = arith.maximumf %15, %16 : vector<256x128xf32>
      %c0_15 = arith.constant 0 : index
      %c0_16 = arith.constant 0 : index
      %18 = vector.load %arg6[%c0_15, %c0_16] : memref<256x128xf32, #tpu.memory_space<vmem>>, vector<256x128xf32>
      tpu.vector_store %arg6[%c0_15, %c0_16], %17 {strides = array<i32>} : memref<256x128xf32, #tpu.memory_space<vmem>>, vector<256x128xf32>,
    } else {
    }
    return
  }
  func.func @transform_0(%arg0: i32, %arg1: i32, %arg2: i32) -> (i32, i32) {
    %c0_i32 = arith.constant 0 : i32
    return %arg0, %arg2 : i32, i32
  }
  func.func @transform_1(%arg0: i32, %arg1: i32, %arg2: i32) -> (i32, i32) {
    %c0_i32 = arith.constant 0 : i32
    return %arg2, %arg1 : i32, i32
  }
  func.func @transform_2(%arg0: i32, %arg1: i32, %arg2: i32) -> (i32, i32) {
    %c0_i32 = arith.constant 0 : i32
    %c0_i32_0 = arith.constant 0 : i32
    return %c0_i32, %arg1 : i32, i32
  }
  func.func @transform_3(%arg0: i32, %arg1: i32, %arg2: i32) -> (i32, i32) {
    %c0_i32 = arith.constant 0 : i32
    return %arg0, %arg1 : i32, i32
  }
}

module attributes {stable_mosaic.version = 11 : i64} {
  func.func @_mm_kernel(%arg0: i32, %arg1: i32, %arg2: i32, %arg3: memref<256x256xbf16, #tpu.memory_space<vmem>>, %arg4: memref<256x128xbf16, #tpu.memory_space<vmem>>, %arg5: memref<1x128xf32, #tpu.memory_space<vmem>>, %arg6: memref<256x128xf32, #tpu.memory_space<vmem>>) attributes {dimension_semantics = [#tpu.dimension_semantics<parallel>, #tpu.dimension_semantics<parallel>, #tpu.dimension_semantics<arbitrary>], iteration_bounds = array<i64: 2, 1, 3>, scalar_prefetch = 0 : i64, scratch_operands = 0 : i64, tpu.core_type = #tpu.core_type<tc>, window_params = [{transform_indices = @transform_0, window_bounds = array<i64: 256, 256>}, {transform_indices = @transform_1, window_bounds = array<i64: 256, 128>}, {transform_indices = @transform_2, window_bounds = array<i64: 1, 128>}, {transform_indices = @transform_3, window_bounds = array<i64: 256, 128>}]} {
    %c0_i32 = arith.constant 0 : i32
    %0 = arith.cmpi eq, %arg2, %c0_i32 : i32
    %1 = arith.extui %0 : i1 to i32
    %c0_i32_0 = arith.constant 0 : i32
    %2 = arith.cmpi ne, %1, %c0_i32_0 : i32
    scf.if %2 {
      %cst_9 = arith.constant 0.000000e+00 : f32
      %12 = vector.broadcast %cst_9 : f32 to vector<256x128xf32>
      %c0_10 = arith.constant 0 : index
      %c0_11 = arith.constant 0 : index
      %13 = vector.load %arg6[%c0_10, %c0_11] : memref<256x128xf32, #tpu.memory_space<vmem>>, vector<256x128xf32>
      tpu.vector_store %arg6[%c0_10, %c0_11], %12 {strides = array<i32>} : memref<256x128xf32, #tpu.memory_space<vmem>>, vector<256x128xf32>,
    } else {
    }
    %c0 = arith.constant 0 : index
    %c0_1 = arith.constant 0 : index
    %3 = vector.load %arg6[%c0, %c0_1] : memref<256x128xf32, #tpu.memory_space<vmem>>, vector<256x128xf32>
    %c0_2 = arith.constant 0 : index
    %c0_3 = arith.constant 0 : index
    %4 = vector.load %arg3[%c0_2, %c0_3] : memref<256x256xbf16, #tpu.memory_space<vmem>>, vector<256x256xbf16>
    %c0_4 = arith.constant 0 : index
    %c0_5 = arith.constant 0 : index
    %5 = vector.load %arg4[%c0_4, %c0_5] : memref<256x128xbf16, #tpu.memory_space<vmem>>, vector<256x128xbf16>
    %cst = arith.constant dense<0.000000e+00> : vector<256x128xf32>
    %6 = tpu.matmul %4, %5, %cst {dimension_numbers = #tpu.dot_dimension_numbers<[1], [0], [0], [1], [0, 0, 1, 1], [], []>} : vector<256x256xbf16>, vector<256x128xbf16>, vector<256x128xf32> -> vector<256x128xf32>
    %7 = arith.addf %3, %6 : vector<256x128xf32>
    %c0_6 = arith.constant 0 : index
    %c0_7 = arith.constant 0 : index
    %8 = vector.load %arg6[%c0_6, %c0_7] : memref<256x128xf32, #tpu.memory_space<vmem>>, vector<256x128xf32>
    tpu.vector_store %arg6[%c0_6, %c0_7], %7 {strides = array<i32>} : memref<256x128xf32, #tpu.memory_space<vmem>>, vector<256x128xf32>,
    %c2_i32 = arith.constant 2 : i32
    %9 = arith.cmpi eq, %arg2, %c2_i32 : i32
    %10 = arith.extui %9 : i1 to i32
    %c0_i32_8 = arith.constant 0 : i32
    %11 = arith.cmpi ne, %10, %c0_i32_8 : i32
    scf.if %11 {
      %c0_9 = arith.constant 0 : index
      %c0_10 = arith.constant 0 : index
      %12 = vector.load %arg6[%c0_9, %c0_10] : memref<256x128xf32, #tpu.memory_space<vmem>>, vector<256x128xf32>
      %c0_11 = arith.constant 0 : index
      %c0_12 = arith.constant 0 : index
      %13 = vector.load %arg5[%c0_11, %c0_12] : memref<1x128xf32, #tpu.memory_space<vmem>>, vector<1x128xf32>
      %14 = vector.broadcast %13 : vector<1x128xf32> to vector<256x128xf32>
      %15 = arith.addf %12, %14 : vector<256x128xf32>
      %cst_13 = arith.constant 0.000000e+00 : f32
      %16 = vector.broadcast %cst_13 : f32 to vector<256x128xf32>
      %17 = arith.maximumf %15, %16 : vector<256x128xf32>
      %c0_14 = arith.constant 0 : index
      %c0_15 = arith.constant 0 : index
      %18 = vector.load %arg6[%c0_14, %c0_15] : memref<256x128xf32, #tpu.memory_space<vmem>>, vector<256x128xf32>
      tpu.vector_store %arg6[%c0_14, %c0_15], %17 {strides = array<i32>} : memref<256x128xf32, #tpu.memory_space<vmem>>, vector<256x128xf32>,
    } else {
    }
    return
  }
  func.func @transform_0(%arg0: i32, %arg1: i32, %arg2: i32) -> (i32, i32) {
    %c0_i32 = arith.constant 0 : i32
    return %arg0, %arg2 : i32, i32
  }
  func.func @transform_1(%arg0: i32, %arg1: i32, %arg2: i32) -> (i32, i32) {
    %c0_i32 = arith.constant 0 : i32
    return %arg2, %arg1 : i32, i32
  }
  func.func @transform_2(%arg0: i32, %arg1: i32, %arg2: i32) -> (i32, i32) {
    %c0_i32 = arith.constant 0 : i32
    %c0_i32_0 = arith.constant 0 : i32
    return %c0_i32, %arg1 : i32, i32
  }
  func.func @transform_3(%arg0: i32, %arg1: i32, %arg2: i32) -> (i32, i32) {
    %c0_i32 = arith.constant 0 : i32
    return %arg0, %arg1 : i32, i32
  }
}

module attributes {stable_mosaic.version = 11 : i64} {
  func.func @_mm_res_kernel(%arg0: i32, %arg1: i32, %arg2: i32, %arg3: memref<256x256xbf16, #tpu.memory_space<vmem>>, %arg4: memref<256x128xbf16, #tpu.memory_space<vmem>>, %arg5: memref<1x128xf32, #tpu.memory_space<vmem>>, %arg6: memref<256x128xf32, #tpu.memory_space<vmem>>, %arg7: memref<256x128xf32, #tpu.memory_space<vmem>>) attributes {dimension_semantics = [#tpu.dimension_semantics<parallel>, #tpu.dimension_semantics<parallel>, #tpu.dimension_semantics<arbitrary>], iteration_bounds = array<i64: 2, 1, 3>, scalar_prefetch = 0 : i64, scratch_operands = 0 : i64, tpu.core_type = #tpu.core_type<tc>, window_params = [{transform_indices = @transform_0, window_bounds = array<i64: 256, 256>}, {transform_indices = @transform_1, window_bounds = array<i64: 256, 128>}, {transform_indices = @transform_2, window_bounds = array<i64: 1, 128>}, {transform_indices = @transform_3, window_bounds = array<i64: 256, 128>}, {transform_indices = @transform_4, window_bounds = array<i64: 256, 128>}]} {
    %c0_i32 = arith.constant 0 : i32
    %0 = arith.cmpi eq, %arg2, %c0_i32 : i32
    %1 = arith.extui %0 : i1 to i32
    %c0_i32_0 = arith.constant 0 : i32
    %2 = arith.cmpi ne, %1, %c0_i32_0 : i32
    scf.if %2 {
      %cst_9 = arith.constant 0.000000e+00 : f32
      %12 = vector.broadcast %cst_9 : f32 to vector<256x128xf32>
      %c0_10 = arith.constant 0 : index
      %c0_11 = arith.constant 0 : index
      %13 = vector.load %arg7[%c0_10, %c0_11] : memref<256x128xf32, #tpu.memory_space<vmem>>, vector<256x128xf32>
      tpu.vector_store %arg7[%c0_10, %c0_11], %12 {strides = array<i32>} : memref<256x128xf32, #tpu.memory_space<vmem>>, vector<256x128xf32>,
    } else {
    }
    %c0 = arith.constant 0 : index
    %c0_1 = arith.constant 0 : index
    %3 = vector.load %arg7[%c0, %c0_1] : memref<256x128xf32, #tpu.memory_space<vmem>>, vector<256x128xf32>
    %c0_2 = arith.constant 0 : index
    %c0_3 = arith.constant 0 : index
    %4 = vector.load %arg3[%c0_2, %c0_3] : memref<256x256xbf16, #tpu.memory_space<vmem>>, vector<256x256xbf16>
    %c0_4 = arith.constant 0 : index
    %c0_5 = arith.constant 0 : index
    %5 = vector.load %arg4[%c0_4, %c0_5] : memref<256x128xbf16, #tpu.memory_space<vmem>>, vector<256x128xbf16>
    %cst = arith.constant dense<0.000000e+00> : vector<256x128xf32>
    %6 = tpu.matmul %4, %5, %cst {dimension_numbers = #tpu.dot_dimension_numbers<[1], [0], [0], [1], [0, 0, 1, 1], [], []>} : vector<256x256xbf16>, vector<256x128xbf16>, vector<256x128xf32> -> vector<256x128xf32>
    %7 = arith.addf %3, %6 : vector<256x128xf32>
    %c0_6 = arith.constant 0 : index
    %c0_7 = arith.constant 0 : index
    %8 = vector.load %arg7[%c0_6, %c0_7] : memref<256x128xf32, #tpu.memory_space<vmem>>, vector<256x128xf32>
    tpu.vector_store %arg7[%c0_6, %c0_7], %7 {strides = array<i32>} : memref<256x128xf32, #tpu.memory_space<vmem>>, vector<256x128xf32>,
    %c2_i32 = arith.constant 2 : i32
    %9 = arith.cmpi eq, %arg2, %c2_i32 : i32
    %10 = arith.extui %9 : i1 to i32
    %c0_i32_8 = arith.constant 0 : i32
    %11 = arith.cmpi ne, %10, %c0_i32_8 : i32
    scf.if %11 {
      %c0_9 = arith.constant 0 : index
      %c0_10 = arith.constant 0 : index
      %12 = vector.load %arg7[%c0_9, %c0_10] : memref<256x128xf32, #tpu.memory_space<vmem>>, vector<256x128xf32>
      %c0_11 = arith.constant 0 : index
      %c0_12 = arith.constant 0 : index
      %13 = vector.load %arg5[%c0_11, %c0_12] : memref<1x128xf32, #tpu.memory_space<vmem>>, vector<1x128xf32>
      %14 = vector.broadcast %13 : vector<1x128xf32> to vector<256x128xf32>
      %15 = arith.addf %12, %14 : vector<256x128xf32>
      %c0_13 = arith.constant 0 : index
      %c0_14 = arith.constant 0 : index
      %16 = vector.load %arg6[%c0_13, %c0_14] : memref<256x128xf32, #tpu.memory_space<vmem>>, vector<256x128xf32>
      %17 = arith.addf %15, %16 : vector<256x128xf32>
      %cst_15 = arith.constant 0.000000e+00 : f32
      %18 = vector.broadcast %cst_15 : f32 to vector<256x128xf32>
      %19 = arith.maximumf %17, %18 : vector<256x128xf32>
      %c0_16 = arith.constant 0 : index
      %c0_17 = arith.constant 0 : index
      %20 = vector.load %arg7[%c0_16, %c0_17] : memref<256x128xf32, #tpu.memory_space<vmem>>, vector<256x128xf32>
      tpu.vector_store %arg7[%c0_16, %c0_17], %19 {strides = array<i32>} : memref<256x128xf32, #tpu.memory_space<vmem>>, vector<256x128xf32>,
    } else {
    }
    return
  }
  func.func @transform_0(%arg0: i32, %arg1: i32, %arg2: i32) -> (i32, i32) {
    %c0_i32 = arith.constant 0 : i32
    return %arg0, %arg2 : i32, i32
  }
  func.func @transform_1(%arg0: i32, %arg1: i32, %arg2: i32) -> (i32, i32) {
    %c0_i32 = arith.constant 0 : i32
    return %arg2, %arg1 : i32, i32
  }
  func.func @transform_2(%arg0: i32, %arg1: i32, %arg2: i32) -> (i32, i32) {
    %c0_i32 = arith.constant 0 : i32
    %c0_i32_0 = arith.constant 0 : i32
    return %c0_i32, %arg1 : i32, i32
  }
  func.func @transform_3(%arg0: i32, %arg1: i32, %arg2: i32) -> (i32, i32) {
    %c0_i32 = arith.constant 0 : i32
    return %arg0, %arg1 : i32, i32
  }
  func.func @transform_4(%arg0: i32, %arg1: i32, %arg2: i32) -> (i32, i32) {
    %c0_i32 = arith.constant 0 : i32
    return %arg0, %arg1 : i32, i32
  }
}

module attributes {stable_mosaic.version = 11 : i64} {
  func.func @_mm_kernel(%arg0: i32, %arg1: i32, %arg2: i32, %arg3: memref<128x128xbf16, #tpu.memory_space<vmem>>, %arg4: memref<128x128xbf16, #tpu.memory_space<vmem>>, %arg5: memref<1x128xf32, #tpu.memory_space<vmem>>, %arg6: memref<128x128xf32, #tpu.memory_space<vmem>>) attributes {dimension_semantics = [#tpu.dimension_semantics<parallel>, #tpu.dimension_semantics<parallel>, #tpu.dimension_semantics<arbitrary>], iteration_bounds = array<i64: 1, 1, 1>, scalar_prefetch = 0 : i64, scratch_operands = 0 : i64, tpu.core_type = #tpu.core_type<tc>, window_params = [{transform_indices = @transform_0, window_bounds = array<i64: 128, 128>}, {transform_indices = @transform_1, window_bounds = array<i64: 128, 128>}, {transform_indices = @transform_2, window_bounds = array<i64: 1, 128>}, {transform_indices = @transform_3, window_bounds = array<i64: 128, 128>}]} {
    %c0_i32 = arith.constant 0 : i32
    %0 = arith.cmpi eq, %arg2, %c0_i32 : i32
    %1 = arith.extui %0 : i1 to i32
    %c0_i32_0 = arith.constant 0 : i32
    %2 = arith.cmpi ne, %1, %c0_i32_0 : i32
    scf.if %2 {
      %cst_10 = arith.constant 0.000000e+00 : f32
      %12 = vector.broadcast %cst_10 : f32 to vector<128x128xf32>
      %c0_11 = arith.constant 0 : index
      %c0_12 = arith.constant 0 : index
      %13 = vector.load %arg6[%c0_11, %c0_12] : memref<128x128xf32, #tpu.memory_space<vmem>>, vector<128x128xf32>
      tpu.vector_store %arg6[%c0_11, %c0_12], %12 {strides = array<i32>} : memref<128x128xf32, #tpu.memory_space<vmem>>, vector<128x128xf32>,
    } else {
    }
    %c0 = arith.constant 0 : index
    %c0_1 = arith.constant 0 : index
    %3 = vector.load %arg6[%c0, %c0_1] : memref<128x128xf32, #tpu.memory_space<vmem>>, vector<128x128xf32>
    %c0_2 = arith.constant 0 : index
    %c0_3 = arith.constant 0 : index
    %4 = vector.load %arg3[%c0_2, %c0_3] : memref<128x128xbf16, #tpu.memory_space<vmem>>, vector<128x128xbf16>
    %c0_4 = arith.constant 0 : index
    %c0_5 = arith.constant 0 : index
    %5 = vector.load %arg4[%c0_4, %c0_5] : memref<128x128xbf16, #tpu.memory_space<vmem>>, vector<128x128xbf16>
    %cst = arith.constant dense<0.000000e+00> : vector<128x128xf32>
    %6 = tpu.matmul %4, %5, %cst {dimension_numbers = #tpu.dot_dimension_numbers<[1], [0], [0], [1], [0, 0, 1, 1], [], []>} : vector<128x128xbf16>, vector<128x128xbf16>, vector<128x128xf32> -> vector<128x128xf32>
    %7 = arith.addf %3, %6 : vector<128x128xf32>
    %c0_6 = arith.constant 0 : index
    %c0_7 = arith.constant 0 : index
    %8 = vector.load %arg6[%c0_6, %c0_7] : memref<128x128xf32, #tpu.memory_space<vmem>>, vector<128x128xf32>
    tpu.vector_store %arg6[%c0_6, %c0_7], %7 {strides = array<i32>} : memref<128x128xf32, #tpu.memory_space<vmem>>, vector<128x128xf32>,
    %c0_i32_8 = arith.constant 0 : i32
    %9 = arith.cmpi eq, %arg2, %c0_i32_8 : i32
    %10 = arith.extui %9 : i1 to i32
    %c0_i32_9 = arith.constant 0 : i32
    %11 = arith.cmpi ne, %10, %c0_i32_9 : i32
    scf.if %11 {
      %c0_10 = arith.constant 0 : index
      %c0_11 = arith.constant 0 : index
      %12 = vector.load %arg6[%c0_10, %c0_11] : memref<128x128xf32, #tpu.memory_space<vmem>>, vector<128x128xf32>
      %c0_12 = arith.constant 0 : index
      %c0_13 = arith.constant 0 : index
      %13 = vector.load %arg5[%c0_12, %c0_13] : memref<1x128xf32, #tpu.memory_space<vmem>>, vector<1x128xf32>
      %14 = vector.broadcast %13 : vector<1x128xf32> to vector<128x128xf32>
      %15 = arith.addf %12, %14 : vector<128x128xf32>
      %c0_14 = arith.constant 0 : index
      %c0_15 = arith.constant 0 : index
      %16 = vector.load %arg6[%c0_14, %c0_15] : memref<128x128xf32, #tpu.memory_space<vmem>>, vector<128x128xf32>
      tpu.vector_store %arg6[%c0_14, %c0_15], %15 {strides = array<i32>} : memref<128x128xf32, #tpu.memory_space<vmem>>, vector<128x128xf32>,
    } else {
    }
    return
  }
  func.func @transform_0(%arg0: i32, %arg1: i32, %arg2: i32) -> (i32, i32) {
    %c0_i32 = arith.constant 0 : i32
    return %arg0, %arg2 : i32, i32
  }
  func.func @transform_1(%arg0: i32, %arg1: i32, %arg2: i32) -> (i32, i32) {
    %c0_i32 = arith.constant 0 : i32
    return %arg2, %arg1 : i32, i32
  }
  func.func @transform_2(%arg0: i32, %arg1: i32, %arg2: i32) -> (i32, i32) {
    %c0_i32 = arith.constant 0 : i32
    %c0_i32_0 = arith.constant 0 : i32
    return %c0_i32, %arg1 : i32, i32
  }
  func.func @transform_3(%arg0: i32, %arg1: i32, %arg2: i32) -> (i32, i32) {
    %c0_i32 = arith.constant 0 : i32
    return %arg0, %arg1 : i32, i32
  }
}

module attributes {stable_mosaic.version = 11 : i64} {
  func.func @_mm_kernel(%arg0: i32, %arg1: i32, %arg2: i32, %arg3: memref<128x256xbf16, #tpu.memory_space<vmem>>, %arg4: memref<256x128xbf16, #tpu.memory_space<vmem>>, %arg5: memref<1x128xf32, #tpu.memory_space<vmem>>, %arg6: memref<128x128xf32, #tpu.memory_space<vmem>>) attributes {dimension_semantics = [#tpu.dimension_semantics<parallel>, #tpu.dimension_semantics<parallel>, #tpu.dimension_semantics<arbitrary>], iteration_bounds = array<i64: 1, 1, 3>, scalar_prefetch = 0 : i64, scratch_operands = 0 : i64, tpu.core_type = #tpu.core_type<tc>, window_params = [{transform_indices = @transform_0, window_bounds = array<i64: 128, 256>}, {transform_indices = @transform_1, window_bounds = array<i64: 256, 128>}, {transform_indices = @transform_2, window_bounds = array<i64: 1, 128>}, {transform_indices = @transform_3, window_bounds = array<i64: 128, 128>}]} {
    %c0_i32 = arith.constant 0 : i32
    %0 = arith.cmpi eq, %arg2, %c0_i32 : i32
    %1 = arith.extui %0 : i1 to i32
    %c0_i32_0 = arith.constant 0 : i32
    %2 = arith.cmpi ne, %1, %c0_i32_0 : i32
    scf.if %2 {
      %cst_9 = arith.constant 0.000000e+00 : f32
      %12 = vector.broadcast %cst_9 : f32 to vector<128x128xf32>
      %c0_10 = arith.constant 0 : index
      %c0_11 = arith.constant 0 : index
      %13 = vector.load %arg6[%c0_10, %c0_11] : memref<128x128xf32, #tpu.memory_space<vmem>>, vector<128x128xf32>
      tpu.vector_store %arg6[%c0_10, %c0_11], %12 {strides = array<i32>} : memref<128x128xf32, #tpu.memory_space<vmem>>, vector<128x128xf32>,
    } else {
    }
    %c0 = arith.constant 0 : index
    %c0_1 = arith.constant 0 : index
    %3 = vector.load %arg6[%c0, %c0_1] : memref<128x128xf32, #tpu.memory_space<vmem>>, vector<128x128xf32>
    %c0_2 = arith.constant 0 : index
    %c0_3 = arith.constant 0 : index
    %4 = vector.load %arg3[%c0_2, %c0_3] : memref<128x256xbf16, #tpu.memory_space<vmem>>, vector<128x256xbf16>
    %c0_4 = arith.constant 0 : index
    %c0_5 = arith.constant 0 : index
    %5 = vector.load %arg4[%c0_4, %c0_5] : memref<256x128xbf16, #tpu.memory_space<vmem>>, vector<256x128xbf16>
    %cst = arith.constant dense<0.000000e+00> : vector<128x128xf32>
    %6 = tpu.matmul %4, %5, %cst {dimension_numbers = #tpu.dot_dimension_numbers<[1], [0], [0], [1], [0, 0, 1, 1], [], []>} : vector<128x256xbf16>, vector<256x128xbf16>, vector<128x128xf32> -> vector<128x128xf32>
    %7 = arith.addf %3, %6 : vector<128x128xf32>
    %c0_6 = arith.constant 0 : index
    %c0_7 = arith.constant 0 : index
    %8 = vector.load %arg6[%c0_6, %c0_7] : memref<128x128xf32, #tpu.memory_space<vmem>>, vector<128x128xf32>
    tpu.vector_store %arg6[%c0_6, %c0_7], %7 {strides = array<i32>} : memref<128x128xf32, #tpu.memory_space<vmem>>, vector<128x128xf32>,
    %c2_i32 = arith.constant 2 : i32
    %9 = arith.cmpi eq, %arg2, %c2_i32 : i32
    %10 = arith.extui %9 : i1 to i32
    %c0_i32_8 = arith.constant 0 : i32
    %11 = arith.cmpi ne, %10, %c0_i32_8 : i32
    scf.if %11 {
      %c0_9 = arith.constant 0 : index
      %c0_10 = arith.constant 0 : index
      %12 = vector.load %arg6[%c0_9, %c0_10] : memref<128x128xf32, #tpu.memory_space<vmem>>, vector<128x128xf32>
      %c0_11 = arith.constant 0 : index
      %c0_12 = arith.constant 0 : index
      %13 = vector.load %arg5[%c0_11, %c0_12] : memref<1x128xf32, #tpu.memory_space<vmem>>, vector<1x128xf32>
      %14 = vector.broadcast %13 : vector<1x128xf32> to vector<128x128xf32>
      %15 = arith.addf %12, %14 : vector<128x128xf32>
      %cst_13 = arith.constant 0.000000e+00 : f32
      %16 = vector.broadcast %cst_13 : f32 to vector<128x128xf32>
      %17 = arith.maximumf %15, %16 : vector<128x128xf32>
      %c0_14 = arith.constant 0 : index
      %c0_15 = arith.constant 0 : index
      %18 = vector.load %arg6[%c0_14, %c0_15] : memref<128x128xf32, #tpu.memory_space<vmem>>, vector<128x128xf32>
      tpu.vector_store %arg6[%c0_14, %c0_15], %17 {strides = array<i32>} : memref<128x128xf32, #tpu.memory_space<vmem>>, vector<128x128xf32>,
    } else {
    }
    return
  }
  func.func @transform_0(%arg0: i32, %arg1: i32, %arg2: i32) -> (i32, i32) {
    %c0_i32 = arith.constant 0 : i32
    return %arg0, %arg2 : i32, i32
  }
  func.func @transform_1(%arg0: i32, %arg1: i32, %arg2: i32) -> (i32, i32) {
    %c0_i32 = arith.constant 0 : i32
    return %arg2, %arg1 : i32, i32
  }
  func.func @transform_2(%arg0: i32, %arg1: i32, %arg2: i32) -> (i32, i32) {
    %c0_i32 = arith.constant 0 : i32
    %c0_i32_0 = arith.constant 0 : i32
    return %c0_i32, %arg1 : i32, i32
  }
  func.func @transform_3(%arg0: i32, %arg1: i32, %arg2: i32) -> (i32, i32) {
    %c0_i32 = arith.constant 0 : i32
    return %arg0, %arg1 : i32, i32
  }
}

module attributes {stable_mosaic.version = 11 : i64} {
  func.func @_mm_res_kernel(%arg0: i32, %arg1: i32, %arg2: i32, %arg3: memref<128x256xbf16, #tpu.memory_space<vmem>>, %arg4: memref<256x128xbf16, #tpu.memory_space<vmem>>, %arg5: memref<1x128xf32, #tpu.memory_space<vmem>>, %arg6: memref<128x128xf32, #tpu.memory_space<vmem>>, %arg7: memref<128x128xf32, #tpu.memory_space<vmem>>) attributes {dimension_semantics = [#tpu.dimension_semantics<parallel>, #tpu.dimension_semantics<parallel>, #tpu.dimension_semantics<arbitrary>], iteration_bounds = array<i64: 1, 1, 5>, scalar_prefetch = 0 : i64, scratch_operands = 0 : i64, tpu.core_type = #tpu.core_type<tc>, window_params = [{transform_indices = @transform_0, window_bounds = array<i64: 128, 256>}, {transform_indices = @transform_1, window_bounds = array<i64: 256, 128>}, {transform_indices = @transform_2, window_bounds = array<i64: 1, 128>}, {transform_indices = @transform_3, window_bounds = array<i64: 128, 128>}, {transform_indices = @transform_4, window_bounds = array<i64: 128, 128>}]} {
    %c0_i32 = arith.constant 0 : i32
    %0 = arith.cmpi eq, %arg2, %c0_i32 : i32
    %1 = arith.extui %0 : i1 to i32
    %c0_i32_0 = arith.constant 0 : i32
    %2 = arith.cmpi ne, %1, %c0_i32_0 : i32
    scf.if %2 {
      %cst_9 = arith.constant 0.000000e+00 : f32
      %12 = vector.broadcast %cst_9 : f32 to vector<128x128xf32>
      %c0_10 = arith.constant 0 : index
      %c0_11 = arith.constant 0 : index
      %13 = vector.load %arg7[%c0_10, %c0_11] : memref<128x128xf32, #tpu.memory_space<vmem>>, vector<128x128xf32>
      tpu.vector_store %arg7[%c0_10, %c0_11], %12 {strides = array<i32>} : memref<128x128xf32, #tpu.memory_space<vmem>>, vector<128x128xf32>,
    } else {
    }
    %c0 = arith.constant 0 : index
    %c0_1 = arith.constant 0 : index
    %3 = vector.load %arg7[%c0, %c0_1] : memref<128x128xf32, #tpu.memory_space<vmem>>, vector<128x128xf32>
    %c0_2 = arith.constant 0 : index
    %c0_3 = arith.constant 0 : index
    %4 = vector.load %arg3[%c0_2, %c0_3] : memref<128x256xbf16, #tpu.memory_space<vmem>>, vector<128x256xbf16>
    %c0_4 = arith.constant 0 : index
    %c0_5 = arith.constant 0 : index
    %5 = vector.load %arg4[%c0_4, %c0_5] : memref<256x128xbf16, #tpu.memory_space<vmem>>, vector<256x128xbf16>
    %cst = arith.constant dense<0.000000e+00> : vector<128x128xf32>
    %6 = tpu.matmul %4, %5, %cst {dimension_numbers = #tpu.dot_dimension_numbers<[1], [0], [0], [1], [0, 0, 1, 1], [], []>} : vector<128x256xbf16>, vector<256x128xbf16>, vector<128x128xf32> -> vector<128x128xf32>
    %7 = arith.addf %3, %6 : vector<128x128xf32>
    %c0_6 = arith.constant 0 : index
    %c0_7 = arith.constant 0 : index
    %8 = vector.load %arg7[%c0_6, %c0_7] : memref<128x128xf32, #tpu.memory_space<vmem>>, vector<128x128xf32>
    tpu.vector_store %arg7[%c0_6, %c0_7], %7 {strides = array<i32>} : memref<128x128xf32, #tpu.memory_space<vmem>>, vector<128x128xf32>,
    %c4_i32 = arith.constant 4 : i32
    %9 = arith.cmpi eq, %arg2, %c4_i32 : i32
    %10 = arith.extui %9 : i1 to i32
    %c0_i32_8 = arith.constant 0 : i32
    %11 = arith.cmpi ne, %10, %c0_i32_8 : i32
    scf.if %11 {
      %c0_9 = arith.constant 0 : index
      %c0_10 = arith.constant 0 : index
      %12 = vector.load %arg7[%c0_9, %c0_10] : memref<128x128xf32, #tpu.memory_space<vmem>>, vector<128x128xf32>
      %c0_11 = arith.constant 0 : index
      %c0_12 = arith.constant 0 : index
      %13 = vector.load %arg5[%c0_11, %c0_12] : memref<1x128xf32, #tpu.memory_space<vmem>>, vector<1x128xf32>
      %14 = vector.broadcast %13 : vector<1x128xf32> to vector<128x128xf32>
      %15 = arith.addf %12, %14 : vector<128x128xf32>
      %c0_13 = arith.constant 0 : index
      %c0_14 = arith.constant 0 : index
      %16 = vector.load %arg6[%c0_13, %c0_14] : memref<128x128xf32, #tpu.memory_space<vmem>>, vector<128x128xf32>
      %17 = arith.addf %15, %16 : vector<128x128xf32>
      %cst_15 = arith.constant 0.000000e+00 : f32
      %18 = vector.broadcast %cst_15 : f32 to vector<128x128xf32>
      %19 = arith.maximumf %17, %18 : vector<128x128xf32>
      %c0_16 = arith.constant 0 : index
      %c0_17 = arith.constant 0 : index
      %20 = vector.load %arg7[%c0_16, %c0_17] : memref<128x128xf32, #tpu.memory_space<vmem>>, vector<128x128xf32>
      tpu.vector_store %arg7[%c0_16, %c0_17], %19 {strides = array<i32>} : memref<128x128xf32, #tpu.memory_space<vmem>>, vector<128x128xf32>,
    } else {
    }
    return
  }
  func.func @transform_0(%arg0: i32, %arg1: i32, %arg2: i32) -> (i32, i32) {
    %c0_i32 = arith.constant 0 : i32
    return %arg0, %arg2 : i32, i32
  }
  func.func @transform_1(%arg0: i32, %arg1: i32, %arg2: i32) -> (i32, i32) {
    %c0_i32 = arith.constant 0 : i32
    return %arg2, %arg1 : i32, i32
  }
  func.func @transform_2(%arg0: i32, %arg1: i32, %arg2: i32) -> (i32, i32) {
    %c0_i32 = arith.constant 0 : i32
    %c0_i32_0 = arith.constant 0 : i32
    return %c0_i32, %arg1 : i32, i32
  }
  func.func @transform_3(%arg0: i32, %arg1: i32, %arg2: i32) -> (i32, i32) {
    %c0_i32 = arith.constant 0 : i32
    return %arg0, %arg1 : i32, i32
  }
  func.func @transform_4(%arg0: i32, %arg1: i32, %arg2: i32) -> (i32, i32) {
    %c0_i32 = arith.constant 0 : i32
    return %arg0, %arg1 : i32, i32
  }
}

module attributes {stable_mosaic.version = 11 : i64} {
  func.func @_mm_kernel(%arg0: i32, %arg1: i32, %arg2: i32, %arg3: memref<32x128xbf16, #tpu.memory_space<vmem>>, %arg4: memref<128x256xbf16, #tpu.memory_space<vmem>>, %arg5: memref<1x256xf32, #tpu.memory_space<vmem>>, %arg6: memref<32x256xf32, #tpu.memory_space<vmem>>) attributes {dimension_semantics = [#tpu.dimension_semantics<parallel>, #tpu.dimension_semantics<parallel>, #tpu.dimension_semantics<arbitrary>], iteration_bounds = array<i64: 1, 1, 1>, scalar_prefetch = 0 : i64, scratch_operands = 0 : i64, tpu.core_type = #tpu.core_type<tc>, window_params = [{transform_indices = @transform_0, window_bounds = array<i64: 32, 128>}, {transform_indices = @transform_1, window_bounds = array<i64: 128, 256>}, {transform_indices = @transform_2, window_bounds = array<i64: 1, 256>}, {transform_indices = @transform_3, window_bounds = array<i64: 32, 256>}]} {
    %c0_i32 = arith.constant 0 : i32
    %0 = arith.cmpi eq, %arg2, %c0_i32 : i32
    %1 = arith.extui %0 : i1 to i32
    %c0_i32_0 = arith.constant 0 : i32
    %2 = arith.cmpi ne, %1, %c0_i32_0 : i32
    scf.if %2 {
      %cst_10 = arith.constant 0.000000e+00 : f32
      %12 = vector.broadcast %cst_10 : f32 to vector<32x256xf32>
      %c0_11 = arith.constant 0 : index
      %c0_12 = arith.constant 0 : index
      %13 = vector.load %arg6[%c0_11, %c0_12] : memref<32x256xf32, #tpu.memory_space<vmem>>, vector<32x256xf32>
      tpu.vector_store %arg6[%c0_11, %c0_12], %12 {strides = array<i32>} : memref<32x256xf32, #tpu.memory_space<vmem>>, vector<32x256xf32>,
    } else {
    }
    %c0 = arith.constant 0 : index
    %c0_1 = arith.constant 0 : index
    %3 = vector.load %arg6[%c0, %c0_1] : memref<32x256xf32, #tpu.memory_space<vmem>>, vector<32x256xf32>
    %c0_2 = arith.constant 0 : index
    %c0_3 = arith.constant 0 : index
    %4 = vector.load %arg3[%c0_2, %c0_3] : memref<32x128xbf16, #tpu.memory_space<vmem>>, vector<32x128xbf16>
    %c0_4 = arith.constant 0 : index
    %c0_5 = arith.constant 0 : index
    %5 = vector.load %arg4[%c0_4, %c0_5] : memref<128x256xbf16, #tpu.memory_space<vmem>>, vector<128x256xbf16>
    %cst = arith.constant dense<0.000000e+00> : vector<32x256xf32>
    %6 = tpu.matmul %4, %5, %cst {dimension_numbers = #tpu.dot_dimension_numbers<[1], [0], [0], [1], [0, 0, 1, 1], [], []>} : vector<32x128xbf16>, vector<128x256xbf16>, vector<32x256xf32> -> vector<32x256xf32>
    %7 = arith.addf %3, %6 : vector<32x256xf32>
    %c0_6 = arith.constant 0 : index
    %c0_7 = arith.constant 0 : index
    %8 = vector.load %arg6[%c0_6, %c0_7] : memref<32x256xf32, #tpu.memory_space<vmem>>, vector<32x256xf32>
    tpu.vector_store %arg6[%c0_6, %c0_7], %7 {strides = array<i32>} : memref<32x256xf32, #tpu.memory_space<vmem>>, vector<32x256xf32>,
    %c0_i32_8 = arith.constant 0 : i32
    %9 = arith.cmpi eq, %arg2, %c0_i32_8 : i32
    %10 = arith.extui %9 : i1 to i32
    %c0_i32_9 = arith.constant 0 : i32
    %11 = arith.cmpi ne, %10, %c0_i32_9 : i32
    scf.if %11 {
      %c0_10 = arith.constant 0 : index
      %c0_11 = arith.constant 0 : index
      %12 = vector.load %arg6[%c0_10, %c0_11] : memref<32x256xf32, #tpu.memory_space<vmem>>, vector<32x256xf32>
      %c0_12 = arith.constant 0 : index
      %c0_13 = arith.constant 0 : index
      %13 = vector.load %arg5[%c0_12, %c0_13] : memref<1x256xf32, #tpu.memory_space<vmem>>, vector<1x256xf32>
      %14 = vector.broadcast %13 : vector<1x256xf32> to vector<32x256xf32>
      %15 = arith.addf %12, %14 : vector<32x256xf32>
      %c0_14 = arith.constant 0 : index
      %c0_15 = arith.constant 0 : index
      %16 = vector.load %arg6[%c0_14, %c0_15] : memref<32x256xf32, #tpu.memory_space<vmem>>, vector<32x256xf32>
      tpu.vector_store %arg6[%c0_14, %c0_15], %15 {strides = array<i32>} : memref<32x256xf32, #tpu.memory_space<vmem>>, vector<32x256xf32>,
    } else {
    }
    return
  }
  func.func @transform_0(%arg0: i32, %arg1: i32, %arg2: i32) -> (i32, i32) {
    %c0_i32 = arith.constant 0 : i32
    return %arg0, %arg2 : i32, i32
  }
  func.func @transform_1(%arg0: i32, %arg1: i32, %arg2: i32) -> (i32, i32) {
    %c0_i32 = arith.constant 0 : i32
    return %arg2, %arg1 : i32, i32
  }
  func.func @transform_2(%arg0: i32, %arg1: i32, %arg2: i32) -> (i32, i32) {
    %c0_i32 = arith.constant 0 : i32
    %c0_i32_0 = arith.constant 0 : i32
    return %c0_i32, %arg1 : i32, i32
  }
  func.func @transform_3(%arg0: i32, %arg1: i32, %arg2: i32) -> (i32, i32) {
    %c0_i32 = arith.constant 0 : i32
    return %arg0, %arg1 : i32, i32
  }
}

module attributes {stable_mosaic.version = 11 : i64} {
  func.func @_mm_kernel(%arg0: i32, %arg1: i32, %arg2: i32, %arg3: memref<32x256xbf16, #tpu.memory_space<vmem>>, %arg4: memref<256x256xbf16, #tpu.memory_space<vmem>>, %arg5: memref<1x256xf32, #tpu.memory_space<vmem>>, %arg6: memref<32x256xf32, #tpu.memory_space<vmem>>) attributes {dimension_semantics = [#tpu.dimension_semantics<parallel>, #tpu.dimension_semantics<parallel>, #tpu.dimension_semantics<arbitrary>], iteration_bounds = array<i64: 1, 1, 5>, scalar_prefetch = 0 : i64, scratch_operands = 0 : i64, tpu.core_type = #tpu.core_type<tc>, window_params = [{transform_indices = @transform_0, window_bounds = array<i64: 32, 256>}, {transform_indices = @transform_1, window_bounds = array<i64: 256, 256>}, {transform_indices = @transform_2, window_bounds = array<i64: 1, 256>}, {transform_indices = @transform_3, window_bounds = array<i64: 32, 256>}]} {
    %c0_i32 = arith.constant 0 : i32
    %0 = arith.cmpi eq, %arg2, %c0_i32 : i32
    %1 = arith.extui %0 : i1 to i32
    %c0_i32_0 = arith.constant 0 : i32
    %2 = arith.cmpi ne, %1, %c0_i32_0 : i32
    scf.if %2 {
      %cst_9 = arith.constant 0.000000e+00 : f32
      %12 = vector.broadcast %cst_9 : f32 to vector<32x256xf32>
      %c0_10 = arith.constant 0 : index
      %c0_11 = arith.constant 0 : index
      %13 = vector.load %arg6[%c0_10, %c0_11] : memref<32x256xf32, #tpu.memory_space<vmem>>, vector<32x256xf32>
      tpu.vector_store %arg6[%c0_10, %c0_11], %12 {strides = array<i32>} : memref<32x256xf32, #tpu.memory_space<vmem>>, vector<32x256xf32>,
    } else {
    }
    %c0 = arith.constant 0 : index
    %c0_1 = arith.constant 0 : index
    %3 = vector.load %arg6[%c0, %c0_1] : memref<32x256xf32, #tpu.memory_space<vmem>>, vector<32x256xf32>
    %c0_2 = arith.constant 0 : index
    %c0_3 = arith.constant 0 : index
    %4 = vector.load %arg3[%c0_2, %c0_3] : memref<32x256xbf16, #tpu.memory_space<vmem>>, vector<32x256xbf16>
    %c0_4 = arith.constant 0 : index
    %c0_5 = arith.constant 0 : index
    %5 = vector.load %arg4[%c0_4, %c0_5] : memref<256x256xbf16, #tpu.memory_space<vmem>>, vector<256x256xbf16>
    %cst = arith.constant dense<0.000000e+00> : vector<32x256xf32>
    %6 = tpu.matmul %4, %5, %cst {dimension_numbers = #tpu.dot_dimension_numbers<[1], [0], [0], [1], [0, 0, 1, 1], [], []>} : vector<32x256xbf16>, vector<256x256xbf16>, vector<32x256xf32> -> vector<32x256xf32>
    %7 = arith.addf %3, %6 : vector<32x256xf32>
    %c0_6 = arith.constant 0 : index
    %c0_7 = arith.constant 0 : index
    %8 = vector.load %arg6[%c0_6, %c0_7] : memref<32x256xf32, #tpu.memory_space<vmem>>, vector<32x256xf32>
    tpu.vector_store %arg6[%c0_6, %c0_7], %7 {strides = array<i32>} : memref<32x256xf32, #tpu.memory_space<vmem>>, vector<32x256xf32>,
    %c4_i32 = arith.constant 4 : i32
    %9 = arith.cmpi eq, %arg2, %c4_i32 : i32
    %10 = arith.extui %9 : i1 to i32
    %c0_i32_8 = arith.constant 0 : i32
    %11 = arith.cmpi ne, %10, %c0_i32_8 : i32
    scf.if %11 {
      %c0_9 = arith.constant 0 : index
      %c0_10 = arith.constant 0 : index
      %12 = vector.load %arg6[%c0_9, %c0_10] : memref<32x256xf32, #tpu.memory_space<vmem>>, vector<32x256xf32>
      %c0_11 = arith.constant 0 : index
      %c0_12 = arith.constant 0 : index
      %13 = vector.load %arg5[%c0_11, %c0_12] : memref<1x256xf32, #tpu.memory_space<vmem>>, vector<1x256xf32>
      %14 = vector.broadcast %13 : vector<1x256xf32> to vector<32x256xf32>
      %15 = arith.addf %12, %14 : vector<32x256xf32>
      %cst_13 = arith.constant 0.000000e+00 : f32
      %16 = vector.broadcast %cst_13 : f32 to vector<32x256xf32>
      %17 = arith.maximumf %15, %16 : vector<32x256xf32>
      %c0_14 = arith.constant 0 : index
      %c0_15 = arith.constant 0 : index
      %18 = vector.load %arg6[%c0_14, %c0_15] : memref<32x256xf32, #tpu.memory_space<vmem>>, vector<32x256xf32>
      tpu.vector_store %arg6[%c0_14, %c0_15], %17 {strides = array<i32>} : memref<32x256xf32, #tpu.memory_space<vmem>>, vector<32x256xf32>,
    } else {
    }
    return
  }
  func.func @transform_0(%arg0: i32, %arg1: i32, %arg2: i32) -> (i32, i32) {
    %c0_i32 = arith.constant 0 : i32
    return %arg0, %arg2 : i32, i32
  }
  func.func @transform_1(%arg0: i32, %arg1: i32, %arg2: i32) -> (i32, i32) {
    %c0_i32 = arith.constant 0 : i32
    return %arg2, %arg1 : i32, i32
  }
  func.func @transform_2(%arg0: i32, %arg1: i32, %arg2: i32) -> (i32, i32) {
    %c0_i32 = arith.constant 0 : i32
    %c0_i32_0 = arith.constant 0 : i32
    return %c0_i32, %arg1 : i32, i32
  }
  func.func @transform_3(%arg0: i32, %arg1: i32, %arg2: i32) -> (i32, i32) {
    %c0_i32 = arith.constant 0 : i32
    return %arg0, %arg1 : i32, i32
  }
}

module attributes {stable_mosaic.version = 11 : i64} {
  func.func @_mm_res_kernel(%arg0: i32, %arg1: i32, %arg2: i32, %arg3: memref<32x256xbf16, #tpu.memory_space<vmem>>, %arg4: memref<256x256xbf16, #tpu.memory_space<vmem>>, %arg5: memref<1x256xf32, #tpu.memory_space<vmem>>, %arg6: memref<32x256xf32, #tpu.memory_space<vmem>>, %arg7: memref<32x256xf32, #tpu.memory_space<vmem>>) attributes {dimension_semantics = [#tpu.dimension_semantics<parallel>, #tpu.dimension_semantics<parallel>, #tpu.dimension_semantics<arbitrary>], iteration_bounds = array<i64: 1, 1, 9>, scalar_prefetch = 0 : i64, scratch_operands = 0 : i64, tpu.core_type = #tpu.core_type<tc>, window_params = [{transform_indices = @transform_0, window_bounds = array<i64: 32, 256>}, {transform_indices = @transform_1, window_bounds = array<i64: 256, 256>}, {transform_indices = @transform_2, window_bounds = array<i64: 1, 256>}, {transform_indices = @transform_3, window_bounds = array<i64: 32, 256>}, {transform_indices = @transform_4, window_bounds = array<i64: 32, 256>}]} {
    %c0_i32 = arith.constant 0 : i32
    %0 = arith.cmpi eq, %arg2, %c0_i32 : i32
    %1 = arith.extui %0 : i1 to i32
    %c0_i32_0 = arith.constant 0 : i32
    %2 = arith.cmpi ne, %1, %c0_i32_0 : i32
    scf.if %2 {
      %cst_9 = arith.constant 0.000000e+00 : f32
      %12 = vector.broadcast %cst_9 : f32 to vector<32x256xf32>
      %c0_10 = arith.constant 0 : index
      %c0_11 = arith.constant 0 : index
      %13 = vector.load %arg7[%c0_10, %c0_11] : memref<32x256xf32, #tpu.memory_space<vmem>>, vector<32x256xf32>
      tpu.vector_store %arg7[%c0_10, %c0_11], %12 {strides = array<i32>} : memref<32x256xf32, #tpu.memory_space<vmem>>, vector<32x256xf32>,
    } else {
    }
    %c0 = arith.constant 0 : index
    %c0_1 = arith.constant 0 : index
    %3 = vector.load %arg7[%c0, %c0_1] : memref<32x256xf32, #tpu.memory_space<vmem>>, vector<32x256xf32>
    %c0_2 = arith.constant 0 : index
    %c0_3 = arith.constant 0 : index
    %4 = vector.load %arg3[%c0_2, %c0_3] : memref<32x256xbf16, #tpu.memory_space<vmem>>, vector<32x256xbf16>
    %c0_4 = arith.constant 0 : index
    %c0_5 = arith.constant 0 : index
    %5 = vector.load %arg4[%c0_4, %c0_5] : memref<256x256xbf16, #tpu.memory_space<vmem>>, vector<256x256xbf16>
    %cst = arith.constant dense<0.000000e+00> : vector<32x256xf32>
    %6 = tpu.matmul %4, %5, %cst {dimension_numbers = #tpu.dot_dimension_numbers<[1], [0], [0], [1], [0, 0, 1, 1], [], []>} : vector<32x256xbf16>, vector<256x256xbf16>, vector<32x256xf32> -> vector<32x256xf32>
    %7 = arith.addf %3, %6 : vector<32x256xf32>
    %c0_6 = arith.constant 0 : index
    %c0_7 = arith.constant 0 : index
    %8 = vector.load %arg7[%c0_6, %c0_7] : memref<32x256xf32, #tpu.memory_space<vmem>>, vector<32x256xf32>
    tpu.vector_store %arg7[%c0_6, %c0_7], %7 {strides = array<i32>} : memref<32x256xf32, #tpu.memory_space<vmem>>, vector<32x256xf32>,
    %c8_i32 = arith.constant 8 : i32
    %9 = arith.cmpi eq, %arg2, %c8_i32 : i32
    %10 = arith.extui %9 : i1 to i32
    %c0_i32_8 = arith.constant 0 : i32
    %11 = arith.cmpi ne, %10, %c0_i32_8 : i32
    scf.if %11 {
      %c0_9 = arith.constant 0 : index
      %c0_10 = arith.constant 0 : index
      %12 = vector.load %arg7[%c0_9, %c0_10] : memref<32x256xf32, #tpu.memory_space<vmem>>, vector<32x256xf32>
      %c0_11 = arith.constant 0 : index
      %c0_12 = arith.constant 0 : index
      %13 = vector.load %arg5[%c0_11, %c0_12] : memref<1x256xf32, #tpu.memory_space<vmem>>, vector<1x256xf32>
      %14 = vector.broadcast %13 : vector<1x256xf32> to vector<32x256xf32>
      %15 = arith.addf %12, %14 : vector<32x256xf32>
      %c0_13 = arith.constant 0 : index
      %c0_14 = arith.constant 0 : index
      %16 = vector.load %arg6[%c0_13, %c0_14] : memref<32x256xf32, #tpu.memory_space<vmem>>, vector<32x256xf32>
      %17 = arith.addf %15, %16 : vector<32x256xf32>
      %cst_15 = arith.constant 0.000000e+00 : f32
      %18 = vector.broadcast %cst_15 : f32 to vector<32x256xf32>
      %19 = arith.maximumf %17, %18 : vector<32x256xf32>
      %c0_16 = arith.constant 0 : index
      %c0_17 = arith.constant 0 : index
      %20 = vector.load %arg7[%c0_16, %c0_17] : memref<32x256xf32, #tpu.memory_space<vmem>>, vector<32x256xf32>
      tpu.vector_store %arg7[%c0_16, %c0_17], %19 {strides = array<i32>} : memref<32x256xf32, #tpu.memory_space<vmem>>, vector<32x256xf32>,
    } else {
    }
    return
  }
  func.func @transform_0(%arg0: i32, %arg1: i32, %arg2: i32) -> (i32, i32) {
    %c0_i32 = arith.constant 0 : i32
    return %arg0, %arg2 : i32, i32
  }
  func.func @transform_1(%arg0: i32, %arg1: i32, %arg2: i32) -> (i32, i32) {
    %c0_i32 = arith.constant 0 : i32
    return %arg2, %arg1 : i32, i32
  }
  func.func @transform_2(%arg0: i32, %arg1: i32, %arg2: i32) -> (i32, i32) {
    %c0_i32 = arith.constant 0 : i32
    %c0_i32_0 = arith.constant 0 : i32
    return %c0_i32, %arg1 : i32, i32
  }
  func.func @transform_3(%arg0: i32, %arg1: i32, %arg2: i32) -> (i32, i32) {
    %c0_i32 = arith.constant 0 : i32
    return %arg0, %arg1 : i32, i32
  }
  func.func @transform_4(%arg0: i32, %arg1: i32, %arg2: i32) -> (i32, i32) {
    %c0_i32 = arith.constant 0 : i32
    return %arg0, %arg1 : i32, i32
  }
}

module attributes {stable_mosaic.version = 11 : i64} {
  func.func @_mm_kernel(%arg0: i32, %arg1: i32, %arg2: i32, %arg3: memref<8x256xbf16, #tpu.memory_space<vmem>>, %arg4: memref<256x256xbf16, #tpu.memory_space<vmem>>, %arg5: memref<1x256xf32, #tpu.memory_space<vmem>>, %arg6: memref<8x256xf32, #tpu.memory_space<vmem>>) attributes {dimension_semantics = [#tpu.dimension_semantics<parallel>, #tpu.dimension_semantics<parallel>, #tpu.dimension_semantics<arbitrary>], iteration_bounds = array<i64: 1, 2, 1>, scalar_prefetch = 0 : i64, scratch_operands = 0 : i64, tpu.core_type = #tpu.core_type<tc>, window_params = [{transform_indices = @transform_0, window_bounds = array<i64: 8, 256>}, {transform_indices = @transform_1, window_bounds = array<i64: 256, 256>}, {transform_indices = @transform_2, window_bounds = array<i64: 1, 256>}, {transform_indices = @transform_3, window_bounds = array<i64: 8, 256>}]} {
    %c0_i32 = arith.constant 0 : i32
    %0 = arith.cmpi eq, %arg2, %c0_i32 : i32
    %1 = arith.extui %0 : i1 to i32
    %c0_i32_0 = arith.constant 0 : i32
    %2 = arith.cmpi ne, %1, %c0_i32_0 : i32
    scf.if %2 {
      %cst_10 = arith.constant 0.000000e+00 : f32
      %12 = vector.broadcast %cst_10 : f32 to vector<8x256xf32>
      %c0_11 = arith.constant 0 : index
      %c0_12 = arith.constant 0 : index
      %13 = vector.load %arg6[%c0_11, %c0_12] : memref<8x256xf32, #tpu.memory_space<vmem>>, vector<8x256xf32>
      tpu.vector_store %arg6[%c0_11, %c0_12], %12 {strides = array<i32>} : memref<8x256xf32, #tpu.memory_space<vmem>>, vector<8x256xf32>,
    } else {
    }
    %c0 = arith.constant 0 : index
    %c0_1 = arith.constant 0 : index
    %3 = vector.load %arg6[%c0, %c0_1] : memref<8x256xf32, #tpu.memory_space<vmem>>, vector<8x256xf32>
    %c0_2 = arith.constant 0 : index
    %c0_3 = arith.constant 0 : index
    %4 = vector.load %arg3[%c0_2, %c0_3] : memref<8x256xbf16, #tpu.memory_space<vmem>>, vector<8x256xbf16>
    %c0_4 = arith.constant 0 : index
    %c0_5 = arith.constant 0 : index
    %5 = vector.load %arg4[%c0_4, %c0_5] : memref<256x256xbf16, #tpu.memory_space<vmem>>, vector<256x256xbf16>
    %cst = arith.constant dense<0.000000e+00> : vector<8x256xf32>
    %6 = tpu.matmul %4, %5, %cst {dimension_numbers = #tpu.dot_dimension_numbers<[1], [0], [0], [1], [0, 0, 1, 1], [], []>} : vector<8x256xbf16>, vector<256x256xbf16>, vector<8x256xf32> -> vector<8x256xf32>
    %7 = arith.addf %3, %6 : vector<8x256xf32>
    %c0_6 = arith.constant 0 : index
    %c0_7 = arith.constant 0 : index
    %8 = vector.load %arg6[%c0_6, %c0_7] : memref<8x256xf32, #tpu.memory_space<vmem>>, vector<8x256xf32>
    tpu.vector_store %arg6[%c0_6, %c0_7], %7 {strides = array<i32>} : memref<8x256xf32, #tpu.memory_space<vmem>>, vector<8x256xf32>,
    %c0_i32_8 = arith.constant 0 : i32
    %9 = arith.cmpi eq, %arg2, %c0_i32_8 : i32
    %10 = arith.extui %9 : i1 to i32
    %c0_i32_9 = arith.constant 0 : i32
    %11 = arith.cmpi ne, %10, %c0_i32_9 : i32
    scf.if %11 {
      %c0_10 = arith.constant 0 : index
      %c0_11 = arith.constant 0 : index
      %12 = vector.load %arg6[%c0_10, %c0_11] : memref<8x256xf32, #tpu.memory_space<vmem>>, vector<8x256xf32>
      %c0_12 = arith.constant 0 : index
      %c0_13 = arith.constant 0 : index
      %13 = vector.load %arg5[%c0_12, %c0_13] : memref<1x256xf32, #tpu.memory_space<vmem>>, vector<1x256xf32>
      %14 = vector.broadcast %13 : vector<1x256xf32> to vector<8x256xf32>
      %15 = arith.addf %12, %14 : vector<8x256xf32>
      %c0_14 = arith.constant 0 : index
      %c0_15 = arith.constant 0 : index
      %16 = vector.load %arg6[%c0_14, %c0_15] : memref<8x256xf32, #tpu.memory_space<vmem>>, vector<8x256xf32>
      tpu.vector_store %arg6[%c0_14, %c0_15], %15 {strides = array<i32>} : memref<8x256xf32, #tpu.memory_space<vmem>>, vector<8x256xf32>,
    } else {
    }
    return
  }
  func.func @transform_0(%arg0: i32, %arg1: i32, %arg2: i32) -> (i32, i32) {
    %c0_i32 = arith.constant 0 : i32
    return %arg0, %arg2 : i32, i32
  }
  func.func @transform_1(%arg0: i32, %arg1: i32, %arg2: i32) -> (i32, i32) {
    %c0_i32 = arith.constant 0 : i32
    return %arg2, %arg1 : i32, i32
  }
  func.func @transform_2(%arg0: i32, %arg1: i32, %arg2: i32) -> (i32, i32) {
    %c0_i32 = arith.constant 0 : i32
    %c0_i32_0 = arith.constant 0 : i32
    return %c0_i32, %arg1 : i32, i32
  }
  func.func @transform_3(%arg0: i32, %arg1: i32, %arg2: i32) -> (i32, i32) {
    %c0_i32 = arith.constant 0 : i32
    return %arg0, %arg1 : i32, i32
  }
}

module attributes {stable_mosaic.version = 11 : i64} {
  func.func @_mm_kernel(%arg0: i32, %arg1: i32, %arg2: i32, %arg3: memref<8x256xbf16, #tpu.memory_space<vmem>>, %arg4: memref<256x256xbf16, #tpu.memory_space<vmem>>, %arg5: memref<1x256xf32, #tpu.memory_space<vmem>>, %arg6: memref<8x256xf32, #tpu.memory_space<vmem>>) attributes {dimension_semantics = [#tpu.dimension_semantics<parallel>, #tpu.dimension_semantics<parallel>, #tpu.dimension_semantics<arbitrary>], iteration_bounds = array<i64: 1, 2, 9>, scalar_prefetch = 0 : i64, scratch_operands = 0 : i64, tpu.core_type = #tpu.core_type<tc>, window_params = [{transform_indices = @transform_0, window_bounds = array<i64: 8, 256>}, {transform_indices = @transform_1, window_bounds = array<i64: 256, 256>}, {transform_indices = @transform_2, window_bounds = array<i64: 1, 256>}, {transform_indices = @transform_3, window_bounds = array<i64: 8, 256>}]} {
    %c0_i32 = arith.constant 0 : i32
    %0 = arith.cmpi eq, %arg2, %c0_i32 : i32
    %1 = arith.extui %0 : i1 to i32
    %c0_i32_0 = arith.constant 0 : i32
    %2 = arith.cmpi ne, %1, %c0_i32_0 : i32
    scf.if %2 {
      %cst_9 = arith.constant 0.000000e+00 : f32
      %12 = vector.broadcast %cst_9 : f32 to vector<8x256xf32>
      %c0_10 = arith.constant 0 : index
      %c0_11 = arith.constant 0 : index
      %13 = vector.load %arg6[%c0_10, %c0_11] : memref<8x256xf32, #tpu.memory_space<vmem>>, vector<8x256xf32>
      tpu.vector_store %arg6[%c0_10, %c0_11], %12 {strides = array<i32>} : memref<8x256xf32, #tpu.memory_space<vmem>>, vector<8x256xf32>,
    } else {
    }
    %c0 = arith.constant 0 : index
    %c0_1 = arith.constant 0 : index
    %3 = vector.load %arg6[%c0, %c0_1] : memref<8x256xf32, #tpu.memory_space<vmem>>, vector<8x256xf32>
    %c0_2 = arith.constant 0 : index
    %c0_3 = arith.constant 0 : index
    %4 = vector.load %arg3[%c0_2, %c0_3] : memref<8x256xbf16, #tpu.memory_space<vmem>>, vector<8x256xbf16>
    %c0_4 = arith.constant 0 : index
    %c0_5 = arith.constant 0 : index
    %5 = vector.load %arg4[%c0_4, %c0_5] : memref<256x256xbf16, #tpu.memory_space<vmem>>, vector<256x256xbf16>
    %cst = arith.constant dense<0.000000e+00> : vector<8x256xf32>
    %6 = tpu.matmul %4, %5, %cst {dimension_numbers = #tpu.dot_dimension_numbers<[1], [0], [0], [1], [0, 0, 1, 1], [], []>} : vector<8x256xbf16>, vector<256x256xbf16>, vector<8x256xf32> -> vector<8x256xf32>
    %7 = arith.addf %3, %6 : vector<8x256xf32>
    %c0_6 = arith.constant 0 : index
    %c0_7 = arith.constant 0 : index
    %8 = vector.load %arg6[%c0_6, %c0_7] : memref<8x256xf32, #tpu.memory_space<vmem>>, vector<8x256xf32>
    tpu.vector_store %arg6[%c0_6, %c0_7], %7 {strides = array<i32>} : memref<8x256xf32, #tpu.memory_space<vmem>>, vector<8x256xf32>,
    %c8_i32 = arith.constant 8 : i32
    %9 = arith.cmpi eq, %arg2, %c8_i32 : i32
    %10 = arith.extui %9 : i1 to i32
    %c0_i32_8 = arith.constant 0 : i32
    %11 = arith.cmpi ne, %10, %c0_i32_8 : i32
    scf.if %11 {
      %c0_9 = arith.constant 0 : index
      %c0_10 = arith.constant 0 : index
      %12 = vector.load %arg6[%c0_9, %c0_10] : memref<8x256xf32, #tpu.memory_space<vmem>>, vector<8x256xf32>
      %c0_11 = arith.constant 0 : index
      %c0_12 = arith.constant 0 : index
      %13 = vector.load %arg5[%c0_11, %c0_12] : memref<1x256xf32, #tpu.memory_space<vmem>>, vector<1x256xf32>
      %14 = vector.broadcast %13 : vector<1x256xf32> to vector<8x256xf32>
      %15 = arith.addf %12, %14 : vector<8x256xf32>
      %cst_13 = arith.constant 0.000000e+00 : f32
      %16 = vector.broadcast %cst_13 : f32 to vector<8x256xf32>
      %17 = arith.maximumf %15, %16 : vector<8x256xf32>
      %c0_14 = arith.constant 0 : index
      %c0_15 = arith.constant 0 : index
      %18 = vector.load %arg6[%c0_14, %c0_15] : memref<8x256xf32, #tpu.memory_space<vmem>>, vector<8x256xf32>
      tpu.vector_store %arg6[%c0_14, %c0_15], %17 {strides = array<i32>} : memref<8x256xf32, #tpu.memory_space<vmem>>, vector<8x256xf32>,
    } else {
    }
    return
  }
  func.func @transform_0(%arg0: i32, %arg1: i32, %arg2: i32) -> (i32, i32) {
    %c0_i32 = arith.constant 0 : i32
    return %arg0, %arg2 : i32, i32
  }
  func.func @transform_1(%arg0: i32, %arg1: i32, %arg2: i32) -> (i32, i32) {
    %c0_i32 = arith.constant 0 : i32
    return %arg2, %arg1 : i32, i32
  }
  func.func @transform_2(%arg0: i32, %arg1: i32, %arg2: i32) -> (i32, i32) {
    %c0_i32 = arith.constant 0 : i32
    %c0_i32_0 = arith.constant 0 : i32
    return %c0_i32, %arg1 : i32, i32
  }
  func.func @transform_3(%arg0: i32, %arg1: i32, %arg2: i32) -> (i32, i32) {
    %c0_i32 = arith.constant 0 : i32
    return %arg0, %arg1 : i32, i32
  }
}

module attributes {stable_mosaic.version = 11 : i64} {
  func.func @_mm_res_kernel(%arg0: i32, %arg1: i32, %arg2: i32, %arg3: memref<8x256xbf16, #tpu.memory_space<vmem>>, %arg4: memref<256x256xbf16, #tpu.memory_space<vmem>>, %arg5: memref<1x256xf32, #tpu.memory_space<vmem>>, %arg6: memref<8x256xf32, #tpu.memory_space<vmem>>, %arg7: memref<8x256xf32, #tpu.memory_space<vmem>>) attributes {dimension_semantics = [#tpu.dimension_semantics<parallel>, #tpu.dimension_semantics<parallel>, #tpu.dimension_semantics<arbitrary>], iteration_bounds = array<i64: 1, 2, 18>, scalar_prefetch = 0 : i64, scratch_operands = 0 : i64, tpu.core_type = #tpu.core_type<tc>, window_params = [{transform_indices = @transform_0, window_bounds = array<i64: 8, 256>}, {transform_indices = @transform_1, window_bounds = array<i64: 256, 256>}, {transform_indices = @transform_2, window_bounds = array<i64: 1, 256>}, {transform_indices = @transform_3, window_bounds = array<i64: 8, 256>}, {transform_indices = @transform_4, window_bounds = array<i64: 8, 256>}]} {
    %c0_i32 = arith.constant 0 : i32
    %0 = arith.cmpi eq, %arg2, %c0_i32 : i32
    %1 = arith.extui %0 : i1 to i32
    %c0_i32_0 = arith.constant 0 : i32
    %2 = arith.cmpi ne, %1, %c0_i32_0 : i32
    scf.if %2 {
      %cst_9 = arith.constant 0.000000e+00 : f32
      %12 = vector.broadcast %cst_9 : f32 to vector<8x256xf32>
      %c0_10 = arith.constant 0 : index
      %c0_11 = arith.constant 0 : index
      %13 = vector.load %arg7[%c0_10, %c0_11] : memref<8x256xf32, #tpu.memory_space<vmem>>, vector<8x256xf32>
      tpu.vector_store %arg7[%c0_10, %c0_11], %12 {strides = array<i32>} : memref<8x256xf32, #tpu.memory_space<vmem>>, vector<8x256xf32>,
    } else {
    }
    %c0 = arith.constant 0 : index
    %c0_1 = arith.constant 0 : index
    %3 = vector.load %arg7[%c0, %c0_1] : memref<8x256xf32, #tpu.memory_space<vmem>>, vector<8x256xf32>
    %c0_2 = arith.constant 0 : index
    %c0_3 = arith.constant 0 : index
    %4 = vector.load %arg3[%c0_2, %c0_3] : memref<8x256xbf16, #tpu.memory_space<vmem>>, vector<8x256xbf16>
    %c0_4 = arith.constant 0 : index
    %c0_5 = arith.constant 0 : index
    %5 = vector.load %arg4[%c0_4, %c0_5] : memref<256x256xbf16, #tpu.memory_space<vmem>>, vector<256x256xbf16>
    %cst = arith.constant dense<0.000000e+00> : vector<8x256xf32>
    %6 = tpu.matmul %4, %5, %cst {dimension_numbers = #tpu.dot_dimension_numbers<[1], [0], [0], [1], [0, 0, 1, 1], [], []>} : vector<8x256xbf16>, vector<256x256xbf16>, vector<8x256xf32> -> vector<8x256xf32>
    %7 = arith.addf %3, %6 : vector<8x256xf32>
    %c0_6 = arith.constant 0 : index
    %c0_7 = arith.constant 0 : index
    %8 = vector.load %arg7[%c0_6, %c0_7] : memref<8x256xf32, #tpu.memory_space<vmem>>, vector<8x256xf32>
    tpu.vector_store %arg7[%c0_6, %c0_7], %7 {strides = array<i32>} : memref<8x256xf32, #tpu.memory_space<vmem>>, vector<8x256xf32>,
    %c17_i32 = arith.constant 17 : i32
    %9 = arith.cmpi eq, %arg2, %c17_i32 : i32
    %10 = arith.extui %9 : i1 to i32
    %c0_i32_8 = arith.constant 0 : i32
    %11 = arith.cmpi ne, %10, %c0_i32_8 : i32
    scf.if %11 {
      %c0_9 = arith.constant 0 : index
      %c0_10 = arith.constant 0 : index
      %12 = vector.load %arg7[%c0_9, %c0_10] : memref<8x256xf32, #tpu.memory_space<vmem>>, vector<8x256xf32>
      %c0_11 = arith.constant 0 : index
      %c0_12 = arith.constant 0 : index
      %13 = vector.load %arg5[%c0_11, %c0_12] : memref<1x256xf32, #tpu.memory_space<vmem>>, vector<1x256xf32>
      %14 = vector.broadcast %13 : vector<1x256xf32> to vector<8x256xf32>
      %15 = arith.addf %12, %14 : vector<8x256xf32>
      %c0_13 = arith.constant 0 : index
      %c0_14 = arith.constant 0 : index
      %16 = vector.load %arg6[%c0_13, %c0_14] : memref<8x256xf32, #tpu.memory_space<vmem>>, vector<8x256xf32>
      %17 = arith.addf %15, %16 : vector<8x256xf32>
      %cst_15 = arith.constant 0.000000e+00 : f32
      %18 = vector.broadcast %cst_15 : f32 to vector<8x256xf32>
      %19 = arith.maximumf %17, %18 : vector<8x256xf32>
      %c0_16 = arith.constant 0 : index
      %c0_17 = arith.constant 0 : index
      %20 = vector.load %arg7[%c0_16, %c0_17] : memref<8x256xf32, #tpu.memory_space<vmem>>, vector<8x256xf32>
      tpu.vector_store %arg7[%c0_16, %c0_17], %19 {strides = array<i32>} : memref<8x256xf32, #tpu.memory_space<vmem>>, vector<8x256xf32>,
    } else {
    }
    return
  }
  func.func @transform_0(%arg0: i32, %arg1: i32, %arg2: i32) -> (i32, i32) {
    %c0_i32 = arith.constant 0 : i32
    return %arg0, %arg2 : i32, i32
  }
  func.func @transform_1(%arg0: i32, %arg1: i32, %arg2: i32) -> (i32, i32) {
    %c0_i32 = arith.constant 0 : i32
    return %arg2, %arg1 : i32, i32
  }
  func.func @transform_2(%arg0: i32, %arg1: i32, %arg2: i32) -> (i32, i32) {
    %c0_i32 = arith.constant 0 : i32
    %c0_i32_0 = arith.constant 0 : i32
    return %c0_i32, %arg1 : i32, i32
  }
  func.func @transform_3(%arg0: i32, %arg1: i32, %arg2: i32) -> (i32, i32) {
    %c0_i32 = arith.constant 0 : i32
    return %arg0, %arg1 : i32, i32
  }
  func.func @transform_4(%arg0: i32, %arg1: i32, %arg2: i32) -> (i32, i32) {
    %c0_i32 = arith.constant 0 : i32
    return %arg0, %arg1 : i32, i32
  }
}

module attributes {stable_mosaic.version = 11 : i64} {
  func.func @_avgpool_kernel(%arg0: memref<2x4x512xf32, #tpu.memory_space<vmem>>, %arg1: memref<2x512xf32, #tpu.memory_space<vmem>>) attributes {dimension_semantics = [], scalar_prefetch = 0 : i64, scratch_operands = 0 : i64, tpu.core_type = #tpu.core_type<tc>} {
    %c0 = arith.constant 0 : index
    %c0_0 = arith.constant 0 : index
    %c0_1 = arith.constant 0 : index
    %0 = vector.load %arg0[%c0, %c0_0, %c0_1] : memref<2x4x512xf32, #tpu.memory_space<vmem>>, vector<2x4x512xf32>
    %cst = arith.constant dense<0.000000e+00> : vector<2x512xf32>
    %1 = vector.multi_reduction <add>, %0, %cst [1] : vector<2x4x512xf32> to vector<2x512xf32>
    %cst_2 = arith.constant 4.000000e+00 : f32
    %2 = vector.broadcast %cst_2 : f32 to vector<2x512xf32>
    %3 = arith.divf %1, %2 : vector<2x512xf32>
    %c0_3 = arith.constant 0 : index
    %c0_4 = arith.constant 0 : index
    %4 = vector.load %arg1[%c0_3, %c0_4] : memref<2x512xf32, #tpu.memory_space<vmem>>, vector<2x512xf32>
    tpu.vector_store %arg1[%c0_3, %c0_4], %3 {strides = array<i32>} : memref<2x512xf32, #tpu.memory_space<vmem>>, vector<2x512xf32>,
    return
  }
}

module attributes {stable_mosaic.version = 11 : i64} {
  func.func @_mm_kernel(%arg0: i32, %arg1: i32, %arg2: i32, %arg3: memref<8x256xbf16, #tpu.memory_space<vmem>>, %arg4: memref<256x128xbf16, #tpu.memory_space<vmem>>, %arg5: memref<1x128xf32, #tpu.memory_space<vmem>>, %arg6: memref<8x128xf32, #tpu.memory_space<vmem>>) attributes {dimension_semantics = [#tpu.dimension_semantics<parallel>, #tpu.dimension_semantics<parallel>, #tpu.dimension_semantics<arbitrary>], iteration_bounds = array<i64: 1, 1, 2>, scalar_prefetch = 0 : i64, scratch_operands = 0 : i64, tpu.core_type = #tpu.core_type<tc>, window_params = [{transform_indices = @transform_0, window_bounds = array<i64: 8, 256>}, {transform_indices = @transform_1, window_bounds = array<i64: 256, 128>}, {transform_indices = @transform_2, window_bounds = array<i64: 1, 128>}, {transform_indices = @transform_3, window_bounds = array<i64: 8, 128>}]} {
    %c0_i32 = arith.constant 0 : i32
    %0 = arith.cmpi eq, %arg2, %c0_i32 : i32
    %1 = arith.extui %0 : i1 to i32
    %c0_i32_0 = arith.constant 0 : i32
    %2 = arith.cmpi ne, %1, %c0_i32_0 : i32
    scf.if %2 {
      %cst_9 = arith.constant 0.000000e+00 : f32
      %12 = vector.broadcast %cst_9 : f32 to vector<8x128xf32>
      %c0_10 = arith.constant 0 : index
      %c0_11 = arith.constant 0 : index
      %13 = vector.load %arg6[%c0_10, %c0_11] : memref<8x128xf32, #tpu.memory_space<vmem>>, vector<8x128xf32>
      tpu.vector_store %arg6[%c0_10, %c0_11], %12 {strides = array<i32>} : memref<8x128xf32, #tpu.memory_space<vmem>>, vector<8x128xf32>,
    } else {
    }
    %c0 = arith.constant 0 : index
    %c0_1 = arith.constant 0 : index
    %3 = vector.load %arg6[%c0, %c0_1] : memref<8x128xf32, #tpu.memory_space<vmem>>, vector<8x128xf32>
    %c0_2 = arith.constant 0 : index
    %c0_3 = arith.constant 0 : index
    %4 = vector.load %arg3[%c0_2, %c0_3] : memref<8x256xbf16, #tpu.memory_space<vmem>>, vector<8x256xbf16>
    %c0_4 = arith.constant 0 : index
    %c0_5 = arith.constant 0 : index
    %5 = vector.load %arg4[%c0_4, %c0_5] : memref<256x128xbf16, #tpu.memory_space<vmem>>, vector<256x128xbf16>
    %cst = arith.constant dense<0.000000e+00> : vector<8x128xf32>
    %6 = tpu.matmul %4, %5, %cst {dimension_numbers = #tpu.dot_dimension_numbers<[1], [0], [0], [1], [0, 0, 1, 1], [], []>} : vector<8x256xbf16>, vector<256x128xbf16>, vector<8x128xf32> -> vector<8x128xf32>
    %7 = arith.addf %3, %6 : vector<8x128xf32>
    %c0_6 = arith.constant 0 : index
    %c0_7 = arith.constant 0 : index
    %8 = vector.load %arg6[%c0_6, %c0_7] : memref<8x128xf32, #tpu.memory_space<vmem>>, vector<8x128xf32>
    tpu.vector_store %arg6[%c0_6, %c0_7], %7 {strides = array<i32>} : memref<8x128xf32, #tpu.memory_space<vmem>>, vector<8x128xf32>,
    %c1_i32 = arith.constant 1 : i32
    %9 = arith.cmpi eq, %arg2, %c1_i32 : i32
    %10 = arith.extui %9 : i1 to i32
    %c0_i32_8 = arith.constant 0 : i32
    %11 = arith.cmpi ne, %10, %c0_i32_8 : i32
    scf.if %11 {
      %c0_9 = arith.constant 0 : index
      %c0_10 = arith.constant 0 : index
      %12 = vector.load %arg6[%c0_9, %c0_10] : memref<8x128xf32, #tpu.memory_space<vmem>>, vector<8x128xf32>
      %c0_11 = arith.constant 0 : index
      %c0_12 = arith.constant 0 : index
      %13 = vector.load %arg5[%c0_11, %c0_12] : memref<1x128xf32, #tpu.memory_space<vmem>>, vector<1x128xf32>
      %14 = vector.broadcast %13 : vector<1x128xf32> to vector<8x128xf32>
      %15 = arith.addf %12, %14 : vector<8x128xf32>
      %c0_13 = arith.constant 0 : index
      %c0_14 = arith.constant 0 : index
      %16 = vector.load %arg6[%c0_13, %c0_14] : memref<8x128xf32, #tpu.memory_space<vmem>>, vector<8x128xf32>
      tpu.vector_store %arg6[%c0_13, %c0_14], %15 {strides = array<i32>} : memref<8x128xf32, #tpu.memory_space<vmem>>, vector<8x128xf32>,
    } else {
    }
    return
  }
  func.func @transform_0(%arg0: i32, %arg1: i32, %arg2: i32) -> (i32, i32) {
    %c0_i32 = arith.constant 0 : i32
    return %arg0, %arg2 : i32, i32
  }
  func.func @transform_1(%arg0: i32, %arg1: i32, %arg2: i32) -> (i32, i32) {
    %c0_i32 = arith.constant 0 : i32
    return %arg2, %arg1 : i32, i32
  }
  func.func @transform_2(%arg0: i32, %arg1: i32, %arg2: i32) -> (i32, i32) {
    %c0_i32 = arith.constant 0 : i32
    %c0_i32_0 = arith.constant 0 : i32
    return %c0_i32, %arg1 : i32, i32
  }
  func.func @transform_3(%arg0: i32, %arg1: i32, %arg2: i32) -> (i32, i32) {
    %c0_i32 = arith.constant 0 : i32
    return %arg0, %arg1 : i32, i32
  }
}

</mosaic_0001>

<bundles_post_ra>
// kernel: _lambda_.14
= control target key start
LH: loop header
LB: loop body
LE: loop exit
PB: predicated region body
PF: predicated region fallthrough
CT: control target
= control target key end

     0   :  { %s1458_s12 = smov 0   ;;  %s1460_s13 = smov 0   ;;  %s1651_s0 = inlined_call_operand.vmem [shape: bf16[512,256], index: 0, kind: input, shape index: {}]   ;;  %s1652_s1 = inlined_call_operand.vmem [shape: bf16[256,128], index: 1, kind: input, shape index: {}]   ;;  %s1653_s2 = inlined_call_operand.vmem [shape: f32[1,128], index: 2, kind: input, shape index: {}]   ;;  %s1654_s3 = inlined_call_operand.vmem [shape: f32[512,128], index: 3, kind: output, shape index: {}]  }
   0x1   :  { %s1462_s14 = smov 0  }
   0x2 LB: > { %s32_s15 = sadd.s32 1, %s1432_s13  ;;  %p1139_p0 = scmp.ge.s32.totalorder %s1436_s14, 1  ;;  %s1436_s14 = sphi %s1462_s14, %s13_s14   ;;  %s1432_s13 = sphi %s1460_s13, %s1656_s13   ;;  %s1428_s12 = sphi %s1458_s12, %s1655_s12  }
   0x3   : > { %p34_p1 = scmp.ge.s32.totalorder %s32_s15, 2  ;;  %p191_p2 = scmp.lt.s32.totalorder %s1436_s14, 3 }
   0x5   : > { %s1658_s15 = smov (%p34_p1, %s32_s15), 0  ;;  %p192_p3 = pnand %p1139_p0, %p191_p2 }
   0x6   : > { %s1140_s18 = sshll.u32 (!%p192_p3), %s1428_s12, 5 }
   0x7   : > { %195 = sbr.rel (%p192_p3) target bundleno = 307 (0x133), region = 32  ;;  %p236_p4 = scmp.lt.s32.totalorder (!%p192_p3), %s1140_s18, 63 }
   0xc   : > { %v1350_v0 = vld [vmem:[%s1652_s1 + $0x78] sm:$0xff]   ;;  %v1352_v2 = vld [vmem:[%s1652_s1 + $0x70] sm:$0xff]   ;;  %v1354_v4 = vld [vmem:[%s1652_s1 + $0x68] sm:$0xff]   ;;  %s1660_s18 = smov (!%p236_p4, %s1140_s18), 63 }
   0xd   : > { %v1351_v1 = vld [vmem:[%s1652_s1 + $0x38] sm:$0xff]   ;;  %1197 = vmatprep.subr.bf16.mxu0 %v1350_v0  ;;  %1309 = vmatprep.subr.bf16.mxu1 %v1350_v0  ;;  %v1353_v3 = vld [vmem:[%s1652_s1 + $0x30] sm:$0xff]   ;;  %v1355_v5 = vld [vmem:[%s1652_s1 + $0x28] sm:$0xff]   ;;  %s1196_s6 = sshll.u32 %s1660_s18, 3 }
   0xe   : > { %1198 = vmatpush3.bf16.msra.mxu0 %v1351_v1  ;;  %1317 = vmatpush3.bf16.msra.mxu1 %v1351_v1  ;;  %v1356_v6 = vld [vmem:[%s1652_s1 + $0x60] sm:$0xff]   ;;  %v1358_v8 = vld [vmem:[%s1652_s1 + $0x58] sm:$0xff]   ;;  %s1511_s11 = scalar_lea.vmem %s1651_s0, %s1196_s6  ;;  %v1360_v10 = vld [vmem:[%s1652_s1 + $0x50] sm:$0xff]   ;;  %s1578_s8 = scalar_lea.vmem %s1654_s3, %s1196_s6 }
   0xf   : > { %1199 = vmatprep.subr.bf16.mxu0 %v1352_v2  ;;  %1310 = vmatprep.subr.bf16.mxu1 %v1352_v2  ;;  %v1357_v7 = vld [vmem:[%s1652_s1 + $0x20] sm:$0xff]   ;;  %v1359_v9 = vld [vmem:[%s1652_s1 + $0x18] sm:$0xff]   ;;  %v1361_v13 = vld [vmem:[%s1652_s1 + $0x10] sm:$0xff]  }
  0x10   : > { %v1368_v11 = vld [vmem:[%s1511_s11 + $0x4] ss:$8 sps:$4 sm:$0xff]   ;;  %v1366_v18 = vld [vmem:[%s1511_s11] ss:$8 sps:$4 sm:$0xff]   ;;  %v1372_v20 = vld [vmem:[%s1511_s11 + $0x14] ss:$8 sps:$4 sm:$0xff]  }
  0x11   : > { %v1371_v12 = vld [vmem:[%s1511_s11 + $0x84] ss:$8 sps:$4 sm:$0xff]   ;;  %688 = vmatprep.mubr.bf16.mxu0 %v1368_v11  ;;  %v1369_v19 = vld [vmem:[%s1511_s11 + $0x80] ss:$8 sps:$4 sm:$0xff]   ;;  %v1374_v21 = vld [vmem:[%s1511_s11 + $0x94] ss:$8 sps:$4 sm:$0xff]  }
  0x12   : > { %1200 = vmatpush3.bf16.msra.mxu0 %v1353_v3  ;;  %1318 = vmatpush3.bf16.msra.mxu1 %v1353_v3  ;;  %v1362_v14 = vld [vmem:[%s1652_s1 + $0x48] sm:$0xff]   ;;  %v1364_v16 = vld [vmem:[%s1652_s1 + $0x40] sm:$0xff]   ;;  %v1376_v22 = vld [vmem:[%s1511_s11 + $0x10] ss:$8 sps:$4 sm:$0xff]  }
  0x13   : > { %1201 = vmatprep.subr.bf16.mxu0 %v1354_v4  ;;  %1311 = vmatprep.subr.bf16.mxu1 %v1354_v4  ;;  %v1363_v15 = vld [vmem:[%s1652_s1 + $0x8] sm:$0xff]   ;;  %v1365_v17 = vld [vmem:[%s1652_s1] sm:$0xff]   ;;  %v1377_v23 = vld [vmem:[%s1511_s11 + $0x90] ss:$8 sps:$4 sm:$0xff]  }
  0x14   : > { %752 = vmatprep.mubr.bf16.mxu1 %v1371_v12  ;;  %v1378_v24 = vld [vmem:[%s1511_s11 + $0x24] ss:$8 sps:$4 sm:$0xff]   ;;  %v1382_v26 = vld [vmem:[%s1511_s11 + $0x20] ss:$8 sps:$4 sm:$0xff]   ;;  %v1384_v28 = vld [vmem:[%s1511_s11 + $0x34] ss:$8 sps:$4 sm:$0xff]  }
  0x15   : > { %v1380_v25 = vld [vmem:[%s1511_s11 + $0xa4] ss:$8 sps:$4 sm:$0xff]   ;;  %v1383_v27 = vld [vmem:[%s1511_s11 + $0xa0] ss:$8 sps:$4 sm:$0xff]   ;;  %v1386_v29 = vld [vmem:[%s1511_s11 + $0xb4] ss:$8 sps:$4 sm:$0xff]  }
  0x16   : > { %1202 = vmatpush3.bf16.msra.mxu0 %v1355_v5  ;;  %1319 = vmatpush3.bf16.msra.mxu1 %v1355_v5  ;;  %v1388_v30 = vld [vmem:[%s1511_s11 + $0x30] ss:$8 sps:$4 sm:$0xff]   ;;  %v1390_v32 = vld [vmem:[%s1511_s11 + $0x44] ss:$8 sps:$4 sm:$0xff]   ;;  %v1394_v34 = vld [vmem:[%s1511_s11 + $0x40] ss:$8 sps:$4 sm:$0xff]  }
  0x17   : > { %1203 = vmatprep.subr.bf16.mxu0 %v1356_v6  ;;  %1312 = vmatprep.subr.bf16.mxu1 %v1356_v6  ;;  %v1389_v31 = vld [vmem:[%s1511_s11 + $0xb0] ss:$8 sps:$4 sm:$0xff]   ;;  %v1392_v33 = vld [vmem:[%s1511_s11 + $0xc4] ss:$8 sps:$4 sm:$0xff]   ;;  %v1395_v35 = vld [vmem:[%s1511_s11 + $0xc0] ss:$8 sps:$4 sm:$0xff]  }
  0x18   : > { %v1396_v36 = vld [vmem:[%s1511_s11 + $0x54] ss:$8 sps:$4 sm:$0xff]   ;;  %v1400_v38 = vld [vmem:[%s1511_s11 + $0x50] ss:$8 sps:$4 sm:$0xff]   ;;  %v1402_v40 = vld [vmem:[%s1511_s11 + $0x64] ss:$8 sps:$4 sm:$0xff]  }
  0x19   : > { %v1398_v37 = vld [vmem:[%s1511_s11 + $0xd4] ss:$8 sps:$4 sm:$0xff]   ;;  %v1401_v39 = vld [vmem:[%s1511_s11 + $0xd0] ss:$8 sps:$4 sm:$0xff]   ;;  %v1404_v41 = vld [vmem:[%s1511_s11 + $0xe4] ss:$8 sps:$4 sm:$0xff]  }
  0x1a   : > { %1204 = vmatpush3.bf16.msra.mxu0 %v1357_v7  ;;  %1320 = vmatpush3.bf16.msra.mxu1 %v1357_v7  ;;  %v1406_v42 = vld [vmem:[%s1511_s11 + $0x60] ss:$8 sps:$4 sm:$0xff]   ;;  %v1408_v44 = vld [vmem:[%s1511_s11 + $0x74] ss:$8 sps:$4 sm:$0xff]   ;;  %v1412_v46 = vld [vmem:[%s1511_s11 + $0x70] ss:$8 sps:$4 sm:$0xff]  }
  0x1b   : > { %1205 = vmatprep.subr.bf16.mxu0 %v1358_v8  ;;  %1313 = vmatprep.subr.bf16.mxu1 %v1358_v8  ;;  %v1407_v43 = vld [vmem:[%s1511_s11 + $0xe0] ss:$8 sps:$4 sm:$0xff]   ;;  %v1410_v45 = vld [vmem:[%s1511_s11 + $0xf4] ss:$8 sps:$4 sm:$0xff]   ;;  %v1413_v47 = vld [vmem:[%s1511_s11 + $0xf0] ss:$8 sps:$4 sm:$0xff]  }
  0x1c   : > { %v1569_v54 = vld [vmem:[%s1653_s2] ss:$0 sm:$0xff] }
  0x1e   : > { %1206 = vmatpush3.bf16.msra.mxu0 %v1359_v9  ;;  %1321 = vmatpush3.bf16.msra.mxu1 %v1359_v9 }
  0x1f   : > { %1207 = vmatprep.subr.bf16.mxu0 %v1360_v10  ;;  %1314 = vmatprep.subr.bf16.mxu1 %v1360_v10 }
  0x22   : > { %1208 = vmatpush3.bf16.msra.mxu0 %v1361_v13  ;;  %1322 = vmatpush3.bf16.msra.mxu1 %v1361_v13 }
  0x23   : > { %1209 = vmatprep.subr.bf16.mxu0 %v1362_v14  ;;  %1315 = vmatprep.subr.bf16.mxu1 %v1362_v14 }
  0x26   : > { %1210 = vmatpush3.bf16.msra.mxu0 %v1363_v15  ;;  %1323 = vmatpush3.bf16.msra.mxu1 %v1363_v15 }
  0x27   : > { %1211 = vmatprep.subr.bf16.mxu0 %v1364_v16  ;;  %1316 = vmatprep.subr.bf16.mxu1 %v1364_v16 }
  0x2a   : > { %1212 = vmatpush3.bf16.msra.mxu0 %v1365_v17  ;;  %1324 = vmatpush3.bf16.msra.mxu1 %v1365_v17 }
  0x2d   : > { %689 = vmatmul.mubr.bf16.vlgmr.msra.gmra.mxu0 %v1366_v18  ;;  %753 = vmatmul.mubr.bf16.vlgmr.msra.gmra.mxu1 %v1369_v19 }
  0x2e   : > { %696 = vmatprep.mubr.bf16.mxu0 %v1372_v20  ;;  %760 = vmatprep.mubr.bf16.mxu1 %v1374_v21 }
  0x35   : > { %697 = vmatmul.mubr.bf16.gmra.mxu0 %v1376_v22  ;;  %761 = vmatmul.mubr.bf16.gmra.mxu1 %v1377_v23 }
  0x36   : > { %704 = vmatprep.mubr.bf16.mxu0 %v1378_v24  ;;  %768 = vmatprep.mubr.bf16.mxu1 %v1380_v25 }
  0x3d   : > { %705 = vmatmul.mubr.bf16.gmra.mxu0 %v1382_v26  ;;  %769 = vmatmul.mubr.bf16.gmra.mxu1 %v1383_v27 }
  0x3e   : > { %712 = vmatprep.mubr.bf16.mxu0 %v1384_v28  ;;  %776 = vmatprep.mubr.bf16.mxu1 %v1386_v29 }
  0x45   : > { %713 = vmatmul.mubr.bf16.gmra.mxu0 %v1388_v30  ;;  %777 = vmatmul.mubr.bf16.gmra.mxu1 %v1389_v31 }
  0x46   : > { %720 = vmatprep.mubr.bf16.mxu0 %v1390_v32  ;;  %784 = vmatprep.mubr.bf16.mxu1 %v1392_v33 }
  0x4d   : > { %721 = vmatmul.mubr.bf16.gmra.mxu0 %v1394_v34  ;;  %785 = vmatmul.mubr.bf16.gmra.mxu1 %v1395_v35 }
  0x4e   : > { %728 = vmatprep.mubr.bf16.mxu0 %v1396_v36  ;;  %792 = vmatprep.mubr.bf16.mxu1 %v1398_v37 }
  0x55   : > { %729 = vmatmul.mubr.bf16.gmra.mxu0 %v1400_v38  ;;  %793 = vmatmul.mubr.bf16.gmra.mxu1 %v1401_v39 }
  0x56   : > { %736 = vmatprep.mubr.bf16.mxu0 %v1402_v40  ;;  %800 = vmatprep.mubr.bf16.mxu1 %v1404_v41 }
  0x5d   : > { %737 = vmatmul.mubr.bf16.gmra.mxu0 %v1406_v42  ;;  %801 = vmatmul.mubr.bf16.gmra.mxu1 %v1407_v43 }
  0x5e   : > { %744 = vmatprep.mubr.bf16.mxu0 %v1408_v44  ;;  %808 = vmatprep.mubr.bf16.mxu1 %v1410_v45 }
  0x65   : > { %745 = vmatmul.mubr.bf16.gmra.mxu0 %v1412_v46  ;;  %809 = vmatmul.mubr.bf16.gmra.mxu1 %v1413_v47 }
  0xed   : > { %v1213_v48 = vpop.f32.mrf.mxu0  ;;  %v1261_v49 = vpop.f32.mrf.mxu1 }
  0xef   : > { %v1214_v50 = vpop.f32.mrf.mxu0  ;;  %v1262_v51 = vpop.f32.mrf.mxu1 }
  0xf0   : > { %v1215_v52 = vadd.f32 %v1214_v50, %v1213_v48  ;;  %v1263_v53 = vadd.f32 %v1262_v51, %v1261_v49 }
  0xf1   : > { %v1216_v55 = vpop.f32.mrf.mxu0  ;;  %v1264_v56 = vpop.f32.mrf.mxu1 }
  0xf2   : > { %v923_v59 = vadd.f32 %v1215_v52, %v1569_v54  ;;  %v939_v60 = vadd.f32 %v1263_v53, %v1569_v54 }
  0xf3   : > { %v1217_v57 = vpop.f32.mrf.mxu0  ;;  %v1265_v58 = vpop.f32.mrf.mxu1 }
  0xf4   : > { %v1218_v61 = vadd.f32 %v1217_v57, %v1216_v55  ;;  %v1266_v62 = vadd.f32 %v1265_v58, %v1264_v56  ;;  %v955_v1 = vmax.f32 %v923_v59, 0.0  ;;  %v971_v2 = vmax.f32 %v939_v60, 0.0 }
  0xf5   : > { %v1219_v63 = vpop.f32.mrf.mxu0  ;;  %v1267_v0 = vpop.f32.mrf.mxu1 }
  0xf6   : > { %987 = vst [vmem:[%s1578_s8] sm:$0xff] %v955_v1  ;;  %1003 = vst [vmem:[%s1578_s8 + $0x80] sm:$0xff] %v971_v2  ;;  %v924_v5 = vadd.f32 %v1218_v61, %v1569_v54  ;;  %v940_v6 = vadd.f32 %v1266_v62, %v1569_v54 }
  0xf7   : > { %v1220_v3 = vpop.f32.mrf.mxu0  ;;  %v1268_v4 = vpop.f32.mrf.mxu1 }
  0xf8   : > { %v1221_v7 = vadd.f32 %v1220_v3, %v1219_v63  ;;  %v1269_v8 = vadd.f32 %v1268_v4, %v1267_v0  ;;  %v956_v11 = vmax.f32 %v924_v5, 0.0  ;;  %v972_v12 = vmax.f32 %v940_v6, 0.0 }
  0xf9   : > { %v1222_v9 = vpop.f32.mrf.mxu0  ;;  %v1270_v10 = vpop.f32.mrf.mxu1 }
  0xfa   : > { %988 = vst [vmem:[%s1578_s8 + $0x8] sm:$0xff] %v956_v11  ;;  %1004 = vst [vmem:[%s1578_s8 + $0x88] sm:$0xff] %v972_v12  ;;  %v925_v15 = vadd.f32 %v1221_v7, %v1569_v54  ;;  %v941_v16 = vadd.f32 %v1269_v8, %v1569_v54 }
  0xfb   : > { %v1223_v13 = vpop.f32.mrf.mxu0  ;;  %v1271_v14 = vpop.f32.mrf.mxu1 }
  0xfc   : > { %v1224_v17 = vadd.f32 %v1223_v13, %v1222_v9  ;;  %v1272_v18 = vadd.f32 %v1271_v14, %v1270_v10  ;;  %v957_v21 = vmax.f32 %v925_v15, 0.0  ;;  %v973_v22 = vmax.f32 %v941_v16, 0.0 }
  0xfd   : > { %v1225_v19 = vpop.f32.mrf.mxu0  ;;  %v1273_v20 = vpop.f32.mrf.mxu1 }
  0xfe   : > { %989 = vst [vmem:[%s1578_s8 + $0x10] sm:$0xff] %v957_v21  ;;  %1005 = vst [vmem:[%s1578_s8 + $0x90] sm:$0xff] %v973_v22  ;;  %v926_v25 = vadd.f32 %v1224_v17, %v1569_v54  ;;  %v942_v26 = vadd.f32 %v1272_v18, %v1569_v54 }
  0xff   : > { %v1226_v23 = vpop.f32.mrf.mxu0  ;;  %v1274_v24 = vpop.f32.mrf.mxu1 }
 0x100   : > { %v1227_v27 = vadd.f32 %v1226_v23, %v1225_v19  ;;  %v1275_v28 = vadd.f32 %v1274_v24, %v1273_v20  ;;  %v958_v31 = vmax.f32 %v926_v25, 0.0  ;;  %v974_v32 = vmax.f32 %v942_v26, 0.0 }
 0x101   : > { %v1228_v29 = vpop.f32.mrf.mxu0  ;;  %v1276_v30 = vpop.f32.mrf.mxu1 }
 0x102   : > { %990 = vst [vmem:[%s1578_s8 + $0x18] sm:$0xff] %v958_v31  ;;  %1006 = vst [vmem:[%s1578_s8 + $0x98] sm:$0xff] %v974_v32  ;;  %v927_v35 = vadd.f32 %v1227_v27, %v1569_v54  ;;  %v943_v36 = vadd.f32 %v1275_v28, %v1569_v54 }
 0x103   : > { %v1229_v33 = vpop.f32.mrf.mxu0  ;;  %v1277_v34 = vpop.f32.mrf.mxu1 }
 0x104   : > { %v1230_v37 = vadd.f32 %v1229_v33, %v1228_v29  ;;  %v1278_v38 = vadd.f32 %v1277_v34, %v1276_v30  ;;  %v959_v41 = vmax.f32 %v927_v35, 0.0  ;;  %v975_v42 = vmax.f32 %v943_v36, 0.0 }
 0x105   : > { %v1231_v39 = vpop.f32.mrf.mxu0  ;;  %v1279_v40 = vpop.f32.mrf.mxu1 }
 0x106   : > { %991 = vst [vmem:[%s1578_s8 + $0x20] sm:$0xff] %v959_v41  ;;  %1007 = vst [vmem:[%s1578_s8 + $0xa0] sm:$0xff] %v975_v42  ;;  %v928_v45 = vadd.f32 %v1230_v37, %v1569_v54  ;;  %v944_v46 = vadd.f32 %v1278_v38, %v1569_v54 }
 0x107   : > { %v1232_v43 = vpop.f32.mrf.mxu0  ;;  %v1280_v44 = vpop.f32.mrf.mxu1 }
 0x108   : > { %v1233_v47 = vadd.f32 %v1232_v43, %v1231_v39  ;;  %v1281_v48 = vadd.f32 %v1280_v44, %v1279_v40  ;;  %v960_v51 = vmax.f32 %v928_v45, 0.0  ;;  %v976_v52 = vmax.f32 %v944_v46, 0.0 }
 0x109   : > { %v1234_v49 = vpop.f32.mrf.mxu0  ;;  %v1282_v50 = vpop.f32.mrf.mxu1 }
 0x10a   : > { %992 = vst [vmem:[%s1578_s8 + $0x28] sm:$0xff] %v960_v51  ;;  %1008 = vst [vmem:[%s1578_s8 + $0xa8] sm:$0xff] %v976_v52  ;;  %v929_v56 = vadd.f32 %v1233_v47, %v1569_v54  ;;  %v945_v57 = vadd.f32 %v1281_v48, %v1569_v54 }
 0x10b   : > { %v1235_v53 = vpop.f32.mrf.mxu0  ;;  %v1283_v55 = vpop.f32.mrf.mxu1 }
 0x10c   : > { %v1236_v58 = vadd.f32 %v1235_v53, %v1234_v49  ;;  %v1284_v59 = vadd.f32 %v1283_v55, %v1282_v50  ;;  %v961_v62 = vmax.f32 %v929_v56, 0.0  ;;  %v977_v63 = vmax.f32 %v945_v57, 0.0 }
 0x10d   : > { %v1237_v60 = vpop.f32.mrf.mxu0  ;;  %v1285_v61 = vpop.f32.mrf.mxu1 }
 0x10e   : > { %993 = vst [vmem:[%s1578_s8 + $0x30] sm:$0xff] %v961_v62  ;;  %1009 = vst [vmem:[%s1578_s8 + $0xb0] sm:$0xff] %v977_v63  ;;  %v930_v2 = vadd.f32 %v1236_v58, %v1569_v54  ;;  %v946_v3 = vadd.f32 %v1284_v59, %v1569_v54 }
 0x10f   : > { %v1238_v0 = vpop.f32.mrf.mxu0  ;;  %v1286_v1 = vpop.f32.mrf.mxu1 }
 0x110   : > { %v1239_v4 = vadd.f32 %v1238_v0, %v1237_v60  ;;  %v1287_v5 = vadd.f32 %v1286_v1, %v1285_v61  ;;  %v962_v8 = vmax.f32 %v930_v2, 0.0  ;;  %v978_v9 = vmax.f32 %v946_v3, 0.0 }
 0x111   : > { %v1240_v6 = vpop.f32.mrf.mxu0  ;;  %v1288_v7 = vpop.f32.mrf.mxu1 }
 0x112   : > { %994 = vst [vmem:[%s1578_s8 + $0x38] sm:$0xff] %v962_v8  ;;  %1010 = vst [vmem:[%s1578_s8 + $0xb8] sm:$0xff] %v978_v9  ;;  %v931_v12 = vadd.f32 %v1239_v4, %v1569_v54  ;;  %v947_v13 = vadd.f32 %v1287_v5, %v1569_v54 }
 0x113   : > { %v1241_v10 = vpop.f32.mrf.mxu0  ;;  %v1289_v11 = vpop.f32.mrf.mxu1 }
 0x114   : > { %v1242_v14 = vadd.f32 %v1241_v10, %v1240_v6  ;;  %v1290_v15 = vadd.f32 %v1289_v11, %v1288_v7  ;;  %v963_v18 = vmax.f32 %v931_v12, 0.0  ;;  %v979_v19 = vmax.f32 %v947_v13, 0.0 }
 0x115   : > { %v1243_v16 = vpop.f32.mrf.mxu0  ;;  %v1291_v17 = vpop.f32.mrf.mxu1 }
 0x116   : > { %995 = vst [vmem:[%s1578_s8 + $0x40] sm:$0xff] %v963_v18  ;;  %1011 = vst [vmem:[%s1578_s8 + $0xc0] sm:$0xff] %v979_v19  ;;  %v932_v22 = vadd.f32 %v1242_v14, %v1569_v54  ;;  %v948_v23 = vadd.f32 %v1290_v15, %v1569_v54 }
 0x117   : > { %v1244_v20 = vpop.f32.mrf.mxu0  ;;  %v1292_v21 = vpop.f32.mrf.mxu1 }
 0x118   : > { %v1245_v24 = vadd.f32 %v1244_v20, %v1243_v16  ;;  %v1293_v25 = vadd.f32 %v1292_v21, %v1291_v17  ;;  %v964_v28 = vmax.f32 %v932_v22, 0.0  ;;  %v980_v29 = vmax.f32 %v948_v23, 0.0 }
 0x119   : > { %v1246_v26 = vpop.f32.mrf.mxu0  ;;  %v1294_v27 = vpop.f32.mrf.mxu1 }
 0x11a   : > { %996 = vst [vmem:[%s1578_s8 + $0x48] sm:$0xff] %v964_v28  ;;  %1012 = vst [vmem:[%s1578_s8 + $0xc8] sm:$0xff] %v980_v29  ;;  %v933_v32 = vadd.f32 %v1245_v24, %v1569_v54  ;;  %v949_v33 = vadd.f32 %v1293_v25, %v1569_v54 }
 0x11b   : > { %v1247_v30 = vpop.f32.mrf.mxu0  ;;  %v1295_v31 = vpop.f32.mrf.mxu1 }
 0x11c   : > { %v1248_v34 = vadd.f32 %v1247_v30, %v1246_v26  ;;  %v1296_v35 = vadd.f32 %v1295_v31, %v1294_v27  ;;  %v965_v38 = vmax.f32 %v933_v32, 0.0  ;;  %v981_v39 = vmax.f32 %v949_v33, 0.0 }
 0x11d   : > { %v1249_v36 = vpop.f32.mrf.mxu0  ;;  %v1297_v37 = vpop.f32.mrf.mxu1 }
 0x11e   : > { %997 = vst [vmem:[%s1578_s8 + $0x50] sm:$0xff] %v965_v38  ;;  %1013 = vst [vmem:[%s1578_s8 + $0xd0] sm:$0xff] %v981_v39  ;;  %v934_v42 = vadd.f32 %v1248_v34, %v1569_v54  ;;  %v950_v43 = vadd.f32 %v1296_v35, %v1569_v54 }
 0x11f   : > { %v1250_v40 = vpop.f32.mrf.mxu0  ;;  %v1298_v41 = vpop.f32.mrf.mxu1 }
 0x120   : > { %v1251_v44 = vadd.f32 %v1250_v40, %v1249_v36  ;;  %v1299_v45 = vadd.f32 %v1298_v41, %v1297_v37  ;;  %v966_v48 = vmax.f32 %v934_v42, 0.0  ;;  %v982_v49 = vmax.f32 %v950_v43, 0.0 }
 0x121   : > { %v1252_v46 = vpop.f32.mrf.mxu0  ;;  %v1300_v47 = vpop.f32.mrf.mxu1 }
 0x122   : > { %998 = vst [vmem:[%s1578_s8 + $0x58] sm:$0xff] %v966_v48  ;;  %1014 = vst [vmem:[%s1578_s8 + $0xd8] sm:$0xff] %v982_v49  ;;  %v935_v52 = vadd.f32 %v1251_v44, %v1569_v54  ;;  %v951_v53 = vadd.f32 %v1299_v45, %v1569_v54 }
 0x123   : > { %v1253_v50 = vpop.f32.mrf.mxu0  ;;  %v1301_v51 = vpop.f32.mrf.mxu1 }
 0x124   : > { %v1254_v55 = vadd.f32 %v1253_v50, %v1252_v46  ;;  %v1302_v56 = vadd.f32 %v1301_v51, %v1300_v47  ;;  %v967_v59 = vmax.f32 %v935_v52, 0.0  ;;  %v983_v60 = vmax.f32 %v951_v53, 0.0 }
 0x125   : > { %v1255_v57 = vpop.f32.mrf.mxu0  ;;  %v1303_v58 = vpop.f32.mrf.mxu1 }
 0x126   : > { %999 = vst [vmem:[%s1578_s8 + $0x60] sm:$0xff] %v967_v59  ;;  %1015 = vst [vmem:[%s1578_s8 + $0xe0] sm:$0xff] %v983_v60  ;;  %v936_v63 = vadd.f32 %v1254_v55, %v1569_v54  ;;  %v952_v0 = vadd.f32 %v1302_v56, %v1569_v54 }
 0x127   : > { %v1256_v61 = vpop.f32.mrf.mxu0  ;;  %v1304_v62 = vpop.f32.mrf.mxu1 }
 0x128   : > { %v1257_v1 = vadd.f32 %v1256_v61, %v1255_v57  ;;  %v1305_v2 = vadd.f32 %v1304_v62, %v1303_v58  ;;  %v968_v5 = vmax.f32 %v936_v63, 0.0  ;;  %v984_v6 = vmax.f32 %v952_v0, 0.0 }
 0x129   : > { %v1258_v3 = vpop.f32.mrf.mxu0  ;;  %v1306_v4 = vpop.f32.mrf.mxu1 }
 0x12a   : > { %1000 = vst [vmem:[%s1578_s8 + $0x68] sm:$0xff] %v968_v5  ;;  %1016 = vst [vmem:[%s1578_s8 + $0xe8] sm:$0xff] %v984_v6  ;;  %v937_v9 = vadd.f32 %v1257_v1, %v1569_v54  ;;  %v953_v10 = vadd.f32 %v1305_v2, %v1569_v54 }
 0x12b   : > { %v1259_v7 = vpop.f32.mrf.mxu0  ;;  %v1307_v8 = vpop.f32.mrf.mxu1 }
 0x12c   : > { %v1260_v11 = vadd.f32 %v1259_v7, %v1258_v3  ;;  %v1308_v12 = vadd.f32 %v1307_v8, %v1306_v4  ;;  %v969_v13 = vmax.f32 %v937_v9, 0.0  ;;  %v985_v14 = vmax.f32 %v953_v10, 0.0 }
 0x12e   : > { %1001 = vst [vmem:[%s1578_s8 + $0x70] sm:$0xff] %v969_v13  ;;  %1017 = vst [vmem:[%s1578_s8 + $0xf0] sm:$0xff] %v985_v14  ;;  %v938_v15 = vadd.f32 %v1260_v11, %v1569_v54  ;;  %v954_v16 = vadd.f32 %v1308_v12, %v1569_v54 }
 0x130   : > { %v970_v17 = vmax.f32 %v938_v15, 0.0  ;;  %v986_v18 = vmax.f32 %v954_v16, 0.0 }
 0x132   : > { %1002 = vst [vmem:[%s1578_s8 + $0x78] sm:$0xff] %v970_v17  ;;  %1018 = vst [vmem:[%s1578_s8 + $0xf8] sm:$0xff] %v986_v18 }
 0x133 PF: > { %s13_s14 = sadd.s32 1, %s1436_s14   ;;  %s1655_s12 = smov %s1432_s13 }
 0x134   : > { %p10_p5 = scmp.ge.s32.totalorder %s13_s14, 4   ;;  %s1656_s13 = smov %s1658_s15 }
 0x136   :  { %12 = sbr.rel (!%p10_p5) target bundleno = 2 (0x2), region = 76 }

// kernel: _lambda_.15
= control target key start
LH: loop header
LB: loop body
LE: loop exit
PB: predicated region body
PF: predicated region fallthrough
CT: control target
= control target key end

     0   :  { %s1679_s12 = smov 0   ;;  %s1681_s13 = smov 0   ;;  %s2092_s0 = inlined_call_operand.vmem [shape: bf16[512,768], index: 0, kind: input, shape index: {}]   ;;  %s2093_s1 = inlined_call_operand.vmem [shape: bf16[768,128], index: 1, kind: input, shape index: {}]   ;;  %s2094_s2 = inlined_call_operand.vmem [shape: f32[1,128], index: 2, kind: input, shape index: {}]   ;;  %s2095_s3 = inlined_call_operand.vmem [shape: f32[512,128], index: 3, kind: output, shape index: {}]  }
   0x1   :  { %s1683_s14 = smov 0   ;;  %s1685_s15 = smov 0  }
   0x2   :  { %s1687_s16 = smov 0   ;;  %s1689_s17 = smov 0  }
   0x3   :  { %s1691_s18 = smov 0  }
   0x4 LB: > { %s25_s19 = sadd.s32 1, %s1648_s16  ;;  %s32_s20 = sadd.s32 1, %s1652_s17  ;;  %s1656_s18 = sphi %s1691_s18, %s13_s18   ;;  %s1652_s17 = sphi %s1689_s17, %s2101_s17   ;;  %s1648_s16 = sphi %s1687_s16, %s2100_s16   ;;  %s1644_s15 = sphi %s1685_s15, %s2099_s15   ;;  %s1640_s14 = sphi %s1683_s14, %s2098_s14   ;;  %s1636_s13 = sphi %s1681_s13, %s2097_s13   ;;  %s1632_s12 = sphi %s1679_s12, %s2096_s12  }
   0x5   : > { %p26_p0 = scmp.ge.s32.totalorder %s25_s19, 3  ;;  %p48_p1 = scmp.ne.s32.totalorder %s1636_s13, %s1632_s12 }
   0x6   : > { %p49_p2 = scmp.eq.s32.totalorder %s1656_s18, 0  ;;  %s41_s24 = sadd.s32 1, %s1636_s13 }
   0x7   : > { %s2103_s19 = smov (%p26_p0, %s25_s19), 0  ;;  %s2105_s20 = smov (!%p26_p0, %s32_s20), %s1652_s17 }
   0x8   : > { %p50_p3 = por %p49_p2, %p48_p1  ;;  %p34_p4 = scmp.ge.s32.totalorder %s2105_s20, 2 }
   0x9   : > { %s37_s21 = ssub.s32 %s1648_s16, %s2103_s19  ;;  %p1287_p6 = scmp.ge.s32.totalorder %s1656_s18, 6 }
   0xa   : > { %s2107_s20 = smov (%p34_p4, %s2105_s20), 0 }
   0xb   : > { %s36_s22 = ssub.s32 %s1652_s17, %s2107_s20  ;;  %162 = sbr.rel (%p1287_p6) target bundleno = 40 (0x28), region = 20 }
   0xc   : > { %s38_s23 = sor.u32 %s37_s21, %s36_s22 }
   0xd   : > { %p39_p5 = scmp.eq.s32.totalorder %s38_s23, 0 }
   0xf   : > { %s1730_s25 = scalar_select %p39_p5, %s1636_s13, %s41_s24  }
  0x10   : > { %165 = sbr.rel (!%p50_p3) target bundleno = 40 (0x28), region = 24  ;;  %s167_s26 = sand.u32 (%p50_p3), 1, %s1636_s13  }
  0x11   : > { %s1290_s27 = sshll.u32 (%p50_p3), %s1648_s16, 1  ;;  %s1288_s28 = sshll.u32 (%p50_p3), %s167_s26, 8 }
  0x12   : > { %s1480_s29 = smul.u32 (%p50_p3), 192, %s1652_s17  ;;  %s1744_s8 = scalar_lea.vmem (%p50_p3), [#allocation2], %s1288_s28 }
  0x14   : > { %s173_s30 = sadd.s32 (%p50_p3), %s1480_s29, %s1290_s27 }
  0x15   : > { %s1292_s4 = sshll.u32 %s173_s30, 2 }
  0x16   : > { %s1739_s7 = scalar_lea.vmem %s2092_s0, %s1292_s4 }
  0x17   : > { %v266_v0 = vld [vmem:[%s1739_s7] sm:$0xff]  ;;  %v268_v1 = vld [vmem:[%s1739_s7 + $0x18] sm:$0xff]  ;;  %v270_v2 = vld [vmem:[%s1739_s7 + $0x30] sm:$0xff] }
  0x18   : > { %267 = vst [vmem:[%s1744_s8] sm:$0xff] %v266_v0  ;;  %269 = vst [vmem:[%s1744_s8 + $0x8] sm:$0xff] %v268_v1  ;;  %v272_v3 = vld [vmem:[%s1739_s7 + $0x48] sm:$0xff]  ;;  %v274_v4 = vld [vmem:[%s1739_s7 + $0x60] sm:$0xff] }
  0x19   : > { %271 = vst [vmem:[%s1744_s8 + $0x10] sm:$0xff] %v270_v2  ;;  %v276_v5 = vld [vmem:[%s1739_s7 + $0x78] sm:$0xff]  ;;  %273 = vst [vmem:[%s1744_s8 + $0x18] sm:$0xff] %v272_v3  ;;  %v278_v6 = vld [vmem:[%s1739_s7 + $0x90] sm:$0xff] }
  0x1a   : > { %275 = vst [vmem:[%s1744_s8 + $0x20] sm:$0xff] %v274_v4  ;;  %277 = vst [vmem:[%s1744_s8 + $0x28] sm:$0xff] %v276_v5  ;;  %v280_v7 = vld [vmem:[%s1739_s7 + $0xa8] sm:$0xff]  ;;  %v282_v8 = vld [vmem:[%s1739_s7 + $0xc0] sm:$0xff] }
  0x1b   : > { %279 = vst [vmem:[%s1744_s8 + $0x30] sm:$0xff] %v278_v6  ;;  %281 = vst [vmem:[%s1744_s8 + $0x38] sm:$0xff] %v280_v7  ;;  %v284_v9 = vld [vmem:[%s1739_s7 + $0xd8] sm:$0xff]  ;;  %v286_v10 = vld [vmem:[%s1739_s7 + $0xf0] sm:$0xff] }
  0x1c   : > { %283 = vst [vmem:[%s1744_s8 + $0x40] sm:$0xff] %v282_v8  ;;  %v288_v11 = vld [vmem:[%s1739_s7 + $0x108] sm:$0xff]  ;;  %285 = vst [vmem:[%s1744_s8 + $0x48] sm:$0xff] %v284_v9  ;;  %v290_v12 = vld [vmem:[%s1739_s7 + $0x120] sm:$0xff] }
  0x1d   : > { %287 = vst [vmem:[%s1744_s8 + $0x50] sm:$0xff] %v286_v10  ;;  %289 = vst [vmem:[%s1744_s8 + $0x58] sm:$0xff] %v288_v11  ;;  %v292_v13 = vld [vmem:[%s1739_s7 + $0x138] sm:$0xff]  ;;  %v294_v14 = vld [vmem:[%s1739_s7 + $0x150] sm:$0xff] }
  0x1e   : > { %291 = vst [vmem:[%s1744_s8 + $0x60] sm:$0xff] %v290_v12  ;;  %293 = vst [vmem:[%s1744_s8 + $0x68] sm:$0xff] %v292_v13  ;;  %v296_v15 = vld [vmem:[%s1739_s7 + $0x168] sm:$0xff]  ;;  %v298_v16 = vld [vmem:[%s1739_s7 + $0x180] sm:$0xff] }
  0x1f   : > { %295 = vst [vmem:[%s1744_s8 + $0x70] sm:$0xff] %v294_v14  ;;  %v300_v17 = vld [vmem:[%s1739_s7 + $0x198] sm:$0xff]  ;;  %297 = vst [vmem:[%s1744_s8 + $0x78] sm:$0xff] %v296_v15  ;;  %v302_v18 = vld [vmem:[%s1739_s7 + $0x1b0] sm:$0xff] }
  0x20   : > { %299 = vst [vmem:[%s1744_s8 + $0x80] sm:$0xff] %v298_v16  ;;  %301 = vst [vmem:[%s1744_s8 + $0x88] sm:$0xff] %v300_v17  ;;  %v304_v19 = vld [vmem:[%s1739_s7 + $0x1c8] sm:$0xff]  ;;  %v306_v20 = vld [vmem:[%s1739_s7 + $0x1e0] sm:$0xff] }
  0x21   : > { %303 = vst [vmem:[%s1744_s8 + $0x90] sm:$0xff] %v302_v18  ;;  %305 = vst [vmem:[%s1744_s8 + $0x98] sm:$0xff] %v304_v19  ;;  %v308_v21 = vld [vmem:[%s1739_s7 + $0x1f8] sm:$0xff]  ;;  %v310_v22 = vld [vmem:[%s1739_s7 + $0x210] sm:$0xff] }
  0x22   : > { %307 = vst [vmem:[%s1744_s8 + $0xa0] sm:$0xff] %v306_v20  ;;  %v312_v23 = vld [vmem:[%s1739_s7 + $0x228] sm:$0xff]  ;;  %309 = vst [vmem:[%s1744_s8 + $0xa8] sm:$0xff] %v308_v21  ;;  %v314_v24 = vld [vmem:[%s1739_s7 + $0x240] sm:$0xff] }
  0x23   : > { %311 = vst [vmem:[%s1744_s8 + $0xb0] sm:$0xff] %v310_v22  ;;  %313 = vst [vmem:[%s1744_s8 + $0xb8] sm:$0xff] %v312_v23  ;;  %v316_v25 = vld [vmem:[%s1739_s7 + $0x258] sm:$0xff]  ;;  %v318_v26 = vld [vmem:[%s1739_s7 + $0x270] sm:$0xff] }
  0x24   : > { %315 = vst [vmem:[%s1744_s8 + $0xc0] sm:$0xff] %v314_v24  ;;  %317 = vst [vmem:[%s1744_s8 + $0xc8] sm:$0xff] %v316_v25  ;;  %v320_v27 = vld [vmem:[%s1739_s7 + $0x288] sm:$0xff]  ;;  %v322_v28 = vld [vmem:[%s1739_s7 + $0x2a0] sm:$0xff] }
  0x25   : > { %319 = vst [vmem:[%s1744_s8 + $0xd0] sm:$0xff] %v318_v26  ;;  %v324_v29 = vld [vmem:[%s1739_s7 + $0x2b8] sm:$0xff]  ;;  %321 = vst [vmem:[%s1744_s8 + $0xd8] sm:$0xff] %v320_v27  ;;  %v326_v30 = vld [vmem:[%s1739_s7 + $0x2d0] sm:$0xff] }
  0x26   : > { %323 = vst [vmem:[%s1744_s8 + $0xe0] sm:$0xff] %v322_v28  ;;  %325 = vst [vmem:[%s1744_s8 + $0xe8] sm:$0xff] %v324_v29  ;;  %v328_v31 = vld [vmem:[%s1739_s7 + $0x2e8] sm:$0xff] }
  0x27   : > { %327 = vst [vmem:[%s1744_s8 + $0xf0] sm:$0xff] %v326_v30  ;;  %329 = vst [vmem:[%s1744_s8 + $0xf8] sm:$0xff] %v328_v31 }
  0x28 PF: > { %p1293_p7 = scmp.ge.s32.totalorder %s1656_s18, 1  ;;  %p346_p8 = scmp.lt.s32.totalorder %s1656_s18, 7 }
  0x2a   : > { %p347_p9 = pnand %p1293_p7, %p346_p8 }
  0x2b   : > { %s353_s9 = sand.u32 (!%p347_p9), 1, %s1632_s12   ;;  %s1295_s10 = sshll.u32 (!%p347_p9), %s1640_s14, 5 }
  0x2c   : > { %350 = sbr.rel (%p347_p9) target bundleno = 389 (0x185), region = 66  ;;  %s1294_s11 = sshll.u32 (!%p347_p9), %s353_s9, 8 }
  0x2d   : > { %p393_p10 = scmp.lt.s32.totalorder (!%p347_p9), %s1295_s10, 95  ;;  %s1297_s21 = sshll.u32 (!%p347_p9), %s1644_s15, 5 }
  0x2e   : > { %p405_p11 = scmp.lt.s32.totalorder (!%p347_p9), %s1297_s21, 63  ;;  %s1822_s12 = scalar_lea.vmem (!%p347_p9), [#allocation2], %s1294_s11 }
  0x2f   : > { %p1299_p12 = scmp.ne.s32.totalorder (!%p347_p9), %s1640_s14, 0 }
  0x31   : > { %s2109_s10 = smov (!%p393_p10, %s1295_s10), 95  ;;  %s2111_s21 = smov (!%p405_p11, %s1297_s21), 63 }
  0x32   : > { %s1296_s22 = sshll.u32 %s2109_s10, 2  ;;  %s1298_s27 = sshll.u32 %s2111_s21, 3 }
  0x33   : > { %s1815_s26 = scalar_lea.vmem %s2093_s1, %s1296_s22  ;;  %s1820_s30 = scalar_lea.vmem %s2095_s3, %s1298_s27 }
  0x34   : > { %417 = sbr.rel (%p1299_p12) target bundleno = 74 (0x4a), region = 74 }
  0x39   : > { %v1658_v32 = vmov 0.0  }
  0x3a   : > { %418 = vst [vmem:[%s1820_s30] sm:$0xff] %v1658_v32  ;;  %419 = vst [vmem:[%s1820_s30 + $0x8] sm:$0xff] %v1658_v32 }
  0x3b   : > { %420 = vst [vmem:[%s1820_s30 + $0x10] sm:$0xff] %v1658_v32  ;;  %421 = vst [vmem:[%s1820_s30 + $0x18] sm:$0xff] %v1658_v32 }
  0x3c   : > { %422 = vst [vmem:[%s1820_s30 + $0x20] sm:$0xff] %v1658_v32  ;;  %423 = vst [vmem:[%s1820_s30 + $0x28] sm:$0xff] %v1658_v32 }
  0x3d   : > { %424 = vst [vmem:[%s1820_s30 + $0x30] sm:$0xff] %v1658_v32  ;;  %425 = vst [vmem:[%s1820_s30 + $0x38] sm:$0xff] %v1658_v32 }
  0x3e   : > { %426 = vst [vmem:[%s1820_s30 + $0x40] sm:$0xff] %v1658_v32  ;;  %427 = vst [vmem:[%s1820_s30 + $0x48] sm:$0xff] %v1658_v32 }
  0x3f   : > { %428 = vst [vmem:[%s1820_s30 + $0x50] sm:$0xff] %v1658_v32  ;;  %429 = vst [vmem:[%s1820_s30 + $0x58] sm:$0xff] %v1658_v32 }
  0x40   : > { %430 = vst [vmem:[%s1820_s30 + $0x60] sm:$0xff] %v1658_v32  ;;  %431 = vst [vmem:[%s1820_s30 + $0x68] sm:$0xff] %v1658_v32 }
  0x41   : > { %432 = vst [vmem:[%s1820_s30 + $0x70] sm:$0xff] %v1658_v32  ;;  %433 = vst [vmem:[%s1820_s30 + $0x78] sm:$0xff] %v1658_v32 }
  0x42   : > { %434 = vst [vmem:[%s1820_s30 + $0x80] sm:$0xff] %v1658_v32  ;;  %435 = vst [vmem:[%s1820_s30 + $0x88] sm:$0xff] %v1658_v32 }
  0x43   : > { %436 = vst [vmem:[%s1820_s30 + $0x90] sm:$0xff] %v1658_v32  ;;  %437 = vst [vmem:[%s1820_s30 + $0x98] sm:$0xff] %v1658_v32 }
  0x44   : > { %438 = vst [vmem:[%s1820_s30 + $0xa0] sm:$0xff] %v1658_v32  ;;  %439 = vst [vmem:[%s1820_s30 + $0xa8] sm:$0xff] %v1658_v32 }
  0x45   : > { %440 = vst [vmem:[%s1820_s30 + $0xb0] sm:$0xff] %v1658_v32  ;;  %441 = vst [vmem:[%s1820_s30 + $0xb8] sm:$0xff] %v1658_v32 }
  0x46   : > { %442 = vst [vmem:[%s1820_s30 + $0xc0] sm:$0xff] %v1658_v32  ;;  %443 = vst [vmem:[%s1820_s30 + $0xc8] sm:$0xff] %v1658_v32 }
  0x47   : > { %444 = vst [vmem:[%s1820_s30 + $0xd0] sm:$0xff] %v1658_v32  ;;  %445 = vst [vmem:[%s1820_s30 + $0xd8] sm:$0xff] %v1658_v32 }
  0x48   : > { %446 = vst [vmem:[%s1820_s30 + $0xe0] sm:$0xff] %v1658_v32  ;;  %447 = vst [vmem:[%s1820_s30 + $0xe8] sm:$0xff] %v1658_v32 }
  0x49   : > { %448 = vst [vmem:[%s1820_s30 + $0xf0] sm:$0xff] %v1658_v32  ;;  %449 = vst [vmem:[%s1820_s30 + $0xf8] sm:$0xff] %v1658_v32 }
  0x4a PF: > { %v1538_v33 = vld [vmem:[%s1815_s26 + $0x78] sm:$0xff]   ;;  %v1540_v35 = vld [vmem:[%s1815_s26 + $0x70] sm:$0xff]   ;;  %v1542_v37 = vld [vmem:[%s1815_s26 + $0x68] sm:$0xff]   ;;  %p1348_p13 = scmp.ne.s32.totalorder %s1640_s14, 2 }
  0x4b   : > { %v1539_v34 = vld [vmem:[%s1815_s26 + $0x38] sm:$0xff]   ;;  %1352 = vmatprep.subr.bf16.mxu0 %v1538_v33  ;;  %1464 = vmatprep.subr.bf16.mxu1 %v1538_v33  ;;  %v1541_v36 = vld [vmem:[%s1815_s26 + $0x30] sm:$0xff]   ;;  %v1543_v38 = vld [vmem:[%s1815_s26 + $0x28] sm:$0xff]  }
  0x4c   : > { %1353 = vmatpush3.bf16.msra.mxu0 %v1539_v34  ;;  %1472 = vmatpush3.bf16.msra.mxu1 %v1539_v34  ;;  %v1544_v39 = vld [vmem:[%s1815_s26 + $0x60] sm:$0xff]   ;;  %v1546_v41 = vld [vmem:[%s1815_s26 + $0x58] sm:$0xff]   ;;  %v1548_v43 = vld [vmem:[%s1815_s26 + $0x50] sm:$0xff]  }
  0x4d   : > { %1354 = vmatprep.subr.bf16.mxu0 %v1540_v35  ;;  %1465 = vmatprep.subr.bf16.mxu1 %v1540_v35  ;;  %v1545_v40 = vld [vmem:[%s1815_s26 + $0x20] sm:$0xff]   ;;  %v1547_v42 = vld [vmem:[%s1815_s26 + $0x18] sm:$0xff]   ;;  %v1549_v46 = vld [vmem:[%s1815_s26 + $0x10] sm:$0xff]  }
  0x4e   : > { %v1556_v44 = vld [vmem:[%s1822_s12 + $0x4] ss:$8 sps:$4 sm:$0xff]   ;;  %v1554_v51 = vld [vmem:[%s1822_s12] ss:$8 sps:$4 sm:$0xff]   ;;  %v1560_v53 = vld [vmem:[%s1822_s12 + $0x14] ss:$8 sps:$4 sm:$0xff]  }
  0x4f   : > { %v1559_v45 = vld [vmem:[%s1822_s12 + $0x84] ss:$8 sps:$4 sm:$0xff]   ;;  %834 = vmatprep.mubr.bf16.mxu0 %v1556_v44  ;;  %v1557_v52 = vld [vmem:[%s1822_s12 + $0x80] ss:$8 sps:$4 sm:$0xff]   ;;  %v1562_v54 = vld [vmem:[%s1822_s12 + $0x94] ss:$8 sps:$4 sm:$0xff]  }
  0x50   : > { %1355 = vmatpush3.bf16.msra.mxu0 %v1541_v36  ;;  %1473 = vmatpush3.bf16.msra.mxu1 %v1541_v36  ;;  %v1550_v47 = vld [vmem:[%s1815_s26 + $0x48] sm:$0xff]   ;;  %v1552_v49 = vld [vmem:[%s1815_s26 + $0x40] sm:$0xff]   ;;  %v1564_v55 = vld [vmem:[%s1822_s12 + $0x10] ss:$8 sps:$4 sm:$0xff]  }
  0x51   : > { %1356 = vmatprep.subr.bf16.mxu0 %v1542_v37  ;;  %1466 = vmatprep.subr.bf16.mxu1 %v1542_v37  ;;  %v1551_v48 = vld [vmem:[%s1815_s26 + $0x8] sm:$0xff]   ;;  %v1553_v50 = vld [vmem:[%s1815_s26] sm:$0xff]   ;;  %v1565_v56 = vld [vmem:[%s1822_s12 + $0x90] ss:$8 sps:$4 sm:$0xff]  }
  0x52   : > { %898 = vmatprep.mubr.bf16.mxu1 %v1559_v45  ;;  %v1566_v57 = vld [vmem:[%s1822_s12 + $0x24] ss:$8 sps:$4 sm:$0xff]   ;;  %v1570_v59 = vld [vmem:[%s1822_s12 + $0x20] ss:$8 sps:$4 sm:$0xff]   ;;  %v1572_v61 = vld [vmem:[%s1822_s12 + $0x34] ss:$8 sps:$4 sm:$0xff]  }
  0x53   : > { %v1568_v58 = vld [vmem:[%s1822_s12 + $0xa4] ss:$8 sps:$4 sm:$0xff]   ;;  %v1571_v60 = vld [vmem:[%s1822_s12 + $0xa0] ss:$8 sps:$4 sm:$0xff]   ;;  %v1574_v62 = vld [vmem:[%s1822_s12 + $0xb4] ss:$8 sps:$4 sm:$0xff]  }
  0x54   : > { %1357 = vmatpush3.bf16.msra.mxu0 %v1543_v38  ;;  %1474 = vmatpush3.bf16.msra.mxu1 %v1543_v38  ;;  %v1576_v63 = vld [vmem:[%s1822_s12 + $0x30] ss:$8 sps:$4 sm:$0xff]   ;;  %v1578_v1 = vld [vmem:[%s1822_s12 + $0x44] ss:$8 sps:$4 sm:$0xff]   ;;  %v1582_v3 = vld [vmem:[%s1822_s12 + $0x40] ss:$8 sps:$4 sm:$0xff]  }
  0x55   : > { %1358 = vmatprep.subr.bf16.mxu0 %v1544_v39  ;;  %1467 = vmatprep.subr.bf16.mxu1 %v1544_v39  ;;  %v1577_v0 = vld [vmem:[%s1822_s12 + $0xb0] ss:$8 sps:$4 sm:$0xff]   ;;  %v1580_v2 = vld [vmem:[%s1822_s12 + $0xc4] ss:$8 sps:$4 sm:$0xff]   ;;  %v1583_v4 = vld [vmem:[%s1822_s12 + $0xc0] ss:$8 sps:$4 sm:$0xff]  }
  0x56   : > { %v1584_v5 = vld [vmem:[%s1822_s12 + $0x54] ss:$8 sps:$4 sm:$0xff]   ;;  %v1588_v7 = vld [vmem:[%s1822_s12 + $0x50] ss:$8 sps:$4 sm:$0xff]   ;;  %v1590_v9 = vld [vmem:[%s1822_s12 + $0x64] ss:$8 sps:$4 sm:$0xff]  }
  0x57   : > { %v1586_v6 = vld [vmem:[%s1822_s12 + $0xd4] ss:$8 sps:$4 sm:$0xff]   ;;  %v1589_v8 = vld [vmem:[%s1822_s12 + $0xd0] ss:$8 sps:$4 sm:$0xff]   ;;  %v1592_v10 = vld [vmem:[%s1822_s12 + $0xe4] ss:$8 sps:$4 sm:$0xff]  }
  0x58   : > { %1359 = vmatpush3.bf16.msra.mxu0 %v1545_v40  ;;  %1475 = vmatpush3.bf16.msra.mxu1 %v1545_v40  ;;  %v1594_v11 = vld [vmem:[%s1822_s12 + $0x60] ss:$8 sps:$4 sm:$0xff]   ;;  %v1596_v13 = vld [vmem:[%s1822_s12 + $0x74] ss:$8 sps:$4 sm:$0xff]   ;;  %v1600_v15 = vld [vmem:[%s1822_s12 + $0x70] ss:$8 sps:$4 sm:$0xff]  }
  0x59   : > { %1360 = vmatprep.subr.bf16.mxu0 %v1546_v41  ;;  %1468 = vmatprep.subr.bf16.mxu1 %v1546_v41  ;;  %v1595_v12 = vld [vmem:[%s1822_s12 + $0xe0] ss:$8 sps:$4 sm:$0xff]   ;;  %v1598_v14 = vld [vmem:[%s1822_s12 + $0xf4] ss:$8 sps:$4 sm:$0xff]   ;;  %v1601_v16 = vld [vmem:[%s1822_s12 + $0xf0] ss:$8 sps:$4 sm:$0xff]  }
  0x5a   : > { %v450_v19 = vld [vmem:[%s1820_s30] sm:$0xff]  ;;  %v451_v29 = vld [vmem:[%s1820_s30 + $0x8] sm:$0xff]  ;;  %v452_v39 = vld [vmem:[%s1820_s30 + $0x10] sm:$0xff] }
  0x5b   : > { %v466_v21 = vld [vmem:[%s1820_s30 + $0x80] sm:$0xff]  ;;  %v467_v31 = vld [vmem:[%s1820_s30 + $0x88] sm:$0xff]  ;;  %v468_v41 = vld [vmem:[%s1820_s30 + $0x90] sm:$0xff] }
  0x5c   : > { %1361 = vmatpush3.bf16.msra.mxu0 %v1547_v42  ;;  %1476 = vmatpush3.bf16.msra.mxu1 %v1547_v42 }
  0x5d   : > { %1362 = vmatprep.subr.bf16.mxu0 %v1548_v43  ;;  %1469 = vmatprep.subr.bf16.mxu1 %v1548_v43 }
  0x60   : > { %1363 = vmatpush3.bf16.msra.mxu0 %v1549_v46  ;;  %1477 = vmatpush3.bf16.msra.mxu1 %v1549_v46 }
  0x61   : > { %1364 = vmatprep.subr.bf16.mxu0 %v1550_v47  ;;  %1470 = vmatprep.subr.bf16.mxu1 %v1550_v47 }
  0x64   : > { %1365 = vmatpush3.bf16.msra.mxu0 %v1551_v48  ;;  %1478 = vmatpush3.bf16.msra.mxu1 %v1551_v48 }
  0x65   : > { %1366 = vmatprep.subr.bf16.mxu0 %v1552_v49  ;;  %1471 = vmatprep.subr.bf16.mxu1 %v1552_v49  ;;  %v453_v49 = vld [vmem:[%s1820_s30 + $0x18] sm:$0xff] }
  0x68   : > { %1367 = vmatpush3.bf16.msra.mxu0 %v1553_v50  ;;  %1479 = vmatpush3.bf16.msra.mxu1 %v1553_v50 }
  0x6b   : > { %835 = vmatmul.mubr.bf16.vlgmr.msra.gmra.mxu0 %v1554_v51  ;;  %899 = vmatmul.mubr.bf16.vlgmr.msra.gmra.mxu1 %v1557_v52  ;;  %v469_v51 = vld [vmem:[%s1820_s30 + $0x98] sm:$0xff] }
  0x6c   : > { %842 = vmatprep.mubr.bf16.mxu0 %v1560_v53  ;;  %906 = vmatprep.mubr.bf16.mxu1 %v1562_v54 }
  0x73   : > { %843 = vmatmul.mubr.bf16.gmra.mxu0 %v1564_v55  ;;  %907 = vmatmul.mubr.bf16.gmra.mxu1 %v1565_v56 }
  0x74   : > { %850 = vmatprep.mubr.bf16.mxu0 %v1566_v57  ;;  %914 = vmatprep.mubr.bf16.mxu1 %v1568_v58 }
  0x7b   : > { %851 = vmatmul.mubr.bf16.gmra.mxu0 %v1570_v59  ;;  %915 = vmatmul.mubr.bf16.gmra.mxu1 %v1571_v60  ;;  %v454_v59 = vld [vmem:[%s1820_s30 + $0x20] sm:$0xff] }
  0x7c   : > { %858 = vmatprep.mubr.bf16.mxu0 %v1572_v61  ;;  %922 = vmatprep.mubr.bf16.mxu1 %v1574_v62  ;;  %v470_v61 = vld [vmem:[%s1820_s30 + $0xa0] sm:$0xff] }
  0x83   : > { %859 = vmatmul.mubr.bf16.gmra.mxu0 %v1576_v63  ;;  %923 = vmatmul.mubr.bf16.gmra.mxu1 %v1577_v0 }
  0x84   : > { %866 = vmatprep.mubr.bf16.mxu0 %v1578_v1  ;;  %930 = vmatprep.mubr.bf16.mxu1 %v1580_v2 }
  0x8b   : > { %867 = vmatmul.mubr.bf16.gmra.mxu0 %v1582_v3  ;;  %931 = vmatmul.mubr.bf16.gmra.mxu1 %v1583_v4 }
  0x8c   : > { %874 = vmatprep.mubr.bf16.mxu0 %v1584_v5  ;;  %938 = vmatprep.mubr.bf16.mxu1 %v1586_v6  ;;  %v455_v5 = vld [vmem:[%s1820_s30 + $0x28] sm:$0xff] }
  0x93   : > { %875 = vmatmul.mubr.bf16.gmra.mxu0 %v1588_v7  ;;  %939 = vmatmul.mubr.bf16.gmra.mxu1 %v1589_v8  ;;  %v471_v7 = vld [vmem:[%s1820_s30 + $0xa8] sm:$0xff] }
  0x94   : > { %882 = vmatprep.mubr.bf16.mxu0 %v1590_v9  ;;  %946 = vmatprep.mubr.bf16.mxu1 %v1592_v10 }
  0x9b   : > { %883 = vmatmul.mubr.bf16.gmra.mxu0 %v1594_v11  ;;  %947 = vmatmul.mubr.bf16.gmra.mxu1 %v1595_v12 }
  0x9c   : > { %890 = vmatprep.mubr.bf16.mxu0 %v1596_v13  ;;  %954 = vmatprep.mubr.bf16.mxu1 %v1598_v14 }
  0xa3   : > { %891 = vmatmul.mubr.bf16.gmra.mxu0 %v1600_v15  ;;  %955 = vmatmul.mubr.bf16.gmra.mxu1 %v1601_v16  ;;  %v456_v15 = vld [vmem:[%s1820_s30 + $0x30] sm:$0xff] }
 0x12b   : > { %v1368_v17 = vpop.f32.mrf.mxu0  ;;  %v1416_v18 = vpop.f32.mrf.mxu1 }
 0x12d   : > { %v1369_v20 = vpop.f32.mrf.mxu0  ;;  %v1417_v22 = vpop.f32.mrf.mxu1 }
 0x12e   : > { %v1370_v23 = vadd.f32 %v1369_v20, %v1368_v17  ;;  %v1418_v24 = vadd.f32 %v1417_v22, %v1416_v18  ;;  %v472_v17 = vld [vmem:[%s1820_s30 + $0xb0] sm:$0xff] }
 0x12f   : > { %v1371_v25 = vpop.f32.mrf.mxu0  ;;  %v1419_v26 = vpop.f32.mrf.mxu1 }
 0x130   : > { %v963_v27 = vadd.f32 %v1370_v23, %v450_v19  ;;  %v979_v28 = vadd.f32 %v1418_v24, %v466_v21 }
 0x131   : > { %v1372_v30 = vpop.f32.mrf.mxu0  ;;  %v1420_v32 = vpop.f32.mrf.mxu1 }
 0x132   : > { %995 = vst [vmem:[%s1820_s30] sm:$0xff] %v963_v27  ;;  %1011 = vst [vmem:[%s1820_s30 + $0x80] sm:$0xff] %v979_v28  ;;  %v1373_v33 = vadd.f32 %v1372_v30, %v1371_v25  ;;  %v1421_v34 = vadd.f32 %v1420_v32, %v1419_v26  ;;  %v457_v25 = vld [vmem:[%s1820_s30 + $0x38] sm:$0xff] }
 0x133   : > { %v1374_v35 = vpop.f32.mrf.mxu0  ;;  %v1422_v36 = vpop.f32.mrf.mxu1  ;;  %v473_v27 = vld [vmem:[%s1820_s30 + $0xb8] sm:$0xff] }
 0x134   : > { %v964_v37 = vadd.f32 %v1373_v33, %v451_v29  ;;  %v980_v38 = vadd.f32 %v1421_v34, %v467_v31 }
 0x135   : > { %v1375_v40 = vpop.f32.mrf.mxu0  ;;  %v1423_v42 = vpop.f32.mrf.mxu1 }
 0x136   : > { %996 = vst [vmem:[%s1820_s30 + $0x8] sm:$0xff] %v964_v37  ;;  %1012 = vst [vmem:[%s1820_s30 + $0x88] sm:$0xff] %v980_v38  ;;  %v1376_v43 = vadd.f32 %v1375_v40, %v1374_v35  ;;  %v1424_v44 = vadd.f32 %v1423_v42, %v1422_v36  ;;  %v458_v35 = vld [vmem:[%s1820_s30 + $0x40] sm:$0xff] }
 0x137   : > { %v1377_v45 = vpop.f32.mrf.mxu0  ;;  %v1425_v46 = vpop.f32.mrf.mxu1  ;;  %v474_v37 = vld [vmem:[%s1820_s30 + $0xc0] sm:$0xff] }
 0x138   : > { %v965_v47 = vadd.f32 %v1376_v43, %v452_v39  ;;  %v981_v48 = vadd.f32 %v1424_v44, %v468_v41 }
 0x139   : > { %v1378_v50 = vpop.f32.mrf.mxu0  ;;  %v1426_v52 = vpop.f32.mrf.mxu1 }
 0x13a   : > { %997 = vst [vmem:[%s1820_s30 + $0x10] sm:$0xff] %v965_v47  ;;  %1013 = vst [vmem:[%s1820_s30 + $0x90] sm:$0xff] %v981_v48  ;;  %v1379_v53 = vadd.f32 %v1378_v50, %v1377_v45  ;;  %v1427_v54 = vadd.f32 %v1426_v52, %v1425_v46  ;;  %v459_v45 = vld [vmem:[%s1820_s30 + $0x48] sm:$0xff] }
 0x13b   : > { %v1380_v55 = vpop.f32.mrf.mxu0  ;;  %v1428_v56 = vpop.f32.mrf.mxu1  ;;  %v475_v47 = vld [vmem:[%s1820_s30 + $0xc8] sm:$0xff] }
 0x13c   : > { %v966_v57 = vadd.f32 %v1379_v53, %v453_v49  ;;  %v982_v58 = vadd.f32 %v1427_v54, %v469_v51 }
 0x13d   : > { %v1381_v60 = vpop.f32.mrf.mxu0  ;;  %v1429_v62 = vpop.f32.mrf.mxu1 }
 0x13e   : > { %998 = vst [vmem:[%s1820_s30 + $0x18] sm:$0xff] %v966_v57  ;;  %1014 = vst [vmem:[%s1820_s30 + $0x98] sm:$0xff] %v982_v58  ;;  %v1382_v63 = vadd.f32 %v1381_v60, %v1380_v55  ;;  %v1430_v0 = vadd.f32 %v1429_v62, %v1428_v56  ;;  %v460_v55 = vld [vmem:[%s1820_s30 + $0x50] sm:$0xff] }
 0x13f   : > { %v1383_v1 = vpop.f32.mrf.mxu0  ;;  %v1431_v2 = vpop.f32.mrf.mxu1  ;;  %v476_v57 = vld [vmem:[%s1820_s30 + $0xd0] sm:$0xff] }
 0x140   : > { %v967_v3 = vadd.f32 %v1382_v63, %v454_v59  ;;  %v983_v4 = vadd.f32 %v1430_v0, %v470_v61 }
 0x141   : > { %v1384_v6 = vpop.f32.mrf.mxu0  ;;  %v1432_v8 = vpop.f32.mrf.mxu1 }
 0x142   : > { %999 = vst [vmem:[%s1820_s30 + $0x20] sm:$0xff] %v967_v3  ;;  %1015 = vst [vmem:[%s1820_s30 + $0xa0] sm:$0xff] %v983_v4  ;;  %v1385_v9 = vadd.f32 %v1384_v6, %v1383_v1  ;;  %v1433_v10 = vadd.f32 %v1432_v8, %v1431_v2  ;;  %v461_v1 = vld [vmem:[%s1820_s30 + $0x58] sm:$0xff] }
 0x143   : > { %v1386_v11 = vpop.f32.mrf.mxu0  ;;  %v1434_v12 = vpop.f32.mrf.mxu1  ;;  %v477_v3 = vld [vmem:[%s1820_s30 + $0xd8] sm:$0xff] }
 0x144   : > { %v968_v13 = vadd.f32 %v1385_v9, %v455_v5  ;;  %v984_v14 = vadd.f32 %v1433_v10, %v471_v7 }
 0x145   : > { %v1387_v16 = vpop.f32.mrf.mxu0  ;;  %v1435_v18 = vpop.f32.mrf.mxu1 }
 0x146   : > { %1000 = vst [vmem:[%s1820_s30 + $0x28] sm:$0xff] %v968_v13  ;;  %1016 = vst [vmem:[%s1820_s30 + $0xa8] sm:$0xff] %v984_v14  ;;  %v1388_v19 = vadd.f32 %v1387_v16, %v1386_v11  ;;  %v1436_v20 = vadd.f32 %v1435_v18, %v1434_v12  ;;  %v462_v11 = vld [vmem:[%s1820_s30 + $0x60] sm:$0xff] }
 0x147   : > { %v1389_v21 = vpop.f32.mrf.mxu0  ;;  %v1437_v22 = vpop.f32.mrf.mxu1  ;;  %v478_v13 = vld [vmem:[%s1820_s30 + $0xe0] sm:$0xff] }
 0x148   : > { %v969_v23 = vadd.f32 %v1388_v19, %v456_v15  ;;  %v985_v24 = vadd.f32 %v1436_v20, %v472_v17 }
 0x149   : > { %v1390_v26 = vpop.f32.mrf.mxu0  ;;  %v1438_v28 = vpop.f32.mrf.mxu1 }
 0x14a   : > { %1001 = vst [vmem:[%s1820_s30 + $0x30] sm:$0xff] %v969_v23  ;;  %1017 = vst [vmem:[%s1820_s30 + $0xb0] sm:$0xff] %v985_v24  ;;  %v1391_v29 = vadd.f32 %v1390_v26, %v1389_v21  ;;  %v1439_v30 = vadd.f32 %v1438_v28, %v1437_v22  ;;  %v463_v21 = vld [vmem:[%s1820_s30 + $0x68] sm:$0xff] }
 0x14b   : > { %v1392_v31 = vpop.f32.mrf.mxu0  ;;  %v1440_v32 = vpop.f32.mrf.mxu1  ;;  %v479_v23 = vld [vmem:[%s1820_s30 + $0xe8] sm:$0xff] }
 0x14c   : > { %v970_v33 = vadd.f32 %v1391_v29, %v457_v25  ;;  %v986_v34 = vadd.f32 %v1439_v30, %v473_v27 }
 0x14d   : > { %v1393_v36 = vpop.f32.mrf.mxu0  ;;  %v1441_v38 = vpop.f32.mrf.mxu1 }
 0x14e   : > { %1002 = vst [vmem:[%s1820_s30 + $0x38] sm:$0xff] %v970_v33  ;;  %1018 = vst [vmem:[%s1820_s30 + $0xb8] sm:$0xff] %v986_v34  ;;  %v1394_v39 = vadd.f32 %v1393_v36, %v1392_v31  ;;  %v1442_v40 = vadd.f32 %v1441_v38, %v1440_v32  ;;  %v464_v31 = vld [vmem:[%s1820_s30 + $0x70] sm:$0xff] }
 0x14f   : > { %v1395_v41 = vpop.f32.mrf.mxu0  ;;  %v1443_v42 = vpop.f32.mrf.mxu1  ;;  %v480_v33 = vld [vmem:[%s1820_s30 + $0xf0] sm:$0xff] }
 0x150   : > { %v971_v43 = vadd.f32 %v1394_v39, %v458_v35  ;;  %v987_v44 = vadd.f32 %v1442_v40, %v474_v37 }
 0x151   : > { %v1396_v46 = vpop.f32.mrf.mxu0  ;;  %v1444_v48 = vpop.f32.mrf.mxu1 }
 0x152   : > { %1003 = vst [vmem:[%s1820_s30 + $0x40] sm:$0xff] %v971_v43  ;;  %1019 = vst [vmem:[%s1820_s30 + $0xc0] sm:$0xff] %v987_v44  ;;  %v1397_v49 = vadd.f32 %v1396_v46, %v1395_v41  ;;  %v1445_v50 = vadd.f32 %v1444_v48, %v1443_v42  ;;  %v465_v41 = vld [vmem:[%s1820_s30 + $0x78] sm:$0xff] }
 0x153   : > { %v1398_v51 = vpop.f32.mrf.mxu0  ;;  %v1446_v52 = vpop.f32.mrf.mxu1  ;;  %v481_v43 = vld [vmem:[%s1820_s30 + $0xf8] sm:$0xff] }
 0x154   : > { %v972_v53 = vadd.f32 %v1397_v49, %v459_v45  ;;  %v988_v54 = vadd.f32 %v1445_v50, %v475_v47 }
 0x155   : > { %v1399_v56 = vpop.f32.mrf.mxu0  ;;  %v1447_v58 = vpop.f32.mrf.mxu1 }
 0x156   : > { %1004 = vst [vmem:[%s1820_s30 + $0x48] sm:$0xff] %v972_v53  ;;  %1020 = vst [vmem:[%s1820_s30 + $0xc8] sm:$0xff] %v988_v54  ;;  %v1400_v59 = vadd.f32 %v1399_v56, %v1398_v51  ;;  %v1448_v60 = vadd.f32 %v1447_v58, %v1446_v52 }
 0x157   : > { %v1401_v61 = vpop.f32.mrf.mxu0  ;;  %v1449_v62 = vpop.f32.mrf.mxu1 }
 0x158   : > { %v973_v63 = vadd.f32 %v1400_v59, %v460_v55  ;;  %v989_v0 = vadd.f32 %v1448_v60, %v476_v57 }
 0x159   : > { %v1402_v2 = vpop.f32.mrf.mxu0  ;;  %v1450_v4 = vpop.f32.mrf.mxu1 }
 0x15a   : > { %1005 = vst [vmem:[%s1820_s30 + $0x50] sm:$0xff] %v973_v63  ;;  %1021 = vst [vmem:[%s1820_s30 + $0xd0] sm:$0xff] %v989_v0  ;;  %v1403_v5 = vadd.f32 %v1402_v2, %v1401_v61  ;;  %v1451_v6 = vadd.f32 %v1450_v4, %v1449_v62 }
 0x15b   : > { %v1404_v7 = vpop.f32.mrf.mxu0  ;;  %v1452_v8 = vpop.f32.mrf.mxu1 }
 0x15c   : > { %v974_v9 = vadd.f32 %v1403_v5, %v461_v1  ;;  %v990_v10 = vadd.f32 %v1451_v6, %v477_v3 }
 0x15d   : > { %v1405_v12 = vpop.f32.mrf.mxu0  ;;  %v1453_v14 = vpop.f32.mrf.mxu1 }
 0x15e   : > { %1006 = vst [vmem:[%s1820_s30 + $0x58] sm:$0xff] %v974_v9  ;;  %1022 = vst [vmem:[%s1820_s30 + $0xd8] sm:$0xff] %v990_v10  ;;  %v1406_v15 = vadd.f32 %v1405_v12, %v1404_v7  ;;  %v1454_v16 = vadd.f32 %v1453_v14, %v1452_v8 }
 0x15f   : > { %v1407_v17 = vpop.f32.mrf.mxu0  ;;  %v1455_v18 = vpop.f32.mrf.mxu1 }
 0x160   : > { %v975_v19 = vadd.f32 %v1406_v15, %v462_v11  ;;  %v991_v20 = vadd.f32 %v1454_v16, %v478_v13 }
 0x161   : > { %v1408_v22 = vpop.f32.mrf.mxu0  ;;  %v1456_v24 = vpop.f32.mrf.mxu1 }
 0x162   : > { %1007 = vst [vmem:[%s1820_s30 + $0x60] sm:$0xff] %v975_v19  ;;  %1023 = vst [vmem:[%s1820_s30 + $0xe0] sm:$0xff] %v991_v20  ;;  %v1409_v25 = vadd.f32 %v1408_v22, %v1407_v17  ;;  %v1457_v26 = vadd.f32 %v1456_v24, %v1455_v18 }
 0x163   : > { %v1410_v27 = vpop.f32.mrf.mxu0  ;;  %v1458_v28 = vpop.f32.mrf.mxu1 }
 0x164   : > { %v976_v29 = vadd.f32 %v1409_v25, %v463_v21  ;;  %v992_v30 = vadd.f32 %v1457_v26, %v479_v23 }
 0x165   : > { %v1411_v32 = vpop.f32.mrf.mxu0  ;;  %v1459_v34 = vpop.f32.mrf.mxu1 }
 0x166   : > { %1008 = vst [vmem:[%s1820_s30 + $0x68] sm:$0xff] %v976_v29  ;;  %1024 = vst [vmem:[%s1820_s30 + $0xe8] sm:$0xff] %v992_v30  ;;  %v1412_v35 = vadd.f32 %v1411_v32, %v1410_v27  ;;  %v1460_v36 = vadd.f32 %v1459_v34, %v1458_v28 }
 0x167   : > { %v1413_v37 = vpop.f32.mrf.mxu0  ;;  %v1461_v38 = vpop.f32.mrf.mxu1 }
 0x168   : > { %v977_v39 = vadd.f32 %v1412_v35, %v464_v31  ;;  %v993_v40 = vadd.f32 %v1460_v36, %v480_v33 }
 0x169   : > { %v1414_v42 = vpop.f32.mrf.mxu0  ;;  %v1462_v44 = vpop.f32.mrf.mxu1 }
 0x16a   : > { %1009 = vst [vmem:[%s1820_s30 + $0x70] sm:$0xff] %v977_v39  ;;  %1025 = vst [vmem:[%s1820_s30 + $0xf0] sm:$0xff] %v993_v40  ;;  %v1415_v45 = vadd.f32 %v1414_v42, %v1413_v37  ;;  %v1463_v46 = vadd.f32 %v1462_v44, %v1461_v38  ;;  %1030 = sbr.rel (%p1348_p13) target bundleno = 389 (0x185), region = 78 }
 0x16c   : > { %v978_v47 = vadd.f32 %v1415_v45, %v465_v41  ;;  %v994_v48 = vadd.f32 %v1463_v46, %v481_v43 }
 0x16e   : > { %1010 = vst [vmem:[%s1820_s30 + $0x78] sm:$0xff] %v978_v47  ;;  %1026 = vst [vmem:[%s1820_s30 + $0xf8] sm:$0xff] %v994_v48 }
 0x16f   : > { %v1031_v49 = vld [vmem:[%s1820_s30] sm:$0xff]  ;;  %v1032_v51 = vld [vmem:[%s1820_s30 + $0x8] sm:$0xff]  ;;  %v1033_v54 = vld [vmem:[%s1820_s30 + $0x10] sm:$0xff] }
 0x170   : > { %v1974_v50 = vld [vmem:[%s2094_s2] ss:$0 sm:$0xff]  ;;  %v1034_v55 = vld [vmem:[%s1820_s30 + $0x18] sm:$0xff]  ;;  %v1036_v60 = vld [vmem:[%s1820_s30 + $0x28] sm:$0xff] }
 0x171   : > { %v1070_v52 = vadd.f32 %v1974_v50, %v1031_v49  ;;  %v1071_v53 = vadd.f32 %v1974_v50, %v1032_v51  ;;  %v1035_v56 = vld [vmem:[%s1820_s30 + $0x20] sm:$0xff]  ;;  %v1072_v57 = vadd.f32 %v1974_v50, %v1033_v54  ;;  %v1073_v58 = vadd.f32 %v1974_v50, %v1034_v55  ;;  %v1037_v61 = vld [vmem:[%s1820_s30 + $0x30] sm:$0xff]  ;;  %v1038_v62 = vld [vmem:[%s1820_s30 + $0x38] sm:$0xff] }
 0x172   : > { %v1074_v59 = vadd.f32 %v1974_v50, %v1035_v56  ;;  %v1075_v1 = vadd.f32 %v1974_v50, %v1036_v60  ;;  %v1076_v2 = vadd.f32 %v1974_v50, %v1037_v61  ;;  %v1039_v3 = vld [vmem:[%s1820_s30 + $0x40] sm:$0xff]  ;;  %v1040_v4 = vld [vmem:[%s1820_s30 + $0x48] sm:$0xff]  ;;  %v1041_v5 = vld [vmem:[%s1820_s30 + $0x50] sm:$0xff]  ;;  %v1077_v9 = vadd.f32 %v1974_v50, %v1038_v62 }
 0x173   : > { %v1102_v63 = vmax.f32 %v1070_v52, 0.0  ;;  %v1103_v0 = vmax.f32 %v1071_v53, 0.0  ;;  %v1104_v6 = vmax.f32 %v1072_v57, 0.0  ;;  %v1105_v7 = vmax.f32 %v1073_v58, 0.0  ;;  %v1042_v10 = vld [vmem:[%s1820_s30 + $0x58] sm:$0xff]  ;;  %v1043_v11 = vld [vmem:[%s1820_s30 + $0x60] sm:$0xff] }
 0x174   : > { %v1106_v8 = vmax.f32 %v1074_v59, 0.0  ;;  %v1044_v12 = vld [vmem:[%s1820_s30 + $0x68] sm:$0xff]  ;;  %v1107_v13 = vmax.f32 %v1075_v1, 0.0  ;;  %v1108_v14 = vmax.f32 %v1076_v2, 0.0  ;;  %v1078_v15 = vadd.f32 %v1974_v50, %v1039_v3  ;;  %v1045_v17 = vld [vmem:[%s1820_s30 + $0x70] sm:$0xff]  ;;  %v1047_v23 = vld [vmem:[%s1820_s30 + $0x80] sm:$0xff] }
 0x175   : > { %1134 = vst [vmem:[%s1820_s30] sm:$0xff] %v1102_v63  ;;  %1135 = vst [vmem:[%s1820_s30 + $0x8] sm:$0xff] %v1103_v0  ;;  %v1079_v16 = vadd.f32 %v1974_v50, %v1040_v4  ;;  %v1046_v18 = vld [vmem:[%s1820_s30 + $0x78] sm:$0xff]  ;;  %v1109_v19 = vmax.f32 %v1077_v9, 0.0  ;;  %v1080_v20 = vadd.f32 %v1974_v50, %v1041_v5  ;;  %v1081_v21 = vadd.f32 %v1974_v50, %v1042_v10  ;;  %v1048_v24 = vld [vmem:[%s1820_s30 + $0x88] sm:$0xff] }
 0x176   : > { %1136 = vst [vmem:[%s1820_s30 + $0x10] sm:$0xff] %v1104_v6  ;;  %1137 = vst [vmem:[%s1820_s30 + $0x18] sm:$0xff] %v1105_v7  ;;  %v1082_v22 = vadd.f32 %v1974_v50, %v1043_v11  ;;  %v1110_v25 = vmax.f32 %v1078_v15, 0.0  ;;  %v1083_v27 = vadd.f32 %v1974_v50, %v1044_v12  ;;  %v1084_v28 = vadd.f32 %v1974_v50, %v1045_v17  ;;  %v1049_v29 = vld [vmem:[%s1820_s30 + $0x90] sm:$0xff]  ;;  %v1050_v30 = vld [vmem:[%s1820_s30 + $0x98] sm:$0xff] }
 0x177   : > { %1138 = vst [vmem:[%s1820_s30 + $0x20] sm:$0xff] %v1106_v8  ;;  %1139 = vst [vmem:[%s1820_s30 + $0x28] sm:$0xff] %v1107_v13  ;;  %v1111_v26 = vmax.f32 %v1079_v16, 0.0  ;;  %v1051_v31 = vld [vmem:[%s1820_s30 + $0xa0] sm:$0xff]  ;;  %v1112_v32 = vmax.f32 %v1080_v20, 0.0  ;;  %v1113_v33 = vmax.f32 %v1081_v21, 0.0  ;;  %v1085_v35 = vadd.f32 %v1974_v50, %v1046_v18 }
 0x178   : > { %1140 = vst [vmem:[%s1820_s30 + $0x30] sm:$0xff] %v1108_v14  ;;  %1141 = vst [vmem:[%s1820_s30 + $0x38] sm:$0xff] %v1109_v19  ;;  %v1114_v34 = vmax.f32 %v1082_v22, 0.0  ;;  %v1052_v36 = vld [vmem:[%s1820_s30 + $0xa8] sm:$0xff]  ;;  %v1053_v37 = vld [vmem:[%s1820_s30 + $0xb0] sm:$0xff]  ;;  %v1115_v38 = vmax.f32 %v1083_v27, 0.0  ;;  %v1086_v40 = vadd.f32 %v1974_v50, %v1047_v23  ;;  %v1087_v41 = vadd.f32 %v1974_v50, %v1048_v24 }
 0x179   : > { %1142 = vst [vmem:[%s1820_s30 + $0x40] sm:$0xff] %v1110_v25  ;;  %1143 = vst [vmem:[%s1820_s30 + $0x48] sm:$0xff] %v1111_v26  ;;  %v1116_v39 = vmax.f32 %v1084_v28, 0.0  ;;  %v1054_v42 = vld [vmem:[%s1820_s30 + $0xb8] sm:$0xff]  ;;  %v1117_v43 = vmax.f32 %v1085_v35, 0.0  ;;  %v1088_v44 = vadd.f32 %v1974_v50, %v1049_v29  ;;  %v1089_v45 = vadd.f32 %v1974_v50, %v1050_v30  ;;  %v1055_v47 = vld [vmem:[%s1820_s30 + $0xc0] sm:$0xff] }
 0x17a   : > { %1144 = vst [vmem:[%s1820_s30 + $0x50] sm:$0xff] %v1112_v32  ;;  %1145 = vst [vmem:[%s1820_s30 + $0x58] sm:$0xff] %v1113_v33  ;;  %v1090_v46 = vadd.f32 %v1974_v50, %v1051_v31  ;;  %v1056_v48 = vld [vmem:[%s1820_s30 + $0xc8] sm:$0xff]  ;;  %v1118_v49 = vmax.f32 %v1086_v40, 0.0  ;;  %v1119_v51 = vmax.f32 %v1087_v41, 0.0  ;;  %v1091_v52 = vadd.f32 %v1974_v50, %v1052_v36  ;;  %v1057_v54 = vld [vmem:[%s1820_s30 + $0xd0] sm:$0xff] }
 0x17b   : > { %1146 = vst [vmem:[%s1820_s30 + $0x60] sm:$0xff] %v1114_v34  ;;  %1147 = vst [vmem:[%s1820_s30 + $0x68] sm:$0xff] %v1115_v38  ;;  %v1092_v53 = vadd.f32 %v1974_v50, %v1053_v37  ;;  %v1058_v55 = vld [vmem:[%s1820_s30 + $0xd8] sm:$0xff]  ;;  %v1059_v56 = vld [vmem:[%s1820_s30 + $0xe0] sm:$0xff]  ;;  %v1120_v57 = vmax.f32 %v1088_v44, 0.0  ;;  %v1121_v58 = vmax.f32 %v1089_v45, 0.0  ;;  %v1093_v60 = vadd.f32 %v1974_v50, %v1054_v42 }
 0x17c   : > { %1148 = vst [vmem:[%s1820_s30 + $0x70] sm:$0xff] %v1116_v39  ;;  %1149 = vst [vmem:[%s1820_s30 + $0x78] sm:$0xff] %v1117_v43  ;;  %v1122_v59 = vmax.f32 %v1090_v46, 0.0  ;;  %v1060_v61 = vld [vmem:[%s1820_s30 + $0xe8] sm:$0xff]  ;;  %v1061_v62 = vld [vmem:[%s1820_s30 + $0xf0] sm:$0xff]  ;;  %v1123_v63 = vmax.f32 %v1091_v52, 0.0  ;;  %v1094_v1 = vadd.f32 %v1974_v50, %v1055_v47  ;;  %v1095_v2 = vadd.f32 %v1974_v50, %v1056_v48 }
 0x17d   : > { %1150 = vst [vmem:[%s1820_s30 + $0x80] sm:$0xff] %v1118_v49  ;;  %1151 = vst [vmem:[%s1820_s30 + $0x88] sm:$0xff] %v1119_v51  ;;  %v1124_v0 = vmax.f32 %v1092_v53, 0.0  ;;  %v1062_v3 = vld [vmem:[%s1820_s30 + $0xf8] sm:$0xff]  ;;  %v1125_v4 = vmax.f32 %v1093_v60, 0.0  ;;  %v1096_v5 = vadd.f32 %v1974_v50, %v1057_v54  ;;  %v1097_v6 = vadd.f32 %v1974_v50, %v1058_v55 }
 0x17e   : > { %1152 = vst [vmem:[%s1820_s30 + $0x90] sm:$0xff] %v1120_v57  ;;  %1153 = vst [vmem:[%s1820_s30 + $0x98] sm:$0xff] %v1121_v58  ;;  %v1098_v7 = vadd.f32 %v1974_v50, %v1059_v56  ;;  %v1126_v8 = vmax.f32 %v1094_v1, 0.0  ;;  %v1127_v9 = vmax.f32 %v1095_v2, 0.0  ;;  %v1099_v10 = vadd.f32 %v1974_v50, %v1060_v61 }
 0x17f   : > { %1154 = vst [vmem:[%s1820_s30 + $0xa0] sm:$0xff] %v1122_v59  ;;  %1155 = vst [vmem:[%s1820_s30 + $0xa8] sm:$0xff] %v1123_v63  ;;  %v1100_v11 = vadd.f32 %v1974_v50, %v1061_v62  ;;  %v1128_v12 = vmax.f32 %v1096_v5, 0.0  ;;  %v1129_v13 = vmax.f32 %v1097_v6, 0.0  ;;  %v1101_v15 = vadd.f32 %v1974_v50, %v1062_v3 }
 0x180   : > { %1156 = vst [vmem:[%s1820_s30 + $0xb0] sm:$0xff] %v1124_v0  ;;  %1157 = vst [vmem:[%s1820_s30 + $0xb8] sm:$0xff] %v1125_v4  ;;  %v1130_v14 = vmax.f32 %v1098_v7, 0.0  ;;  %v1131_v16 = vmax.f32 %v1099_v10, 0.0 }
 0x181   : > { %1158 = vst [vmem:[%s1820_s30 + $0xc0] sm:$0xff] %v1126_v8  ;;  %1159 = vst [vmem:[%s1820_s30 + $0xc8] sm:$0xff] %v1127_v9  ;;  %v1132_v17 = vmax.f32 %v1100_v11, 0.0  ;;  %v1133_v18 = vmax.f32 %v1101_v15, 0.0 }
 0x182   : > { %1160 = vst [vmem:[%s1820_s30 + $0xd0] sm:$0xff] %v1128_v12  ;;  %1161 = vst [vmem:[%s1820_s30 + $0xd8] sm:$0xff] %v1129_v13 }
 0x183   : > { %1162 = vst [vmem:[%s1820_s30 + $0xe0] sm:$0xff] %v1130_v14  ;;  %1163 = vst [vmem:[%s1820_s30 + $0xe8] sm:$0xff] %v1131_v16 }
 0x184   : > { %1164 = vst [vmem:[%s1820_s30 + $0xf0] sm:$0xff] %v1132_v17  ;;  %1165 = vst [vmem:[%s1820_s30 + $0xf8] sm:$0xff] %v1133_v18 }
 0x185 PF: > { %s13_s18 = sadd.s32 1, %s1656_s18   ;;  %s2096_s12 = smov %s1636_s13 }
 0x186   : > { %p10_p0 = scmp.ge.s32.totalorder %s13_s18, 8   ;;  %s2097_s13 = smov %s1730_s25 }
 0x187   : > { %s2098_s14 = smov %s1648_s16  ;;  %s2099_s15 = smov %s1652_s17 }
 0x188   : > { %s2100_s16 = smov %s2103_s19  ;;  %s2101_s17 = smov %s2107_s20 }
 0x189   :  { %12 = sbr.rel (!%p10_p0) target bundleno = 4 (0x4), region = 119 }

// kernel: _lambda_.16
= control target key start
LH: loop header
LB: loop body
LE: loop exit
PB: predicated region body
PF: predicated region fallthrough
CT: control target
= control target key end

     0   :  { %s1825_s15 = smov 0   ;;  %s1827_s16 = smov 0   ;;  %s2275_s0 = inlined_call_operand.vmem [shape: bf16[512,768], index: 0, kind: input, shape index: {}]   ;;  %s2276_s1 = inlined_call_operand.vmem [shape: bf16[768,128], index: 1, kind: input, shape index: {}]   ;;  %s2277_s2 = inlined_call_operand.vmem [shape: f32[1,128], index: 2, kind: input, shape index: {}]   ;;  %s2278_s3 = inlined_call_operand.vmem [shape: f32[512,128], index: 3, kind: input, shape index: {}]   ;;  %s2279_s4 = inlined_call_operand.vmem [shape: f32[512,128], index: 4, kind: output, shape index: {}]  }
   0x1   :  { %s1829_s17 = smov 0   ;;  %s1831_s18 = smov 0  }
   0x2   :  { %s1833_s19 = smov 0   ;;  %s1835_s20 = smov 0  }
   0x3   :  { %s1837_s21 = smov 0  }
   0x4 LB: > { %s26_s22 = sadd.s32 1, %s1789_s19  ;;  %s33_s23 = sadd.s32 1, %s1793_s20  ;;  %s1797_s21 = sphi %s1837_s21, %s14_s21   ;;  %s1793_s20 = sphi %s1835_s20, %s2285_s20   ;;  %s1789_s19 = sphi %s1833_s19, %s2284_s19   ;;  %s1785_s18 = sphi %s1831_s18, %s2283_s18   ;;  %s1781_s17 = sphi %s1829_s17, %s2282_s17   ;;  %s1777_s16 = sphi %s1827_s16, %s2281_s16   ;;  %s1773_s15 = sphi %s1825_s15, %s2280_s15  }
   0x5   : > { %p27_p0 = scmp.ge.s32.totalorder %s26_s22, 3  ;;  %p49_p1 = scmp.ne.s32.totalorder %s1777_s16, %s1773_s15 }
   0x6   : > { %p50_p2 = scmp.eq.s32.totalorder %s1797_s21, 0  ;;  %s42_s27 = sadd.s32 1, %s1777_s16 }
   0x7   : > { %s2287_s22 = smov (%p27_p0, %s26_s22), 0  ;;  %s2289_s23 = smov (!%p27_p0, %s33_s23), %s1793_s20 }
   0x8   : > { %p51_p3 = por %p50_p2, %p49_p1  ;;  %p35_p4 = scmp.ge.s32.totalorder %s2289_s23, 2 }
   0x9   : > { %s38_s24 = ssub.s32 %s1789_s19, %s2287_s22  ;;  %p1426_p6 = scmp.ge.s32.totalorder %s1797_s21, 6 }
   0xa   : > { %s2291_s23 = smov (%p35_p4, %s2289_s23), 0 }
   0xb   : > { %s37_s25 = ssub.s32 %s1793_s20, %s2291_s23  ;;  %191 = sbr.rel (%p1426_p6) target bundleno = 40 (0x28), region = 20 }
   0xc   : > { %s39_s26 = sor.u32 %s38_s24, %s37_s25 }
   0xd   : > { %p40_p5 = scmp.eq.s32.totalorder %s39_s26, 0 }
   0xf   : > { %s1876_s28 = scalar_select %p40_p5, %s1777_s16, %s42_s27  }
  0x10   : > { %194 = sbr.rel (!%p51_p3) target bundleno = 40 (0x28), region = 24  ;;  %s196_s29 = sand.u32 (%p51_p3), 1, %s1777_s16  }
  0x11   : > { %s1429_s30 = sshll.u32 (%p51_p3), %s1789_s19, 1  ;;  %s1427_s5 = sshll.u32 (%p51_p3), %s196_s29, 8 }
  0x12   : > { %s1621_s6 = smul.u32 (%p51_p3), 192, %s1793_s20  ;;  %s1890_s12 = scalar_lea.vmem (%p51_p3), [#allocation2], %s1427_s5 }
  0x14   : > { %s202_s7 = sadd.s32 (%p51_p3), %s1621_s6, %s1429_s30 }
  0x15   : > { %s1431_s8 = sshll.u32 %s202_s7, 2 }
  0x16   : > { %s1885_s11 = scalar_lea.vmem %s2275_s0, %s1431_s8 }
  0x17   : > { %v295_v0 = vld [vmem:[%s1885_s11] sm:$0xff]  ;;  %v297_v1 = vld [vmem:[%s1885_s11 + $0x18] sm:$0xff]  ;;  %v299_v2 = vld [vmem:[%s1885_s11 + $0x30] sm:$0xff] }
  0x18   : > { %296 = vst [vmem:[%s1890_s12] sm:$0xff] %v295_v0  ;;  %298 = vst [vmem:[%s1890_s12 + $0x8] sm:$0xff] %v297_v1  ;;  %v301_v3 = vld [vmem:[%s1885_s11 + $0x48] sm:$0xff]  ;;  %v303_v4 = vld [vmem:[%s1885_s11 + $0x60] sm:$0xff] }
  0x19   : > { %300 = vst [vmem:[%s1890_s12 + $0x10] sm:$0xff] %v299_v2  ;;  %v305_v5 = vld [vmem:[%s1885_s11 + $0x78] sm:$0xff]  ;;  %302 = vst [vmem:[%s1890_s12 + $0x18] sm:$0xff] %v301_v3  ;;  %v307_v6 = vld [vmem:[%s1885_s11 + $0x90] sm:$0xff] }
  0x1a   : > { %304 = vst [vmem:[%s1890_s12 + $0x20] sm:$0xff] %v303_v4  ;;  %306 = vst [vmem:[%s1890_s12 + $0x28] sm:$0xff] %v305_v5  ;;  %v309_v7 = vld [vmem:[%s1885_s11 + $0xa8] sm:$0xff]  ;;  %v311_v8 = vld [vmem:[%s1885_s11 + $0xc0] sm:$0xff] }
  0x1b   : > { %308 = vst [vmem:[%s1890_s12 + $0x30] sm:$0xff] %v307_v6  ;;  %310 = vst [vmem:[%s1890_s12 + $0x38] sm:$0xff] %v309_v7  ;;  %v313_v9 = vld [vmem:[%s1885_s11 + $0xd8] sm:$0xff]  ;;  %v315_v10 = vld [vmem:[%s1885_s11 + $0xf0] sm:$0xff] }
  0x1c   : > { %312 = vst [vmem:[%s1890_s12 + $0x40] sm:$0xff] %v311_v8  ;;  %v317_v11 = vld [vmem:[%s1885_s11 + $0x108] sm:$0xff]  ;;  %314 = vst [vmem:[%s1890_s12 + $0x48] sm:$0xff] %v313_v9  ;;  %v319_v12 = vld [vmem:[%s1885_s11 + $0x120] sm:$0xff] }
  0x1d   : > { %316 = vst [vmem:[%s1890_s12 + $0x50] sm:$0xff] %v315_v10  ;;  %318 = vst [vmem:[%s1890_s12 + $0x58] sm:$0xff] %v317_v11  ;;  %v321_v13 = vld [vmem:[%s1885_s11 + $0x138] sm:$0xff]  ;;  %v323_v14 = vld [vmem:[%s1885_s11 + $0x150] sm:$0xff] }
  0x1e   : > { %320 = vst [vmem:[%s1890_s12 + $0x60] sm:$0xff] %v319_v12  ;;  %322 = vst [vmem:[%s1890_s12 + $0x68] sm:$0xff] %v321_v13  ;;  %v325_v15 = vld [vmem:[%s1885_s11 + $0x168] sm:$0xff]  ;;  %v327_v16 = vld [vmem:[%s1885_s11 + $0x180] sm:$0xff] }
  0x1f   : > { %324 = vst [vmem:[%s1890_s12 + $0x70] sm:$0xff] %v323_v14  ;;  %v329_v17 = vld [vmem:[%s1885_s11 + $0x198] sm:$0xff]  ;;  %326 = vst [vmem:[%s1890_s12 + $0x78] sm:$0xff] %v325_v15  ;;  %v331_v18 = vld [vmem:[%s1885_s11 + $0x1b0] sm:$0xff] }
  0x20   : > { %328 = vst [vmem:[%s1890_s12 + $0x80] sm:$0xff] %v327_v16  ;;  %330 = vst [vmem:[%s1890_s12 + $0x88] sm:$0xff] %v329_v17  ;;  %v333_v19 = vld [vmem:[%s1885_s11 + $0x1c8] sm:$0xff]  ;;  %v335_v20 = vld [vmem:[%s1885_s11 + $0x1e0] sm:$0xff] }
  0x21   : > { %332 = vst [vmem:[%s1890_s12 + $0x90] sm:$0xff] %v331_v18  ;;  %334 = vst [vmem:[%s1890_s12 + $0x98] sm:$0xff] %v333_v19  ;;  %v337_v21 = vld [vmem:[%s1885_s11 + $0x1f8] sm:$0xff]  ;;  %v339_v22 = vld [vmem:[%s1885_s11 + $0x210] sm:$0xff] }
  0x22   : > { %336 = vst [vmem:[%s1890_s12 + $0xa0] sm:$0xff] %v335_v20  ;;  %v341_v23 = vld [vmem:[%s1885_s11 + $0x228] sm:$0xff]  ;;  %338 = vst [vmem:[%s1890_s12 + $0xa8] sm:$0xff] %v337_v21  ;;  %v343_v24 = vld [vmem:[%s1885_s11 + $0x240] sm:$0xff] }
  0x23   : > { %340 = vst [vmem:[%s1890_s12 + $0xb0] sm:$0xff] %v339_v22  ;;  %342 = vst [vmem:[%s1890_s12 + $0xb8] sm:$0xff] %v341_v23  ;;  %v345_v25 = vld [vmem:[%s1885_s11 + $0x258] sm:$0xff]  ;;  %v347_v26 = vld [vmem:[%s1885_s11 + $0x270] sm:$0xff] }
  0x24   : > { %344 = vst [vmem:[%s1890_s12 + $0xc0] sm:$0xff] %v343_v24  ;;  %346 = vst [vmem:[%s1890_s12 + $0xc8] sm:$0xff] %v345_v25  ;;  %v349_v27 = vld [vmem:[%s1885_s11 + $0x288] sm:$0xff]  ;;  %v351_v28 = vld [vmem:[%s1885_s11 + $0x2a0] sm:$0xff] }
  0x25   : > { %348 = vst [vmem:[%s1890_s12 + $0xd0] sm:$0xff] %v347_v26  ;;  %v353_v29 = vld [vmem:[%s1885_s11 + $0x2b8] sm:$0xff]  ;;  %350 = vst [vmem:[%s1890_s12 + $0xd8] sm:$0xff] %v349_v27  ;;  %v355_v30 = vld [vmem:[%s1885_s11 + $0x2d0] sm:$0xff] }
  0x26   : > { %352 = vst [vmem:[%s1890_s12 + $0xe0] sm:$0xff] %v351_v28  ;;  %354 = vst [vmem:[%s1890_s12 + $0xe8] sm:$0xff] %v353_v29  ;;  %v357_v31 = vld [vmem:[%s1885_s11 + $0x2e8] sm:$0xff] }
  0x27   : > { %356 = vst [vmem:[%s1890_s12 + $0xf0] sm:$0xff] %v355_v30  ;;  %358 = vst [vmem:[%s1890_s12 + $0xf8] sm:$0xff] %v357_v31 }
  0x28 PF: > { %p1432_p7 = scmp.ge.s32.totalorder %s1797_s21, 1  ;;  %p387_p8 = scmp.lt.s32.totalorder %s1797_s21, 7 }
  0x2a   : > { %p388_p9 = pnand %p1432_p7, %p387_p8 }
  0x2b   : > { %s394_s13 = sand.u32 (!%p388_p9), 1, %s1773_s15   ;;  %s1434_s14 = sshll.u32 (!%p388_p9), %s1781_s17, 5 }
  0x2c   : > { %391 = sbr.rel (%p388_p9) target bundleno = 398 (0x18e), region = 70  ;;  %s1433_s24 = sshll.u32 (!%p388_p9), %s394_s13, 8 }
  0x2d   : > { %p444_p10 = scmp.lt.s32.totalorder (!%p388_p9), %s1434_s14, 95  ;;  %s1436_s25 = sshll.u32 (!%p388_p9), %s1785_s18, 5 }
  0x2e   : > { %p456_p11 = scmp.lt.s32.totalorder (!%p388_p9), %s1436_s25, 63  ;;  %s1973_s18 = scalar_lea.vmem (!%p388_p9), [#allocation2], %s1433_s24 }
  0x2f   : > { %p1440_p12 = scmp.ne.s32.totalorder (!%p388_p9), %s1781_s17, 0 }
  0x31   : > { %s2293_s14 = smov (!%p444_p10, %s1434_s14), 95  ;;  %s2295_s25 = smov (!%p456_p11, %s1436_s25), 63 }
  0x32   : > { %s1435_s26 = sshll.u32 %s2293_s14, 2  ;;  %s1437_s5 = sshll.u32 %s2295_s25, 3 }
  0x33   : > { %s1961_s30 = scalar_lea.vmem %s2276_s1, %s1435_s26  ;;  %s1966_s8 = scalar_lea.vmem %s2278_s3, %s1437_s5 }
  0x34   : > { %s1971_s10 = scalar_lea.vmem %s2279_s4, %s1437_s5  ;;  %477 = sbr.rel (%p1440_p12) target bundleno = 74 (0x4a), region = 78 }
  0x39   : > { %v1799_v32 = vmov 0.0  }
  0x3a   : > { %478 = vst [vmem:[%s1971_s10] sm:$0xff] %v1799_v32  ;;  %479 = vst [vmem:[%s1971_s10 + $0x8] sm:$0xff] %v1799_v32 }
  0x3b   : > { %480 = vst [vmem:[%s1971_s10 + $0x10] sm:$0xff] %v1799_v32  ;;  %481 = vst [vmem:[%s1971_s10 + $0x18] sm:$0xff] %v1799_v32 }
  0x3c   : > { %482 = vst [vmem:[%s1971_s10 + $0x20] sm:$0xff] %v1799_v32  ;;  %483 = vst [vmem:[%s1971_s10 + $0x28] sm:$0xff] %v1799_v32 }
  0x3d   : > { %484 = vst [vmem:[%s1971_s10 + $0x30] sm:$0xff] %v1799_v32  ;;  %485 = vst [vmem:[%s1971_s10 + $0x38] sm:$0xff] %v1799_v32 }
  0x3e   : > { %486 = vst [vmem:[%s1971_s10 + $0x40] sm:$0xff] %v1799_v32  ;;  %487 = vst [vmem:[%s1971_s10 + $0x48] sm:$0xff] %v1799_v32 }
  0x3f   : > { %488 = vst [vmem:[%s1971_s10 + $0x50] sm:$0xff] %v1799_v32  ;;  %489 = vst [vmem:[%s1971_s10 + $0x58] sm:$0xff] %v1799_v32 }
  0x40   : > { %490 = vst [vmem:[%s1971_s10 + $0x60] sm:$0xff] %v1799_v32  ;;  %491 = vst [vmem:[%s1971_s10 + $0x68] sm:$0xff] %v1799_v32 }
  0x41   : > { %492 = vst [vmem:[%s1971_s10 + $0x70] sm:$0xff] %v1799_v32  ;;  %493 = vst [vmem:[%s1971_s10 + $0x78] sm:$0xff] %v1799_v32 }
  0x42   : > { %494 = vst [vmem:[%s1971_s10 + $0x80] sm:$0xff] %v1799_v32  ;;  %495 = vst [vmem:[%s1971_s10 + $0x88] sm:$0xff] %v1799_v32 }
  0x43   : > { %496 = vst [vmem:[%s1971_s10 + $0x90] sm:$0xff] %v1799_v32  ;;  %497 = vst [vmem:[%s1971_s10 + $0x98] sm:$0xff] %v1799_v32 }
  0x44   : > { %498 = vst [vmem:[%s1971_s10 + $0xa0] sm:$0xff] %v1799_v32  ;;  %499 = vst [vmem:[%s1971_s10 + $0xa8] sm:$0xff] %v1799_v32 }
  0x45   : > { %500 = vst [vmem:[%s1971_s10 + $0xb0] sm:$0xff] %v1799_v32  ;;  %501 = vst [vmem:[%s1971_s10 + $0xb8] sm:$0xff] %v1799_v32 }
  0x46   : > { %502 = vst [vmem:[%s1971_s10 + $0xc0] sm:$0xff] %v1799_v32  ;;  %503 = vst [vmem:[%s1971_s10 + $0xc8] sm:$0xff] %v1799_v32 }
  0x47   : > { %504 = vst [vmem:[%s1971_s10 + $0xd0] sm:$0xff] %v1799_v32  ;;  %505 = vst [vmem:[%s1971_s10 + $0xd8] sm:$0xff] %v1799_v32 }
  0x48   : > { %506 = vst [vmem:[%s1971_s10 + $0xe0] sm:$0xff] %v1799_v32  ;;  %507 = vst [vmem:[%s1971_s10 + $0xe8] sm:$0xff] %v1799_v32 }
  0x49   : > { %508 = vst [vmem:[%s1971_s10 + $0xf0] sm:$0xff] %v1799_v32  ;;  %509 = vst [vmem:[%s1971_s10 + $0xf8] sm:$0xff] %v1799_v32 }
  0x4a PF: > { %v1679_v33 = vld [vmem:[%s1961_s30 + $0x78] sm:$0xff]   ;;  %v1681_v35 = vld [vmem:[%s1961_s30 + $0x70] sm:$0xff]   ;;  %v1683_v37 = vld [vmem:[%s1961_s30 + $0x68] sm:$0xff]   ;;  %p1489_p13 = scmp.ne.s32.totalorder %s1781_s17, 2 }
  0x4b   : > { %v1680_v34 = vld [vmem:[%s1961_s30 + $0x38] sm:$0xff]   ;;  %1493 = vmatprep.subr.bf16.mxu0 %v1679_v33  ;;  %1605 = vmatprep.subr.bf16.mxu1 %v1679_v33  ;;  %v1682_v36 = vld [vmem:[%s1961_s30 + $0x30] sm:$0xff]   ;;  %v1684_v38 = vld [vmem:[%s1961_s30 + $0x28] sm:$0xff]  }
  0x4c   : > { %1494 = vmatpush3.bf16.msra.mxu0 %v1680_v34  ;;  %1613 = vmatpush3.bf16.msra.mxu1 %v1680_v34  ;;  %v1685_v39 = vld [vmem:[%s1961_s30 + $0x60] sm:$0xff]   ;;  %v1687_v41 = vld [vmem:[%s1961_s30 + $0x58] sm:$0xff]   ;;  %v1689_v43 = vld [vmem:[%s1961_s30 + $0x50] sm:$0xff]  }
  0x4d   : > { %1495 = vmatprep.subr.bf16.mxu0 %v1681_v35  ;;  %1606 = vmatprep.subr.bf16.mxu1 %v1681_v35  ;;  %v1686_v40 = vld [vmem:[%s1961_s30 + $0x20] sm:$0xff]   ;;  %v1688_v42 = vld [vmem:[%s1961_s30 + $0x18] sm:$0xff]   ;;  %v1690_v46 = vld [vmem:[%s1961_s30 + $0x10] sm:$0xff]  }
  0x4e   : > { %v1697_v44 = vld [vmem:[%s1973_s18 + $0x4] ss:$8 sps:$4 sm:$0xff]   ;;  %v1695_v51 = vld [vmem:[%s1973_s18] ss:$8 sps:$4 sm:$0xff]   ;;  %v1701_v53 = vld [vmem:[%s1973_s18 + $0x14] ss:$8 sps:$4 sm:$0xff]  }
  0x4f   : > { %v1700_v45 = vld [vmem:[%s1973_s18 + $0x84] ss:$8 sps:$4 sm:$0xff]   ;;  %894 = vmatprep.mubr.bf16.mxu0 %v1697_v44  ;;  %v1698_v52 = vld [vmem:[%s1973_s18 + $0x80] ss:$8 sps:$4 sm:$0xff]   ;;  %v1703_v54 = vld [vmem:[%s1973_s18 + $0x94] ss:$8 sps:$4 sm:$0xff]  }
  0x50   : > { %1496 = vmatpush3.bf16.msra.mxu0 %v1682_v36  ;;  %1614 = vmatpush3.bf16.msra.mxu1 %v1682_v36  ;;  %v1691_v47 = vld [vmem:[%s1961_s30 + $0x48] sm:$0xff]   ;;  %v1693_v49 = vld [vmem:[%s1961_s30 + $0x40] sm:$0xff]   ;;  %v1705_v55 = vld [vmem:[%s1973_s18 + $0x10] ss:$8 sps:$4 sm:$0xff]  }
  0x51   : > { %1497 = vmatprep.subr.bf16.mxu0 %v1683_v37  ;;  %1607 = vmatprep.subr.bf16.mxu1 %v1683_v37  ;;  %v1692_v48 = vld [vmem:[%s1961_s30 + $0x8] sm:$0xff]   ;;  %v1694_v50 = vld [vmem:[%s1961_s30] sm:$0xff]   ;;  %v1706_v56 = vld [vmem:[%s1973_s18 + $0x90] ss:$8 sps:$4 sm:$0xff]  }
  0x52   : > { %958 = vmatprep.mubr.bf16.mxu1 %v1700_v45  ;;  %v1707_v57 = vld [vmem:[%s1973_s18 + $0x24] ss:$8 sps:$4 sm:$0xff]   ;;  %v1711_v59 = vld [vmem:[%s1973_s18 + $0x20] ss:$8 sps:$4 sm:$0xff]   ;;  %v1713_v61 = vld [vmem:[%s1973_s18 + $0x34] ss:$8 sps:$4 sm:$0xff]  }
  0x53   : > { %v1709_v58 = vld [vmem:[%s1973_s18 + $0xa4] ss:$8 sps:$4 sm:$0xff]   ;;  %v1712_v60 = vld [vmem:[%s1973_s18 + $0xa0] ss:$8 sps:$4 sm:$0xff]   ;;  %v1715_v62 = vld [vmem:[%s1973_s18 + $0xb4] ss:$8 sps:$4 sm:$0xff]  }
  0x54   : > { %1498 = vmatpush3.bf16.msra.mxu0 %v1684_v38  ;;  %1615 = vmatpush3.bf16.msra.mxu1 %v1684_v38  ;;  %v1717_v63 = vld [vmem:[%s1973_s18 + $0x30] ss:$8 sps:$4 sm:$0xff]   ;;  %v1719_v1 = vld [vmem:[%s1973_s18 + $0x44] ss:$8 sps:$4 sm:$0xff]   ;;  %v1723_v3 = vld [vmem:[%s1973_s18 + $0x40] ss:$8 sps:$4 sm:$0xff]  }
  0x55   : > { %1499 = vmatprep.subr.bf16.mxu0 %v1685_v39  ;;  %1608 = vmatprep.subr.bf16.mxu1 %v1685_v39  ;;  %v1718_v0 = vld [vmem:[%s1973_s18 + $0xb0] ss:$8 sps:$4 sm:$0xff]   ;;  %v1721_v2 = vld [vmem:[%s1973_s18 + $0xc4] ss:$8 sps:$4 sm:$0xff]   ;;  %v1724_v4 = vld [vmem:[%s1973_s18 + $0xc0] ss:$8 sps:$4 sm:$0xff]  }
  0x56   : > { %v1725_v5 = vld [vmem:[%s1973_s18 + $0x54] ss:$8 sps:$4 sm:$0xff]   ;;  %v1729_v7 = vld [vmem:[%s1973_s18 + $0x50] ss:$8 sps:$4 sm:$0xff]   ;;  %v1731_v9 = vld [vmem:[%s1973_s18 + $0x64] ss:$8 sps:$4 sm:$0xff]  }
  0x57   : > { %v1727_v6 = vld [vmem:[%s1973_s18 + $0xd4] ss:$8 sps:$4 sm:$0xff]   ;;  %v1730_v8 = vld [vmem:[%s1973_s18 + $0xd0] ss:$8 sps:$4 sm:$0xff]   ;;  %v1733_v10 = vld [vmem:[%s1973_s18 + $0xe4] ss:$8 sps:$4 sm:$0xff]  }
  0x58   : > { %1500 = vmatpush3.bf16.msra.mxu0 %v1686_v40  ;;  %1616 = vmatpush3.bf16.msra.mxu1 %v1686_v40  ;;  %v1735_v11 = vld [vmem:[%s1973_s18 + $0x60] ss:$8 sps:$4 sm:$0xff]   ;;  %v1737_v13 = vld [vmem:[%s1973_s18 + $0x74] ss:$8 sps:$4 sm:$0xff]   ;;  %v1741_v15 = vld [vmem:[%s1973_s18 + $0x70] ss:$8 sps:$4 sm:$0xff]  }
  0x59   : > { %1501 = vmatprep.subr.bf16.mxu0 %v1687_v41  ;;  %1609 = vmatprep.subr.bf16.mxu1 %v1687_v41  ;;  %v1736_v12 = vld [vmem:[%s1973_s18 + $0xe0] ss:$8 sps:$4 sm:$0xff]   ;;  %v1739_v14 = vld [vmem:[%s1973_s18 + $0xf4] ss:$8 sps:$4 sm:$0xff]   ;;  %v1742_v16 = vld [vmem:[%s1973_s18 + $0xf0] ss:$8 sps:$4 sm:$0xff]  }
  0x5a   : > { %v510_v19 = vld [vmem:[%s1971_s10] sm:$0xff]  ;;  %v511_v29 = vld [vmem:[%s1971_s10 + $0x8] sm:$0xff]  ;;  %v512_v39 = vld [vmem:[%s1971_s10 + $0x10] sm:$0xff] }
  0x5b   : > { %v526_v21 = vld [vmem:[%s1971_s10 + $0x80] sm:$0xff]  ;;  %v527_v31 = vld [vmem:[%s1971_s10 + $0x88] sm:$0xff]  ;;  %v528_v41 = vld [vmem:[%s1971_s10 + $0x90] sm:$0xff] }
  0x5c   : > { %1502 = vmatpush3.bf16.msra.mxu0 %v1688_v42  ;;  %1617 = vmatpush3.bf16.msra.mxu1 %v1688_v42 }
  0x5d   : > { %1503 = vmatprep.subr.bf16.mxu0 %v1689_v43  ;;  %1610 = vmatprep.subr.bf16.mxu1 %v1689_v43 }
  0x60   : > { %1504 = vmatpush3.bf16.msra.mxu0 %v1690_v46  ;;  %1618 = vmatpush3.bf16.msra.mxu1 %v1690_v46 }
  0x61   : > { %1505 = vmatprep.subr.bf16.mxu0 %v1691_v47  ;;  %1611 = vmatprep.subr.bf16.mxu1 %v1691_v47 }
  0x64   : > { %1506 = vmatpush3.bf16.msra.mxu0 %v1692_v48  ;;  %1619 = vmatpush3.bf16.msra.mxu1 %v1692_v48 }
  0x65   : > { %1507 = vmatprep.subr.bf16.mxu0 %v1693_v49  ;;  %1612 = vmatprep.subr.bf16.mxu1 %v1693_v49  ;;  %v513_v49 = vld [vmem:[%s1971_s10 + $0x18] sm:$0xff] }
  0x68   : > { %1508 = vmatpush3.bf16.msra.mxu0 %v1694_v50  ;;  %1620 = vmatpush3.bf16.msra.mxu1 %v1694_v50 }
  0x6b   : > { %895 = vmatmul.mubr.bf16.vlgmr.msra.gmra.mxu0 %v1695_v51  ;;  %959 = vmatmul.mubr.bf16.vlgmr.msra.gmra.mxu1 %v1698_v52  ;;  %v529_v51 = vld [vmem:[%s1971_s10 + $0x98] sm:$0xff] }
  0x6c   : > { %902 = vmatprep.mubr.bf16.mxu0 %v1701_v53  ;;  %966 = vmatprep.mubr.bf16.mxu1 %v1703_v54 }
  0x73   : > { %903 = vmatmul.mubr.bf16.gmra.mxu0 %v1705_v55  ;;  %967 = vmatmul.mubr.bf16.gmra.mxu1 %v1706_v56 }
  0x74   : > { %910 = vmatprep.mubr.bf16.mxu0 %v1707_v57  ;;  %974 = vmatprep.mubr.bf16.mxu1 %v1709_v58 }
  0x7b   : > { %911 = vmatmul.mubr.bf16.gmra.mxu0 %v1711_v59  ;;  %975 = vmatmul.mubr.bf16.gmra.mxu1 %v1712_v60  ;;  %v514_v59 = vld [vmem:[%s1971_s10 + $0x20] sm:$0xff] }
  0x7c   : > { %918 = vmatprep.mubr.bf16.mxu0 %v1713_v61  ;;  %982 = vmatprep.mubr.bf16.mxu1 %v1715_v62  ;;  %v530_v61 = vld [vmem:[%s1971_s10 + $0xa0] sm:$0xff] }
  0x83   : > { %919 = vmatmul.mubr.bf16.gmra.mxu0 %v1717_v63  ;;  %983 = vmatmul.mubr.bf16.gmra.mxu1 %v1718_v0 }
  0x84   : > { %926 = vmatprep.mubr.bf16.mxu0 %v1719_v1  ;;  %990 = vmatprep.mubr.bf16.mxu1 %v1721_v2 }
  0x8b   : > { %927 = vmatmul.mubr.bf16.gmra.mxu0 %v1723_v3  ;;  %991 = vmatmul.mubr.bf16.gmra.mxu1 %v1724_v4 }
  0x8c   : > { %934 = vmatprep.mubr.bf16.mxu0 %v1725_v5  ;;  %998 = vmatprep.mubr.bf16.mxu1 %v1727_v6  ;;  %v515_v5 = vld [vmem:[%s1971_s10 + $0x28] sm:$0xff] }
  0x93   : > { %935 = vmatmul.mubr.bf16.gmra.mxu0 %v1729_v7  ;;  %999 = vmatmul.mubr.bf16.gmra.mxu1 %v1730_v8  ;;  %v531_v7 = vld [vmem:[%s1971_s10 + $0xa8] sm:$0xff] }
  0x94   : > { %942 = vmatprep.mubr.bf16.mxu0 %v1731_v9  ;;  %1006 = vmatprep.mubr.bf16.mxu1 %v1733_v10 }
  0x9b   : > { %943 = vmatmul.mubr.bf16.gmra.mxu0 %v1735_v11  ;;  %1007 = vmatmul.mubr.bf16.gmra.mxu1 %v1736_v12 }
  0x9c   : > { %950 = vmatprep.mubr.bf16.mxu0 %v1737_v13  ;;  %1014 = vmatprep.mubr.bf16.mxu1 %v1739_v14 }
  0xa3   : > { %951 = vmatmul.mubr.bf16.gmra.mxu0 %v1741_v15  ;;  %1015 = vmatmul.mubr.bf16.gmra.mxu1 %v1742_v16  ;;  %v516_v15 = vld [vmem:[%s1971_s10 + $0x30] sm:$0xff] }
 0x12b   : > { %v1509_v17 = vpop.f32.mrf.mxu0  ;;  %v1557_v18 = vpop.f32.mrf.mxu1 }
 0x12d   : > { %v1510_v20 = vpop.f32.mrf.mxu0  ;;  %v1558_v22 = vpop.f32.mrf.mxu1 }
 0x12e   : > { %v1511_v23 = vadd.f32 %v1510_v20, %v1509_v17  ;;  %v1559_v24 = vadd.f32 %v1558_v22, %v1557_v18  ;;  %v532_v17 = vld [vmem:[%s1971_s10 + $0xb0] sm:$0xff] }
 0x12f   : > { %v1512_v25 = vpop.f32.mrf.mxu0  ;;  %v1560_v26 = vpop.f32.mrf.mxu1 }
 0x130   : > { %v1023_v27 = vadd.f32 %v1511_v23, %v510_v19  ;;  %v1039_v28 = vadd.f32 %v1559_v24, %v526_v21 }
 0x131   : > { %v1513_v30 = vpop.f32.mrf.mxu0  ;;  %v1561_v32 = vpop.f32.mrf.mxu1 }
 0x132   : > { %1055 = vst [vmem:[%s1971_s10] sm:$0xff] %v1023_v27  ;;  %1071 = vst [vmem:[%s1971_s10 + $0x80] sm:$0xff] %v1039_v28  ;;  %v1514_v33 = vadd.f32 %v1513_v30, %v1512_v25  ;;  %v1562_v34 = vadd.f32 %v1561_v32, %v1560_v26  ;;  %v517_v25 = vld [vmem:[%s1971_s10 + $0x38] sm:$0xff] }
 0x133   : > { %v1515_v35 = vpop.f32.mrf.mxu0  ;;  %v1563_v36 = vpop.f32.mrf.mxu1  ;;  %v533_v27 = vld [vmem:[%s1971_s10 + $0xb8] sm:$0xff] }
 0x134   : > { %v1024_v37 = vadd.f32 %v1514_v33, %v511_v29  ;;  %v1040_v38 = vadd.f32 %v1562_v34, %v527_v31 }
 0x135   : > { %v1516_v40 = vpop.f32.mrf.mxu0  ;;  %v1564_v42 = vpop.f32.mrf.mxu1 }
 0x136   : > { %1056 = vst [vmem:[%s1971_s10 + $0x8] sm:$0xff] %v1024_v37  ;;  %1072 = vst [vmem:[%s1971_s10 + $0x88] sm:$0xff] %v1040_v38  ;;  %v1517_v43 = vadd.f32 %v1516_v40, %v1515_v35  ;;  %v1565_v44 = vadd.f32 %v1564_v42, %v1563_v36  ;;  %v518_v35 = vld [vmem:[%s1971_s10 + $0x40] sm:$0xff] }
 0x137   : > { %v1518_v45 = vpop.f32.mrf.mxu0  ;;  %v1566_v46 = vpop.f32.mrf.mxu1  ;;  %v534_v37 = vld [vmem:[%s1971_s10 + $0xc0] sm:$0xff] }
 0x138   : > { %v1025_v47 = vadd.f32 %v1517_v43, %v512_v39  ;;  %v1041_v48 = vadd.f32 %v1565_v44, %v528_v41 }
 0x139   : > { %v1519_v50 = vpop.f32.mrf.mxu0  ;;  %v1567_v52 = vpop.f32.mrf.mxu1 }
 0x13a   : > { %1057 = vst [vmem:[%s1971_s10 + $0x10] sm:$0xff] %v1025_v47  ;;  %1073 = vst [vmem:[%s1971_s10 + $0x90] sm:$0xff] %v1041_v48  ;;  %v1520_v53 = vadd.f32 %v1519_v50, %v1518_v45  ;;  %v1568_v54 = vadd.f32 %v1567_v52, %v1566_v46  ;;  %v519_v45 = vld [vmem:[%s1971_s10 + $0x48] sm:$0xff] }
 0x13b   : > { %v1521_v55 = vpop.f32.mrf.mxu0  ;;  %v1569_v56 = vpop.f32.mrf.mxu1  ;;  %v535_v47 = vld [vmem:[%s1971_s10 + $0xc8] sm:$0xff] }
 0x13c   : > { %v1026_v57 = vadd.f32 %v1520_v53, %v513_v49  ;;  %v1042_v58 = vadd.f32 %v1568_v54, %v529_v51 }
 0x13d   : > { %v1522_v60 = vpop.f32.mrf.mxu0  ;;  %v1570_v62 = vpop.f32.mrf.mxu1 }
 0x13e   : > { %1058 = vst [vmem:[%s1971_s10 + $0x18] sm:$0xff] %v1026_v57  ;;  %1074 = vst [vmem:[%s1971_s10 + $0x98] sm:$0xff] %v1042_v58  ;;  %v1523_v63 = vadd.f32 %v1522_v60, %v1521_v55  ;;  %v1571_v0 = vadd.f32 %v1570_v62, %v1569_v56  ;;  %v520_v55 = vld [vmem:[%s1971_s10 + $0x50] sm:$0xff] }
 0x13f   : > { %v1524_v1 = vpop.f32.mrf.mxu0  ;;  %v1572_v2 = vpop.f32.mrf.mxu1  ;;  %v536_v57 = vld [vmem:[%s1971_s10 + $0xd0] sm:$0xff] }
 0x140   : > { %v1027_v3 = vadd.f32 %v1523_v63, %v514_v59  ;;  %v1043_v4 = vadd.f32 %v1571_v0, %v530_v61 }
 0x141   : > { %v1525_v6 = vpop.f32.mrf.mxu0  ;;  %v1573_v8 = vpop.f32.mrf.mxu1 }
 0x142   : > { %1059 = vst [vmem:[%s1971_s10 + $0x20] sm:$0xff] %v1027_v3  ;;  %1075 = vst [vmem:[%s1971_s10 + $0xa0] sm:$0xff] %v1043_v4  ;;  %v1526_v9 = vadd.f32 %v1525_v6, %v1524_v1  ;;  %v1574_v10 = vadd.f32 %v1573_v8, %v1572_v2  ;;  %v521_v1 = vld [vmem:[%s1971_s10 + $0x58] sm:$0xff] }
 0x143   : > { %v1527_v11 = vpop.f32.mrf.mxu0  ;;  %v1575_v12 = vpop.f32.mrf.mxu1  ;;  %v537_v3 = vld [vmem:[%s1971_s10 + $0xd8] sm:$0xff] }
 0x144   : > { %v1028_v13 = vadd.f32 %v1526_v9, %v515_v5  ;;  %v1044_v14 = vadd.f32 %v1574_v10, %v531_v7 }
 0x145   : > { %v1528_v16 = vpop.f32.mrf.mxu0  ;;  %v1576_v18 = vpop.f32.mrf.mxu1 }
 0x146   : > { %1060 = vst [vmem:[%s1971_s10 + $0x28] sm:$0xff] %v1028_v13  ;;  %1076 = vst [vmem:[%s1971_s10 + $0xa8] sm:$0xff] %v1044_v14  ;;  %v1529_v19 = vadd.f32 %v1528_v16, %v1527_v11  ;;  %v1577_v20 = vadd.f32 %v1576_v18, %v1575_v12  ;;  %v522_v11 = vld [vmem:[%s1971_s10 + $0x60] sm:$0xff] }
 0x147   : > { %v1530_v21 = vpop.f32.mrf.mxu0  ;;  %v1578_v22 = vpop.f32.mrf.mxu1  ;;  %v538_v13 = vld [vmem:[%s1971_s10 + $0xe0] sm:$0xff] }
 0x148   : > { %v1029_v23 = vadd.f32 %v1529_v19, %v516_v15  ;;  %v1045_v24 = vadd.f32 %v1577_v20, %v532_v17 }
 0x149   : > { %v1531_v26 = vpop.f32.mrf.mxu0  ;;  %v1579_v28 = vpop.f32.mrf.mxu1 }
 0x14a   : > { %1061 = vst [vmem:[%s1971_s10 + $0x30] sm:$0xff] %v1029_v23  ;;  %1077 = vst [vmem:[%s1971_s10 + $0xb0] sm:$0xff] %v1045_v24  ;;  %v1532_v29 = vadd.f32 %v1531_v26, %v1530_v21  ;;  %v1580_v30 = vadd.f32 %v1579_v28, %v1578_v22  ;;  %v523_v21 = vld [vmem:[%s1971_s10 + $0x68] sm:$0xff] }
 0x14b   : > { %v1533_v31 = vpop.f32.mrf.mxu0  ;;  %v1581_v32 = vpop.f32.mrf.mxu1  ;;  %v539_v23 = vld [vmem:[%s1971_s10 + $0xe8] sm:$0xff] }
 0x14c   : > { %v1030_v33 = vadd.f32 %v1532_v29, %v517_v25  ;;  %v1046_v34 = vadd.f32 %v1580_v30, %v533_v27 }
 0x14d   : > { %v1534_v36 = vpop.f32.mrf.mxu0  ;;  %v1582_v38 = vpop.f32.mrf.mxu1 }
 0x14e   : > { %1062 = vst [vmem:[%s1971_s10 + $0x38] sm:$0xff] %v1030_v33  ;;  %1078 = vst [vmem:[%s1971_s10 + $0xb8] sm:$0xff] %v1046_v34  ;;  %v1535_v39 = vadd.f32 %v1534_v36, %v1533_v31  ;;  %v1583_v40 = vadd.f32 %v1582_v38, %v1581_v32  ;;  %v524_v31 = vld [vmem:[%s1971_s10 + $0x70] sm:$0xff] }
 0x14f   : > { %v1536_v41 = vpop.f32.mrf.mxu0  ;;  %v1584_v42 = vpop.f32.mrf.mxu1  ;;  %v540_v33 = vld [vmem:[%s1971_s10 + $0xf0] sm:$0xff] }
 0x150   : > { %v1031_v43 = vadd.f32 %v1535_v39, %v518_v35  ;;  %v1047_v44 = vadd.f32 %v1583_v40, %v534_v37 }
 0x151   : > { %v1537_v46 = vpop.f32.mrf.mxu0  ;;  %v1585_v48 = vpop.f32.mrf.mxu1 }
 0x152   : > { %1063 = vst [vmem:[%s1971_s10 + $0x40] sm:$0xff] %v1031_v43  ;;  %1079 = vst [vmem:[%s1971_s10 + $0xc0] sm:$0xff] %v1047_v44  ;;  %v1538_v49 = vadd.f32 %v1537_v46, %v1536_v41  ;;  %v1586_v50 = vadd.f32 %v1585_v48, %v1584_v42  ;;  %v525_v41 = vld [vmem:[%s1971_s10 + $0x78] sm:$0xff] }
 0x153   : > { %v1539_v51 = vpop.f32.mrf.mxu0  ;;  %v1587_v52 = vpop.f32.mrf.mxu1  ;;  %v541_v43 = vld [vmem:[%s1971_s10 + $0xf8] sm:$0xff] }
 0x154   : > { %v1032_v53 = vadd.f32 %v1538_v49, %v519_v45  ;;  %v1048_v54 = vadd.f32 %v1586_v50, %v535_v47 }
 0x155   : > { %v1540_v56 = vpop.f32.mrf.mxu0  ;;  %v1588_v58 = vpop.f32.mrf.mxu1 }
 0x156   : > { %1064 = vst [vmem:[%s1971_s10 + $0x48] sm:$0xff] %v1032_v53  ;;  %1080 = vst [vmem:[%s1971_s10 + $0xc8] sm:$0xff] %v1048_v54  ;;  %v1541_v59 = vadd.f32 %v1540_v56, %v1539_v51  ;;  %v1589_v60 = vadd.f32 %v1588_v58, %v1587_v52 }
 0x157   : > { %v1542_v61 = vpop.f32.mrf.mxu0  ;;  %v1590_v62 = vpop.f32.mrf.mxu1 }
 0x158   : > { %v1033_v63 = vadd.f32 %v1541_v59, %v520_v55  ;;  %v1049_v0 = vadd.f32 %v1589_v60, %v536_v57 }
 0x159   : > { %v1543_v2 = vpop.f32.mrf.mxu0  ;;  %v1591_v4 = vpop.f32.mrf.mxu1 }
 0x15a   : > { %1065 = vst [vmem:[%s1971_s10 + $0x50] sm:$0xff] %v1033_v63  ;;  %1081 = vst [vmem:[%s1971_s10 + $0xd0] sm:$0xff] %v1049_v0  ;;  %v1544_v5 = vadd.f32 %v1543_v2, %v1542_v61  ;;  %v1592_v6 = vadd.f32 %v1591_v4, %v1590_v62 }
 0x15b   : > { %v1545_v7 = vpop.f32.mrf.mxu0  ;;  %v1593_v8 = vpop.f32.mrf.mxu1 }
 0x15c   : > { %v1034_v9 = vadd.f32 %v1544_v5, %v521_v1  ;;  %v1050_v10 = vadd.f32 %v1592_v6, %v537_v3 }
 0x15d   : > { %v1546_v12 = vpop.f32.mrf.mxu0  ;;  %v1594_v14 = vpop.f32.mrf.mxu1 }
 0x15e   : > { %1066 = vst [vmem:[%s1971_s10 + $0x58] sm:$0xff] %v1034_v9  ;;  %1082 = vst [vmem:[%s1971_s10 + $0xd8] sm:$0xff] %v1050_v10  ;;  %v1547_v15 = vadd.f32 %v1546_v12, %v1545_v7  ;;  %v1595_v16 = vadd.f32 %v1594_v14, %v1593_v8 }
 0x15f   : > { %v1548_v17 = vpop.f32.mrf.mxu0  ;;  %v1596_v18 = vpop.f32.mrf.mxu1 }
 0x160   : > { %v1035_v19 = vadd.f32 %v1547_v15, %v522_v11  ;;  %v1051_v20 = vadd.f32 %v1595_v16, %v538_v13 }
 0x161   : > { %v1549_v22 = vpop.f32.mrf.mxu0  ;;  %v1597_v24 = vpop.f32.mrf.mxu1 }
 0x162   : > { %1067 = vst [vmem:[%s1971_s10 + $0x60] sm:$0xff] %v1035_v19  ;;  %1083 = vst [vmem:[%s1971_s10 + $0xe0] sm:$0xff] %v1051_v20  ;;  %v1550_v25 = vadd.f32 %v1549_v22, %v1548_v17  ;;  %v1598_v26 = vadd.f32 %v1597_v24, %v1596_v18 }
 0x163   : > { %v1551_v27 = vpop.f32.mrf.mxu0  ;;  %v1599_v28 = vpop.f32.mrf.mxu1 }
 0x164   : > { %v1036_v29 = vadd.f32 %v1550_v25, %v523_v21  ;;  %v1052_v30 = vadd.f32 %v1598_v26, %v539_v23 }
 0x165   : > { %v1552_v32 = vpop.f32.mrf.mxu0  ;;  %v1600_v34 = vpop.f32.mrf.mxu1 }
 0x166   : > { %1068 = vst [vmem:[%s1971_s10 + $0x68] sm:$0xff] %v1036_v29  ;;  %1084 = vst [vmem:[%s1971_s10 + $0xe8] sm:$0xff] %v1052_v30  ;;  %v1553_v35 = vadd.f32 %v1552_v32, %v1551_v27  ;;  %v1601_v36 = vadd.f32 %v1600_v34, %v1599_v28 }
 0x167   : > { %v1554_v37 = vpop.f32.mrf.mxu0  ;;  %v1602_v38 = vpop.f32.mrf.mxu1 }
 0x168   : > { %v1037_v39 = vadd.f32 %v1553_v35, %v524_v31  ;;  %v1053_v40 = vadd.f32 %v1601_v36, %v540_v33 }
 0x169   : > { %v1555_v42 = vpop.f32.mrf.mxu0  ;;  %v1603_v44 = vpop.f32.mrf.mxu1 }
 0x16a   : > { %1069 = vst [vmem:[%s1971_s10 + $0x70] sm:$0xff] %v1037_v39  ;;  %1085 = vst [vmem:[%s1971_s10 + $0xf0] sm:$0xff] %v1053_v40  ;;  %v1556_v45 = vadd.f32 %v1555_v42, %v1554_v37  ;;  %v1604_v46 = vadd.f32 %v1603_v44, %v1602_v38  ;;  %1090 = sbr.rel (%p1489_p13) target bundleno = 398 (0x18e), region = 82 }
 0x16c   : > { %v1038_v47 = vadd.f32 %v1556_v45, %v525_v41  ;;  %v1054_v48 = vadd.f32 %v1604_v46, %v541_v43 }
 0x16e   : > { %1070 = vst [vmem:[%s1971_s10 + $0x78] sm:$0xff] %v1038_v47  ;;  %1086 = vst [vmem:[%s1971_s10 + $0xf8] sm:$0xff] %v1054_v48 }
 0x16f   : > { %v1091_v49 = vld [vmem:[%s1971_s10] sm:$0xff]  ;;  %v1092_v53 = vld [vmem:[%s1971_s10 + $0x8] sm:$0xff]  ;;  %v1093_v55 = vld [vmem:[%s1971_s10 + $0x10] sm:$0xff] }
 0x170   : > { %v2125_v50 = vld [vmem:[%s2277_s2] ss:$0 sm:$0xff]  ;;  %v1163_v54 = vld [vmem:[%s1966_s8 + $0x8] sm:$0xff]  ;;  %v1164_v58 = vld [vmem:[%s1966_s8 + $0x10] sm:$0xff] }
 0x171   : > { %v1162_v51 = vld [vmem:[%s1966_s8] sm:$0xff]  ;;  %v1130_v52 = vadd.f32 %v2125_v50, %v1091_v49  ;;  %v1131_v56 = vadd.f32 %v2125_v50, %v1092_v53  ;;  %v1132_v57 = vadd.f32 %v2125_v50, %v1093_v55  ;;  %v1094_v59 = vld [vmem:[%s1971_s10 + $0x18] sm:$0xff]  ;;  %v1096_v1 = vld [vmem:[%s1971_s10 + $0x28] sm:$0xff] }
 0x172   : > { %v1165_v60 = vld [vmem:[%s1966_s8 + $0x18] sm:$0xff]  ;;  %v1133_v62 = vadd.f32 %v2125_v50, %v1094_v59  ;;  %v1095_v63 = vld [vmem:[%s1971_s10 + $0x20] sm:$0xff]  ;;  %v1135_v5 = vadd.f32 %v2125_v50, %v1096_v1  ;;  %v1167_v6 = vld [vmem:[%s1966_s8 + $0x28] sm:$0xff] }
 0x173   : > { %v1194_v61 = vadd.f32 %v1162_v51, %v1130_v52  ;;  %v1166_v0 = vld [vmem:[%s1966_s8 + $0x20] sm:$0xff]  ;;  %v1195_v2 = vadd.f32 %v1163_v54, %v1131_v56  ;;  %v1196_v3 = vadd.f32 %v1164_v58, %v1132_v57  ;;  %v1134_v4 = vadd.f32 %v2125_v50, %v1095_v63  ;;  %v1097_v7 = vld [vmem:[%s1971_s10 + $0x30] sm:$0xff]  ;;  %v1098_v12 = vld [vmem:[%s1971_s10 + $0x38] sm:$0xff] }
 0x174   : > { %v1168_v8 = vld [vmem:[%s1966_s8 + $0x30] sm:$0xff]  ;;  %v1197_v10 = vadd.f32 %v1165_v60, %v1133_v62  ;;  %v1136_v11 = vadd.f32 %v2125_v50, %v1097_v7  ;;  %v1169_v13 = vld [vmem:[%s1966_s8 + $0x38] sm:$0xff]  ;;  %v1099_v14 = vld [vmem:[%s1971_s10 + $0x40] sm:$0xff]  ;;  %v1199_v18 = vadd.f32 %v1167_v6, %v1135_v5  ;;  %v1137_v24 = vadd.f32 %v2125_v50, %v1098_v12 }
 0x175   : > { %v1226_v9 = vmax.f32 %v1194_v61, 0.0  ;;  %v1227_v15 = vmax.f32 %v1195_v2, 0.0  ;;  %v1228_v16 = vmax.f32 %v1196_v3, 0.0  ;;  %v1198_v17 = vadd.f32 %v1166_v0, %v1134_v4  ;;  %v1170_v19 = vld [vmem:[%s1966_s8 + $0x40] sm:$0xff]  ;;  %v1100_v20 = vld [vmem:[%s1971_s10 + $0x48] sm:$0xff]  ;;  %v1101_v26 = vld [vmem:[%s1971_s10 + $0x50] sm:$0xff] }
 0x176   : > { %v1171_v21 = vld [vmem:[%s1966_s8 + $0x48] sm:$0xff]  ;;  %v1229_v22 = vmax.f32 %v1197_v10, 0.0  ;;  %v1200_v23 = vadd.f32 %v1168_v8, %v1136_v11  ;;  %v1138_v25 = vadd.f32 %v2125_v50, %v1099_v14  ;;  %v1172_v27 = vld [vmem:[%s1966_s8 + $0x50] sm:$0xff]  ;;  %v1102_v28 = vld [vmem:[%s1971_s10 + $0x58] sm:$0xff]  ;;  %v1231_v30 = vmax.f32 %v1199_v18, 0.0 }
 0x177   : > { %1258 = vst [vmem:[%s1971_s10] sm:$0xff] %v1226_v9  ;;  %1259 = vst [vmem:[%s1971_s10 + $0x8] sm:$0xff] %v1227_v15  ;;  %v1230_v29 = vmax.f32 %v1198_v17, 0.0  ;;  %v1139_v31 = vadd.f32 %v2125_v50, %v1100_v20  ;;  %v1140_v32 = vadd.f32 %v2125_v50, %v1101_v26  ;;  %v1173_v33 = vld [vmem:[%s1966_s8 + $0x58] sm:$0xff]  ;;  %v1103_v34 = vld [vmem:[%s1971_s10 + $0x60] sm:$0xff]  ;;  %v1201_v37 = vadd.f32 %v1169_v13, %v1137_v24 }
 0x178   : > { %1260 = vst [vmem:[%s1971_s10 + $0x10] sm:$0xff] %v1228_v16  ;;  %v1174_v35 = vld [vmem:[%s1966_s8 + $0x60] sm:$0xff]  ;;  %1261 = vst [vmem:[%s1971_s10 + $0x18] sm:$0xff] %v1229_v22  ;;  %v1232_v36 = vmax.f32 %v1200_v23, 0.0  ;;  %v1202_v38 = vadd.f32 %v1170_v19, %v1138_v25  ;;  %v1141_v39 = vadd.f32 %v2125_v50, %v1102_v28  ;;  %v1104_v40 = vld [vmem:[%s1971_s10 + $0x68] sm:$0xff]  ;;  %v1142_v45 = vadd.f32 %v2125_v50, %v1103_v34 }
 0x179   : > { %v1175_v41 = vld [vmem:[%s1966_s8 + $0x68] sm:$0xff]  ;;  %v1105_v42 = vld [vmem:[%s1971_s10 + $0x70] sm:$0xff]  ;;  %1262 = vst [vmem:[%s1971_s10 + $0x20] sm:$0xff] %v1230_v29  ;;  %1263 = vst [vmem:[%s1971_s10 + $0x28] sm:$0xff] %v1231_v30  ;;  %v1203_v43 = vadd.f32 %v1171_v21, %v1139_v31  ;;  %v1204_v44 = vadd.f32 %v1172_v27, %v1140_v32  ;;  %v1143_v46 = vadd.f32 %v2125_v50, %v1104_v40  ;;  %v1233_v49 = vmax.f32 %v1201_v37, 0.0 }
 0x17a   : > { %v1176_v47 = vld [vmem:[%s1966_s8 + $0x70] sm:$0xff]  ;;  %v1106_v48 = vld [vmem:[%s1971_s10 + $0x78] sm:$0xff]  ;;  %1264 = vst [vmem:[%s1971_s10 + $0x30] sm:$0xff] %v1232_v36  ;;  %v1234_v51 = vmax.f32 %v1202_v38, 0.0  ;;  %v1205_v52 = vadd.f32 %v1173_v33, %v1141_v39  ;;  %v1144_v53 = vadd.f32 %v2125_v50, %v1105_v42  ;;  %v1107_v55 = vld [vmem:[%s1971_s10 + $0x80] sm:$0xff]  ;;  %v1206_v59 = vadd.f32 %v1174_v35, %v1142_v45 }
 0x17b   : > { %v1177_v54 = vld [vmem:[%s1966_s8 + $0x78] sm:$0xff]  ;;  %v1108_v56 = vld [vmem:[%s1971_s10 + $0x88] sm:$0xff]  ;;  %v1235_v57 = vmax.f32 %v1203_v43, 0.0  ;;  %v1236_v58 = vmax.f32 %v1204_v44, 0.0  ;;  %v1207_v60 = vadd.f32 %v1175_v41, %v1143_v46  ;;  %v1178_v61 = vld [vmem:[%s1966_s8 + $0x80] sm:$0xff]  ;;  %1265 = vst [vmem:[%s1971_s10 + $0x38] sm:$0xff] %v1233_v49  ;;  %v1145_v2 = vadd.f32 %v2125_v50, %v1106_v48 }
 0x17c   : > { %v1179_v62 = vld [vmem:[%s1966_s8 + $0x88] sm:$0xff]  ;;  %v1109_v63 = vld [vmem:[%s1971_s10 + $0x90] sm:$0xff]  ;;  %1266 = vst [vmem:[%s1971_s10 + $0x40] sm:$0xff] %v1234_v51  ;;  %v1237_v0 = vmax.f32 %v1205_v52, 0.0  ;;  %v1208_v1 = vadd.f32 %v1176_v47, %v1144_v53  ;;  %v1146_v3 = vadd.f32 %v2125_v50, %v1107_v55  ;;  %v1110_v5 = vld [vmem:[%s1971_s10 + $0x98] sm:$0xff]  ;;  %v1238_v7 = vmax.f32 %v1206_v59, 0.0 }
 0x17d   : > { %v1180_v4 = vld [vmem:[%s1966_s8 + $0x90] sm:$0xff]  ;;  %v1111_v6 = vld [vmem:[%s1971_s10 + $0xa0] sm:$0xff]  ;;  %1267 = vst [vmem:[%s1971_s10 + $0x48] sm:$0xff] %v1235_v57  ;;  %1268 = vst [vmem:[%s1971_s10 + $0x50] sm:$0xff] %v1236_v58  ;;  %v1239_v8 = vmax.f32 %v1207_v60, 0.0  ;;  %v1147_v9 = vadd.f32 %v2125_v50, %v1108_v56  ;;  %v1148_v10 = vadd.f32 %v2125_v50, %v1109_v63  ;;  %v1209_v14 = vadd.f32 %v1177_v54, %v1145_v2 }
 0x17e   : > { %v1181_v11 = vld [vmem:[%s1966_s8 + $0x98] sm:$0xff]  ;;  %v1112_v12 = vld [vmem:[%s1971_s10 + $0xa8] sm:$0xff]  ;;  %1269 = vst [vmem:[%s1971_s10 + $0x58] sm:$0xff] %v1237_v0  ;;  %v1240_v13 = vmax.f32 %v1208_v1, 0.0  ;;  %v1210_v15 = vadd.f32 %v1178_v61, %v1146_v3  ;;  %v1149_v16 = vadd.f32 %v2125_v50, %v1110_v5  ;;  %v1182_v17 = vld [vmem:[%s1966_s8 + $0xa0] sm:$0xff]  ;;  %v1150_v22 = vadd.f32 %v2125_v50, %v1111_v6 }
 0x17f   : > { %v1183_v18 = vld [vmem:[%s1966_s8 + $0xa8] sm:$0xff]  ;;  %v1113_v19 = vld [vmem:[%s1971_s10 + $0xb0] sm:$0xff]  ;;  %1270 = vst [vmem:[%s1971_s10 + $0x60] sm:$0xff] %v1238_v7  ;;  %1271 = vst [vmem:[%s1971_s10 + $0x68] sm:$0xff] %v1239_v8  ;;  %v1211_v20 = vadd.f32 %v1179_v62, %v1147_v9  ;;  %v1212_v21 = vadd.f32 %v1180_v4, %v1148_v10  ;;  %v1151_v23 = vadd.f32 %v2125_v50, %v1112_v12  ;;  %v1241_v27 = vmax.f32 %v1209_v14, 0.0 }
 0x180   : > { %v1184_v24 = vld [vmem:[%s1966_s8 + $0xb0] sm:$0xff]  ;;  %v1114_v25 = vld [vmem:[%s1971_s10 + $0xb8] sm:$0xff]  ;;  %v1115_v26 = vld [vmem:[%s1971_s10 + $0xc0] sm:$0xff]  ;;  %1272 = vst [vmem:[%s1971_s10 + $0x70] sm:$0xff] %v1240_v13  ;;  %v1242_v28 = vmax.f32 %v1210_v15, 0.0  ;;  %v1213_v29 = vadd.f32 %v1181_v11, %v1149_v16  ;;  %v1152_v30 = vadd.f32 %v2125_v50, %v1113_v19  ;;  %v1214_v36 = vadd.f32 %v1182_v17, %v1150_v22 }
 0x181   : > { %v1185_v31 = vld [vmem:[%s1966_s8 + $0xb8] sm:$0xff]  ;;  %v1116_v32 = vld [vmem:[%s1971_s10 + $0xc8] sm:$0xff]  ;;  %v1117_v33 = vld [vmem:[%s1971_s10 + $0xd0] sm:$0xff]  ;;  %v1243_v34 = vmax.f32 %v1211_v20, 0.0  ;;  %v1244_v35 = vmax.f32 %v1212_v21, 0.0  ;;  %v1215_v37 = vadd.f32 %v1183_v18, %v1151_v23  ;;  %1273 = vst [vmem:[%s1971_s10 + $0x78] sm:$0xff] %v1241_v27  ;;  %v1153_v43 = vadd.f32 %v2125_v50, %v1114_v25 }
 0x182   : > { %v1186_v38 = vld [vmem:[%s1966_s8 + $0xc0] sm:$0xff]  ;;  %v1187_v39 = vld [vmem:[%s1966_s8 + $0xc8] sm:$0xff]  ;;  %v1118_v40 = vld [vmem:[%s1971_s10 + $0xd8] sm:$0xff]  ;;  %1274 = vst [vmem:[%s1971_s10 + $0x80] sm:$0xff] %v1242_v28  ;;  %v1245_v41 = vmax.f32 %v1213_v29, 0.0  ;;  %v1216_v42 = vadd.f32 %v1184_v24, %v1152_v30  ;;  %v1154_v44 = vadd.f32 %v2125_v50, %v1115_v26  ;;  %v1246_v48 = vmax.f32 %v1214_v36, 0.0 }
 0x183   : > { %v1188_v45 = vld [vmem:[%s1966_s8 + $0xd0] sm:$0xff]  ;;  %v1119_v46 = vld [vmem:[%s1971_s10 + $0xe0] sm:$0xff]  ;;  %v1120_v47 = vld [vmem:[%s1971_s10 + $0xe8] sm:$0xff]  ;;  %1275 = vst [vmem:[%s1971_s10 + $0x88] sm:$0xff] %v1243_v34  ;;  %v1247_v49 = vmax.f32 %v1215_v37, 0.0  ;;  %v1155_v51 = vadd.f32 %v2125_v50, %v1116_v32  ;;  %v1156_v52 = vadd.f32 %v2125_v50, %v1117_v33  ;;  %v1217_v56 = vadd.f32 %v1185_v31, %v1153_v43 }
 0x184   : > { %1276 = vst [vmem:[%s1971_s10 + $0x90] sm:$0xff] %v1244_v35  ;;  %v1189_v53 = vld [vmem:[%s1966_s8 + $0xd8] sm:$0xff]  ;;  %v1121_v54 = vld [vmem:[%s1971_s10 + $0xf0] sm:$0xff]  ;;  %1277 = vst [vmem:[%s1971_s10 + $0x98] sm:$0xff] %v1245_v41  ;;  %v1248_v55 = vmax.f32 %v1216_v42, 0.0  ;;  %v1218_v57 = vadd.f32 %v1186_v38, %v1154_v44  ;;  %v1157_v58 = vadd.f32 %v2125_v50, %v1118_v40  ;;  %v1158_v63 = vadd.f32 %v2125_v50, %v1119_v46 }
 0x185   : > { %v1190_v59 = vld [vmem:[%s1966_s8 + $0xe0] sm:$0xff]  ;;  %v1191_v60 = vld [vmem:[%s1966_s8 + $0xe8] sm:$0xff]  ;;  %1278 = vst [vmem:[%s1971_s10 + $0xa0] sm:$0xff] %v1246_v48  ;;  %1279 = vst [vmem:[%s1971_s10 + $0xa8] sm:$0xff] %v1247_v49  ;;  %v1219_v61 = vadd.f32 %v1187_v39, %v1155_v51  ;;  %v1220_v62 = vadd.f32 %v1188_v45, %v1156_v52  ;;  %v1159_v0 = vadd.f32 %v2125_v50, %v1120_v47  ;;  %v1249_v3 = vmax.f32 %v1217_v56, 0.0 }
 0x186   : > { %v1192_v1 = vld [vmem:[%s1966_s8 + $0xf0] sm:$0xff]  ;;  %v1122_v2 = vld [vmem:[%s1971_s10 + $0xf8] sm:$0xff]  ;;  %1280 = vst [vmem:[%s1971_s10 + $0xb0] sm:$0xff] %v1248_v55  ;;  %v1250_v4 = vmax.f32 %v1218_v57, 0.0  ;;  %v1221_v5 = vadd.f32 %v1189_v53, %v1157_v58  ;;  %v1160_v6 = vadd.f32 %v2125_v50, %v1121_v54  ;;  %v1222_v9 = vadd.f32 %v1190_v59, %v1158_v63 }
 0x187   : > { %v1251_v7 = vmax.f32 %v1219_v61, 0.0  ;;  %v1252_v8 = vmax.f32 %v1220_v62, 0.0  ;;  %v1223_v10 = vadd.f32 %v1191_v60, %v1159_v0  ;;  %v1193_v11 = vld [vmem:[%s1966_s8 + $0xf8] sm:$0xff]  ;;  %1281 = vst [vmem:[%s1971_s10 + $0xb8] sm:$0xff] %v1249_v3  ;;  %v1161_v14 = vadd.f32 %v2125_v50, %v1122_v2 }
 0x188   : > { %1282 = vst [vmem:[%s1971_s10 + $0xc0] sm:$0xff] %v1250_v4  ;;  %v1253_v12 = vmax.f32 %v1221_v5, 0.0  ;;  %v1224_v13 = vadd.f32 %v1192_v1, %v1160_v6  ;;  %v1254_v15 = vmax.f32 %v1222_v9, 0.0 }
 0x189   : > { %1283 = vst [vmem:[%s1971_s10 + $0xc8] sm:$0xff] %v1251_v7  ;;  %1284 = vst [vmem:[%s1971_s10 + $0xd0] sm:$0xff] %v1252_v8  ;;  %v1255_v16 = vmax.f32 %v1223_v10, 0.0  ;;  %v1225_v18 = vadd.f32 %v1193_v11, %v1161_v14 }
 0x18a   : > { %1285 = vst [vmem:[%s1971_s10 + $0xd8] sm:$0xff] %v1253_v12  ;;  %v1256_v17 = vmax.f32 %v1224_v13, 0.0  ;;  %1286 = vst [vmem:[%s1971_s10 + $0xe0] sm:$0xff] %v1254_v15 }
 0x18b   : > { %1287 = vst [vmem:[%s1971_s10 + $0xe8] sm:$0xff] %v1255_v16  ;;  %v1257_v19 = vmax.f32 %v1225_v18, 0.0 }
 0x18c   : > { %1288 = vst [vmem:[%s1971_s10 + $0xf0] sm:$0xff] %v1256_v17 }
 0x18d   : > { %1289 = vst [vmem:[%s1971_s10 + $0xf8] sm:$0xff] %v1257_v19 }
 0x18e PF: > { %s14_s21 = sadd.s32 1, %s1797_s21   ;;  %s2280_s15 = smov %s1777_s16 }
 0x18f   : > { %p11_p0 = scmp.ge.s32.totalorder %s14_s21, 8   ;;  %s2281_s16 = smov %s1876_s28 }
 0x190   : > { %s2282_s17 = smov %s1789_s19  ;;  %s2283_s18 = smov %s1793_s20 }
 0x191   : > { %s2284_s19 = smov %s2287_s22  ;;  %s2285_s20 = smov %s2291_s23 }
 0x192   :  { %13 = sbr.rel (!%p11_p0) target bundleno = 4 (0x4), region = 126 }

// kernel: _lambda_.18
= control target key start
LH: loop header
LB: loop body
LE: loop exit
PB: predicated region body
PF: predicated region fallthrough
CT: control target
= control target key end

     0   :  { %s587_s1 = inlined_call_operand.vmem [shape: bf16[128,128], index: 1, kind: input, shape index: {}]   ;;  %s588_s0 = inlined_call_operand.vmem [shape: bf16[128,128], index: 0, kind: input, shape index: {}]   ;;  %s589_s2 = inlined_call_operand.vmem [shape: f32[1,128], index: 2, kind: input, shape index: {}]   ;;  %s590_s3 = inlined_call_operand.vmem [shape: f32[128,128], index: 3, kind: output, shape index: {}]  }
   0x1   :  { %v452_v0 = vld [vmem:[%s587_s1 + $0x38] sm:$0xff]   ;;  %v453_v1 = vld [vmem:[%s587_s1 + $0x30] sm:$0xff]   ;;  %v454_v2 = vld [vmem:[%s587_s1 + $0x28] sm:$0xff]  }
   0x2   :  { %403 = vmatprep.subr.bf16.mxu0 %v452_v0  ;;  %435 = vmatprep.subr.bf16.mxu1 %v452_v0  ;;  %v455_v3 = vld [vmem:[%s587_s1 + $0x20] sm:$0xff]   ;;  %v456_v6 = vld [vmem:[%s587_s1 + $0x18] sm:$0xff]   ;;  %v457_v7 = vld [vmem:[%s587_s1 + $0x10] sm:$0xff]  }
   0x3   :  { %404 = vmatpush3.bf16.msra.mxu0 %v452_v0  ;;  %443 = vmatpush3.bf16.msra.mxu1 %v452_v0  ;;  %v460_v4 = vld [vmem:[%s588_s0] sm:$0xff]   ;;  %v458_v8 = vld [vmem:[%s587_s1 + $0x8] sm:$0xff]   ;;  %v464_v12 = vld [vmem:[%s588_s0 + $0x10] sm:$0xff]  }
   0x4   :  { %405 = vmatprep.subr.bf16.mxu0 %v453_v1  ;;  %436 = vmatprep.subr.bf16.mxu1 %v453_v1  ;;  %v461_v5 = vld [vmem:[%s588_s0 + $0x20] sm:$0xff]   ;;  %v462_v10 = vld [vmem:[%s588_s0 + $0x8] sm:$0xff]   ;;  %v465_v13 = vld [vmem:[%s588_s0 + $0x30] sm:$0xff]  }
   0x5   :  { %419 = vmatprep.mubr.bf16.mxu0 %v460_v4  ;;  %427 = vmatprep.mubr.bf16.mxu1 %v461_v5  ;;  %v459_v9 = vld [vmem:[%s587_s1] sm:$0xff]   ;;  %v463_v11 = vld [vmem:[%s588_s0 + $0x28] sm:$0xff]   ;;  %v466_v14 = vld [vmem:[%s588_s0 + $0x18] sm:$0xff]  }
   0x6   :  { %v467_v15 = vld [vmem:[%s588_s0 + $0x38] sm:$0xff]   ;;  %v386_v17 = vld [vmem:[%s589_s2] ss:$0 sm:$0xff] }
   0x7   :  { %406 = vmatpush3.bf16.msra.mxu0 %v453_v1  ;;  %444 = vmatpush3.bf16.msra.mxu1 %v453_v1 }
   0x8   :  { %407 = vmatprep.subr.bf16.mxu0 %v454_v2  ;;  %437 = vmatprep.subr.bf16.mxu1 %v454_v2 }
   0xb   :  { %408 = vmatpush3.bf16.msra.mxu0 %v454_v2  ;;  %445 = vmatpush3.bf16.msra.mxu1 %v454_v2 }
   0xc   :  { %409 = vmatprep.subr.bf16.mxu0 %v455_v3  ;;  %438 = vmatprep.subr.bf16.mxu1 %v455_v3 }
   0xf   :  { %410 = vmatpush3.bf16.msra.mxu0 %v455_v3  ;;  %446 = vmatpush3.bf16.msra.mxu1 %v455_v3 }
  0x10   :  { %411 = vmatprep.subr.bf16.mxu0 %v456_v6  ;;  %439 = vmatprep.subr.bf16.mxu1 %v456_v6 }
  0x13   :  { %412 = vmatpush3.bf16.msra.mxu0 %v456_v6  ;;  %447 = vmatpush3.bf16.msra.mxu1 %v456_v6 }
  0x14   :  { %413 = vmatprep.subr.bf16.mxu0 %v457_v7  ;;  %440 = vmatprep.subr.bf16.mxu1 %v457_v7 }
  0x17   :  { %414 = vmatpush3.bf16.msra.mxu0 %v457_v7  ;;  %448 = vmatpush3.bf16.msra.mxu1 %v457_v7 }
  0x18   :  { %415 = vmatprep.subr.bf16.mxu0 %v458_v8  ;;  %441 = vmatprep.subr.bf16.mxu1 %v458_v8 }
  0x1b   :  { %416 = vmatpush3.bf16.msra.mxu0 %v458_v8  ;;  %449 = vmatpush3.bf16.msra.mxu1 %v458_v8 }
  0x1c   :  { %417 = vmatprep.subr.bf16.mxu0 %v459_v9  ;;  %442 = vmatprep.subr.bf16.mxu1 %v459_v9 }
  0x1f   :  { %418 = vmatpush3.bf16.msra.mxu0 %v459_v9  ;;  %450 = vmatpush3.bf16.msra.mxu1 %v459_v9 }
  0x22   :  { %420 = vmatmul.mubr.bf16.vlgmr.msra.gmra.mxu0 %v462_v10  ;;  %428 = vmatmul.mubr.bf16.vlgmr.msra.gmra.mxu1 %v463_v11 }
  0x23   :  { %423 = vmatprep.mubr.bf16.mxu0 %v464_v12  ;;  %431 = vmatprep.mubr.bf16.mxu1 %v465_v13 }
  0x2a   :  { %424 = vmatmul.mubr.bf16.gmra.mxu0 %v466_v14  ;;  %432 = vmatmul.mubr.bf16.gmra.mxu1 %v467_v15 }
  0xe2   :  { %v421_v16 = vpop.f32.mrf.mxu0  ;;  %v429_v18 = vpop.f32.mrf.mxu1 }
  0xe3   :  { %v336_v21 = vadd.f32 %v421_v16, %v386_v17  ;;  %v344_v22 = vadd.f32 %v429_v18, %v386_v17 }
  0xe4   :  { %v213_v19 = vpop.f32.mrf.mxu0  ;;  %v245_v20 = vpop.f32.mrf.mxu1 }
  0xe5   :  { %352 = vst [vmem:[%s590_s3 + $0x10] sm:$0xff] %v336_v21  ;;  %360 = vst [vmem:[%s590_s3 + $0x50] sm:$0xff] %v344_v22  ;;  %v334_v25 = vadd.f32 %v386_v17, %v213_v19  ;;  %v342_v26 = vadd.f32 %v386_v17, %v245_v20 }
  0xe6   :  { %v422_v23 = vpop.f32.mrf.mxu0  ;;  %v430_v24 = vpop.f32.mrf.mxu1 }
  0xe7   :  { %350 = vst [vmem:[%s590_s3] sm:$0xff] %v334_v25  ;;  %358 = vst [vmem:[%s590_s3 + $0x40] sm:$0xff] %v342_v26  ;;  %v337_v29 = vadd.f32 %v422_v23, %v386_v17  ;;  %v345_v30 = vadd.f32 %v430_v24, %v386_v17 }
  0xe8   :  { %v216_v27 = vpop.f32.mrf.mxu0  ;;  %v248_v28 = vpop.f32.mrf.mxu1 }
  0xe9   :  { %353 = vst [vmem:[%s590_s3 + $0x18] sm:$0xff] %v337_v29  ;;  %361 = vst [vmem:[%s590_s3 + $0x58] sm:$0xff] %v345_v30  ;;  %v335_v33 = vadd.f32 %v386_v17, %v216_v27  ;;  %v343_v34 = vadd.f32 %v386_v17, %v248_v28 }
  0xea   :  { %v425_v31 = vpop.f32.mrf.mxu0  ;;  %v433_v32 = vpop.f32.mrf.mxu1 }
  0xeb   :  { %351 = vst [vmem:[%s590_s3 + $0x8] sm:$0xff] %v335_v33  ;;  %359 = vst [vmem:[%s590_s3 + $0x48] sm:$0xff] %v343_v34  ;;  %v340_v37 = vadd.f32 %v425_v31, %v386_v17  ;;  %v348_v38 = vadd.f32 %v433_v32, %v386_v17 }
  0xec   :  { %v229_v35 = vpop.f32.mrf.mxu0  ;;  %v261_v36 = vpop.f32.mrf.mxu1 }
  0xed   :  { %356 = vst [vmem:[%s590_s3 + $0x30] sm:$0xff] %v340_v37  ;;  %364 = vst [vmem:[%s590_s3 + $0x70] sm:$0xff] %v348_v38  ;;  %v338_v41 = vadd.f32 %v386_v17, %v229_v35  ;;  %v346_v42 = vadd.f32 %v386_v17, %v261_v36 }
  0xee   :  { %v426_v39 = vpop.f32.mrf.mxu0  ;;  %v434_v40 = vpop.f32.mrf.mxu1 }
  0xef   :  { %354 = vst [vmem:[%s590_s3 + $0x20] sm:$0xff] %v338_v41  ;;  %362 = vst [vmem:[%s590_s3 + $0x60] sm:$0xff] %v346_v42  ;;  %v341_v45 = vadd.f32 %v426_v39, %v386_v17  ;;  %v349_v46 = vadd.f32 %v434_v40, %v386_v17 }
  0xf0   :  { %v232_v43 = vpop.f32.mrf.mxu0  ;;  %v264_v44 = vpop.f32.mrf.mxu1 }
  0xf1   :  { %357 = vst [vmem:[%s590_s3 + $0x38] sm:$0xff] %v341_v45  ;;  %365 = vst [vmem:[%s590_s3 + $0x78] sm:$0xff] %v349_v46  ;;  %v339_v47 = vadd.f32 %v386_v17, %v232_v43  ;;  %v347_v48 = vadd.f32 %v386_v17, %v264_v44 }
  0xf3   :  { %355 = vst [vmem:[%s590_s3 + $0x28] sm:$0xff] %v339_v47  ;;  %363 = vst [vmem:[%s590_s3 + $0x68] sm:$0xff] %v347_v48 }

// kernel: _lambda_.17
= control target key start
LH: loop header
LB: loop body
LE: loop exit
PB: predicated region body
PF: predicated region fallthrough
CT: control target
= control target key end

     0   :  { %s1198_s12 = smov 0   ;;  %s1200_s13 = smov 0   ;;  %s1562_s0 = inlined_call_operand.vmem [shape: bf16[128,768], index: 0, kind: input, shape index: {}]   ;;  %s1563_s1 = inlined_call_operand.vmem [shape: bf16[768,128], index: 1, kind: input, shape index: {}]   ;;  %s1564_s2 = inlined_call_operand.vmem [shape: f32[1,128], index: 2, kind: input, shape index: {}]   ;;  %s1565_s3 = inlined_call_operand.vmem [shape: f32[128,128], index: 3, kind: output, shape index: {}]  }
   0x1   :  { %s1202_s14 = smov 0   ;;  %s1204_s15 = smov 0  }
   0x2   :  { %s1206_s16 = smov 0  }
   0x3 LB: > { %s25_s17 = sadd.s32 1, %s1171_s15  ;;  %p48_p1 = scmp.ne.s32.totalorder %s1163_s13, %s1159_s12  ;;  %s1175_s16 = sphi %s1206_s16, %s13_s16   ;;  %s1171_s15 = sphi %s1204_s15, %s1569_s15   ;;  %s1167_s14 = sphi %s1202_s14, %s1568_s14   ;;  %s1163_s13 = sphi %s1200_s13, %s1567_s13   ;;  %s1159_s12 = sphi %s1198_s12, %s1566_s12  }
   0x4   : > { %p26_p0 = scmp.ge.s32.totalorder %s25_s17, 3  ;;  %p49_p2 = scmp.eq.s32.totalorder %s1175_s16, 0 }
   0x5   : > { %s41_s19 = sadd.s32 1, %s1163_s13  ;;  %p928_p5 = scmp.ge.s32.totalorder %s1175_s16, 3 }
   0x6   : > { %s1571_s17 = smov (%p26_p0, %s25_s17), 0  ;;  %p50_p3 = por %p49_p2, %p48_p1 }
   0x7   : > { %s37_s18 = ssub.s32 %s1171_s15, %s1571_s17  ;;  %162 = sbr.rel (%p928_p5) target bundleno = 24 (0x18), region = 20 }
   0x8   : > { %p39_p4 = scmp.eq.s32.totalorder %s37_s18, 0 }
   0xa   : > { %s1233_s20 = scalar_select %p39_p4, %s1163_s13, %s41_s19  }
   0xc   : > { %165 = sbr.rel (!%p50_p3) target bundleno = 24 (0x18), region = 24  ;;  %s167_s21 = sand.u32 (%p50_p3), 1, %s1163_s13  }
   0xd   : > { %s975_s22 = sshll.u32 (%p50_p3), %s1171_s15, 3  ;;  %s929_s23 = sshll.u32 (%p50_p3), %s167_s21, 7 }
   0xe   : > { %s1241_s26 = scalar_lea.vmem (%p50_p3), %s1562_s0, %s975_s22  ;;  %s169_s27 = scalar_lea.vmem (%p50_p3), [#allocation2], %s929_s23 }
   0xf   : > { %v234_v0 = vld [vmem:[%s1241_s26] sm:$0xff] (%p50_p3)  ;;  %v236_v1 = vld [vmem:[%s1241_s26 + $0x18] sm:$0xff] (%p50_p3)  ;;  %v238_v2 = vld [vmem:[%s1241_s26 + $0x30] sm:$0xff] (%p50_p3) }
  0x10   : > { %235 = vst [vmem:[%s169_s27] sm:$0xff] (%p50_p3), %v234_v0  ;;  %237 = vst [vmem:[%s169_s27 + $0x8] sm:$0xff] (%p50_p3), %v236_v1  ;;  %v240_v3 = vld [vmem:[%s1241_s26 + $0x48] sm:$0xff] (%p50_p3)  ;;  %v242_v4 = vld [vmem:[%s1241_s26 + $0x60] sm:$0xff] (%p50_p3) }
  0x11   : > { %239 = vst [vmem:[%s169_s27 + $0x10] sm:$0xff] %v238_v2  ;;  %v244_v5 = vld [vmem:[%s1241_s26 + $0x78] sm:$0xff]  ;;  %241 = vst [vmem:[%s169_s27 + $0x18] sm:$0xff] %v240_v3  ;;  %v246_v6 = vld [vmem:[%s1241_s26 + $0x90] sm:$0xff] }
  0x12   : > { %243 = vst [vmem:[%s169_s27 + $0x20] sm:$0xff] %v242_v4  ;;  %245 = vst [vmem:[%s169_s27 + $0x28] sm:$0xff] %v244_v5  ;;  %v248_v7 = vld [vmem:[%s1241_s26 + $0xa8] sm:$0xff]  ;;  %v250_v8 = vld [vmem:[%s1241_s26 + $0xc0] sm:$0xff] }
  0x13   : > { %247 = vst [vmem:[%s169_s27 + $0x30] sm:$0xff] %v246_v6  ;;  %249 = vst [vmem:[%s169_s27 + $0x38] sm:$0xff] %v248_v7  ;;  %v252_v9 = vld [vmem:[%s1241_s26 + $0xd8] sm:$0xff]  ;;  %v254_v10 = vld [vmem:[%s1241_s26 + $0xf0] sm:$0xff] }
  0x14   : > { %251 = vst [vmem:[%s169_s27 + $0x40] sm:$0xff] %v250_v8  ;;  %v256_v11 = vld [vmem:[%s1241_s26 + $0x108] sm:$0xff]  ;;  %253 = vst [vmem:[%s169_s27 + $0x48] sm:$0xff] %v252_v9  ;;  %v258_v12 = vld [vmem:[%s1241_s26 + $0x120] sm:$0xff] }
  0x15   : > { %255 = vst [vmem:[%s169_s27 + $0x50] sm:$0xff] %v254_v10  ;;  %257 = vst [vmem:[%s169_s27 + $0x58] sm:$0xff] %v256_v11  ;;  %v260_v13 = vld [vmem:[%s1241_s26 + $0x138] sm:$0xff]  ;;  %v262_v14 = vld [vmem:[%s1241_s26 + $0x150] sm:$0xff] }
  0x16   : > { %259 = vst [vmem:[%s169_s27 + $0x60] sm:$0xff] %v258_v12  ;;  %261 = vst [vmem:[%s169_s27 + $0x68] sm:$0xff] %v260_v13  ;;  %v264_v15 = vld [vmem:[%s1241_s26 + $0x168] sm:$0xff] }
  0x17   : > { %263 = vst [vmem:[%s169_s27 + $0x70] sm:$0xff] %v262_v14  ;;  %265 = vst [vmem:[%s169_s27 + $0x78] sm:$0xff] %v264_v15 }
  0x18 PF: > { %p932_p6 = scmp.ge.s32.totalorder %s1175_s16, 1  ;;  %p282_p7 = scmp.lt.s32.totalorder %s1175_s16, 4 }
  0x1a   : > { %p283_p8 = pnand %p932_p6, %p282_p7 }
  0x1b   : > { %s289_s28 = sand.u32 (!%p283_p8), 1, %s1159_s12   ;;  %s934_s29 = sshll.u32 (!%p283_p8), %s1167_s14, 5 }
  0x1c   : > { %286 = sbr.rel (%p283_p8) target bundleno = 322 (0x142), region = 66  ;;  %s933_s30 = sshll.u32 (!%p283_p8), %s289_s28, 7 }
  0x1d   : > { %p329_p9 = scmp.lt.s32.totalorder (!%p283_p8), %s934_s29, 95  ;;  %s1268_s8 = scalar_lea.vmem (!%p283_p8), [#allocation2], %s933_s30 }
  0x1e   : > { %p936_p10 = scmp.ne.s32.totalorder (!%p283_p8), %s1167_s14, 0 }
  0x21   : > { %s1573_s29 = smov (!%p329_p9, %s934_s29), 95  ;;  %353 = sbr.rel (%p936_p10) target bundleno = 47 (0x2f), region = 74 }
  0x22   : > { %s935_s4 = sshll.u32 %s1573_s29, 2 }
  0x23   : > { %s1266_s7 = scalar_lea.vmem %s1563_s1, %s935_s4 }
  0x26   : > { %v1177_v16 = vmov 0.0  }
  0x27   : > { %354 = vst [vmem:[%s1565_s3] sm:$0xff] %v1177_v16  ;;  %355 = vst [vmem:[%s1565_s3 + $0x8] sm:$0xff] %v1177_v16 }
  0x28   : > { %356 = vst [vmem:[%s1565_s3 + $0x10] sm:$0xff] %v1177_v16  ;;  %357 = vst [vmem:[%s1565_s3 + $0x18] sm:$0xff] %v1177_v16 }
  0x29   : > { %358 = vst [vmem:[%s1565_s3 + $0x20] sm:$0xff] %v1177_v16  ;;  %359 = vst [vmem:[%s1565_s3 + $0x28] sm:$0xff] %v1177_v16 }
  0x2a   : > { %360 = vst [vmem:[%s1565_s3 + $0x30] sm:$0xff] %v1177_v16  ;;  %361 = vst [vmem:[%s1565_s3 + $0x38] sm:$0xff] %v1177_v16 }
  0x2b   : > { %362 = vst [vmem:[%s1565_s3 + $0x40] sm:$0xff] %v1177_v16  ;;  %363 = vst [vmem:[%s1565_s3 + $0x48] sm:$0xff] %v1177_v16 }
  0x2c   : > { %364 = vst [vmem:[%s1565_s3 + $0x50] sm:$0xff] %v1177_v16  ;;  %365 = vst [vmem:[%s1565_s3 + $0x58] sm:$0xff] %v1177_v16 }
  0x2d   : > { %366 = vst [vmem:[%s1565_s3 + $0x60] sm:$0xff] %v1177_v16  ;;  %367 = vst [vmem:[%s1565_s3 + $0x68] sm:$0xff] %v1177_v16 }
  0x2e   : > { %368 = vst [vmem:[%s1565_s3 + $0x70] sm:$0xff] %v1177_v16  ;;  %369 = vst [vmem:[%s1565_s3 + $0x78] sm:$0xff] %v1177_v16 }
  0x2f PF: > { %v1097_v17 = vld [vmem:[%s1266_s7 + $0x78] sm:$0xff]   ;;  %v1099_v19 = vld [vmem:[%s1266_s7 + $0x70] sm:$0xff]   ;;  %v1101_v21 = vld [vmem:[%s1266_s7 + $0x68] sm:$0xff]   ;;  %p969_p11 = scmp.ne.s32.totalorder %s1167_s14, 2 }
  0x30   : > { %v1098_v18 = vld [vmem:[%s1266_s7 + $0x38] sm:$0xff]   ;;  %976 = vmatprep.subr.bf16.mxu0 %v1097_v17  ;;  %1040 = vmatprep.subr.bf16.mxu1 %v1097_v17  ;;  %v1100_v20 = vld [vmem:[%s1266_s7 + $0x30] sm:$0xff]   ;;  %v1102_v22 = vld [vmem:[%s1266_s7 + $0x28] sm:$0xff]  }
  0x31   : > { %977 = vmatpush3.bf16.msra.mxu0 %v1098_v18  ;;  %1048 = vmatpush3.bf16.msra.mxu1 %v1098_v18  ;;  %v1103_v23 = vld [vmem:[%s1266_s7 + $0x60] sm:$0xff]   ;;  %v1105_v25 = vld [vmem:[%s1266_s7 + $0x58] sm:$0xff]   ;;  %v1107_v27 = vld [vmem:[%s1266_s7 + $0x50] sm:$0xff]  }
  0x32   : > { %978 = vmatprep.subr.bf16.mxu0 %v1099_v19  ;;  %1041 = vmatprep.subr.bf16.mxu1 %v1099_v19  ;;  %v1104_v24 = vld [vmem:[%s1266_s7 + $0x20] sm:$0xff]   ;;  %v1106_v26 = vld [vmem:[%s1266_s7 + $0x18] sm:$0xff]   ;;  %v1108_v30 = vld [vmem:[%s1266_s7 + $0x10] sm:$0xff]  }
  0x33   : > { %v1115_v28 = vld [vmem:[%s1268_s8 + $0x4] ss:$8 sps:$4 sm:$0xff]   ;;  %v1113_v35 = vld [vmem:[%s1268_s8] ss:$8 sps:$4 sm:$0xff]   ;;  %v1119_v37 = vld [vmem:[%s1268_s8 + $0x14] ss:$8 sps:$4 sm:$0xff]  }
  0x34   : > { %v1118_v29 = vld [vmem:[%s1268_s8 + $0x44] ss:$8 sps:$4 sm:$0xff]   ;;  %642 = vmatprep.mubr.bf16.mxu0 %v1115_v28  ;;  %v1116_v36 = vld [vmem:[%s1268_s8 + $0x40] ss:$8 sps:$4 sm:$0xff]   ;;  %v1121_v38 = vld [vmem:[%s1268_s8 + $0x54] ss:$8 sps:$4 sm:$0xff]  }
  0x35   : > { %979 = vmatpush3.bf16.msra.mxu0 %v1100_v20  ;;  %1049 = vmatpush3.bf16.msra.mxu1 %v1100_v20  ;;  %v1109_v31 = vld [vmem:[%s1266_s7 + $0x48] sm:$0xff]   ;;  %v1111_v33 = vld [vmem:[%s1266_s7 + $0x40] sm:$0xff]   ;;  %v1123_v39 = vld [vmem:[%s1268_s8 + $0x10] ss:$8 sps:$4 sm:$0xff]  }
  0x36   : > { %980 = vmatprep.subr.bf16.mxu0 %v1101_v21  ;;  %1042 = vmatprep.subr.bf16.mxu1 %v1101_v21  ;;  %v1110_v32 = vld [vmem:[%s1266_s7 + $0x8] sm:$0xff]   ;;  %v1112_v34 = vld [vmem:[%s1266_s7] sm:$0xff]   ;;  %v1124_v40 = vld [vmem:[%s1268_s8 + $0x50] ss:$8 sps:$4 sm:$0xff]  }
  0x37   : > { %674 = vmatprep.mubr.bf16.mxu1 %v1118_v29  ;;  %v1125_v41 = vld [vmem:[%s1268_s8 + $0x24] ss:$8 sps:$4 sm:$0xff]   ;;  %v1129_v43 = vld [vmem:[%s1268_s8 + $0x20] ss:$8 sps:$4 sm:$0xff]   ;;  %v1131_v45 = vld [vmem:[%s1268_s8 + $0x34] ss:$8 sps:$4 sm:$0xff]  }
  0x38   : > { %v1127_v42 = vld [vmem:[%s1268_s8 + $0x64] ss:$8 sps:$4 sm:$0xff]   ;;  %v1130_v44 = vld [vmem:[%s1268_s8 + $0x60] ss:$8 sps:$4 sm:$0xff]   ;;  %v1133_v46 = vld [vmem:[%s1268_s8 + $0x74] ss:$8 sps:$4 sm:$0xff]  }
  0x39   : > { %981 = vmatpush3.bf16.msra.mxu0 %v1102_v22  ;;  %1050 = vmatpush3.bf16.msra.mxu1 %v1102_v22  ;;  %v1135_v47 = vld [vmem:[%s1268_s8 + $0x30] ss:$8 sps:$4 sm:$0xff]   ;;  %v370_v51 = vld [vmem:[%s1565_s3] sm:$0xff]  ;;  %v371_v61 = vld [vmem:[%s1565_s3 + $0x8] sm:$0xff] }
  0x3a   : > { %982 = vmatprep.subr.bf16.mxu0 %v1103_v23  ;;  %1043 = vmatprep.subr.bf16.mxu1 %v1103_v23  ;;  %v1136_v48 = vld [vmem:[%s1268_s8 + $0x70] ss:$8 sps:$4 sm:$0xff]   ;;  %v378_v53 = vld [vmem:[%s1565_s3 + $0x40] sm:$0xff]  ;;  %v379_v63 = vld [vmem:[%s1565_s3 + $0x48] sm:$0xff] }
  0x3b   : > { %v372_v7 = vld [vmem:[%s1565_s3 + $0x10] sm:$0xff]  ;;  %v373_v17 = vld [vmem:[%s1565_s3 + $0x18] sm:$0xff]  ;;  %v382_v29 = vld [vmem:[%s1565_s3 + $0x60] sm:$0xff] }
  0x3c   : > { %v380_v9 = vld [vmem:[%s1565_s3 + $0x50] sm:$0xff]  ;;  %v381_v19 = vld [vmem:[%s1565_s3 + $0x58] sm:$0xff] }
  0x3d   : > { %983 = vmatpush3.bf16.msra.mxu0 %v1104_v24  ;;  %1051 = vmatpush3.bf16.msra.mxu1 %v1104_v24 }
  0x3e   : > { %984 = vmatprep.subr.bf16.mxu0 %v1105_v25  ;;  %1044 = vmatprep.subr.bf16.mxu1 %v1105_v25 }
  0x41   : > { %985 = vmatpush3.bf16.msra.mxu0 %v1106_v26  ;;  %1052 = vmatpush3.bf16.msra.mxu1 %v1106_v26 }
  0x42   : > { %986 = vmatprep.subr.bf16.mxu0 %v1107_v27  ;;  %1045 = vmatprep.subr.bf16.mxu1 %v1107_v27  ;;  %v374_v27 = vld [vmem:[%s1565_s3 + $0x20] sm:$0xff] }
  0x45   : > { %987 = vmatpush3.bf16.msra.mxu0 %v1108_v30  ;;  %1053 = vmatpush3.bf16.msra.mxu1 %v1108_v30 }
  0x46   : > { %988 = vmatprep.subr.bf16.mxu0 %v1109_v31  ;;  %1046 = vmatprep.subr.bf16.mxu1 %v1109_v31 }
  0x49   : > { %989 = vmatpush3.bf16.msra.mxu0 %v1110_v32  ;;  %1054 = vmatpush3.bf16.msra.mxu1 %v1110_v32 }
  0x4a   : > { %990 = vmatprep.subr.bf16.mxu0 %v1111_v33  ;;  %1047 = vmatprep.subr.bf16.mxu1 %v1111_v33 }
  0x4d   : > { %991 = vmatpush3.bf16.msra.mxu0 %v1112_v34  ;;  %1055 = vmatpush3.bf16.msra.mxu1 %v1112_v34 }
  0x50   : > { %643 = vmatmul.mubr.bf16.vlgmr.msra.gmra.mxu0 %v1113_v35  ;;  %675 = vmatmul.mubr.bf16.vlgmr.msra.gmra.mxu1 %v1116_v36 }
  0x51   : > { %650 = vmatprep.mubr.bf16.mxu0 %v1119_v37  ;;  %682 = vmatprep.mubr.bf16.mxu1 %v1121_v38  ;;  %v375_v37 = vld [vmem:[%s1565_s3 + $0x28] sm:$0xff] }
  0x58   : > { %651 = vmatmul.mubr.bf16.gmra.mxu0 %v1123_v39  ;;  %683 = vmatmul.mubr.bf16.gmra.mxu1 %v1124_v40  ;;  %v383_v39 = vld [vmem:[%s1565_s3 + $0x68] sm:$0xff] }
  0x59   : > { %658 = vmatprep.mubr.bf16.mxu0 %v1125_v41  ;;  %690 = vmatprep.mubr.bf16.mxu1 %v1127_v42 }
  0x60   : > { %659 = vmatmul.mubr.bf16.gmra.mxu0 %v1129_v43  ;;  %691 = vmatmul.mubr.bf16.gmra.mxu1 %v1130_v44 }
  0x61   : > { %666 = vmatprep.mubr.bf16.mxu0 %v1131_v45  ;;  %698 = vmatprep.mubr.bf16.mxu1 %v1133_v46 }
  0x68   : > { %667 = vmatmul.mubr.bf16.gmra.mxu0 %v1135_v47  ;;  %699 = vmatmul.mubr.bf16.gmra.mxu1 %v1136_v48  ;;  %v376_v47 = vld [vmem:[%s1565_s3 + $0x30] sm:$0xff] }
 0x110   : > { %v992_v49 = vpop.f32.mrf.mxu0  ;;  %v1016_v50 = vpop.f32.mrf.mxu1 }
 0x112   : > { %v993_v52 = vpop.f32.mrf.mxu0  ;;  %v1017_v54 = vpop.f32.mrf.mxu1 }
 0x113   : > { %v994_v55 = vadd.f32 %v993_v52, %v992_v49  ;;  %v1018_v56 = vadd.f32 %v1017_v54, %v1016_v50  ;;  %v384_v49 = vld [vmem:[%s1565_s3 + $0x70] sm:$0xff] }
 0x114   : > { %v995_v57 = vpop.f32.mrf.mxu0  ;;  %v1019_v58 = vpop.f32.mrf.mxu1 }
 0x115   : > { %v707_v59 = vadd.f32 %v994_v55, %v370_v51  ;;  %v715_v60 = vadd.f32 %v1018_v56, %v378_v53 }
 0x116   : > { %v996_v62 = vpop.f32.mrf.mxu0  ;;  %v1020_v0 = vpop.f32.mrf.mxu1 }
 0x117   : > { %723 = vst [vmem:[%s1565_s3] sm:$0xff] %v707_v59  ;;  %731 = vst [vmem:[%s1565_s3 + $0x40] sm:$0xff] %v715_v60  ;;  %v997_v1 = vadd.f32 %v996_v62, %v995_v57  ;;  %v1021_v2 = vadd.f32 %v1020_v0, %v1019_v58  ;;  %v377_v57 = vld [vmem:[%s1565_s3 + $0x38] sm:$0xff] }
 0x118   : > { %v998_v3 = vpop.f32.mrf.mxu0  ;;  %v1022_v4 = vpop.f32.mrf.mxu1  ;;  %v385_v59 = vld [vmem:[%s1565_s3 + $0x78] sm:$0xff] }
 0x119   : > { %v708_v5 = vadd.f32 %v997_v1, %v371_v61  ;;  %v716_v6 = vadd.f32 %v1021_v2, %v379_v63 }
 0x11a   : > { %v999_v8 = vpop.f32.mrf.mxu0  ;;  %v1023_v10 = vpop.f32.mrf.mxu1 }
 0x11b   : > { %724 = vst [vmem:[%s1565_s3 + $0x8] sm:$0xff] %v708_v5  ;;  %732 = vst [vmem:[%s1565_s3 + $0x48] sm:$0xff] %v716_v6  ;;  %v1000_v11 = vadd.f32 %v999_v8, %v998_v3  ;;  %v1024_v12 = vadd.f32 %v1023_v10, %v1022_v4 }
 0x11c   : > { %v1001_v13 = vpop.f32.mrf.mxu0  ;;  %v1025_v14 = vpop.f32.mrf.mxu1 }
 0x11d   : > { %v709_v15 = vadd.f32 %v1000_v11, %v372_v7  ;;  %v717_v16 = vadd.f32 %v1024_v12, %v380_v9 }
 0x11e   : > { %v1002_v18 = vpop.f32.mrf.mxu0  ;;  %v1026_v20 = vpop.f32.mrf.mxu1 }
 0x11f   : > { %725 = vst [vmem:[%s1565_s3 + $0x10] sm:$0xff] %v709_v15  ;;  %733 = vst [vmem:[%s1565_s3 + $0x50] sm:$0xff] %v717_v16  ;;  %v1003_v21 = vadd.f32 %v1002_v18, %v1001_v13  ;;  %v1027_v22 = vadd.f32 %v1026_v20, %v1025_v14 }
 0x120   : > { %v1004_v23 = vpop.f32.mrf.mxu0  ;;  %v1028_v24 = vpop.f32.mrf.mxu1 }
 0x121   : > { %v710_v25 = vadd.f32 %v1003_v21, %v373_v17  ;;  %v718_v26 = vadd.f32 %v1027_v22, %v381_v19 }
 0x122   : > { %v1005_v28 = vpop.f32.mrf.mxu0  ;;  %v1029_v30 = vpop.f32.mrf.mxu1 }
 0x123   : > { %726 = vst [vmem:[%s1565_s3 + $0x18] sm:$0xff] %v710_v25  ;;  %734 = vst [vmem:[%s1565_s3 + $0x58] sm:$0xff] %v718_v26  ;;  %v1006_v31 = vadd.f32 %v1005_v28, %v1004_v23  ;;  %v1030_v32 = vadd.f32 %v1029_v30, %v1028_v24 }
 0x124   : > { %v1007_v33 = vpop.f32.mrf.mxu0  ;;  %v1031_v34 = vpop.f32.mrf.mxu1 }
 0x125   : > { %v711_v35 = vadd.f32 %v1006_v31, %v374_v27  ;;  %v719_v36 = vadd.f32 %v1030_v32, %v382_v29 }
 0x126   : > { %v1008_v38 = vpop.f32.mrf.mxu0  ;;  %v1032_v40 = vpop.f32.mrf.mxu1 }
 0x127   : > { %727 = vst [vmem:[%s1565_s3 + $0x20] sm:$0xff] %v711_v35  ;;  %735 = vst [vmem:[%s1565_s3 + $0x60] sm:$0xff] %v719_v36  ;;  %v1009_v41 = vadd.f32 %v1008_v38, %v1007_v33  ;;  %v1033_v42 = vadd.f32 %v1032_v40, %v1031_v34 }
 0x128   : > { %v1010_v43 = vpop.f32.mrf.mxu0  ;;  %v1034_v44 = vpop.f32.mrf.mxu1 }
 0x129   : > { %v712_v45 = vadd.f32 %v1009_v41, %v375_v37  ;;  %v720_v46 = vadd.f32 %v1033_v42, %v383_v39 }
 0x12a   : > { %v1011_v48 = vpop.f32.mrf.mxu0  ;;  %v1035_v50 = vpop.f32.mrf.mxu1 }
 0x12b   : > { %728 = vst [vmem:[%s1565_s3 + $0x28] sm:$0xff] %v712_v45  ;;  %736 = vst [vmem:[%s1565_s3 + $0x68] sm:$0xff] %v720_v46  ;;  %v1012_v51 = vadd.f32 %v1011_v48, %v1010_v43  ;;  %v1036_v52 = vadd.f32 %v1035_v50, %v1034_v44 }
 0x12c   : > { %v1013_v53 = vpop.f32.mrf.mxu0  ;;  %v1037_v54 = vpop.f32.mrf.mxu1 }
 0x12d   : > { %v713_v55 = vadd.f32 %v1012_v51, %v376_v47  ;;  %v721_v56 = vadd.f32 %v1036_v52, %v384_v49 }
 0x12e   : > { %v1014_v58 = vpop.f32.mrf.mxu0  ;;  %v1038_v60 = vpop.f32.mrf.mxu1 }
 0x12f   : > { %729 = vst [vmem:[%s1565_s3 + $0x30] sm:$0xff] %v713_v55  ;;  %737 = vst [vmem:[%s1565_s3 + $0x70] sm:$0xff] %v721_v56  ;;  %v1015_v61 = vadd.f32 %v1014_v58, %v1013_v53  ;;  %v1039_v62 = vadd.f32 %v1038_v60, %v1037_v54  ;;  %742 = sbr.rel (%p969_p11) target bundleno = 322 (0x142), region = 78 }
 0x131   : > { %v714_v63 = vadd.f32 %v1015_v61, %v377_v57  ;;  %v722_v0 = vadd.f32 %v1039_v62, %v385_v59 }
 0x133   : > { %730 = vst [vmem:[%s1565_s3 + $0x38] sm:$0xff] %v714_v63  ;;  %738 = vst [vmem:[%s1565_s3 + $0x78] sm:$0xff] %v722_v0 }
 0x134   : > { %v743_v1 = vld [vmem:[%s1565_s3] sm:$0xff]  ;;  %v744_v3 = vld [vmem:[%s1565_s3 + $0x8] sm:$0xff]  ;;  %v745_v6 = vld [vmem:[%s1565_s3 + $0x10] sm:$0xff] }
 0x135   : > { %v970_v2 = vld [vmem:[%s1564_s2] ss:$0 sm:$0xff]  ;;  %v746_v7 = vld [vmem:[%s1565_s3 + $0x18] sm:$0xff]  ;;  %v748_v12 = vld [vmem:[%s1565_s3 + $0x28] sm:$0xff] }
 0x136   : > { %v766_v4 = vadd.f32 %v970_v2, %v743_v1  ;;  %v767_v5 = vadd.f32 %v970_v2, %v744_v3  ;;  %v747_v8 = vld [vmem:[%s1565_s3 + $0x20] sm:$0xff]  ;;  %v768_v9 = vadd.f32 %v970_v2, %v745_v6  ;;  %v769_v10 = vadd.f32 %v970_v2, %v746_v7  ;;  %v749_v13 = vld [vmem:[%s1565_s3 + $0x30] sm:$0xff]  ;;  %v752_v20 = vld [vmem:[%s1565_s3 + $0x48] sm:$0xff] }
 0x137   : > { %v770_v11 = vadd.f32 %v970_v2, %v747_v8  ;;  %v771_v17 = vadd.f32 %v970_v2, %v748_v12  ;;  %v772_v18 = vadd.f32 %v970_v2, %v749_v13  ;;  %v751_v19 = vld [vmem:[%s1565_s3 + $0x40] sm:$0xff]  ;;  %v753_v21 = vld [vmem:[%s1565_s3 + $0x50] sm:$0xff]  ;;  %v754_v26 = vld [vmem:[%s1565_s3 + $0x58] sm:$0xff]  ;;  %v775_v32 = vadd.f32 %v970_v2, %v752_v20 }
 0x138   : > { %v782_v15 = vmax.f32 %v766_v4, 0.0  ;;  %v783_v16 = vmax.f32 %v767_v5, 0.0  ;;  %v784_v22 = vmax.f32 %v768_v9, 0.0  ;;  %v785_v23 = vmax.f32 %v769_v10, 0.0  ;;  %v755_v27 = vld [vmem:[%s1565_s3 + $0x60] sm:$0xff]  ;;  %v756_v28 = vld [vmem:[%s1565_s3 + $0x68] sm:$0xff] }
 0x139   : > { %v786_v24 = vmax.f32 %v770_v11, 0.0  ;;  %v787_v29 = vmax.f32 %v771_v17, 0.0  ;;  %v788_v30 = vmax.f32 %v772_v18, 0.0  ;;  %v774_v31 = vadd.f32 %v970_v2, %v751_v19  ;;  %v757_v33 = vld [vmem:[%s1565_s3 + $0x70] sm:$0xff] }
 0x13a   : > { %v750_v14 = vld [vmem:[%s1565_s3 + $0x38] sm:$0xff]  ;;  %798 = vst [vmem:[%s1565_s3] sm:$0xff] %v782_v15  ;;  %799 = vst [vmem:[%s1565_s3 + $0x8] sm:$0xff] %v783_v16  ;;  %v776_v36 = vadd.f32 %v970_v2, %v753_v21  ;;  %v777_v37 = vadd.f32 %v970_v2, %v754_v26  ;;  %v778_v38 = vadd.f32 %v970_v2, %v755_v27  ;;  %v791_v40 = vmax.f32 %v775_v32, 0.0 }
 0x13b   : > { %v773_v25 = vadd.f32 %v970_v2, %v750_v14  ;;  %v758_v34 = vld [vmem:[%s1565_s3 + $0x78] sm:$0xff]  ;;  %800 = vst [vmem:[%s1565_s3 + $0x10] sm:$0xff] %v784_v22  ;;  %801 = vst [vmem:[%s1565_s3 + $0x18] sm:$0xff] %v785_v23  ;;  %v790_v39 = vmax.f32 %v774_v31, 0.0  ;;  %v779_v41 = vadd.f32 %v970_v2, %v756_v28  ;;  %v780_v42 = vadd.f32 %v970_v2, %v757_v33 }
 0x13c   : > { %802 = vst [vmem:[%s1565_s3 + $0x20] sm:$0xff] %v786_v24  ;;  %803 = vst [vmem:[%s1565_s3 + $0x28] sm:$0xff] %v787_v29  ;;  %v792_v43 = vmax.f32 %v776_v36, 0.0  ;;  %v793_v44 = vmax.f32 %v777_v37, 0.0  ;;  %v794_v45 = vmax.f32 %v778_v38, 0.0  ;;  %v781_v46 = vadd.f32 %v970_v2, %v758_v34 }
 0x13d   : > { %v789_v35 = vmax.f32 %v773_v25, 0.0  ;;  %804 = vst [vmem:[%s1565_s3 + $0x30] sm:$0xff] %v788_v30  ;;  %806 = vst [vmem:[%s1565_s3 + $0x40] sm:$0xff] %v790_v39  ;;  %v795_v47 = vmax.f32 %v779_v41, 0.0  ;;  %v796_v48 = vmax.f32 %v780_v42, 0.0 }
 0x13e   : > { %807 = vst [vmem:[%s1565_s3 + $0x48] sm:$0xff] %v791_v40  ;;  %808 = vst [vmem:[%s1565_s3 + $0x50] sm:$0xff] %v792_v43  ;;  %v797_v49 = vmax.f32 %v781_v46, 0.0 }
 0x13f   : > { %805 = vst [vmem:[%s1565_s3 + $0x38] sm:$0xff] %v789_v35  ;;  %809 = vst [vmem:[%s1565_s3 + $0x58] sm:$0xff] %v793_v44 }
 0x140   : > { %810 = vst [vmem:[%s1565_s3 + $0x60] sm:$0xff] %v794_v45  ;;  %811 = vst [vmem:[%s1565_s3 + $0x68] sm:$0xff] %v795_v47 }
 0x141   : > { %812 = vst [vmem:[%s1565_s3 + $0x70] sm:$0xff] %v796_v48  ;;  %813 = vst [vmem:[%s1565_s3 + $0x78] sm:$0xff] %v797_v49 }
 0x142 PF: > { %s13_s16 = sadd.s32 1, %s1175_s16   ;;  %s1566_s12 = smov %s1163_s13 }
 0x143   : > { %p10_p12 = scmp.ge.s32.totalorder %s13_s16, 5   ;;  %s1567_s13 = smov %s1233_s20 }
 0x144   : > { %s1568_s14 = smov %s1171_s15  ;;  %s1569_s15 = smov %s1571_s17 }
 0x145   :  { %12 = sbr.rel (!%p10_p12) target bundleno = 3 (0x3), region = 119 }

// kernel: _lambda_.19
= control target key start
LH: loop header
LB: loop body
LE: loop exit
PB: predicated region body
PF: predicated region fallthrough
CT: control target
= control target key end

     0   :  { %s1314_s15 = smov 0   ;;  %s1316_s16 = smov 0   ;;  %s1744_s0 = inlined_call_operand.vmem [shape: bf16[128,1280], index: 0, kind: input, shape index: {}]   ;;  %s1745_s1 = inlined_call_operand.vmem [shape: bf16[1280,128], index: 1, kind: input, shape index: {}]   ;;  %s1746_s2 = inlined_call_operand.vmem [shape: f32[1,128], index: 2, kind: input, shape index: {}]   ;;  %s1747_s3 = inlined_call_operand.vmem [shape: f32[128,128], index: 3, kind: input, shape index: {}]   ;;  %s1748_s4 = inlined_call_operand.vmem [shape: f32[128,128], index: 4, kind: output, shape index: {}]  }
   0x1   :  { %s1318_s17 = smov 0   ;;  %s1320_s18 = smov 0  }
   0x2   :  { %s1322_s19 = smov 0  }
   0x3 LB: > { %s26_s20 = sadd.s32 1, %s1282_s18  ;;  %p49_p1 = scmp.ne.s32.totalorder %s1274_s16, %s1270_s15  ;;  %s1286_s19 = sphi %s1322_s19, %s14_s19   ;;  %s1282_s18 = sphi %s1320_s18, %s1752_s18   ;;  %s1278_s17 = sphi %s1318_s17, %s1751_s17   ;;  %s1274_s16 = sphi %s1316_s16, %s1750_s16   ;;  %s1270_s15 = sphi %s1314_s15, %s1749_s15  }
   0x4   : > { %p27_p0 = scmp.ge.s32.totalorder %s26_s20, 5  ;;  %p50_p2 = scmp.eq.s32.totalorder %s1286_s19, 0 }
   0x5   : > { %s42_s22 = sadd.s32 1, %s1274_s16  ;;  %p1039_p5 = scmp.ge.s32.totalorder %s1286_s19, 5 }
   0x6   : > { %s1754_s20 = smov (%p27_p0, %s26_s20), 0  ;;  %p51_p3 = por %p50_p2, %p49_p1 }
   0x7   : > { %s38_s21 = ssub.s32 %s1282_s18, %s1754_s20  ;;  %203 = sbr.rel (%p1039_p5) target bundleno = 24 (0x18), region = 24 }
   0x8   : > { %p40_p4 = scmp.eq.s32.totalorder %s38_s21, 0 }
   0xa   : > { %s1349_s23 = scalar_select %p40_p4, %s1274_s16, %s42_s22  }
   0xc   : > { %206 = sbr.rel (!%p51_p3) target bundleno = 24 (0x18), region = 28  ;;  %s208_s24 = sand.u32 (%p51_p3), 1, %s1274_s16  }
   0xd   : > { %s1086_s25 = sshll.u32 (%p51_p3), %s1282_s18, 3  ;;  %s1040_s26 = sshll.u32 (%p51_p3), %s208_s24, 7 }
   0xe   : > { %s1357_s29 = scalar_lea.vmem (%p51_p3), %s1744_s0, %s1086_s25  ;;  %s210_s30 = scalar_lea.vmem (%p51_p3), [#allocation2], %s1040_s26 }
   0xf   : > { %v275_v0 = vld [vmem:[%s1357_s29] sm:$0xff] (%p51_p3)  ;;  %v277_v1 = vld [vmem:[%s1357_s29 + $0x28] sm:$0xff] (%p51_p3)  ;;  %v279_v2 = vld [vmem:[%s1357_s29 + $0x50] sm:$0xff] (%p51_p3) }
  0x10   : > { %276 = vst [vmem:[%s210_s30] sm:$0xff] (%p51_p3), %v275_v0  ;;  %278 = vst [vmem:[%s210_s30 + $0x8] sm:$0xff] (%p51_p3), %v277_v1  ;;  %v281_v3 = vld [vmem:[%s1357_s29 + $0x78] sm:$0xff] (%p51_p3)  ;;  %v283_v4 = vld [vmem:[%s1357_s29 + $0xa0] sm:$0xff] (%p51_p3) }
  0x11   : > { %280 = vst [vmem:[%s210_s30 + $0x10] sm:$0xff] %v279_v2  ;;  %v285_v5 = vld [vmem:[%s1357_s29 + $0xc8] sm:$0xff]  ;;  %282 = vst [vmem:[%s210_s30 + $0x18] sm:$0xff] %v281_v3  ;;  %v287_v6 = vld [vmem:[%s1357_s29 + $0xf0] sm:$0xff] }
  0x12   : > { %284 = vst [vmem:[%s210_s30 + $0x20] sm:$0xff] %v283_v4  ;;  %286 = vst [vmem:[%s210_s30 + $0x28] sm:$0xff] %v285_v5  ;;  %v289_v7 = vld [vmem:[%s1357_s29 + $0x118] sm:$0xff]  ;;  %v291_v8 = vld [vmem:[%s1357_s29 + $0x140] sm:$0xff] }
  0x13   : > { %288 = vst [vmem:[%s210_s30 + $0x30] sm:$0xff] %v287_v6  ;;  %290 = vst [vmem:[%s210_s30 + $0x38] sm:$0xff] %v289_v7  ;;  %v293_v9 = vld [vmem:[%s1357_s29 + $0x168] sm:$0xff]  ;;  %v295_v10 = vld [vmem:[%s1357_s29 + $0x190] sm:$0xff] }
  0x14   : > { %292 = vst [vmem:[%s210_s30 + $0x40] sm:$0xff] %v291_v8  ;;  %v297_v11 = vld [vmem:[%s1357_s29 + $0x1b8] sm:$0xff]  ;;  %294 = vst [vmem:[%s210_s30 + $0x48] sm:$0xff] %v293_v9  ;;  %v299_v12 = vld [vmem:[%s1357_s29 + $0x1e0] sm:$0xff] }
  0x15   : > { %296 = vst [vmem:[%s210_s30 + $0x50] sm:$0xff] %v295_v10  ;;  %298 = vst [vmem:[%s210_s30 + $0x58] sm:$0xff] %v297_v11  ;;  %v301_v13 = vld [vmem:[%s1357_s29 + $0x208] sm:$0xff]  ;;  %v303_v14 = vld [vmem:[%s1357_s29 + $0x230] sm:$0xff] }
  0x16   : > { %300 = vst [vmem:[%s210_s30 + $0x60] sm:$0xff] %v299_v12  ;;  %302 = vst [vmem:[%s210_s30 + $0x68] sm:$0xff] %v301_v13  ;;  %v305_v15 = vld [vmem:[%s1357_s29 + $0x258] sm:$0xff] }
  0x17   : > { %304 = vst [vmem:[%s210_s30 + $0x70] sm:$0xff] %v303_v14  ;;  %306 = vst [vmem:[%s210_s30 + $0x78] sm:$0xff] %v305_v15 }
  0x18 PF: > { %p1043_p6 = scmp.ge.s32.totalorder %s1286_s19, 1  ;;  %p323_p7 = scmp.lt.s32.totalorder %s1286_s19, 6 }
  0x1a   : > { %p324_p8 = pnand %p1043_p6, %p323_p7 }
  0x1b   : > { %s330_s5 = sand.u32 (!%p324_p8), 1, %s1270_s15   ;;  %s1045_s6 = sshll.u32 (!%p324_p8), %s1278_s17, 5 }
  0x1c   : > { %327 = sbr.rel (%p324_p8) target bundleno = 328 (0x148), region = 70  ;;  %s1044_s7 = sshll.u32 (!%p324_p8), %s330_s5, 7 }
  0x1d   : > { %p380_p9 = scmp.lt.s32.totalorder (!%p324_p8), %s1045_s6, 159  ;;  %s1384_s12 = scalar_lea.vmem (!%p324_p8), [#allocation2], %s1044_s7 }
  0x1e   : > { %p1047_p10 = scmp.ne.s32.totalorder (!%p324_p8), %s1278_s17, 0 }
  0x21   : > { %s1756_s6 = smov (!%p380_p9, %s1045_s6), 159  ;;  %413 = sbr.rel (%p1047_p10) target bundleno = 47 (0x2f), region = 78 }
  0x22   : > { %s1046_s8 = sshll.u32 %s1756_s6, 2 }
  0x23   : > { %s1382_s11 = scalar_lea.vmem %s1745_s1, %s1046_s8 }
  0x26   : > { %v1288_v16 = vmov 0.0  }
  0x27   : > { %414 = vst [vmem:[%s1748_s4] sm:$0xff] %v1288_v16  ;;  %415 = vst [vmem:[%s1748_s4 + $0x8] sm:$0xff] %v1288_v16 }
  0x28   : > { %416 = vst [vmem:[%s1748_s4 + $0x10] sm:$0xff] %v1288_v16  ;;  %417 = vst [vmem:[%s1748_s4 + $0x18] sm:$0xff] %v1288_v16 }
  0x29   : > { %418 = vst [vmem:[%s1748_s4 + $0x20] sm:$0xff] %v1288_v16  ;;  %419 = vst [vmem:[%s1748_s4 + $0x28] sm:$0xff] %v1288_v16 }
  0x2a   : > { %420 = vst [vmem:[%s1748_s4 + $0x30] sm:$0xff] %v1288_v16  ;;  %421 = vst [vmem:[%s1748_s4 + $0x38] sm:$0xff] %v1288_v16 }
  0x2b   : > { %422 = vst [vmem:[%s1748_s4 + $0x40] sm:$0xff] %v1288_v16  ;;  %423 = vst [vmem:[%s1748_s4 + $0x48] sm:$0xff] %v1288_v16 }
  0x2c   : > { %424 = vst [vmem:[%s1748_s4 + $0x50] sm:$0xff] %v1288_v16  ;;  %425 = vst [vmem:[%s1748_s4 + $0x58] sm:$0xff] %v1288_v16 }
  0x2d   : > { %426 = vst [vmem:[%s1748_s4 + $0x60] sm:$0xff] %v1288_v16  ;;  %427 = vst [vmem:[%s1748_s4 + $0x68] sm:$0xff] %v1288_v16 }
  0x2e   : > { %428 = vst [vmem:[%s1748_s4 + $0x70] sm:$0xff] %v1288_v16  ;;  %429 = vst [vmem:[%s1748_s4 + $0x78] sm:$0xff] %v1288_v16 }
  0x2f PF: > { %v1208_v17 = vld [vmem:[%s1382_s11 + $0x78] sm:$0xff]   ;;  %v1210_v19 = vld [vmem:[%s1382_s11 + $0x70] sm:$0xff]   ;;  %v1212_v21 = vld [vmem:[%s1382_s11 + $0x68] sm:$0xff]   ;;  %p1080_p11 = scmp.ne.s32.totalorder %s1278_s17, 4 }
  0x30   : > { %v1209_v18 = vld [vmem:[%s1382_s11 + $0x38] sm:$0xff]   ;;  %1087 = vmatprep.subr.bf16.mxu0 %v1208_v17  ;;  %1151 = vmatprep.subr.bf16.mxu1 %v1208_v17  ;;  %v1211_v20 = vld [vmem:[%s1382_s11 + $0x30] sm:$0xff]   ;;  %v1213_v22 = vld [vmem:[%s1382_s11 + $0x28] sm:$0xff]  }
  0x31   : > { %1088 = vmatpush3.bf16.msra.mxu0 %v1209_v18  ;;  %1159 = vmatpush3.bf16.msra.mxu1 %v1209_v18  ;;  %v1214_v23 = vld [vmem:[%s1382_s11 + $0x60] sm:$0xff]   ;;  %v1216_v25 = vld [vmem:[%s1382_s11 + $0x58] sm:$0xff]   ;;  %v1218_v27 = vld [vmem:[%s1382_s11 + $0x50] sm:$0xff]  }
  0x32   : > { %1089 = vmatprep.subr.bf16.mxu0 %v1210_v19  ;;  %1152 = vmatprep.subr.bf16.mxu1 %v1210_v19  ;;  %v1215_v24 = vld [vmem:[%s1382_s11 + $0x20] sm:$0xff]   ;;  %v1217_v26 = vld [vmem:[%s1382_s11 + $0x18] sm:$0xff]   ;;  %v1219_v30 = vld [vmem:[%s1382_s11 + $0x10] sm:$0xff]  }
  0x33   : > { %v1226_v28 = vld [vmem:[%s1384_s12 + $0x4] ss:$8 sps:$4 sm:$0xff]   ;;  %v1224_v35 = vld [vmem:[%s1384_s12] ss:$8 sps:$4 sm:$0xff]   ;;  %v1230_v37 = vld [vmem:[%s1384_s12 + $0x14] ss:$8 sps:$4 sm:$0xff]  }
  0x34   : > { %v1229_v29 = vld [vmem:[%s1384_s12 + $0x44] ss:$8 sps:$4 sm:$0xff]   ;;  %702 = vmatprep.mubr.bf16.mxu0 %v1226_v28  ;;  %v1227_v36 = vld [vmem:[%s1384_s12 + $0x40] ss:$8 sps:$4 sm:$0xff]   ;;  %v1232_v38 = vld [vmem:[%s1384_s12 + $0x54] ss:$8 sps:$4 sm:$0xff]  }
  0x35   : > { %1090 = vmatpush3.bf16.msra.mxu0 %v1211_v20  ;;  %1160 = vmatpush3.bf16.msra.mxu1 %v1211_v20  ;;  %v1220_v31 = vld [vmem:[%s1382_s11 + $0x48] sm:$0xff]   ;;  %v1222_v33 = vld [vmem:[%s1382_s11 + $0x40] sm:$0xff]   ;;  %v1234_v39 = vld [vmem:[%s1384_s12 + $0x10] ss:$8 sps:$4 sm:$0xff]  }
  0x36   : > { %1091 = vmatprep.subr.bf16.mxu0 %v1212_v21  ;;  %1153 = vmatprep.subr.bf16.mxu1 %v1212_v21  ;;  %v1221_v32 = vld [vmem:[%s1382_s11 + $0x8] sm:$0xff]   ;;  %v1223_v34 = vld [vmem:[%s1382_s11] sm:$0xff]   ;;  %v1235_v40 = vld [vmem:[%s1384_s12 + $0x50] ss:$8 sps:$4 sm:$0xff]  }
  0x37   : > { %734 = vmatprep.mubr.bf16.mxu1 %v1229_v29  ;;  %v1236_v41 = vld [vmem:[%s1384_s12 + $0x24] ss:$8 sps:$4 sm:$0xff]   ;;  %v1240_v43 = vld [vmem:[%s1384_s12 + $0x20] ss:$8 sps:$4 sm:$0xff]   ;;  %v1242_v45 = vld [vmem:[%s1384_s12 + $0x34] ss:$8 sps:$4 sm:$0xff]  }
  0x38   : > { %v1238_v42 = vld [vmem:[%s1384_s12 + $0x64] ss:$8 sps:$4 sm:$0xff]   ;;  %v1241_v44 = vld [vmem:[%s1384_s12 + $0x60] ss:$8 sps:$4 sm:$0xff]   ;;  %v1244_v46 = vld [vmem:[%s1384_s12 + $0x74] ss:$8 sps:$4 sm:$0xff]  }
  0x39   : > { %1092 = vmatpush3.bf16.msra.mxu0 %v1213_v22  ;;  %1161 = vmatpush3.bf16.msra.mxu1 %v1213_v22  ;;  %v1246_v47 = vld [vmem:[%s1384_s12 + $0x30] ss:$8 sps:$4 sm:$0xff]   ;;  %v430_v51 = vld [vmem:[%s1748_s4] sm:$0xff]  ;;  %v431_v61 = vld [vmem:[%s1748_s4 + $0x8] sm:$0xff] }
  0x3a   : > { %1093 = vmatprep.subr.bf16.mxu0 %v1214_v23  ;;  %1154 = vmatprep.subr.bf16.mxu1 %v1214_v23  ;;  %v1247_v48 = vld [vmem:[%s1384_s12 + $0x70] ss:$8 sps:$4 sm:$0xff]   ;;  %v438_v53 = vld [vmem:[%s1748_s4 + $0x40] sm:$0xff]  ;;  %v439_v63 = vld [vmem:[%s1748_s4 + $0x48] sm:$0xff] }
  0x3b   : > { %v432_v7 = vld [vmem:[%s1748_s4 + $0x10] sm:$0xff]  ;;  %v433_v17 = vld [vmem:[%s1748_s4 + $0x18] sm:$0xff]  ;;  %v442_v29 = vld [vmem:[%s1748_s4 + $0x60] sm:$0xff] }
  0x3c   : > { %v440_v9 = vld [vmem:[%s1748_s4 + $0x50] sm:$0xff]  ;;  %v441_v19 = vld [vmem:[%s1748_s4 + $0x58] sm:$0xff] }
  0x3d   : > { %1094 = vmatpush3.bf16.msra.mxu0 %v1215_v24  ;;  %1162 = vmatpush3.bf16.msra.mxu1 %v1215_v24 }
  0x3e   : > { %1095 = vmatprep.subr.bf16.mxu0 %v1216_v25  ;;  %1155 = vmatprep.subr.bf16.mxu1 %v1216_v25 }
  0x41   : > { %1096 = vmatpush3.bf16.msra.mxu0 %v1217_v26  ;;  %1163 = vmatpush3.bf16.msra.mxu1 %v1217_v26 }
  0x42   : > { %1097 = vmatprep.subr.bf16.mxu0 %v1218_v27  ;;  %1156 = vmatprep.subr.bf16.mxu1 %v1218_v27  ;;  %v434_v27 = vld [vmem:[%s1748_s4 + $0x20] sm:$0xff] }
  0x45   : > { %1098 = vmatpush3.bf16.msra.mxu0 %v1219_v30  ;;  %1164 = vmatpush3.bf16.msra.mxu1 %v1219_v30 }
  0x46   : > { %1099 = vmatprep.subr.bf16.mxu0 %v1220_v31  ;;  %1157 = vmatprep.subr.bf16.mxu1 %v1220_v31 }
  0x49   : > { %1100 = vmatpush3.bf16.msra.mxu0 %v1221_v32  ;;  %1165 = vmatpush3.bf16.msra.mxu1 %v1221_v32 }
  0x4a   : > { %1101 = vmatprep.subr.bf16.mxu0 %v1222_v33  ;;  %1158 = vmatprep.subr.bf16.mxu1 %v1222_v33 }
  0x4d   : > { %1102 = vmatpush3.bf16.msra.mxu0 %v1223_v34  ;;  %1166 = vmatpush3.bf16.msra.mxu1 %v1223_v34 }
  0x50   : > { %703 = vmatmul.mubr.bf16.vlgmr.msra.gmra.mxu0 %v1224_v35  ;;  %735 = vmatmul.mubr.bf16.vlgmr.msra.gmra.mxu1 %v1227_v36 }
  0x51   : > { %710 = vmatprep.mubr.bf16.mxu0 %v1230_v37  ;;  %742 = vmatprep.mubr.bf16.mxu1 %v1232_v38  ;;  %v435_v37 = vld [vmem:[%s1748_s4 + $0x28] sm:$0xff] }
  0x58   : > { %711 = vmatmul.mubr.bf16.gmra.mxu0 %v1234_v39  ;;  %743 = vmatmul.mubr.bf16.gmra.mxu1 %v1235_v40  ;;  %v443_v39 = vld [vmem:[%s1748_s4 + $0x68] sm:$0xff] }
  0x59   : > { %718 = vmatprep.mubr.bf16.mxu0 %v1236_v41  ;;  %750 = vmatprep.mubr.bf16.mxu1 %v1238_v42 }
  0x60   : > { %719 = vmatmul.mubr.bf16.gmra.mxu0 %v1240_v43  ;;  %751 = vmatmul.mubr.bf16.gmra.mxu1 %v1241_v44 }
  0x61   : > { %726 = vmatprep.mubr.bf16.mxu0 %v1242_v45  ;;  %758 = vmatprep.mubr.bf16.mxu1 %v1244_v46 }
  0x68   : > { %727 = vmatmul.mubr.bf16.gmra.mxu0 %v1246_v47  ;;  %759 = vmatmul.mubr.bf16.gmra.mxu1 %v1247_v48  ;;  %v436_v47 = vld [vmem:[%s1748_s4 + $0x30] sm:$0xff] }
 0x110   : > { %v1103_v49 = vpop.f32.mrf.mxu0  ;;  %v1127_v50 = vpop.f32.mrf.mxu1 }
 0x112   : > { %v1104_v52 = vpop.f32.mrf.mxu0  ;;  %v1128_v54 = vpop.f32.mrf.mxu1 }
 0x113   : > { %v1105_v55 = vadd.f32 %v1104_v52, %v1103_v49  ;;  %v1129_v56 = vadd.f32 %v1128_v54, %v1127_v50  ;;  %v444_v49 = vld [vmem:[%s1748_s4 + $0x70] sm:$0xff] }
 0x114   : > { %v1106_v57 = vpop.f32.mrf.mxu0  ;;  %v1130_v58 = vpop.f32.mrf.mxu1 }
 0x115   : > { %v767_v59 = vadd.f32 %v1105_v55, %v430_v51  ;;  %v775_v60 = vadd.f32 %v1129_v56, %v438_v53 }
 0x116   : > { %v1107_v62 = vpop.f32.mrf.mxu0  ;;  %v1131_v0 = vpop.f32.mrf.mxu1 }
 0x117   : > { %783 = vst [vmem:[%s1748_s4] sm:$0xff] %v767_v59  ;;  %791 = vst [vmem:[%s1748_s4 + $0x40] sm:$0xff] %v775_v60  ;;  %v1108_v1 = vadd.f32 %v1107_v62, %v1106_v57  ;;  %v1132_v2 = vadd.f32 %v1131_v0, %v1130_v58  ;;  %v437_v57 = vld [vmem:[%s1748_s4 + $0x38] sm:$0xff] }
 0x118   : > { %v1109_v3 = vpop.f32.mrf.mxu0  ;;  %v1133_v4 = vpop.f32.mrf.mxu1  ;;  %v445_v59 = vld [vmem:[%s1748_s4 + $0x78] sm:$0xff] }
 0x119   : > { %v768_v5 = vadd.f32 %v1108_v1, %v431_v61  ;;  %v776_v6 = vadd.f32 %v1132_v2, %v439_v63 }
 0x11a   : > { %v1110_v8 = vpop.f32.mrf.mxu0  ;;  %v1134_v10 = vpop.f32.mrf.mxu1 }
 0x11b   : > { %784 = vst [vmem:[%s1748_s4 + $0x8] sm:$0xff] %v768_v5  ;;  %792 = vst [vmem:[%s1748_s4 + $0x48] sm:$0xff] %v776_v6  ;;  %v1111_v11 = vadd.f32 %v1110_v8, %v1109_v3  ;;  %v1135_v12 = vadd.f32 %v1134_v10, %v1133_v4 }
 0x11c   : > { %v1112_v13 = vpop.f32.mrf.mxu0  ;;  %v1136_v14 = vpop.f32.mrf.mxu1 }
 0x11d   : > { %v769_v15 = vadd.f32 %v1111_v11, %v432_v7  ;;  %v777_v16 = vadd.f32 %v1135_v12, %v440_v9 }
 0x11e   : > { %v1113_v18 = vpop.f32.mrf.mxu0  ;;  %v1137_v20 = vpop.f32.mrf.mxu1 }
 0x11f   : > { %785 = vst [vmem:[%s1748_s4 + $0x10] sm:$0xff] %v769_v15  ;;  %793 = vst [vmem:[%s1748_s4 + $0x50] sm:$0xff] %v777_v16  ;;  %v1114_v21 = vadd.f32 %v1113_v18, %v1112_v13  ;;  %v1138_v22 = vadd.f32 %v1137_v20, %v1136_v14 }
 0x120   : > { %v1115_v23 = vpop.f32.mrf.mxu0  ;;  %v1139_v24 = vpop.f32.mrf.mxu1 }
 0x121   : > { %v770_v25 = vadd.f32 %v1114_v21, %v433_v17  ;;  %v778_v26 = vadd.f32 %v1138_v22, %v441_v19 }
 0x122   : > { %v1116_v28 = vpop.f32.mrf.mxu0  ;;  %v1140_v30 = vpop.f32.mrf.mxu1 }
 0x123   : > { %786 = vst [vmem:[%s1748_s4 + $0x18] sm:$0xff] %v770_v25  ;;  %794 = vst [vmem:[%s1748_s4 + $0x58] sm:$0xff] %v778_v26  ;;  %v1117_v31 = vadd.f32 %v1116_v28, %v1115_v23  ;;  %v1141_v32 = vadd.f32 %v1140_v30, %v1139_v24 }
 0x124   : > { %v1118_v33 = vpop.f32.mrf.mxu0  ;;  %v1142_v34 = vpop.f32.mrf.mxu1 }
 0x125   : > { %v771_v35 = vadd.f32 %v1117_v31, %v434_v27  ;;  %v779_v36 = vadd.f32 %v1141_v32, %v442_v29 }
 0x126   : > { %v1119_v38 = vpop.f32.mrf.mxu0  ;;  %v1143_v40 = vpop.f32.mrf.mxu1 }
 0x127   : > { %787 = vst [vmem:[%s1748_s4 + $0x20] sm:$0xff] %v771_v35  ;;  %795 = vst [vmem:[%s1748_s4 + $0x60] sm:$0xff] %v779_v36  ;;  %v1120_v41 = vadd.f32 %v1119_v38, %v1118_v33  ;;  %v1144_v42 = vadd.f32 %v1143_v40, %v1142_v34 }
 0x128   : > { %v1121_v43 = vpop.f32.mrf.mxu0  ;;  %v1145_v44 = vpop.f32.mrf.mxu1 }
 0x129   : > { %v772_v45 = vadd.f32 %v1120_v41, %v435_v37  ;;  %v780_v46 = vadd.f32 %v1144_v42, %v443_v39 }
 0x12a   : > { %v1122_v48 = vpop.f32.mrf.mxu0  ;;  %v1146_v50 = vpop.f32.mrf.mxu1 }
 0x12b   : > { %788 = vst [vmem:[%s1748_s4 + $0x28] sm:$0xff] %v772_v45  ;;  %796 = vst [vmem:[%s1748_s4 + $0x68] sm:$0xff] %v780_v46  ;;  %v1123_v51 = vadd.f32 %v1122_v48, %v1121_v43  ;;  %v1147_v52 = vadd.f32 %v1146_v50, %v1145_v44 }
 0x12c   : > { %v1124_v53 = vpop.f32.mrf.mxu0  ;;  %v1148_v54 = vpop.f32.mrf.mxu1 }
 0x12d   : > { %v773_v55 = vadd.f32 %v1123_v51, %v436_v47  ;;  %v781_v56 = vadd.f32 %v1147_v52, %v444_v49 }
 0x12e   : > { %v1125_v58 = vpop.f32.mrf.mxu0  ;;  %v1149_v60 = vpop.f32.mrf.mxu1 }
 0x12f   : > { %789 = vst [vmem:[%s1748_s4 + $0x30] sm:$0xff] %v773_v55  ;;  %797 = vst [vmem:[%s1748_s4 + $0x70] sm:$0xff] %v781_v56  ;;  %v1126_v61 = vadd.f32 %v1125_v58, %v1124_v53  ;;  %v1150_v62 = vadd.f32 %v1149_v60, %v1148_v54  ;;  %802 = sbr.rel (%p1080_p11) target bundleno = 328 (0x148), region = 82 }
 0x131   : > { %v774_v63 = vadd.f32 %v1126_v61, %v437_v57  ;;  %v782_v0 = vadd.f32 %v1150_v62, %v445_v59 }
 0x133   : > { %790 = vst [vmem:[%s1748_s4 + $0x38] sm:$0xff] %v774_v63  ;;  %798 = vst [vmem:[%s1748_s4 + $0x78] sm:$0xff] %v782_v0 }
 0x134   : > { %v803_v1 = vld [vmem:[%s1748_s4] sm:$0xff]  ;;  %v804_v5 = vld [vmem:[%s1748_s4 + $0x8] sm:$0xff]  ;;  %v805_v7 = vld [vmem:[%s1748_s4 + $0x10] sm:$0xff] }
 0x135   : > { %v1570_v2 = vld [vmem:[%s1746_s2] ss:$0 sm:$0xff]  ;;  %v843_v6 = vld [vmem:[%s1747_s3 + $0x8] sm:$0xff]  ;;  %v844_v10 = vld [vmem:[%s1747_s3 + $0x10] sm:$0xff] }
 0x136   : > { %v842_v3 = vld [vmem:[%s1747_s3] sm:$0xff]  ;;  %v826_v4 = vadd.f32 %v1570_v2, %v803_v1  ;;  %v827_v8 = vadd.f32 %v1570_v2, %v804_v5  ;;  %v828_v9 = vadd.f32 %v1570_v2, %v805_v7  ;;  %v806_v11 = vld [vmem:[%s1748_s4 + $0x18] sm:$0xff]  ;;  %v808_v17 = vld [vmem:[%s1748_s4 + $0x28] sm:$0xff] }
 0x137   : > { %v845_v12 = vld [vmem:[%s1747_s3 + $0x18] sm:$0xff]  ;;  %v829_v14 = vadd.f32 %v1570_v2, %v806_v11  ;;  %v807_v15 = vld [vmem:[%s1748_s4 + $0x20] sm:$0xff]  ;;  %v831_v21 = vadd.f32 %v1570_v2, %v808_v17  ;;  %v847_v22 = vld [vmem:[%s1747_s3 + $0x28] sm:$0xff] }
 0x138   : > { %v858_v13 = vadd.f32 %v842_v3, %v826_v4  ;;  %v846_v16 = vld [vmem:[%s1747_s3 + $0x20] sm:$0xff]  ;;  %v859_v18 = vadd.f32 %v843_v6, %v827_v8  ;;  %v860_v19 = vadd.f32 %v844_v10, %v828_v9  ;;  %v830_v20 = vadd.f32 %v1570_v2, %v807_v15  ;;  %v809_v23 = vld [vmem:[%s1748_s4 + $0x30] sm:$0xff]  ;;  %v849_v29 = vld [vmem:[%s1747_s3 + $0x38] sm:$0xff] }
 0x139   : > { %v848_v24 = vld [vmem:[%s1747_s3 + $0x30] sm:$0xff]  ;;  %v861_v26 = vadd.f32 %v845_v12, %v829_v14  ;;  %v832_v27 = vadd.f32 %v1570_v2, %v809_v23  ;;  %v811_v30 = vld [vmem:[%s1748_s4 + $0x40] sm:$0xff]  ;;  %v863_v34 = vadd.f32 %v847_v22, %v831_v21  ;;  %v812_v36 = vld [vmem:[%s1748_s4 + $0x48] sm:$0xff] }
 0x13a   : > { %v874_v25 = vmax.f32 %v858_v13, 0.0  ;;  %v810_v28 = vld [vmem:[%s1748_s4 + $0x38] sm:$0xff]  ;;  %v875_v31 = vmax.f32 %v859_v18, 0.0  ;;  %v876_v32 = vmax.f32 %v860_v19, 0.0  ;;  %v862_v33 = vadd.f32 %v846_v16, %v830_v20  ;;  %v850_v35 = vld [vmem:[%s1747_s3 + $0x40] sm:$0xff]  ;;  %v851_v37 = vld [vmem:[%s1747_s3 + $0x48] sm:$0xff] }
 0x13b   : > { %v877_v38 = vmax.f32 %v861_v26, 0.0  ;;  %v864_v39 = vadd.f32 %v848_v24, %v832_v27  ;;  %v833_v40 = vadd.f32 %v1570_v2, %v810_v28  ;;  %v834_v41 = vadd.f32 %v1570_v2, %v811_v30  ;;  %v813_v42 = vld [vmem:[%s1748_s4 + $0x50] sm:$0xff]  ;;  %v814_v44 = vld [vmem:[%s1748_s4 + $0x58] sm:$0xff]  ;;  %v815_v50 = vld [vmem:[%s1748_s4 + $0x60] sm:$0xff] }
 0x13c   : > { %890 = vst [vmem:[%s1748_s4] sm:$0xff] %v874_v25  ;;  %v852_v43 = vld [vmem:[%s1747_s3 + $0x50] sm:$0xff]  ;;  %891 = vst [vmem:[%s1748_s4 + $0x8] sm:$0xff] %v875_v31  ;;  %v878_v45 = vmax.f32 %v862_v33, 0.0  ;;  %v879_v46 = vmax.f32 %v863_v34, 0.0  ;;  %v835_v47 = vadd.f32 %v1570_v2, %v812_v36  ;;  %v836_v48 = vadd.f32 %v1570_v2, %v813_v42  ;;  %v853_v49 = vld [vmem:[%s1747_s3 + $0x58] sm:$0xff] }
 0x13d   : > { %892 = vst [vmem:[%s1748_s4 + $0x10] sm:$0xff] %v876_v32  ;;  %v854_v51 = vld [vmem:[%s1747_s3 + $0x60] sm:$0xff]  ;;  %893 = vst [vmem:[%s1748_s4 + $0x18] sm:$0xff] %v877_v38  ;;  %v880_v52 = vmax.f32 %v864_v39, 0.0  ;;  %v865_v53 = vadd.f32 %v849_v29, %v833_v40  ;;  %v866_v54 = vadd.f32 %v850_v35, %v834_v41  ;;  %v837_v55 = vadd.f32 %v1570_v2, %v814_v44  ;;  %v816_v56 = vld [vmem:[%s1748_s4 + $0x68] sm:$0xff] }
 0x13e   : > { %v855_v57 = vld [vmem:[%s1747_s3 + $0x68] sm:$0xff]  ;;  %v817_v58 = vld [vmem:[%s1748_s4 + $0x70] sm:$0xff]  ;;  %894 = vst [vmem:[%s1748_s4 + $0x20] sm:$0xff] %v878_v45  ;;  %895 = vst [vmem:[%s1748_s4 + $0x28] sm:$0xff] %v879_v46  ;;  %v867_v59 = vadd.f32 %v851_v37, %v835_v47  ;;  %v868_v60 = vadd.f32 %v852_v43, %v836_v48  ;;  %v838_v61 = vadd.f32 %v1570_v2, %v815_v50 }
 0x13f   : > { %v839_v62 = vadd.f32 %v1570_v2, %v816_v56  ;;  %v856_v63 = vld [vmem:[%s1747_s3 + $0x70] sm:$0xff]  ;;  %v818_v0 = vld [vmem:[%s1748_s4 + $0x78] sm:$0xff]  ;;  %896 = vst [vmem:[%s1748_s4 + $0x30] sm:$0xff] %v880_v52  ;;  %v881_v1 = vmax.f32 %v865_v53, 0.0  ;;  %v882_v3 = vmax.f32 %v866_v54, 0.0  ;;  %v869_v4 = vadd.f32 %v853_v49, %v837_v55 }
 0x140   : > { %v840_v5 = vadd.f32 %v1570_v2, %v817_v58  ;;  %v883_v6 = vmax.f32 %v867_v59, 0.0  ;;  %v884_v7 = vmax.f32 %v868_v60, 0.0  ;;  %v870_v8 = vadd.f32 %v854_v51, %v838_v61  ;;  %v857_v10 = vld [vmem:[%s1747_s3 + $0x78] sm:$0xff] }
 0x141   : > { %v871_v9 = vadd.f32 %v855_v57, %v839_v62  ;;  %897 = vst [vmem:[%s1748_s4 + $0x38] sm:$0xff] %v881_v1  ;;  %898 = vst [vmem:[%s1748_s4 + $0x40] sm:$0xff] %v882_v3  ;;  %v885_v11 = vmax.f32 %v869_v4, 0.0  ;;  %v841_v13 = vadd.f32 %v1570_v2, %v818_v0 }
 0x142   : > { %v872_v12 = vadd.f32 %v856_v63, %v840_v5  ;;  %899 = vst [vmem:[%s1748_s4 + $0x48] sm:$0xff] %v883_v6  ;;  %900 = vst [vmem:[%s1748_s4 + $0x50] sm:$0xff] %v884_v7  ;;  %v886_v14 = vmax.f32 %v870_v8, 0.0 }
 0x143   : > { %v887_v15 = vmax.f32 %v871_v9, 0.0  ;;  %901 = vst [vmem:[%s1748_s4 + $0x58] sm:$0xff] %v885_v11  ;;  %v873_v17 = vadd.f32 %v857_v10, %v841_v13 }
 0x144   : > { %v888_v16 = vmax.f32 %v872_v12, 0.0  ;;  %902 = vst [vmem:[%s1748_s4 + $0x60] sm:$0xff] %v886_v14 }
 0x145   : > { %903 = vst [vmem:[%s1748_s4 + $0x68] sm:$0xff] %v887_v15  ;;  %v889_v2 = vmax.f32 %v873_v17, 0.0 }
 0x146   : > { %904 = vst [vmem:[%s1748_s4 + $0x70] sm:$0xff] %v888_v16 }
 0x147   : > { %905 = vst [vmem:[%s1748_s4 + $0x78] sm:$0xff] %v889_v2 }
 0x148 PF: > { %s14_s19 = sadd.s32 1, %s1286_s19   ;;  %s1749_s15 = smov %s1274_s16 }
 0x149   : > { %p11_p12 = scmp.ge.s32.totalorder %s14_s19, 7   ;;  %s1750_s16 = smov %s1349_s23 }
 0x14a   : > { %s1751_s17 = smov %s1282_s18  ;;  %s1752_s18 = smov %s1754_s20 }
 0x14b   :  { %13 = sbr.rel (!%p11_p12) target bundleno = 3 (0x3), region = 126 }

// kernel: _lambda_.21
= control target key start
LH: loop header
LB: loop body
LE: loop exit
PB: predicated region body
PF: predicated region fallthrough
CT: control target
= control target key end

     0   :  { %v321_v1 = vmov 0   ;;  %v229_v19 = vlaneseq  ;;  %s423_s1 = inlined_call_operand.vmem [shape: bf16[128,256], index: 1, kind: input, shape index: {}]   ;;  %s424_s0 = inlined_call_operand.vmem [shape: bf16[32,128], index: 0, kind: input, shape index: {}]   ;;  %s425_s2 = inlined_call_operand.vmem [shape: f32[1,256], index: 2, kind: input, shape index: {}]   ;;  %s426_s3 = inlined_call_operand.vmem [shape: f32[32,256], index: 3, kind: output, shape index: {}]  }
   0x1   :  { %v295_v0 = vld [vmem:[%s423_s1 + $0x74] ss:$8 sps:$4 sm:$0xff]   ;;  %179 = vmatprep.mubr.bf16.mxu0 %v321_v1  ;;  %189 = vmatprep.mubr.bf16.mxu1 %v321_v1  ;;  %v297_v2 = vld [vmem:[%s423_s1 + $0x70] ss:$8 sps:$4 sm:$0xff]   ;;  %v298_v3 = vld [vmem:[%s423_s1 + $0x64] ss:$8 sps:$4 sm:$0xff]  }
   0x2   :  { %147 = vmatprep.subr.bf16.mxu0 %v295_v0  ;;  %277 = vmatprep.subr.bf16.mxu1 %v295_v0  ;;  %v300_v4 = vld [vmem:[%s423_s1 + $0x60] ss:$8 sps:$4 sm:$0xff]   ;;  %v301_v5 = vld [vmem:[%s423_s1 + $0x54] ss:$8 sps:$4 sm:$0xff]   ;;  %v303_v6 = vld [vmem:[%s423_s1 + $0x50] ss:$8 sps:$4 sm:$0xff]  }
   0x3   :  { %148 = vmatpush1.bf16.msra.mxu0 %v297_v2  ;;  %285 = vmatpush1.bf16.msra.mxu1 %v297_v2  ;;  %v304_v7 = vld [vmem:[%s423_s1 + $0x44] ss:$8 sps:$4 sm:$0xff]   ;;  %v306_v8 = vld [vmem:[%s423_s1 + $0x40] ss:$8 sps:$4 sm:$0xff]   ;;  %v307_v9 = vld [vmem:[%s423_s1 + $0x34] ss:$8 sps:$4 sm:$0xff]  }
   0x4   :  { %149 = vmatprep.subr.bf16.mxu0 %v298_v3  ;;  %278 = vmatprep.subr.bf16.mxu1 %v298_v3  ;;  %v309_v10 = vld [vmem:[%s423_s1 + $0x30] ss:$8 sps:$4 sm:$0xff]   ;;  %v310_v11 = vld [vmem:[%s423_s1 + $0x24] ss:$8 sps:$4 sm:$0xff]   ;;  %v312_v12 = vld [vmem:[%s423_s1 + $0x20] ss:$8 sps:$4 sm:$0xff]  }
   0x5   :  { %v313_v13 = vld [vmem:[%s423_s1 + $0x14] ss:$8 sps:$4 sm:$0xff]   ;;  %v315_v14 = vld [vmem:[%s423_s1 + $0x10] ss:$8 sps:$4 sm:$0xff]   ;;  %v316_v15 = vld [vmem:[%s423_s1 + $0x4] ss:$8 sps:$4 sm:$0xff]  }
   0x6   :  { %v318_v16 = vld [vmem:[%s423_s1] ss:$8 sps:$4 sm:$0xff]   ;;  %v230_v20 = vshrl.u32 %v229_v19, 7 }
   0x7   :  { %150 = vmatpush1.bf16.msra.mxu0 %v300_v4  ;;  %286 = vmatpush1.bf16.msra.mxu1 %v300_v4  ;;  %v319_v17 = vld [vmem:[%s424_s0] sm:$0xff]   ;;  %v320_v18 = vld [vmem:[%s424_s0 + $0x8] sm:$0xff]  }
   0x8   :  { %151 = vmatprep.subr.bf16.mxu0 %v301_v5  ;;  %279 = vmatprep.subr.bf16.mxu1 %v301_v5  ;;  %v231_v21 = vsub.s32 0, %v230_v20  ;;  %v227_v22 = vld [vmem:[%s425_s2] sm:$0x3]  ;;  %v235_v23 = vsub.s32 1, %v230_v20 }
   0xa   :  { %v232_v24 = vrot.slane %v227_v22, %v231_v21  ;;  %v236_v27 = vrot.slane %v227_v22, %v235_v23 }
   0xb   :  { %152 = vmatpush1.bf16.msra.mxu0 %v303_v6  ;;  %287 = vmatpush1.bf16.msra.mxu1 %v303_v6 }
   0xc   :  { %153 = vmatprep.subr.bf16.mxu0 %v304_v7  ;;  %280 = vmatprep.subr.bf16.mxu1 %v304_v7 }
   0xf   :  { %154 = vmatpush1.bf16.msra.mxu0 %v306_v8  ;;  %288 = vmatpush1.bf16.msra.mxu1 %v306_v8 }
  0x10   :  { %155 = vmatprep.subr.bf16.mxu0 %v307_v9  ;;  %281 = vmatprep.subr.bf16.mxu1 %v307_v9 }
  0x13   :  { %156 = vmatpush1.bf16.msra.mxu0 %v309_v10  ;;  %289 = vmatpush1.bf16.msra.mxu1 %v309_v10 }
  0x14   :  { %157 = vmatprep.subr.bf16.mxu0 %v310_v11  ;;  %282 = vmatprep.subr.bf16.mxu1 %v310_v11 }
  0x17   :  { %158 = vmatpush1.bf16.msra.mxu0 %v312_v12  ;;  %290 = vmatpush1.bf16.msra.mxu1 %v312_v12 }
  0x18   :  { %159 = vmatprep.subr.bf16.mxu0 %v313_v13  ;;  %283 = vmatprep.subr.bf16.mxu1 %v313_v13 }
  0x1b   :  { %160 = vmatpush1.bf16.msra.mxu0 %v315_v14  ;;  %291 = vmatpush1.bf16.msra.mxu1 %v315_v14 }
  0x1c   :  { %161 = vmatprep.subr.bf16.mxu0 %v316_v15  ;;  %284 = vmatprep.subr.bf16.mxu1 %v316_v15 }
  0x1f   :  { %162 = vmatpush1.bf16.msra.mxu0 %v318_v16  ;;  %292 = vmatpush1.bf16.msra.mxu1 %v318_v16 }
  0x22   :  { %180 = vmatmul.mubr.bf16.vlgmr.msra.gmra.mxu0 %v319_v17  ;;  %190 = vmatmul.mubr.bf16.vlgmr.msra.gmra.mxu1 %v320_v18 }
  0xe2   :  { %v181_v25 = vpop.f32.mrf.mxu0  ;;  %v191_v26 = vpop.f32.mrf.mxu1 }
  0xe3   :  { %v239_v30 = vadd.f32 %v232_v24, %v181_v25  ;;  %v243_v31 = vadd.f32 %v232_v24, %v191_v26 }
  0xe4   :  { %v183_v28 = vpop.f32.mrf.mxu0  ;;  %v193_v29 = vpop.f32.mrf.mxu1 }
  0xe5   :  { %247 = vst [vmem:[%s426_s3] sm:$0xff] %v239_v30  ;;  %251 = vst [vmem:[%s426_s3 + $0x20] sm:$0xff] %v243_v31  ;;  %v240_v34 = vadd.f32 %v236_v27, %v183_v28  ;;  %v244_v35 = vadd.f32 %v236_v27, %v193_v29 }
  0xe6   :  { %v185_v32 = vpop.f32.mrf.mxu0  ;;  %v195_v33 = vpop.f32.mrf.mxu1 }
  0xe7   :  { %248 = vst [vmem:[%s426_s3 + $0x8] sm:$0xff] %v240_v34  ;;  %252 = vst [vmem:[%s426_s3 + $0x28] sm:$0xff] %v244_v35  ;;  %v241_v38 = vadd.f32 %v232_v24, %v185_v32  ;;  %v245_v39 = vadd.f32 %v232_v24, %v195_v33 }
  0xe8   :  { %v187_v36 = vpop.f32.mrf.mxu0  ;;  %v197_v37 = vpop.f32.mrf.mxu1 }
  0xe9   :  { %249 = vst [vmem:[%s426_s3 + $0x10] sm:$0xff] %v241_v38  ;;  %253 = vst [vmem:[%s426_s3 + $0x30] sm:$0xff] %v245_v39  ;;  %v242_v40 = vadd.f32 %v236_v27, %v187_v36  ;;  %v246_v41 = vadd.f32 %v236_v27, %v197_v37 }
  0xeb   :  { %250 = vst [vmem:[%s426_s3 + $0x18] sm:$0xff] %v242_v40  ;;  %254 = vst [vmem:[%s426_s3 + $0x38] sm:$0xff] %v246_v41 }

// kernel: _lambda_.20
= control target key start
LH: loop header
LB: loop body
LE: loop exit
PB: predicated region body
PF: predicated region fallthrough
CT: control target
= control target key end

     0   :  { %s1039_s12 = smov 0   ;;  %s1041_s13 = smov 0   ;;  %s1269_s0 = inlined_call_operand.vmem [shape: bf16[32,1280], index: 0, kind: input, shape index: {}]   ;;  %s1270_s1 = inlined_call_operand.vmem [shape: bf16[1280,256], index: 1, kind: input, shape index: {}]   ;;  %s1271_s2 = inlined_call_operand.vmem [shape: f32[1,256], index: 2, kind: input, shape index: {}]   ;;  %s1272_s3 = inlined_call_operand.vmem [shape: f32[32,256], index: 3, kind: output, shape index: {}]  }
   0x1   :  { %s1043_s14 = smov 0   ;;  %s1045_s15 = smov 0  }
   0x2   :  { %s1047_s16 = smov 0  }
   0x3 LB: > { %s25_s17 = sadd.s32 1, %s1012_s15  ;;  %p48_p1 = scmp.ne.s32.totalorder %s1004_s13, %s1000_s12  ;;  %s1016_s16 = sphi %s1047_s16, %s13_s16   ;;  %s1012_s15 = sphi %s1045_s15, %s1276_s15   ;;  %s1008_s14 = sphi %s1043_s14, %s1275_s14   ;;  %s1004_s13 = sphi %s1041_s13, %s1274_s13   ;;  %s1000_s12 = sphi %s1039_s12, %s1273_s12  }
   0x4   : > { %p26_p0 = scmp.ge.s32.totalorder %s25_s17, 5  ;;  %p49_p2 = scmp.eq.s32.totalorder %s1016_s16, 0 }
   0x5   : > { %s41_s19 = sadd.s32 1, %s1004_s13  ;;  %p798_p5 = scmp.ge.s32.totalorder %s1016_s16, 5 }
   0x6   : > { %s1278_s17 = smov (%p26_p0, %s25_s17), 0  ;;  %p50_p3 = por %p49_p2, %p48_p1 }
   0x7   : > { %s37_s18 = ssub.s32 %s1012_s15, %s1278_s17  ;;  %164 = sbr.rel (%p798_p5) target bundleno = 18 (0x12), region = 20 }
   0x8   : > { %p39_p4 = scmp.eq.s32.totalorder %s37_s18, 0 }
   0xa   : > { %s1074_s20 = scalar_select %p39_p4, %s1004_s13, %s41_s19  }
   0xc   : > { %167 = sbr.rel (!%p50_p3) target bundleno = 18 (0x12), region = 24  ;;  %s169_s21 = sand.u32 (%p50_p3), 1, %s1004_s13  }
   0xd   : > { %s849_s22 = sshll.u32 (%p50_p3), %s1012_s15, 3  ;;  %s799_s23 = sshll.u32 (%p50_p3), %s169_s21, 5 }
   0xe   : > { %s177_s26 = scalar_lea.vmem (%p50_p3), %s1269_s0, %s849_s22  ;;  %s171_s27 = scalar_lea.vmem (%p50_p3), [#allocation2], %s799_s23 }
   0xf   : > { %v212_v0 = vld [vmem:[%s177_s26] sm:$0xff] (%p50_p3)  ;;  %v214_v1 = vld [vmem:[%s177_s26 + $0x28] sm:$0xff] (%p50_p3)  ;;  %v216_v2 = vld [vmem:[%s177_s26 + $0x50] sm:$0xff] (%p50_p3) }
  0x10   : > { %213 = vst [vmem:[%s171_s27] sm:$0xff] (%p50_p3), %v212_v0  ;;  %215 = vst [vmem:[%s171_s27 + $0x8] sm:$0xff] (%p50_p3), %v214_v1  ;;  %v218_v3 = vld [vmem:[%s177_s26 + $0x78] sm:$0xff] (%p50_p3) }
  0x11   : > { %217 = vst [vmem:[%s171_s27 + $0x10] sm:$0xff] %v216_v2  ;;  %219 = vst [vmem:[%s171_s27 + $0x18] sm:$0xff] %v218_v3 }
  0x12 PF: > { %p802_p6 = scmp.ge.s32.totalorder %s1016_s16, 1  ;;  %p239_p7 = scmp.lt.s32.totalorder %s1016_s16, 6 }
  0x14   : > { %p240_p8 = pnand %p802_p6, %p239_p7 }
  0x15   : > { %s246_s28 = sand.u32 (!%p240_p8), 1, %s1000_s12   ;;  %s804_s29 = sshll.u32 (!%p240_p8), %s1008_s14, 5 }
  0x16   : > { %243 = sbr.rel (%p240_p8) target bundleno = 320 (0x140), region = 66  ;;  %s803_s30 = sshll.u32 (!%p240_p8), %s246_s28, 5 }
  0x17   : > { %p292_p9 = scmp.lt.s32.totalorder (!%p240_p8), %s804_s29, 159  ;;  %s1091_s8 = scalar_lea.vmem (!%p240_p8), [#allocation2], %s803_s30 }
  0x18   : > { %p807_p10 = scmp.ne.s32.totalorder (!%p240_p8), %s1008_s14, 0 }
  0x1b   : > { %s1280_s29 = smov (!%p292_p9, %s804_s29), 159  ;;  %322 = sbr.rel (%p807_p10) target bundleno = 37 (0x25), region = 74 }
  0x1c   : > { %s850_s4 = sshll.u32 %s1280_s29, 3 }
  0x1d   : > { %s1089_s7 = scalar_lea.vmem %s1270_s1, %s850_s4 }
  0x20   : > { %v1018_v4 = vmov 0.0  }
  0x21   : > { %323 = vst [vmem:[%s1272_s3] sm:$0xff] %v1018_v4  ;;  %324 = vst [vmem:[%s1272_s3 + $0x8] sm:$0xff] %v1018_v4 }
  0x22   : > { %325 = vst [vmem:[%s1272_s3 + $0x10] sm:$0xff] %v1018_v4  ;;  %326 = vst [vmem:[%s1272_s3 + $0x18] sm:$0xff] %v1018_v4 }
  0x23   : > { %327 = vst [vmem:[%s1272_s3 + $0x20] sm:$0xff] %v1018_v4  ;;  %328 = vst [vmem:[%s1272_s3 + $0x28] sm:$0xff] %v1018_v4 }
  0x24   : > { %329 = vst [vmem:[%s1272_s3 + $0x30] sm:$0xff] %v1018_v4  ;;  %330 = vst [vmem:[%s1272_s3 + $0x38] sm:$0xff] %v1018_v4 }
  0x25 PF: > { %v924_v5 = vld [vmem:[%s1089_s7 + $0x74] ss:$8 sps:$4 sm:$0xff]   ;;  %v926_v6 = vld [vmem:[%s1089_s7 + $0x70] ss:$8 sps:$4 sm:$0xff]   ;;  %v927_v7 = vld [vmem:[%s1089_s7 + $0x64] ss:$8 sps:$4 sm:$0xff]  }
  0x26   : > { %555 = vmatprep.subr.bf16.mxu0 %v924_v5  ;;  %851 = vmatprep.subr.bf16.mxu1 %v924_v5  ;;  %v929_v8 = vld [vmem:[%s1089_s7 + $0x60] ss:$8 sps:$4 sm:$0xff]   ;;  %v930_v9 = vld [vmem:[%s1089_s7 + $0x54] ss:$8 sps:$4 sm:$0xff]   ;;  %v932_v10 = vld [vmem:[%s1089_s7 + $0x50] ss:$8 sps:$4 sm:$0xff]  }
  0x27   : > { %556 = vmatpush1.bf16.msra.mxu0 %v926_v6  ;;  %867 = vmatpush1.bf16.msra.mxu1 %v926_v6  ;;  %v933_v11 = vld [vmem:[%s1089_s7 + $0x44] ss:$8 sps:$4 sm:$0xff]   ;;  %v935_v12 = vld [vmem:[%s1089_s7 + $0x40] ss:$8 sps:$4 sm:$0xff]   ;;  %v936_v13 = vld [vmem:[%s1089_s7 + $0x34] ss:$8 sps:$4 sm:$0xff]  }
  0x28   : > { %557 = vmatprep.subr.bf16.mxu0 %v927_v7  ;;  %852 = vmatprep.subr.bf16.mxu1 %v927_v7  ;;  %v938_v14 = vld [vmem:[%s1089_s7 + $0x30] ss:$8 sps:$4 sm:$0xff]   ;;  %v939_v15 = vld [vmem:[%s1089_s7 + $0x24] ss:$8 sps:$4 sm:$0xff]   ;;  %v941_v16 = vld [vmem:[%s1089_s7 + $0x20] ss:$8 sps:$4 sm:$0xff]  }
  0x29   : > { %v942_v17 = vld [vmem:[%s1089_s7 + $0x14] ss:$8 sps:$4 sm:$0xff]   ;;  %v974_v18 = vld [vmem:[%s1091_s8 + $0x4] ss:$8 sps:$4 sm:$0xff]   ;;  %v944_v19 = vld [vmem:[%s1089_s7 + $0x10] ss:$8 sps:$4 sm:$0xff]  }
  0x2a   : > { %v977_v20 = vld [vmem:[%s1091_s8 + $0x14] ss:$8 sps:$4 sm:$0xff]   ;;  %v945_v21 = vld [vmem:[%s1089_s7 + $0x4] ss:$8 sps:$4 sm:$0xff]   ;;  %587 = vmatprep.mubr.bf16.mxu0 %v974_v18  ;;  %v947_v22 = vld [vmem:[%s1089_s7] ss:$8 sps:$4 sm:$0xff]  }
  0x2b   : > { %558 = vmatpush1.bf16.msra.mxu0 %v929_v8  ;;  %868 = vmatpush1.bf16.msra.mxu1 %v929_v8  ;;  %v948_v23 = vld [vmem:[%s1089_s7 + $0xf4] ss:$8 sps:$4 sm:$0xff]   ;;  %v950_v24 = vld [vmem:[%s1089_s7 + $0xf0] ss:$8 sps:$4 sm:$0xff]   ;;  %v951_v25 = vld [vmem:[%s1089_s7 + $0xe4] ss:$8 sps:$4 sm:$0xff]  }
  0x2c   : > { %559 = vmatprep.subr.bf16.mxu0 %v930_v9  ;;  %853 = vmatprep.subr.bf16.mxu1 %v930_v9  ;;  %v953_v26 = vld [vmem:[%s1089_s7 + $0xe0] ss:$8 sps:$4 sm:$0xff]   ;;  %v954_v27 = vld [vmem:[%s1089_s7 + $0xd4] ss:$8 sps:$4 sm:$0xff]   ;;  %v956_v28 = vld [vmem:[%s1089_s7 + $0xd0] ss:$8 sps:$4 sm:$0xff]  }
  0x2d   : > { %597 = vmatprep.mubr.bf16.mxu1 %v977_v20  ;;  %v957_v29 = vld [vmem:[%s1089_s7 + $0xc4] ss:$8 sps:$4 sm:$0xff]   ;;  %v959_v30 = vld [vmem:[%s1089_s7 + $0xc0] ss:$8 sps:$4 sm:$0xff]   ;;  %v960_v31 = vld [vmem:[%s1089_s7 + $0xb4] ss:$8 sps:$4 sm:$0xff]  }
  0x2e   : > { %v962_v32 = vld [vmem:[%s1089_s7 + $0xb0] ss:$8 sps:$4 sm:$0xff]   ;;  %v963_v33 = vld [vmem:[%s1089_s7 + $0xa4] ss:$8 sps:$4 sm:$0xff]   ;;  %v965_v34 = vld [vmem:[%s1089_s7 + $0xa0] ss:$8 sps:$4 sm:$0xff]  }
  0x2f   : > { %560 = vmatpush1.bf16.msra.mxu0 %v932_v10  ;;  %869 = vmatpush1.bf16.msra.mxu1 %v932_v10  ;;  %v966_v35 = vld [vmem:[%s1089_s7 + $0x94] ss:$8 sps:$4 sm:$0xff]   ;;  %v968_v36 = vld [vmem:[%s1089_s7 + $0x90] ss:$8 sps:$4 sm:$0xff]   ;;  %v969_v37 = vld [vmem:[%s1089_s7 + $0x84] ss:$8 sps:$4 sm:$0xff]  }
  0x30   : > { %561 = vmatprep.subr.bf16.mxu0 %v933_v11  ;;  %854 = vmatprep.subr.bf16.mxu1 %v933_v11  ;;  %v971_v38 = vld [vmem:[%s1089_s7 + $0x80] ss:$8 sps:$4 sm:$0xff]   ;;  %v975_v40 = vld [vmem:[%s1091_s8 + $0x10] ss:$8 sps:$4 sm:$0xff]   ;;  %p844_p11 = scmp.ne.s32.totalorder %s1008_s14, 4 }
  0x31   : > { %v972_v39 = vld [vmem:[%s1091_s8] ss:$8 sps:$4 sm:$0xff]   ;;  %v333_v51 = vld [vmem:[%s1272_s3 + $0x10] sm:$0xff]  ;;  %v334_v57 = vld [vmem:[%s1272_s3 + $0x18] sm:$0xff] }
  0x32   : > { %v331_v41 = vld [vmem:[%s1272_s3] sm:$0xff]  ;;  %v332_v45 = vld [vmem:[%s1272_s3 + $0x8] sm:$0xff]  ;;  %v337_v52 = vld [vmem:[%s1272_s3 + $0x30] sm:$0xff] }
  0x33   : > { %562 = vmatpush1.bf16.msra.mxu0 %v935_v12  ;;  %870 = vmatpush1.bf16.msra.mxu1 %v935_v12  ;;  %v335_v42 = vld [vmem:[%s1272_s3 + $0x20] sm:$0xff]  ;;  %v336_v46 = vld [vmem:[%s1272_s3 + $0x28] sm:$0xff]  ;;  %v338_v58 = vld [vmem:[%s1272_s3 + $0x38] sm:$0xff] }
  0x34   : > { %563 = vmatprep.subr.bf16.mxu0 %v936_v13  ;;  %855 = vmatprep.subr.bf16.mxu1 %v936_v13 }
  0x37   : > { %564 = vmatpush1.bf16.msra.mxu0 %v938_v14  ;;  %871 = vmatpush1.bf16.msra.mxu1 %v938_v14 }
  0x38   : > { %565 = vmatprep.subr.bf16.mxu0 %v939_v15  ;;  %856 = vmatprep.subr.bf16.mxu1 %v939_v15 }
  0x3b   : > { %566 = vmatpush1.bf16.msra.mxu0 %v941_v16  ;;  %872 = vmatpush1.bf16.msra.mxu1 %v941_v16 }
  0x3c   : > { %567 = vmatprep.subr.bf16.mxu0 %v942_v17  ;;  %857 = vmatprep.subr.bf16.mxu1 %v942_v17 }
  0x3f   : > { %568 = vmatpush1.bf16.msra.mxu0 %v944_v19  ;;  %873 = vmatpush1.bf16.msra.mxu1 %v944_v19 }
  0x40   : > { %569 = vmatprep.subr.bf16.mxu0 %v945_v21  ;;  %858 = vmatprep.subr.bf16.mxu1 %v945_v21 }
  0x43   : > { %570 = vmatpush1.bf16.msra.mxu0 %v947_v22  ;;  %874 = vmatpush1.bf16.msra.mxu1 %v947_v22 }
  0x44   : > { %571 = vmatprep.subr.bf16.mxu0 %v948_v23  ;;  %859 = vmatprep.subr.bf16.mxu1 %v948_v23 }
  0x47   : > { %572 = vmatpush2.bf16.msra.mxu0 %v950_v24  ;;  %875 = vmatpush2.bf16.msra.mxu1 %v950_v24 }
  0x48   : > { %573 = vmatprep.subr.bf16.mxu0 %v951_v25  ;;  %860 = vmatprep.subr.bf16.mxu1 %v951_v25 }
  0x4b   : > { %574 = vmatpush2.bf16.msra.mxu0 %v953_v26  ;;  %876 = vmatpush2.bf16.msra.mxu1 %v953_v26 }
  0x4c   : > { %575 = vmatprep.subr.bf16.mxu0 %v954_v27  ;;  %861 = vmatprep.subr.bf16.mxu1 %v954_v27 }
  0x4f   : > { %576 = vmatpush2.bf16.msra.mxu0 %v956_v28  ;;  %877 = vmatpush2.bf16.msra.mxu1 %v956_v28 }
  0x50   : > { %577 = vmatprep.subr.bf16.mxu0 %v957_v29  ;;  %862 = vmatprep.subr.bf16.mxu1 %v957_v29 }
  0x53   : > { %578 = vmatpush2.bf16.msra.mxu0 %v959_v30  ;;  %878 = vmatpush2.bf16.msra.mxu1 %v959_v30 }
  0x54   : > { %579 = vmatprep.subr.bf16.mxu0 %v960_v31  ;;  %863 = vmatprep.subr.bf16.mxu1 %v960_v31 }
  0x57   : > { %580 = vmatpush2.bf16.msra.mxu0 %v962_v32  ;;  %879 = vmatpush2.bf16.msra.mxu1 %v962_v32 }
  0x58   : > { %581 = vmatprep.subr.bf16.mxu0 %v963_v33  ;;  %864 = vmatprep.subr.bf16.mxu1 %v963_v33 }
  0x5b   : > { %582 = vmatpush2.bf16.msra.mxu0 %v965_v34  ;;  %880 = vmatpush2.bf16.msra.mxu1 %v965_v34 }
  0x5c   : > { %583 = vmatprep.subr.bf16.mxu0 %v966_v35  ;;  %865 = vmatprep.subr.bf16.mxu1 %v966_v35 }
  0x5f   : > { %584 = vmatpush2.bf16.msra.mxu0 %v968_v36  ;;  %881 = vmatpush2.bf16.msra.mxu1 %v968_v36 }
  0x60   : > { %585 = vmatprep.subr.bf16.mxu0 %v969_v37  ;;  %866 = vmatprep.subr.bf16.mxu1 %v969_v37 }
  0x63   : > { %586 = vmatpush2.bf16.msra.mxu0 %v971_v38  ;;  %882 = vmatpush2.bf16.msra.mxu1 %v971_v38 }
  0x66   : > { %588 = vmatmul.mubr.bf16.vlgmr.msra.gmra.mxu0 %v972_v39  ;;  %598 = vmatmul.mubr.bf16.vlgmr.msra.gmra.mxu1 %v975_v40 }
 0x126   : > { %v589_v43 = vpop.f32.mrf.mxu0  ;;  %v599_v44 = vpop.f32.mrf.mxu1 }
 0x127   : > { %v608_v47 = vadd.f32 %v589_v43, %v331_v41  ;;  %v612_v48 = vadd.f32 %v599_v44, %v335_v42 }
 0x128   : > { %v591_v49 = vpop.f32.mrf.mxu0  ;;  %v601_v50 = vpop.f32.mrf.mxu1 }
 0x129   : > { %616 = vst [vmem:[%s1272_s3] sm:$0xff] %v608_v47  ;;  %620 = vst [vmem:[%s1272_s3 + $0x20] sm:$0xff] %v612_v48  ;;  %v609_v53 = vadd.f32 %v591_v49, %v332_v45  ;;  %v613_v54 = vadd.f32 %v601_v50, %v336_v46 }
 0x12a   : > { %v593_v55 = vpop.f32.mrf.mxu0  ;;  %v603_v56 = vpop.f32.mrf.mxu1 }
 0x12b   : > { %617 = vst [vmem:[%s1272_s3 + $0x8] sm:$0xff] %v609_v53  ;;  %621 = vst [vmem:[%s1272_s3 + $0x28] sm:$0xff] %v613_v54  ;;  %v610_v59 = vadd.f32 %v593_v55, %v333_v51  ;;  %v614_v60 = vadd.f32 %v603_v56, %v337_v52  ;;  %627 = sbr.rel (%p844_p11) target bundleno = 320 (0x140), region = 78 }
 0x12c   : > { %v595_v61 = vpop.f32.mrf.mxu0  ;;  %v605_v62 = vpop.f32.mrf.mxu1 }
 0x12d   : > { %618 = vst [vmem:[%s1272_s3 + $0x10] sm:$0xff] %v610_v59  ;;  %622 = vst [vmem:[%s1272_s3 + $0x30] sm:$0xff] %v614_v60  ;;  %v611_v63 = vadd.f32 %v595_v61, %v334_v57  ;;  %v615_v0 = vadd.f32 %v605_v62, %v338_v58 }
 0x12f   : > { %619 = vst [vmem:[%s1272_s3 + $0x18] sm:$0xff] %v611_v63  ;;  %623 = vst [vmem:[%s1272_s3 + $0x38] sm:$0xff] %v615_v0 }
 0x130   : > { %v638_v1 = vlaneseq  ;;  %v636_v3 = vld [vmem:[%s1271_s2] sm:$0x3] }
 0x131   : > { %v628_v4 = vld [vmem:[%s1272_s3] sm:$0xff] }
 0x132   : > { %v639_v2 = vshrl.u32 %v638_v1, 7  ;;  %v629_v6 = vld [vmem:[%s1272_s3 + $0x8] sm:$0xff]  ;;  %v632_v10 = vld [vmem:[%s1272_s3 + $0x20] sm:$0xff] }
 0x133   : > { %v633_v13 = vld [vmem:[%s1272_s3 + $0x28] sm:$0xff] }
 0x134   : > { %v640_v5 = vsub.s32 0, %v639_v2  ;;  %v644_v7 = vsub.s32 1, %v639_v2  ;;  %v630_v8 = vld [vmem:[%s1272_s3 + $0x10] sm:$0xff] }
 0x135   : > { %v634_v14 = vld [vmem:[%s1272_s3 + $0x30] sm:$0xff] }
 0x136   : > { %v631_v9 = vld [vmem:[%s1272_s3 + $0x18] sm:$0xff]  ;;  %v641_v11 = vrot.slane %v636_v3, %v640_v5  ;;  %v645_v12 = vrot.slane %v636_v3, %v644_v7 }
 0x137   : > { %v635_v15 = vld [vmem:[%s1272_s3 + $0x38] sm:$0xff] }
 0x138   : > { %v648_v16 = vadd.f32 %v641_v11, %v628_v4  ;;  %v649_v17 = vadd.f32 %v645_v12, %v629_v6  ;;  %v650_v18 = vadd.f32 %v641_v11, %v630_v8  ;;  %v651_v19 = vadd.f32 %v645_v12, %v631_v9 }
 0x139   : > { %v652_v20 = vadd.f32 %v641_v11, %v632_v10  ;;  %v653_v21 = vadd.f32 %v645_v12, %v633_v13  ;;  %v654_v22 = vadd.f32 %v641_v11, %v634_v14  ;;  %v655_v23 = vadd.f32 %v645_v12, %v635_v15 }
 0x13a   : > { %v656_v24 = vmax.f32 %v648_v16, 0.0  ;;  %v657_v25 = vmax.f32 %v649_v17, 0.0  ;;  %v658_v26 = vmax.f32 %v650_v18, 0.0  ;;  %v659_v27 = vmax.f32 %v651_v19, 0.0 }
 0x13b   : > { %v660_v28 = vmax.f32 %v652_v20, 0.0  ;;  %v661_v29 = vmax.f32 %v653_v21, 0.0  ;;  %v662_v30 = vmax.f32 %v654_v22, 0.0  ;;  %v663_v31 = vmax.f32 %v655_v23, 0.0 }
 0x13c   : > { %664 = vst [vmem:[%s1272_s3] sm:$0xff] %v656_v24  ;;  %665 = vst [vmem:[%s1272_s3 + $0x8] sm:$0xff] %v657_v25 }
 0x13d   : > { %666 = vst [vmem:[%s1272_s3 + $0x10] sm:$0xff] %v658_v26  ;;  %667 = vst [vmem:[%s1272_s3 + $0x18] sm:$0xff] %v659_v27 }
 0x13e   : > { %668 = vst [vmem:[%s1272_s3 + $0x20] sm:$0xff] %v660_v28  ;;  %669 = vst [vmem:[%s1272_s3 + $0x28] sm:$0xff] %v661_v29 }
 0x13f   : > { %670 = vst [vmem:[%s1272_s3 + $0x30] sm:$0xff] %v662_v30  ;;  %671 = vst [vmem:[%s1272_s3 + $0x38] sm:$0xff] %v663_v31 }
 0x140 PF: > { %s13_s16 = sadd.s32 1, %s1016_s16   ;;  %s1273_s12 = smov %s1004_s13 }
 0x141   : > { %p10_p12 = scmp.ge.s32.totalorder %s13_s16, 7   ;;  %s1274_s13 = smov %s1074_s20 }
 0x142   : > { %s1275_s14 = smov %s1012_s15  ;;  %s1276_s15 = smov %s1278_s17 }
 0x143   :  { %12 = sbr.rel (!%p10_p12) target bundleno = 3 (0x3), region = 119 }

// kernel: _lambda_.22
= control target key start
LH: loop header
LB: loop body
LE: loop exit
PB: predicated region body
PF: predicated region fallthrough
CT: control target
= control target key end

     0   :  { %s1150_s15 = smov 0   ;;  %s1152_s16 = smov 0   ;;  %s1404_s0 = inlined_call_operand.vmem [shape: bf16[32,2304], index: 0, kind: input, shape index: {}]   ;;  %s1405_s1 = inlined_call_operand.vmem [shape: bf16[2304,256], index: 1, kind: input, shape index: {}]   ;;  %s1406_s2 = inlined_call_operand.vmem [shape: f32[1,256], index: 2, kind: input, shape index: {}]   ;;  %s1407_s3 = inlined_call_operand.vmem [shape: f32[32,256], index: 3, kind: input, shape index: {}]   ;;  %s1408_s4 = inlined_call_operand.vmem [shape: f32[32,256], index: 4, kind: output, shape index: {}]  }
   0x1   :  { %s1154_s17 = smov 0   ;;  %s1156_s18 = smov 0  }
   0x2   :  { %s1158_s19 = smov 0  }
   0x3 LB: > { %s26_s20 = sadd.s32 1, %s1118_s18  ;;  %p49_p1 = scmp.ne.s32.totalorder %s1110_s16, %s1106_s15  ;;  %s1122_s19 = sphi %s1158_s19, %s14_s19   ;;  %s1118_s18 = sphi %s1156_s18, %s1412_s18   ;;  %s1114_s17 = sphi %s1154_s17, %s1411_s17   ;;  %s1110_s16 = sphi %s1152_s16, %s1410_s16   ;;  %s1106_s15 = sphi %s1150_s15, %s1409_s15  }
   0x4   : > { %p27_p0 = scmp.ge.s32.totalorder %s26_s20, 9  ;;  %p50_p2 = scmp.eq.s32.totalorder %s1122_s19, 0 }
   0x5   : > { %s42_s22 = sadd.s32 1, %s1110_s16  ;;  %p904_p5 = scmp.ge.s32.totalorder %s1122_s19, 9 }
   0x6   : > { %s1414_s20 = smov (%p27_p0, %s26_s20), 0  ;;  %p51_p3 = por %p50_p2, %p49_p1 }
   0x7   : > { %s38_s21 = ssub.s32 %s1118_s18, %s1414_s20  ;;  %208 = sbr.rel (%p904_p5) target bundleno = 18 (0x12), region = 24 }
   0x8   : > { %p40_p4 = scmp.eq.s32.totalorder %s38_s21, 0 }
   0xa   : > { %s1185_s23 = scalar_select %p40_p4, %s1110_s16, %s42_s22  }
   0xc   : > { %211 = sbr.rel (!%p51_p3) target bundleno = 18 (0x12), region = 28  ;;  %s213_s24 = sand.u32 (%p51_p3), 1, %s1110_s16  }
   0xd   : > { %s955_s25 = sshll.u32 (%p51_p3), %s1118_s18, 3  ;;  %s905_s26 = sshll.u32 (%p51_p3), %s213_s24, 5 }
   0xe   : > { %s221_s29 = scalar_lea.vmem (%p51_p3), %s1404_s0, %s955_s25  ;;  %s215_s30 = scalar_lea.vmem (%p51_p3), [#allocation2], %s905_s26 }
   0xf   : > { %v256_v0 = vld [vmem:[%s221_s29] sm:$0xff] (%p51_p3)  ;;  %v258_v1 = vld [vmem:[%s221_s29 + $0x48] sm:$0xff] (%p51_p3)  ;;  %v260_v2 = vld [vmem:[%s221_s29 + $0x90] sm:$0xff] (%p51_p3) }
  0x10   : > { %257 = vst [vmem:[%s215_s30] sm:$0xff] (%p51_p3), %v256_v0  ;;  %259 = vst [vmem:[%s215_s30 + $0x8] sm:$0xff] (%p51_p3), %v258_v1  ;;  %v262_v3 = vld [vmem:[%s221_s29 + $0xd8] sm:$0xff] (%p51_p3) }
  0x11   : > { %261 = vst [vmem:[%s215_s30 + $0x10] sm:$0xff] %v260_v2  ;;  %263 = vst [vmem:[%s215_s30 + $0x18] sm:$0xff] %v262_v3 }
  0x12 PF: > { %p908_p6 = scmp.ge.s32.totalorder %s1122_s19, 1  ;;  %p283_p7 = scmp.lt.s32.totalorder %s1122_s19, 10 }
  0x14   : > { %p284_p8 = pnand %p908_p6, %p283_p7 }
  0x15   : > { %s290_s5 = sand.u32 (!%p284_p8), 1, %s1106_s15   ;;  %s910_s6 = sshll.u32 (!%p284_p8), %s1114_s17, 5 }
  0x16   : > { %287 = sbr.rel (%p284_p8) target bundleno = 322 (0x142), region = 70  ;;  %s909_s7 = sshll.u32 (!%p284_p8), %s290_s5, 5 }
  0x17   : > { %p348_p9 = scmp.lt.s32.totalorder (!%p284_p8), %s910_s6, 287  ;;  %s1202_s12 = scalar_lea.vmem (!%p284_p8), [#allocation2], %s909_s7 }
  0x18   : > { %p913_p10 = scmp.ne.s32.totalorder (!%p284_p8), %s1114_s17, 0 }
  0x1b   : > { %s1416_s6 = smov (!%p348_p9, %s910_s6), 287  ;;  %390 = sbr.rel (%p913_p10) target bundleno = 37 (0x25), region = 78 }
  0x1c   : > { %s956_s8 = sshll.u32 %s1416_s6, 3 }
  0x1d   : > { %s1200_s11 = scalar_lea.vmem %s1405_s1, %s956_s8 }
  0x20   : > { %v1124_v4 = vmov 0.0  }
  0x21   : > { %391 = vst [vmem:[%s1408_s4] sm:$0xff] %v1124_v4  ;;  %392 = vst [vmem:[%s1408_s4 + $0x8] sm:$0xff] %v1124_v4 }
  0x22   : > { %393 = vst [vmem:[%s1408_s4 + $0x10] sm:$0xff] %v1124_v4  ;;  %394 = vst [vmem:[%s1408_s4 + $0x18] sm:$0xff] %v1124_v4 }
  0x23   : > { %395 = vst [vmem:[%s1408_s4 + $0x20] sm:$0xff] %v1124_v4  ;;  %396 = vst [vmem:[%s1408_s4 + $0x28] sm:$0xff] %v1124_v4 }
  0x24   : > { %397 = vst [vmem:[%s1408_s4 + $0x30] sm:$0xff] %v1124_v4  ;;  %398 = vst [vmem:[%s1408_s4 + $0x38] sm:$0xff] %v1124_v4 }
  0x25 PF: > { %v1030_v5 = vld [vmem:[%s1200_s11 + $0x74] ss:$8 sps:$4 sm:$0xff]   ;;  %v1032_v6 = vld [vmem:[%s1200_s11 + $0x70] ss:$8 sps:$4 sm:$0xff]   ;;  %v1033_v7 = vld [vmem:[%s1200_s11 + $0x64] ss:$8 sps:$4 sm:$0xff]  }
  0x26   : > { %623 = vmatprep.subr.bf16.mxu0 %v1030_v5  ;;  %957 = vmatprep.subr.bf16.mxu1 %v1030_v5  ;;  %v1035_v8 = vld [vmem:[%s1200_s11 + $0x60] ss:$8 sps:$4 sm:$0xff]   ;;  %v1036_v9 = vld [vmem:[%s1200_s11 + $0x54] ss:$8 sps:$4 sm:$0xff]   ;;  %v1038_v10 = vld [vmem:[%s1200_s11 + $0x50] ss:$8 sps:$4 sm:$0xff]  }
  0x27   : > { %624 = vmatpush1.bf16.msra.mxu0 %v1032_v6  ;;  %973 = vmatpush1.bf16.msra.mxu1 %v1032_v6  ;;  %v1039_v11 = vld [vmem:[%s1200_s11 + $0x44] ss:$8 sps:$4 sm:$0xff]   ;;  %v1041_v12 = vld [vmem:[%s1200_s11 + $0x40] ss:$8 sps:$4 sm:$0xff]   ;;  %v1042_v13 = vld [vmem:[%s1200_s11 + $0x34] ss:$8 sps:$4 sm:$0xff]  }
  0x28   : > { %625 = vmatprep.subr.bf16.mxu0 %v1033_v7  ;;  %958 = vmatprep.subr.bf16.mxu1 %v1033_v7  ;;  %v1044_v14 = vld [vmem:[%s1200_s11 + $0x30] ss:$8 sps:$4 sm:$0xff]   ;;  %v1045_v15 = vld [vmem:[%s1200_s11 + $0x24] ss:$8 sps:$4 sm:$0xff]   ;;  %v1047_v16 = vld [vmem:[%s1200_s11 + $0x20] ss:$8 sps:$4 sm:$0xff]  }
  0x29   : > { %v1048_v17 = vld [vmem:[%s1200_s11 + $0x14] ss:$8 sps:$4 sm:$0xff]   ;;  %v1080_v18 = vld [vmem:[%s1202_s12 + $0x4] ss:$8 sps:$4 sm:$0xff]   ;;  %v1050_v19 = vld [vmem:[%s1200_s11 + $0x10] ss:$8 sps:$4 sm:$0xff]  }
  0x2a   : > { %v1083_v20 = vld [vmem:[%s1202_s12 + $0x14] ss:$8 sps:$4 sm:$0xff]   ;;  %v1051_v21 = vld [vmem:[%s1200_s11 + $0x4] ss:$8 sps:$4 sm:$0xff]   ;;  %655 = vmatprep.mubr.bf16.mxu0 %v1080_v18  ;;  %v1053_v22 = vld [vmem:[%s1200_s11] ss:$8 sps:$4 sm:$0xff]  }
  0x2b   : > { %626 = vmatpush1.bf16.msra.mxu0 %v1035_v8  ;;  %974 = vmatpush1.bf16.msra.mxu1 %v1035_v8  ;;  %v1054_v23 = vld [vmem:[%s1200_s11 + $0xf4] ss:$8 sps:$4 sm:$0xff]   ;;  %v1056_v24 = vld [vmem:[%s1200_s11 + $0xf0] ss:$8 sps:$4 sm:$0xff]   ;;  %v1057_v25 = vld [vmem:[%s1200_s11 + $0xe4] ss:$8 sps:$4 sm:$0xff]  }
  0x2c   : > { %627 = vmatprep.subr.bf16.mxu0 %v1036_v9  ;;  %959 = vmatprep.subr.bf16.mxu1 %v1036_v9  ;;  %v1059_v26 = vld [vmem:[%s1200_s11 + $0xe0] ss:$8 sps:$4 sm:$0xff]   ;;  %v1060_v27 = vld [vmem:[%s1200_s11 + $0xd4] ss:$8 sps:$4 sm:$0xff]   ;;  %v1062_v28 = vld [vmem:[%s1200_s11 + $0xd0] ss:$8 sps:$4 sm:$0xff]  }
  0x2d   : > { %665 = vmatprep.mubr.bf16.mxu1 %v1083_v20  ;;  %v1063_v29 = vld [vmem:[%s1200_s11 + $0xc4] ss:$8 sps:$4 sm:$0xff]   ;;  %v1065_v30 = vld [vmem:[%s1200_s11 + $0xc0] ss:$8 sps:$4 sm:$0xff]   ;;  %v1066_v31 = vld [vmem:[%s1200_s11 + $0xb4] ss:$8 sps:$4 sm:$0xff]  }
  0x2e   : > { %v1068_v32 = vld [vmem:[%s1200_s11 + $0xb0] ss:$8 sps:$4 sm:$0xff]   ;;  %v1069_v33 = vld [vmem:[%s1200_s11 + $0xa4] ss:$8 sps:$4 sm:$0xff]   ;;  %v1071_v34 = vld [vmem:[%s1200_s11 + $0xa0] ss:$8 sps:$4 sm:$0xff]  }
  0x2f   : > { %628 = vmatpush1.bf16.msra.mxu0 %v1038_v10  ;;  %975 = vmatpush1.bf16.msra.mxu1 %v1038_v10  ;;  %v1072_v35 = vld [vmem:[%s1200_s11 + $0x94] ss:$8 sps:$4 sm:$0xff]   ;;  %v1074_v36 = vld [vmem:[%s1200_s11 + $0x90] ss:$8 sps:$4 sm:$0xff]   ;;  %v1075_v37 = vld [vmem:[%s1200_s11 + $0x84] ss:$8 sps:$4 sm:$0xff]  }
  0x30   : > { %629 = vmatprep.subr.bf16.mxu0 %v1039_v11  ;;  %960 = vmatprep.subr.bf16.mxu1 %v1039_v11  ;;  %v1077_v38 = vld [vmem:[%s1200_s11 + $0x80] ss:$8 sps:$4 sm:$0xff]   ;;  %v1081_v40 = vld [vmem:[%s1202_s12 + $0x10] ss:$8 sps:$4 sm:$0xff]   ;;  %p950_p11 = scmp.ne.s32.totalorder %s1114_s17, 8 }
  0x31   : > { %v1078_v39 = vld [vmem:[%s1202_s12] ss:$8 sps:$4 sm:$0xff]   ;;  %v401_v51 = vld [vmem:[%s1408_s4 + $0x10] sm:$0xff]  ;;  %v402_v57 = vld [vmem:[%s1408_s4 + $0x18] sm:$0xff] }
  0x32   : > { %v399_v41 = vld [vmem:[%s1408_s4] sm:$0xff]  ;;  %v400_v45 = vld [vmem:[%s1408_s4 + $0x8] sm:$0xff]  ;;  %v405_v52 = vld [vmem:[%s1408_s4 + $0x30] sm:$0xff] }
  0x33   : > { %630 = vmatpush1.bf16.msra.mxu0 %v1041_v12  ;;  %976 = vmatpush1.bf16.msra.mxu1 %v1041_v12  ;;  %v403_v42 = vld [vmem:[%s1408_s4 + $0x20] sm:$0xff]  ;;  %v404_v46 = vld [vmem:[%s1408_s4 + $0x28] sm:$0xff]  ;;  %v406_v58 = vld [vmem:[%s1408_s4 + $0x38] sm:$0xff] }
  0x34   : > { %631 = vmatprep.subr.bf16.mxu0 %v1042_v13  ;;  %961 = vmatprep.subr.bf16.mxu1 %v1042_v13 }
  0x37   : > { %632 = vmatpush1.bf16.msra.mxu0 %v1044_v14  ;;  %977 = vmatpush1.bf16.msra.mxu1 %v1044_v14 }
  0x38   : > { %633 = vmatprep.subr.bf16.mxu0 %v1045_v15  ;;  %962 = vmatprep.subr.bf16.mxu1 %v1045_v15 }
  0x3b   : > { %634 = vmatpush1.bf16.msra.mxu0 %v1047_v16  ;;  %978 = vmatpush1.bf16.msra.mxu1 %v1047_v16 }
  0x3c   : > { %635 = vmatprep.subr.bf16.mxu0 %v1048_v17  ;;  %963 = vmatprep.subr.bf16.mxu1 %v1048_v17 }
  0x3f   : > { %636 = vmatpush1.bf16.msra.mxu0 %v1050_v19  ;;  %979 = vmatpush1.bf16.msra.mxu1 %v1050_v19 }
  0x40   : > { %637 = vmatprep.subr.bf16.mxu0 %v1051_v21  ;;  %964 = vmatprep.subr.bf16.mxu1 %v1051_v21 }
  0x43   : > { %638 = vmatpush1.bf16.msra.mxu0 %v1053_v22  ;;  %980 = vmatpush1.bf16.msra.mxu1 %v1053_v22 }
  0x44   : > { %639 = vmatprep.subr.bf16.mxu0 %v1054_v23  ;;  %965 = vmatprep.subr.bf16.mxu1 %v1054_v23 }
  0x47   : > { %640 = vmatpush2.bf16.msra.mxu0 %v1056_v24  ;;  %981 = vmatpush2.bf16.msra.mxu1 %v1056_v24 }
  0x48   : > { %641 = vmatprep.subr.bf16.mxu0 %v1057_v25  ;;  %966 = vmatprep.subr.bf16.mxu1 %v1057_v25 }
  0x4b   : > { %642 = vmatpush2.bf16.msra.mxu0 %v1059_v26  ;;  %982 = vmatpush2.bf16.msra.mxu1 %v1059_v26 }
  0x4c   : > { %643 = vmatprep.subr.bf16.mxu0 %v1060_v27  ;;  %967 = vmatprep.subr.bf16.mxu1 %v1060_v27 }
  0x4f   : > { %644 = vmatpush2.bf16.msra.mxu0 %v1062_v28  ;;  %983 = vmatpush2.bf16.msra.mxu1 %v1062_v28 }
  0x50   : > { %645 = vmatprep.subr.bf16.mxu0 %v1063_v29  ;;  %968 = vmatprep.subr.bf16.mxu1 %v1063_v29 }
  0x53   : > { %646 = vmatpush2.bf16.msra.mxu0 %v1065_v30  ;;  %984 = vmatpush2.bf16.msra.mxu1 %v1065_v30 }
  0x54   : > { %647 = vmatprep.subr.bf16.mxu0 %v1066_v31  ;;  %969 = vmatprep.subr.bf16.mxu1 %v1066_v31 }
  0x57   : > { %648 = vmatpush2.bf16.msra.mxu0 %v1068_v32  ;;  %985 = vmatpush2.bf16.msra.mxu1 %v1068_v32 }
  0x58   : > { %649 = vmatprep.subr.bf16.mxu0 %v1069_v33  ;;  %970 = vmatprep.subr.bf16.mxu1 %v1069_v33 }
  0x5b   : > { %650 = vmatpush2.bf16.msra.mxu0 %v1071_v34  ;;  %986 = vmatpush2.bf16.msra.mxu1 %v1071_v34 }
  0x5c   : > { %651 = vmatprep.subr.bf16.mxu0 %v1072_v35  ;;  %971 = vmatprep.subr.bf16.mxu1 %v1072_v35 }
  0x5f   : > { %652 = vmatpush2.bf16.msra.mxu0 %v1074_v36  ;;  %987 = vmatpush2.bf16.msra.mxu1 %v1074_v36 }
  0x60   : > { %653 = vmatprep.subr.bf16.mxu0 %v1075_v37  ;;  %972 = vmatprep.subr.bf16.mxu1 %v1075_v37 }
  0x63   : > { %654 = vmatpush2.bf16.msra.mxu0 %v1077_v38  ;;  %988 = vmatpush2.bf16.msra.mxu1 %v1077_v38 }
  0x66   : > { %656 = vmatmul.mubr.bf16.vlgmr.msra.gmra.mxu0 %v1078_v39  ;;  %666 = vmatmul.mubr.bf16.vlgmr.msra.gmra.mxu1 %v1081_v40 }
 0x126   : > { %v657_v43 = vpop.f32.mrf.mxu0  ;;  %v667_v44 = vpop.f32.mrf.mxu1 }
 0x127   : > { %v676_v47 = vadd.f32 %v657_v43, %v399_v41  ;;  %v680_v48 = vadd.f32 %v667_v44, %v403_v42 }
 0x128   : > { %v659_v49 = vpop.f32.mrf.mxu0  ;;  %v669_v50 = vpop.f32.mrf.mxu1 }
 0x129   : > { %684 = vst [vmem:[%s1408_s4] sm:$0xff] %v676_v47  ;;  %688 = vst [vmem:[%s1408_s4 + $0x20] sm:$0xff] %v680_v48  ;;  %v677_v53 = vadd.f32 %v659_v49, %v400_v45  ;;  %v681_v54 = vadd.f32 %v669_v50, %v404_v46 }
 0x12a   : > { %v661_v55 = vpop.f32.mrf.mxu0  ;;  %v671_v56 = vpop.f32.mrf.mxu1 }
 0x12b   : > { %685 = vst [vmem:[%s1408_s4 + $0x8] sm:$0xff] %v677_v53  ;;  %689 = vst [vmem:[%s1408_s4 + $0x28] sm:$0xff] %v681_v54  ;;  %v678_v59 = vadd.f32 %v661_v55, %v401_v51  ;;  %v682_v60 = vadd.f32 %v671_v56, %v405_v52  ;;  %695 = sbr.rel (%p950_p11) target bundleno = 322 (0x142), region = 82 }
 0x12c   : > { %v663_v61 = vpop.f32.mrf.mxu0  ;;  %v673_v62 = vpop.f32.mrf.mxu1 }
 0x12d   : > { %686 = vst [vmem:[%s1408_s4 + $0x10] sm:$0xff] %v678_v59  ;;  %690 = vst [vmem:[%s1408_s4 + $0x30] sm:$0xff] %v682_v60  ;;  %v679_v63 = vadd.f32 %v663_v61, %v402_v57  ;;  %v683_v0 = vadd.f32 %v673_v62, %v406_v58 }
 0x12f   : > { %687 = vst [vmem:[%s1408_s4 + $0x18] sm:$0xff] %v679_v63  ;;  %691 = vst [vmem:[%s1408_s4 + $0x38] sm:$0xff] %v683_v0 }
 0x130   : > { %v706_v1 = vlaneseq  ;;  %v704_v3 = vld [vmem:[%s1406_s2] sm:$0x3]  ;;  %v725_v9 = vld [vmem:[%s1407_s3 + $0x8] sm:$0xff]  ;;  %v726_v18 = vld [vmem:[%s1407_s3 + $0x10] sm:$0xff] }
 0x131   : > { %v696_v4 = vld [vmem:[%s1408_s4] sm:$0xff]  ;;  %v727_v19 = vld [vmem:[%s1407_s3 + $0x18] sm:$0xff]  ;;  %v729_v25 = vld [vmem:[%s1407_s3 + $0x28] sm:$0xff] }
 0x132   : > { %v707_v2 = vshrl.u32 %v706_v1, 7  ;;  %v697_v6 = vld [vmem:[%s1408_s4 + $0x8] sm:$0xff]  ;;  %v724_v8 = vld [vmem:[%s1407_s3] sm:$0xff]  ;;  %v730_v26 = vld [vmem:[%s1407_s3 + $0x30] sm:$0xff] }
 0x133   : > { %v700_v12 = vld [vmem:[%s1408_s4 + $0x20] sm:$0xff]  ;;  %v701_v15 = vld [vmem:[%s1408_s4 + $0x28] sm:$0xff]  ;;  %v731_v27 = vld [vmem:[%s1407_s3 + $0x38] sm:$0xff] }
 0x134   : > { %v708_v5 = vsub.s32 0, %v707_v2  ;;  %v712_v7 = vsub.s32 1, %v707_v2  ;;  %v698_v10 = vld [vmem:[%s1408_s4 + $0x10] sm:$0xff]  ;;  %v728_v20 = vld [vmem:[%s1407_s3 + $0x20] sm:$0xff] }
 0x135   : > { %v702_v16 = vld [vmem:[%s1408_s4 + $0x30] sm:$0xff] }
 0x136   : > { %v699_v11 = vld [vmem:[%s1408_s4 + $0x18] sm:$0xff]  ;;  %v709_v13 = vrot.slane %v704_v3, %v708_v5  ;;  %v713_v14 = vrot.slane %v704_v3, %v712_v7 }
 0x137   : > { %v703_v17 = vld [vmem:[%s1408_s4 + $0x38] sm:$0xff] }
 0x138   : > { %v716_v21 = vadd.f32 %v709_v13, %v696_v4  ;;  %v717_v22 = vadd.f32 %v713_v14, %v697_v6  ;;  %v718_v23 = vadd.f32 %v709_v13, %v698_v10  ;;  %v719_v24 = vadd.f32 %v713_v14, %v699_v11 }
 0x139   : > { %v720_v28 = vadd.f32 %v709_v13, %v700_v12  ;;  %v721_v29 = vadd.f32 %v713_v14, %v701_v15  ;;  %v722_v30 = vadd.f32 %v709_v13, %v702_v16  ;;  %v723_v31 = vadd.f32 %v713_v14, %v703_v17 }
 0x13a   : > { %v732_v32 = vadd.f32 %v724_v8, %v716_v21  ;;  %v733_v33 = vadd.f32 %v725_v9, %v717_v22  ;;  %v734_v34 = vadd.f32 %v726_v18, %v718_v23  ;;  %v735_v35 = vadd.f32 %v727_v19, %v719_v24 }
 0x13b   : > { %v736_v36 = vadd.f32 %v728_v20, %v720_v28  ;;  %v737_v37 = vadd.f32 %v729_v25, %v721_v29  ;;  %v738_v38 = vadd.f32 %v730_v26, %v722_v30  ;;  %v739_v39 = vadd.f32 %v731_v27, %v723_v31 }
 0x13c   : > { %v740_v40 = vmax.f32 %v732_v32, 0.0  ;;  %v741_v41 = vmax.f32 %v733_v33, 0.0  ;;  %v742_v42 = vmax.f32 %v734_v34, 0.0  ;;  %v743_v43 = vmax.f32 %v735_v35, 0.0 }
 0x13d   : > { %v744_v44 = vmax.f32 %v736_v36, 0.0  ;;  %v745_v45 = vmax.f32 %v737_v37, 0.0  ;;  %v746_v46 = vmax.f32 %v738_v38, 0.0  ;;  %v747_v47 = vmax.f32 %v739_v39, 0.0 }
 0x13e   : > { %748 = vst [vmem:[%s1408_s4] sm:$0xff] %v740_v40  ;;  %749 = vst [vmem:[%s1408_s4 + $0x8] sm:$0xff] %v741_v41 }
 0x13f   : > { %750 = vst [vmem:[%s1408_s4 + $0x10] sm:$0xff] %v742_v42  ;;  %751 = vst [vmem:[%s1408_s4 + $0x18] sm:$0xff] %v743_v43 }
 0x140   : > { %752 = vst [vmem:[%s1408_s4 + $0x20] sm:$0xff] %v744_v44  ;;  %753 = vst [vmem:[%s1408_s4 + $0x28] sm:$0xff] %v745_v45 }
 0x141   : > { %754 = vst [vmem:[%s1408_s4 + $0x30] sm:$0xff] %v746_v46  ;;  %755 = vst [vmem:[%s1408_s4 + $0x38] sm:$0xff] %v747_v47 }
 0x142 PF: > { %s14_s19 = sadd.s32 1, %s1122_s19   ;;  %s1409_s15 = smov %s1110_s16 }
 0x143   : > { %p11_p12 = scmp.ge.s32.totalorder %s14_s19, 11   ;;  %s1410_s16 = smov %s1185_s23 }
 0x144   : > { %s1411_s17 = smov %s1118_s18  ;;  %s1412_s18 = smov %s1414_s20 }
 0x145   :  { %13 = sbr.rel (!%p11_p12) target bundleno = 3 (0x3), region = 126 }

// kernel: _lambda_.24
= control target key start
LH: loop header
LB: loop body
LE: loop exit
PB: predicated region body
PF: predicated region fallthrough
CT: control target
= control target key end

     0   :  { %s1022_s12 = smov 0   ;;  %s1024_s13 = smov 0   ;;  %s1215_s0 = inlined_call_operand.vmem [shape: bf16[8,256], index: 0, kind: input, shape index: {}]   ;;  %s1216_s1 = inlined_call_operand.vmem [shape: bf16[256,512], index: 1, kind: input, shape index: {}]   ;;  %s1217_s2 = inlined_call_operand.vmem [shape: f32[1,512], index: 2, kind: input, shape index: {}]   ;;  %s1218_s3 = inlined_call_operand.vmem [shape: f32[8,512], index: 3, kind: output, shape index: {}]  }
   0x1   :  { %s1026_s14 = smov 0   ;;  %s1028_s15 = smov 0  }
   0x2   :  { %s1030_s16 = smov 0  }
   0x3 LB: > { %s28_s17 = sadd.s32 1, %s995_s15  ;;  %p76_p1 = scmp.ne.s32.totalorder %s987_s13, %s983_s12  ;;  %s999_s16 = sphi %s1030_s16, %s13_s16   ;;  %s995_s15 = sphi %s1028_s15, %s1222_s15   ;;  %s991_s14 = sphi %s1026_s14, %s1221_s14   ;;  %s987_s13 = sphi %s1024_s13, %s1220_s13   ;;  %s983_s12 = sphi %s1022_s12, %s1219_s12  }
   0x4   : > { %p30_p0 = scmp.ge.s32.totalorder %s28_s17, 2  ;;  %p77_p2 = scmp.eq.s32.totalorder %s999_s16, 0 }
   0x5   : > { %s69_s19 = sadd.s32 1, %s987_s13  ;;  %p824_p5 = scmp.ge.s32.totalorder %s999_s16, 2 }
   0x6   : > { %s1224_s17 = smov (%p30_p0, %s28_s17), 0  ;;  %p78_p3 = por %p77_p2, %p76_p1 }
   0x7   : > { %s65_s18 = ssub.s32 %s995_s15, %s1224_s17  ;;  %169 = sbr.rel (%p824_p5) target bundleno = 32 (0x20), region = 20 }
   0x8   : > { %p67_p4 = scmp.eq.s32.totalorder %s65_s18, 0 }
   0xa   : > { %s1057_s20 = scalar_select %p67_p4, %s987_s13, %s69_s19  }
   0xc   : > { %172 = sbr.rel (!%p78_p3) target bundleno = 32 (0x20), region = 24  ;;  %s174_s21 = sand.u32 (%p78_p3), 1, %s987_s13  }
   0xd   : > { %s869_s22 = sshll.u32 (%p78_p3), %s995_s15, 3  ;;  %s825_s23 = sshll.u32 (%p78_p3), %s174_s21, 8 }
   0xe   : > { %s1065_s26 = scalar_lea.vmem (%p78_p3), %s1216_s1, %s869_s22  ;;  %s1070_s27 = scalar_lea.vmem (%p78_p3), [#allocation2], %s825_s23 }
   0xf   : > { %v273_v0 = vld [vmem:[%s1065_s26] sm:$0xff] (%p78_p3)  ;;  %v275_v1 = vld [vmem:[%s1065_s26 + $0x10] sm:$0xff] (%p78_p3) }
  0x10   : > { %v277_v2 = vld [vmem:[%s1065_s26 + $0x20] sm:$0xff] (%p78_p3)  ;;  %274 = vst [vmem:[%s1070_s27] sm:$0xff] (%p78_p3), %v273_v0  ;;  %276 = vst [vmem:[%s1070_s27 + $0x8] sm:$0xff] (%p78_p3), %v275_v1  ;;  %v279_v3 = vld [vmem:[%s1065_s26 + $0x30] sm:$0xff] (%p78_p3) }
  0x11   : > { %278 = vst [vmem:[%s1070_s27 + $0x10] sm:$0xff] %v277_v2  ;;  %v281_v4 = vld [vmem:[%s1065_s26 + $0x40] sm:$0xff]  ;;  %v283_v5 = vld [vmem:[%s1065_s26 + $0x50] sm:$0xff]  ;;  %280 = vst [vmem:[%s1070_s27 + $0x18] sm:$0xff] %v279_v3 }
  0x12   : > { %282 = vst [vmem:[%s1070_s27 + $0x20] sm:$0xff] %v281_v4  ;;  %284 = vst [vmem:[%s1070_s27 + $0x28] sm:$0xff] %v283_v5  ;;  %v285_v6 = vld [vmem:[%s1065_s26 + $0x60] sm:$0xff]  ;;  %v287_v7 = vld [vmem:[%s1065_s26 + $0x70] sm:$0xff] }
  0x13   : > { %v289_v8 = vld [vmem:[%s1065_s26 + $0x80] sm:$0xff]  ;;  %286 = vst [vmem:[%s1070_s27 + $0x30] sm:$0xff] %v285_v6  ;;  %288 = vst [vmem:[%s1070_s27 + $0x38] sm:$0xff] %v287_v7  ;;  %v291_v9 = vld [vmem:[%s1065_s26 + $0x90] sm:$0xff] }
  0x14   : > { %290 = vst [vmem:[%s1070_s27 + $0x40] sm:$0xff] %v289_v8  ;;  %v293_v10 = vld [vmem:[%s1065_s26 + $0xa0] sm:$0xff]  ;;  %v295_v11 = vld [vmem:[%s1065_s26 + $0xb0] sm:$0xff]  ;;  %292 = vst [vmem:[%s1070_s27 + $0x48] sm:$0xff] %v291_v9 }
  0x15   : > { %294 = vst [vmem:[%s1070_s27 + $0x50] sm:$0xff] %v293_v10  ;;  %296 = vst [vmem:[%s1070_s27 + $0x58] sm:$0xff] %v295_v11  ;;  %v297_v12 = vld [vmem:[%s1065_s26 + $0xc0] sm:$0xff]  ;;  %v299_v13 = vld [vmem:[%s1065_s26 + $0xd0] sm:$0xff] }
  0x16   : > { %v301_v14 = vld [vmem:[%s1065_s26 + $0xe0] sm:$0xff]  ;;  %298 = vst [vmem:[%s1070_s27 + $0x60] sm:$0xff] %v297_v12  ;;  %300 = vst [vmem:[%s1070_s27 + $0x68] sm:$0xff] %v299_v13  ;;  %v303_v15 = vld [vmem:[%s1065_s26 + $0xf0] sm:$0xff] }
  0x17   : > { %302 = vst [vmem:[%s1070_s27 + $0x70] sm:$0xff] %v301_v14  ;;  %v305_v16 = vld [vmem:[%s1065_s26 + $0x100] sm:$0xff]  ;;  %v307_v17 = vld [vmem:[%s1065_s26 + $0x110] sm:$0xff]  ;;  %304 = vst [vmem:[%s1070_s27 + $0x78] sm:$0xff] %v303_v15 }
  0x18   : > { %306 = vst [vmem:[%s1070_s27 + $0x80] sm:$0xff] %v305_v16  ;;  %308 = vst [vmem:[%s1070_s27 + $0x88] sm:$0xff] %v307_v17  ;;  %v309_v18 = vld [vmem:[%s1065_s26 + $0x120] sm:$0xff]  ;;  %v311_v19 = vld [vmem:[%s1065_s26 + $0x130] sm:$0xff] }
  0x19   : > { %v313_v20 = vld [vmem:[%s1065_s26 + $0x140] sm:$0xff]  ;;  %310 = vst [vmem:[%s1070_s27 + $0x90] sm:$0xff] %v309_v18  ;;  %312 = vst [vmem:[%s1070_s27 + $0x98] sm:$0xff] %v311_v19  ;;  %v315_v21 = vld [vmem:[%s1065_s26 + $0x150] sm:$0xff] }
  0x1a   : > { %314 = vst [vmem:[%s1070_s27 + $0xa0] sm:$0xff] %v313_v20  ;;  %v317_v22 = vld [vmem:[%s1065_s26 + $0x160] sm:$0xff]  ;;  %v319_v23 = vld [vmem:[%s1065_s26 + $0x170] sm:$0xff]  ;;  %316 = vst [vmem:[%s1070_s27 + $0xa8] sm:$0xff] %v315_v21 }
  0x1b   : > { %318 = vst [vmem:[%s1070_s27 + $0xb0] sm:$0xff] %v317_v22  ;;  %320 = vst [vmem:[%s1070_s27 + $0xb8] sm:$0xff] %v319_v23  ;;  %v321_v24 = vld [vmem:[%s1065_s26 + $0x180] sm:$0xff]  ;;  %v323_v25 = vld [vmem:[%s1065_s26 + $0x190] sm:$0xff] }
  0x1c   : > { %v325_v26 = vld [vmem:[%s1065_s26 + $0x1a0] sm:$0xff]  ;;  %322 = vst [vmem:[%s1070_s27 + $0xc0] sm:$0xff] %v321_v24  ;;  %324 = vst [vmem:[%s1070_s27 + $0xc8] sm:$0xff] %v323_v25  ;;  %v327_v27 = vld [vmem:[%s1065_s26 + $0x1b0] sm:$0xff] }
  0x1d   : > { %326 = vst [vmem:[%s1070_s27 + $0xd0] sm:$0xff] %v325_v26  ;;  %v329_v28 = vld [vmem:[%s1065_s26 + $0x1c0] sm:$0xff]  ;;  %v331_v29 = vld [vmem:[%s1065_s26 + $0x1d0] sm:$0xff]  ;;  %328 = vst [vmem:[%s1070_s27 + $0xd8] sm:$0xff] %v327_v27 }
  0x1e   : > { %330 = vst [vmem:[%s1070_s27 + $0xe0] sm:$0xff] %v329_v28  ;;  %332 = vst [vmem:[%s1070_s27 + $0xe8] sm:$0xff] %v331_v29  ;;  %v333_v30 = vld [vmem:[%s1065_s26 + $0x1e0] sm:$0xff]  ;;  %v335_v31 = vld [vmem:[%s1065_s26 + $0x1f0] sm:$0xff] }
  0x1f   : > { %334 = vst [vmem:[%s1070_s27 + $0xf0] sm:$0xff] %v333_v30  ;;  %336 = vst [vmem:[%s1070_s27 + $0xf8] sm:$0xff] %v335_v31 }
  0x20 PF: > { %p828_p6 = scmp.ge.s32.totalorder %s999_s16, 1  ;;  %p349_p7 = scmp.lt.s32.totalorder %s999_s16, 3 }
  0x22   : > { %p350_p8 = pnand %p828_p6, %p349_p7 }
  0x23   : > { %s356_s28 = sand.u32 (!%p350_p8), 1, %s983_s12   ;;  %s830_s4 = sshll.u32 (!%p350_p8), %s991_s14, 1 }
  0x24   : > { %353 = sbr.rel (%p350_p8) target bundleno = 312 (0x138), region = 66  ;;  %s829_s5 = sshll.u32 (!%p350_p8), %s356_s28, 8 }
  0x25   : > { %p409_p9 = scmp.lt.s32.totalorder (!%p350_p8), %s830_s4, 3  ;;  %s1144_s6 = scalar_lea.vmem (!%p350_p8), [#allocation2], %s829_s5 }
  0x29   : > { %v1139_v32 = vld [vmem:[%s1215_s0] sm:$0xff]  ;;  %v911_v34 = vld [vmem:[%s1144_s6 + $0x74] ss:$8 sps:$4 sm:$0xff]   ;;  %s1226_s4 = smov (!%p409_p9, %s830_s4), 3  ;;  %v913_v35 = vld [vmem:[%s1144_s6 + $0x70] ss:$8 sps:$4 sm:$0xff]   ;;  %v683_v5 = vlaneseq }
  0x2a   : > { %v834_v33 = vcombine.high %v1139_v32, %v1139_v32  ;;  %631 = vmatprep.subr.bf16.mxu0 %v911_v34  ;;  %v914_v36 = vld [vmem:[%s1144_s6 + $0x64] ss:$8 sps:$4 sm:$0xff]   ;;  %s832_s7 = sshll.u32 %s1226_s4, 3  ;;  %v916_v37 = vld [vmem:[%s1144_s6 + $0x60] ss:$8 sps:$4 sm:$0xff]   ;;  %v1001_v39 = vmov 0.0   ;;  %v833_v3 = vcombine.low %v1139_v32, %v1139_v32  ;;  %s411_s14 = scalar_lea.vmem %s1217_s2, %s1226_s4 }
  0x2b   : > { %632 = vmatpush1.bf16.msra.mxu0 %v913_v35  ;;  %s1156_s10 = scalar_lea.vmem %s1218_s3, %s832_s7  ;;  %v917_v38 = vld [vmem:[%s1144_s6 + $0x54] ss:$8 sps:$4 sm:$0xff]   ;;  %v919_v40 = vld [vmem:[%s1144_s6 + $0x50] ss:$8 sps:$4 sm:$0xff]   ;;  %v920_v41 = vld [vmem:[%s1144_s6 + $0x44] ss:$8 sps:$4 sm:$0xff]  }
  0x2c   : > { %663 = vmatprep.mubr.bf16.mxu0 %v834_v33  ;;  %633 = vmatprep.subr.bf16.mxu0 %v914_v36  ;;  %427 = vst [vmem:[%s1156_s10] sm:$0xff] %v1001_v39  ;;  %428 = vst [vmem:[%s1156_s10 + $0x8] sm:$0xff] %v1001_v39  ;;  %v922_v42 = vld [vmem:[%s1144_s6 + $0x40] ss:$8 sps:$4 sm:$0xff]   ;;  %v923_v43 = vld [vmem:[%s1144_s6 + $0x34] ss:$8 sps:$4 sm:$0xff]   ;;  %v684_v9 = vshrl.u32 %v683_v5, 7 }
  0x2d   : > { %v925_v44 = vld [vmem:[%s1144_s6 + $0x30] ss:$8 sps:$4 sm:$0xff]   ;;  %v926_v45 = vld [vmem:[%s1144_s6 + $0x24] ss:$8 sps:$4 sm:$0xff]   ;;  %v928_v46 = vld [vmem:[%s1144_s6 + $0x20] ss:$8 sps:$4 sm:$0xff]  }
  0x2e   : > { %v929_v47 = vld [vmem:[%s1144_s6 + $0x14] ss:$8 sps:$4 sm:$0xff]   ;;  %v931_v48 = vld [vmem:[%s1144_s6 + $0x10] ss:$8 sps:$4 sm:$0xff]   ;;  %v932_v49 = vld [vmem:[%s1144_s6 + $0x4] ss:$8 sps:$4 sm:$0xff]  }
  0x2f   : > { %634 = vmatpush1.bf16.msra.mxu0 %v916_v37  ;;  %v934_v50 = vld [vmem:[%s1144_s6] ss:$8 sps:$4 sm:$0xff]   ;;  %v935_v51 = vld [vmem:[%s1144_s6 + $0xf4] ss:$8 sps:$4 sm:$0xff]   ;;  %v937_v52 = vld [vmem:[%s1144_s6 + $0xf0] ss:$8 sps:$4 sm:$0xff]  }
  0x30   : > { %635 = vmatprep.subr.bf16.mxu0 %v917_v38  ;;  %v938_v53 = vld [vmem:[%s1144_s6 + $0xe4] ss:$8 sps:$4 sm:$0xff]   ;;  %v940_v54 = vld [vmem:[%s1144_s6 + $0xe0] ss:$8 sps:$4 sm:$0xff]   ;;  %v941_v55 = vld [vmem:[%s1144_s6 + $0xd4] ss:$8 sps:$4 sm:$0xff]  }
  0x31   : > { %v943_v56 = vld [vmem:[%s1144_s6 + $0xd0] ss:$8 sps:$4 sm:$0xff]   ;;  %v944_v57 = vld [vmem:[%s1144_s6 + $0xc4] ss:$8 sps:$4 sm:$0xff]   ;;  %v946_v58 = vld [vmem:[%s1144_s6 + $0xc0] ss:$8 sps:$4 sm:$0xff]  }
  0x32   : > { %v947_v59 = vld [vmem:[%s1144_s6 + $0xb4] ss:$8 sps:$4 sm:$0xff]   ;;  %v949_v60 = vld [vmem:[%s1144_s6 + $0xb0] ss:$8 sps:$4 sm:$0xff]   ;;  %v950_v61 = vld [vmem:[%s1144_s6 + $0xa4] ss:$8 sps:$4 sm:$0xff]  }
  0x33   : > { %636 = vmatpush1.bf16.msra.mxu0 %v919_v40  ;;  %v952_v62 = vld [vmem:[%s1144_s6 + $0xa0] ss:$8 sps:$4 sm:$0xff]   ;;  %v953_v63 = vld [vmem:[%s1144_s6 + $0x94] ss:$8 sps:$4 sm:$0xff]   ;;  %v955_v0 = vld [vmem:[%s1144_s6 + $0x90] ss:$8 sps:$4 sm:$0xff]  }
  0x34   : > { %637 = vmatprep.subr.bf16.mxu0 %v920_v41  ;;  %v956_v1 = vld [vmem:[%s1144_s6 + $0x84] ss:$8 sps:$4 sm:$0xff]   ;;  %v958_v2 = vld [vmem:[%s1144_s6 + $0x80] ss:$8 sps:$4 sm:$0xff]   ;;  %v685_v11 = vsub.s32 0, %v684_v9  ;;  %v689_v12 = vsub.s32 1, %v684_v9 }
  0x35   : > { %v429_v4 = vld [vmem:[%s1156_s10] sm:$0xff] }
  0x36   : > { %v681_v14 = vld [vmem:[%s411_s14] sm:$0x3] }
  0x37   : > { %638 = vmatpush1.bf16.msra.mxu0 %v922_v42  ;;  %v686_v15 = vrot.slane %v681_v14, %v685_v11  ;;  %v690_v16 = vrot.slane %v681_v14, %v689_v12 }
  0x38   : > { %639 = vmatprep.subr.bf16.mxu0 %v923_v43 }
  0x3b   : > { %640 = vmatpush1.bf16.msra.mxu0 %v925_v44 }
  0x3c   : > { %641 = vmatprep.subr.bf16.mxu0 %v926_v45 }
  0x3f   : > { %642 = vmatpush1.bf16.msra.mxu0 %v928_v46 }
  0x40   : > { %643 = vmatprep.subr.bf16.mxu0 %v929_v47 }
  0x43   : > { %644 = vmatpush1.bf16.msra.mxu0 %v931_v48 }
  0x44   : > { %645 = vmatprep.subr.bf16.mxu0 %v932_v49 }
  0x47   : > { %646 = vmatpush1.bf16.msra.mxu0 %v934_v50 }
  0x48   : > { %647 = vmatprep.subr.bf16.mxu0 %v935_v51 }
  0x4b   : > { %648 = vmatpush2.bf16.msra.mxu0 %v937_v52 }
  0x4c   : > { %649 = vmatprep.subr.bf16.mxu0 %v938_v53 }
  0x4f   : > { %650 = vmatpush2.bf16.msra.mxu0 %v940_v54 }
  0x50   : > { %651 = vmatprep.subr.bf16.mxu0 %v941_v55 }
  0x53   : > { %652 = vmatpush2.bf16.msra.mxu0 %v943_v56 }
  0x54   : > { %653 = vmatprep.subr.bf16.mxu0 %v944_v57 }
  0x57   : > { %654 = vmatpush2.bf16.msra.mxu0 %v946_v58 }
  0x58   : > { %655 = vmatprep.subr.bf16.mxu0 %v947_v59 }
  0x5b   : > { %656 = vmatpush2.bf16.msra.mxu0 %v949_v60 }
  0x5c   : > { %657 = vmatprep.subr.bf16.mxu0 %v950_v61 }
  0x5f   : > { %658 = vmatpush2.bf16.msra.mxu0 %v952_v62 }
  0x60   : > { %659 = vmatprep.subr.bf16.mxu0 %v953_v63 }
  0x63   : > { %660 = vmatpush2.bf16.msra.mxu0 %v955_v0 }
  0x64   : > { %661 = vmatprep.subr.bf16.mxu0 %v956_v1 }
  0x67   : > { %662 = vmatpush2.bf16.msra.mxu0 %v958_v2 }
  0x6a   : > { %664 = vmatmul.mubr.bf16.vlgmr.msra.gmra.mxu0 %v833_v3 }
 0x12a   : > { %v665_v6 = vpop.f32.mrf.mxu0 }
 0x12b   : > { %v672_v7 = vadd.f32 %v665_v6, %v429_v4 }
 0x12c   : > { %v667_v8 = vpop.f32.mrf.mxu0 }
 0x12d   : > { %674 = vst [vmem:[%s1156_s10] sm:$0xff] %v672_v7  ;;  %675 = vst [vmem:[%s1156_s10 + $0x8] sm:$0xff] %v667_v8  ;;  %v694_v19 = vadd.f32 %v690_v16, %v667_v8 }
 0x12e   : > { %v669_v10 = vpop.f32.mrf.mxu0 }
 0x12f   : > { %696 = vst [vmem:[%s1156_s10 + $0x8] sm:$0xff] %v694_v19 }
 0x130   : > { %v670_v13 = vpop.f32.mrf.mxu0 }
 0x134   : > { %v679_v17 = vld [vmem:[%s1156_s10] sm:$0xff] }
 0x135   : > { %v693_v18 = vadd.f32 %v686_v15, %v679_v17 }
 0x137   : > { %695 = vst [vmem:[%s1156_s10] sm:$0xff] %v693_v18 }
 0x138 PF: > { %s13_s16 = sadd.s32 1, %s999_s16   ;;  %s1219_s12 = smov %s987_s13 }
 0x139   : > { %p10_p10 = scmp.ge.s32.totalorder %s13_s16, 4   ;;  %s1220_s13 = smov %s1057_s20 }
 0x13a   : > { %s1221_s14 = smov %s995_s15  ;;  %s1222_s15 = smov %s1224_s17 }
 0x13b   :  { %12 = sbr.rel (!%p10_p10) target bundleno = 3 (0x3), region = 119 }

// kernel: _lambda_.23
= control target key start
LH: loop header
LB: loop body
LE: loop exit
PB: predicated region body
PF: predicated region fallthrough
CT: control target
= control target key end

     0   :  { %s1062_s12 = smov 0   ;;  %s1064_s13 = smov 0   ;;  %s1285_s0 = inlined_call_operand.vmem [shape: bf16[8,2304], index: 0, kind: input, shape index: {}]   ;;  %s1286_s1 = inlined_call_operand.vmem [shape: bf16[2304,512], index: 1, kind: input, shape index: {}]   ;;  %s1287_s2 = inlined_call_operand.vmem [shape: f32[1,512], index: 2, kind: input, shape index: {}]   ;;  %s1288_s3 = inlined_call_operand.vmem [shape: f32[8,512], index: 3, kind: output, shape index: {}]  }
   0x1   :  { %s1066_s14 = smov 0   ;;  %s1068_s15 = smov 0  }
   0x2   :  { %s1070_s16 = smov 0   ;;  %s1072_s17 = smov 0  }
   0x3   :  { %s1074_s18 = smov 0  }
   0x4 LB: > { %s25_s19 = sadd.s32 1, %s1031_s16  ;;  %s28_s20 = sadd.s32 1, %s1035_s17  ;;  %s1039_s18 = sphi %s1074_s18, %s13_s18   ;;  %s1035_s17 = sphi %s1072_s17, %s1294_s17   ;;  %s1031_s16 = sphi %s1070_s16, %s1293_s16   ;;  %s1027_s15 = sphi %s1068_s15, %s1292_s15   ;;  %s1023_s14 = sphi %s1066_s14, %s1291_s14   ;;  %s1019_s13 = sphi %s1064_s13, %s1290_s13   ;;  %s1015_s12 = sphi %s1062_s12, %s1289_s12  }
   0x5   : > { %p26_p0 = scmp.ge.s32.totalorder %s25_s19, 9  ;;  %p76_p1 = scmp.ne.s32.totalorder %s1019_s13, %s1015_s12 }
   0x6   : > { %p77_p2 = scmp.eq.s32.totalorder %s1039_s18, 0  ;;  %s69_s24 = sadd.s32 1, %s1019_s13 }
   0x7   : > { %s1296_s19 = smov (%p26_p0, %s25_s19), 0  ;;  %s1298_s20 = smov (!%p26_p0, %s28_s20), %s1035_s17 }
   0x8   : > { %p78_p3 = por %p77_p2, %p76_p1  ;;  %p30_p4 = scmp.ge.s32.totalorder %s1298_s20, 2 }
   0x9   : > { %s64_s21 = ssub.s32 %s1031_s16, %s1296_s19  ;;  %p826_p6 = scmp.ge.s32.totalorder %s1039_s18, 18 }
   0xa   : > { %s1300_s20 = smov (%p30_p4, %s1298_s20), 0 }
   0xb   : > { %s65_s22 = ssub.s32 %s1035_s17, %s1300_s20  ;;  %156 = sbr.rel (%p826_p6) target bundleno = 39 (0x27), region = 16 }
   0xc   : > { %s66_s23 = sor.u32 %s65_s22, %s64_s21 }
   0xd   : > { %p67_p5 = scmp.eq.s32.totalorder %s66_s23, 0 }
   0xf   : > { %s1113_s25 = scalar_select %p67_p5, %s1019_s13, %s69_s24  }
  0x10   : > { %172 = sbr.rel (!%p78_p3) target bundleno = 39 (0x27), region = 24  ;;  %s174_s26 = sand.u32 (%p78_p3), 1, %s1019_s13  }
  0x11   : > { %s829_s27 = sshll.u32 (%p78_p3), %s1035_s17, 1  ;;  %s827_s28 = sshll.u32 (%p78_p3), %s174_s26, 8 }
  0x12   : > { %s877_s29 = sshll.u32 (%p78_p3), %s1031_s16, 7  ;;  %s1127_s8 = scalar_lea.vmem (%p78_p3), [#allocation2], %s827_s28 }
  0x13   : > { %s180_s30 = sadd.s32 (%p78_p3), %s877_s29, %s829_s27 }
  0x14   : > { %s831_s4 = sshll.u32 (%p78_p3), %s180_s30, 2 }
  0x15   : > { %s1122_s7 = scalar_lea.vmem %s1286_s1, %s831_s4 }
  0x16   : > { %v273_v0 = vld [vmem:[%s1122_s7] sm:$0xff]  ;;  %v275_v1 = vld [vmem:[%s1122_s7 + $0x10] sm:$0xff] }
  0x17   : > { %v277_v2 = vld [vmem:[%s1122_s7 + $0x20] sm:$0xff]  ;;  %274 = vst [vmem:[%s1127_s8] sm:$0xff] %v273_v0  ;;  %276 = vst [vmem:[%s1127_s8 + $0x8] sm:$0xff] %v275_v1  ;;  %v279_v3 = vld [vmem:[%s1122_s7 + $0x30] sm:$0xff] }
  0x18   : > { %278 = vst [vmem:[%s1127_s8 + $0x10] sm:$0xff] %v277_v2  ;;  %v281_v4 = vld [vmem:[%s1122_s7 + $0x40] sm:$0xff]  ;;  %v283_v5 = vld [vmem:[%s1122_s7 + $0x50] sm:$0xff]  ;;  %280 = vst [vmem:[%s1127_s8 + $0x18] sm:$0xff] %v279_v3 }
  0x19   : > { %282 = vst [vmem:[%s1127_s8 + $0x20] sm:$0xff] %v281_v4  ;;  %284 = vst [vmem:[%s1127_s8 + $0x28] sm:$0xff] %v283_v5  ;;  %v285_v6 = vld [vmem:[%s1122_s7 + $0x60] sm:$0xff]  ;;  %v287_v7 = vld [vmem:[%s1122_s7 + $0x70] sm:$0xff] }
  0x1a   : > { %v289_v8 = vld [vmem:[%s1122_s7 + $0x80] sm:$0xff]  ;;  %286 = vst [vmem:[%s1127_s8 + $0x30] sm:$0xff] %v285_v6  ;;  %288 = vst [vmem:[%s1127_s8 + $0x38] sm:$0xff] %v287_v7  ;;  %v291_v9 = vld [vmem:[%s1122_s7 + $0x90] sm:$0xff] }
  0x1b   : > { %290 = vst [vmem:[%s1127_s8 + $0x40] sm:$0xff] %v289_v8  ;;  %v293_v10 = vld [vmem:[%s1122_s7 + $0xa0] sm:$0xff]  ;;  %v295_v11 = vld [vmem:[%s1122_s7 + $0xb0] sm:$0xff]  ;;  %292 = vst [vmem:[%s1127_s8 + $0x48] sm:$0xff] %v291_v9 }
  0x1c   : > { %294 = vst [vmem:[%s1127_s8 + $0x50] sm:$0xff] %v293_v10  ;;  %296 = vst [vmem:[%s1127_s8 + $0x58] sm:$0xff] %v295_v11  ;;  %v297_v12 = vld [vmem:[%s1122_s7 + $0xc0] sm:$0xff]  ;;  %v299_v13 = vld [vmem:[%s1122_s7 + $0xd0] sm:$0xff] }
  0x1d   : > { %v301_v14 = vld [vmem:[%s1122_s7 + $0xe0] sm:$0xff]  ;;  %298 = vst [vmem:[%s1127_s8 + $0x60] sm:$0xff] %v297_v12  ;;  %300 = vst [vmem:[%s1127_s8 + $0x68] sm:$0xff] %v299_v13  ;;  %v303_v15 = vld [vmem:[%s1122_s7 + $0xf0] sm:$0xff] }
  0x1e   : > { %302 = vst [vmem:[%s1127_s8 + $0x70] sm:$0xff] %v301_v14  ;;  %v305_v16 = vld [vmem:[%s1122_s7 + $0x100] sm:$0xff]  ;;  %v307_v17 = vld [vmem:[%s1122_s7 + $0x110] sm:$0xff]  ;;  %304 = vst [vmem:[%s1127_s8 + $0x78] sm:$0xff] %v303_v15 }
  0x1f   : > { %306 = vst [vmem:[%s1127_s8 + $0x80] sm:$0xff] %v305_v16  ;;  %308 = vst [vmem:[%s1127_s8 + $0x88] sm:$0xff] %v307_v17  ;;  %v309_v18 = vld [vmem:[%s1122_s7 + $0x120] sm:$0xff]  ;;  %v311_v19 = vld [vmem:[%s1122_s7 + $0x130] sm:$0xff] }
  0x20   : > { %v313_v20 = vld [vmem:[%s1122_s7 + $0x140] sm:$0xff]  ;;  %310 = vst [vmem:[%s1127_s8 + $0x90] sm:$0xff] %v309_v18  ;;  %312 = vst [vmem:[%s1127_s8 + $0x98] sm:$0xff] %v311_v19  ;;  %v315_v21 = vld [vmem:[%s1122_s7 + $0x150] sm:$0xff] }
  0x21   : > { %314 = vst [vmem:[%s1127_s8 + $0xa0] sm:$0xff] %v313_v20  ;;  %v317_v22 = vld [vmem:[%s1122_s7 + $0x160] sm:$0xff]  ;;  %v319_v23 = vld [vmem:[%s1122_s7 + $0x170] sm:$0xff]  ;;  %316 = vst [vmem:[%s1127_s8 + $0xa8] sm:$0xff] %v315_v21 }
  0x22   : > { %318 = vst [vmem:[%s1127_s8 + $0xb0] sm:$0xff] %v317_v22  ;;  %320 = vst [vmem:[%s1127_s8 + $0xb8] sm:$0xff] %v319_v23  ;;  %v321_v24 = vld [vmem:[%s1122_s7 + $0x180] sm:$0xff]  ;;  %v323_v25 = vld [vmem:[%s1122_s7 + $0x190] sm:$0xff] }
  0x23   : > { %v325_v26 = vld [vmem:[%s1122_s7 + $0x1a0] sm:$0xff]  ;;  %322 = vst [vmem:[%s1127_s8 + $0xc0] sm:$0xff] %v321_v24  ;;  %324 = vst [vmem:[%s1127_s8 + $0xc8] sm:$0xff] %v323_v25  ;;  %v327_v27 = vld [vmem:[%s1122_s7 + $0x1b0] sm:$0xff] }
  0x24   : > { %326 = vst [vmem:[%s1127_s8 + $0xd0] sm:$0xff] %v325_v26  ;;  %v329_v28 = vld [vmem:[%s1122_s7 + $0x1c0] sm:$0xff]  ;;  %v331_v29 = vld [vmem:[%s1122_s7 + $0x1d0] sm:$0xff]  ;;  %328 = vst [vmem:[%s1127_s8 + $0xd8] sm:$0xff] %v327_v27 }
  0x25   : > { %330 = vst [vmem:[%s1127_s8 + $0xe0] sm:$0xff] %v329_v28  ;;  %332 = vst [vmem:[%s1127_s8 + $0xe8] sm:$0xff] %v331_v29  ;;  %v333_v30 = vld [vmem:[%s1122_s7 + $0x1e0] sm:$0xff]  ;;  %v335_v31 = vld [vmem:[%s1122_s7 + $0x1f0] sm:$0xff] }
  0x26   : > { %334 = vst [vmem:[%s1127_s8 + $0xf0] sm:$0xff] %v333_v30  ;;  %336 = vst [vmem:[%s1127_s8 + $0xf8] sm:$0xff] %v335_v31 }
  0x27 PF: > { %p832_p7 = scmp.ge.s32.totalorder %s1039_s18, 1  ;;  %p349_p8 = scmp.lt.s32.totalorder %s1039_s18, 19 }
  0x29   : > { %p350_p9 = pnand %p832_p7, %p349_p8 }
  0x2a   : > { %s356_s9 = sand.u32 (!%p350_p9), 1, %s1015_s12   ;;  %s834_s10 = sshll.u32 (!%p350_p9), %s1023_s14, 1 }
  0x2b   : > { %353 = sbr.rel (%p350_p9) target bundleno = 335 (0x14f), region = 66  ;;  %s833_s11 = sshll.u32 (!%p350_p9), %s356_s9, 8 }
  0x2c   : > { %p399_p10 = scmp.lt.s32.totalorder (!%p350_p9), %s834_s10, 17  ;;  %s836_s21 = sshll.u32 (!%p350_p9), %s1027_s15, 1 }
  0x2d   : > { %p409_p11 = scmp.lt.s32.totalorder (!%p350_p9), %s836_s21, 3  ;;  %s1212_s5 = scalar_lea.vmem (!%p350_p9), [#allocation2], %s833_s11 }
  0x2e   : > { %p839_p12 = scmp.ne.s32.totalorder (!%p350_p9), %s1023_s14, 0 }
  0x30   : > { %s1302_s10 = smov (!%p399_p10, %s834_s10), 17  ;;  %s1304_s21 = smov (!%p409_p11, %s836_s21), 3 }
  0x31   : > { %s835_s22 = sshll.u32 %s1302_s10, 2  ;;  %s411_s12 = scalar_lea.vmem %s1287_s2, %s1304_s21 }
  0x32   : > { %s1198_s26 = scalar_lea.vmem %s1285_s0, %s835_s22  ;;  %s838_s29 = sshll.u32 %s1304_s21, 3 }
  0x33   : > { %s1210_s15 = scalar_lea.vmem %s1288_s3, %s838_s29  ;;  %426 = sbr.rel (%p839_p12) target bundleno = 58 (0x3a), region = 74 }
  0x38   : > { %v1041_v32 = vmov 0.0  }
  0x39   : > { %427 = vst [vmem:[%s1210_s15] sm:$0xff] %v1041_v32  ;;  %428 = vst [vmem:[%s1210_s15 + $0x8] sm:$0xff] %v1041_v32 }
  0x3a PF: > { %v935_v33 = vld [vmem:[%s1212_s5 + $0x74] ss:$8 sps:$4 sm:$0xff]   ;;  %v937_v34 = vld [vmem:[%s1212_s5 + $0x70] ss:$8 sps:$4 sm:$0xff]   ;;  %v938_v35 = vld [vmem:[%s1212_s5 + $0x64] ss:$8 sps:$4 sm:$0xff]  }
  0x3b   : > { %631 = vmatprep.subr.bf16.mxu0 %v935_v33  ;;  %v940_v36 = vld [vmem:[%s1212_s5 + $0x60] ss:$8 sps:$4 sm:$0xff]   ;;  %v941_v37 = vld [vmem:[%s1212_s5 + $0x54] ss:$8 sps:$4 sm:$0xff]   ;;  %v943_v38 = vld [vmem:[%s1212_s5 + $0x50] ss:$8 sps:$4 sm:$0xff]  }
  0x3c   : > { %632 = vmatpush1.bf16.msra.mxu0 %v937_v34  ;;  %v944_v39 = vld [vmem:[%s1212_s5 + $0x44] ss:$8 sps:$4 sm:$0xff]   ;;  %v946_v40 = vld [vmem:[%s1212_s5 + $0x40] ss:$8 sps:$4 sm:$0xff]   ;;  %v947_v41 = vld [vmem:[%s1212_s5 + $0x34] ss:$8 sps:$4 sm:$0xff]  }
  0x3d   : > { %633 = vmatprep.subr.bf16.mxu0 %v938_v35  ;;  %v949_v42 = vld [vmem:[%s1212_s5 + $0x30] ss:$8 sps:$4 sm:$0xff]   ;;  %v950_v43 = vld [vmem:[%s1212_s5 + $0x24] ss:$8 sps:$4 sm:$0xff]   ;;  %v952_v44 = vld [vmem:[%s1212_s5 + $0x20] ss:$8 sps:$4 sm:$0xff]  }
  0x3e   : > { %v953_v45 = vld [vmem:[%s1212_s5 + $0x14] ss:$8 sps:$4 sm:$0xff]   ;;  %v431_v46 = vld [vmem:[%s1198_s26] sm:$0xff]  ;;  %v955_v48 = vld [vmem:[%s1212_s5 + $0x10] ss:$8 sps:$4 sm:$0xff]   ;;  %p874_p13 = scmp.ne.s32.totalorder %s1023_s14, 8 }
  0x3f   : > { %v841_v47 = vcombine.high %v431_v46, %v431_v46  ;;  %v956_v49 = vld [vmem:[%s1212_s5 + $0x4] ss:$8 sps:$4 sm:$0xff]   ;;  %v958_v50 = vld [vmem:[%s1212_s5] ss:$8 sps:$4 sm:$0xff]   ;;  %v959_v51 = vld [vmem:[%s1212_s5 + $0xf4] ss:$8 sps:$4 sm:$0xff]   ;;  %v840_v3 = vcombine.low %v431_v46, %v431_v46 }
  0x40   : > { %634 = vmatpush1.bf16.msra.mxu0 %v940_v36  ;;  %v961_v52 = vld [vmem:[%s1212_s5 + $0xf0] ss:$8 sps:$4 sm:$0xff]   ;;  %v962_v53 = vld [vmem:[%s1212_s5 + $0xe4] ss:$8 sps:$4 sm:$0xff]   ;;  %v964_v54 = vld [vmem:[%s1212_s5 + $0xe0] ss:$8 sps:$4 sm:$0xff]  }
  0x41   : > { %635 = vmatprep.subr.bf16.mxu0 %v941_v37  ;;  %663 = vmatprep.mubr.bf16.mxu0 %v841_v47  ;;  %v965_v55 = vld [vmem:[%s1212_s5 + $0xd4] ss:$8 sps:$4 sm:$0xff]   ;;  %v967_v56 = vld [vmem:[%s1212_s5 + $0xd0] ss:$8 sps:$4 sm:$0xff]   ;;  %v968_v57 = vld [vmem:[%s1212_s5 + $0xc4] ss:$8 sps:$4 sm:$0xff]  }
  0x42   : > { %v970_v58 = vld [vmem:[%s1212_s5 + $0xc0] ss:$8 sps:$4 sm:$0xff]   ;;  %v971_v59 = vld [vmem:[%s1212_s5 + $0xb4] ss:$8 sps:$4 sm:$0xff]   ;;  %v973_v60 = vld [vmem:[%s1212_s5 + $0xb0] ss:$8 sps:$4 sm:$0xff]  }
  0x43   : > { %v974_v61 = vld [vmem:[%s1212_s5 + $0xa4] ss:$8 sps:$4 sm:$0xff]   ;;  %v976_v62 = vld [vmem:[%s1212_s5 + $0xa0] ss:$8 sps:$4 sm:$0xff]   ;;  %v977_v63 = vld [vmem:[%s1212_s5 + $0x94] ss:$8 sps:$4 sm:$0xff]  }
  0x44   : > { %636 = vmatpush1.bf16.msra.mxu0 %v943_v38  ;;  %v979_v0 = vld [vmem:[%s1212_s5 + $0x90] ss:$8 sps:$4 sm:$0xff]   ;;  %v980_v1 = vld [vmem:[%s1212_s5 + $0x84] ss:$8 sps:$4 sm:$0xff]   ;;  %v982_v2 = vld [vmem:[%s1212_s5 + $0x80] ss:$8 sps:$4 sm:$0xff]  }
  0x45   : > { %637 = vmatprep.subr.bf16.mxu0 %v944_v39  ;;  %v429_v4 = vld [vmem:[%s1210_s15] sm:$0xff]  ;;  %v430_v6 = vld [vmem:[%s1210_s15 + $0x8] sm:$0xff] }
  0x48   : > { %638 = vmatpush1.bf16.msra.mxu0 %v946_v40 }
  0x49   : > { %639 = vmatprep.subr.bf16.mxu0 %v947_v41 }
  0x4c   : > { %640 = vmatpush1.bf16.msra.mxu0 %v949_v42 }
  0x4d   : > { %641 = vmatprep.subr.bf16.mxu0 %v950_v43 }
  0x50   : > { %642 = vmatpush1.bf16.msra.mxu0 %v952_v44 }
  0x51   : > { %643 = vmatprep.subr.bf16.mxu0 %v953_v45 }
  0x54   : > { %644 = vmatpush1.bf16.msra.mxu0 %v955_v48 }
  0x55   : > { %645 = vmatprep.subr.bf16.mxu0 %v956_v49 }
  0x58   : > { %646 = vmatpush1.bf16.msra.mxu0 %v958_v50 }
  0x59   : > { %647 = vmatprep.subr.bf16.mxu0 %v959_v51 }
  0x5c   : > { %648 = vmatpush2.bf16.msra.mxu0 %v961_v52 }
  0x5d   : > { %649 = vmatprep.subr.bf16.mxu0 %v962_v53 }
  0x60   : > { %650 = vmatpush2.bf16.msra.mxu0 %v964_v54 }
  0x61   : > { %651 = vmatprep.subr.bf16.mxu0 %v965_v55 }
  0x64   : > { %652 = vmatpush2.bf16.msra.mxu0 %v967_v56 }
  0x65   : > { %653 = vmatprep.subr.bf16.mxu0 %v968_v57 }
  0x68   : > { %654 = vmatpush2.bf16.msra.mxu0 %v970_v58 }
  0x69   : > { %655 = vmatprep.subr.bf16.mxu0 %v971_v59 }
  0x6c   : > { %656 = vmatpush2.bf16.msra.mxu0 %v973_v60 }
  0x6d   : > { %657 = vmatprep.subr.bf16.mxu0 %v974_v61 }
  0x70   : > { %658 = vmatpush2.bf16.msra.mxu0 %v976_v62 }
  0x71   : > { %659 = vmatprep.subr.bf16.mxu0 %v977_v63 }
  0x74   : > { %660 = vmatpush2.bf16.msra.mxu0 %v979_v0 }
  0x75   : > { %661 = vmatprep.subr.bf16.mxu0 %v980_v1 }
  0x78   : > { %662 = vmatpush2.bf16.msra.mxu0 %v982_v2 }
  0x7b   : > { %664 = vmatmul.mubr.bf16.vlgmr.msra.gmra.mxu0 %v840_v3 }
 0x13b   : > { %v665_v5 = vpop.f32.mrf.mxu0 }
 0x13c   : > { %v672_v7 = vadd.f32 %v665_v5, %v429_v4 }
 0x13d   : > { %v667_v8 = vpop.f32.mrf.mxu0  ;;  %679 = sbr.rel (%p874_p13) target bundleno = 335 (0x14f), region = 78 }
 0x13e   : > { %v673_v9 = vadd.f32 %v667_v8, %v430_v6  ;;  %674 = vst [vmem:[%s1210_s15] sm:$0xff] %v672_v7 }
 0x13f   : > { %v669_v10 = vpop.f32.mrf.mxu0 }
 0x140   : > { %675 = vst [vmem:[%s1210_s15 + $0x8] sm:$0xff] %v673_v9 }
 0x141   : > { %v670_v11 = vpop.f32.mrf.mxu0 }
 0x142   : > { %v684_v12 = vlaneseq  ;;  %v682_v14 = vld [vmem:[%s411_s12] sm:$0x3] }
 0x144   : > { %v685_v13 = vshrl.u32 %v684_v12, 7 }
 0x145   : > { %v680_v17 = vld [vmem:[%s1210_s15] sm:$0xff] }
 0x146   : > { %v686_v15 = vsub.s32 0, %v685_v13  ;;  %v690_v16 = vsub.s32 1, %v685_v13 }
 0x147   : > { %v681_v18 = vld [vmem:[%s1210_s15 + $0x8] sm:$0xff] }
 0x148   : > { %v687_v19 = vrot.slane %v682_v14, %v686_v15  ;;  %v691_v20 = vrot.slane %v682_v14, %v690_v16 }
 0x14a   : > { %v694_v21 = vadd.f32 %v687_v19, %v680_v17  ;;  %v695_v22 = vadd.f32 %v691_v20, %v681_v18 }
 0x14c   : > { %v696_v23 = vmax.f32 %v694_v21, 0.0  ;;  %v697_v24 = vmax.f32 %v695_v22, 0.0 }
 0x14e   : > { %698 = vst [vmem:[%s1210_s15] sm:$0xff] %v696_v23  ;;  %699 = vst [vmem:[%s1210_s15 + $0x8] sm:$0xff] %v697_v24 }
 0x14f PF: > { %s13_s18 = sadd.s32 1, %s1039_s18   ;;  %s1289_s12 = smov %s1019_s13 }
 0x150   : > { %p10_p0 = scmp.ge.s32.totalorder %s13_s18, 20   ;;  %s1290_s13 = smov %s1113_s25 }
 0x151   : > { %s1291_s14 = smov %s1031_s16  ;;  %s1292_s15 = smov %s1035_s17 }
 0x152   : > { %s1293_s16 = smov %s1296_s19  ;;  %s1294_s17 = smov %s1300_s20 }
 0x153   :  { %12 = sbr.rel (!%p10_p0) target bundleno = 4 (0x4), region = 119 }

// kernel: _lambda_.26
= control target key start
LH: loop header
LB: loop body
LE: loop exit
PB: predicated region body
PF: predicated region fallthrough
CT: control target
= control target key end

     0   :  { %vm24_vm0 = vcmask 1043456   ;;  %v156_v3 = vmov 1983009808   ;;  %v103_v5 = vlaneseq  ;;  %vm137_vm1 = vcmask 1041409   ;;  %s194_s0 = inlined_call_operand.vmem [shape: f32[2,4,512], index: 0, kind: input, shape index: {}]   ;;  %s195_s1 = inlined_call_operand.vmem [shape: f32[2,512], index: 1, kind: output, shape index: {}]  }
   0x1   :  { %v8_v0 = vld [vmem:[%s194_s0] sm:$0xff]  ;;  %v9_v1 = vld [vmem:[%s194_s0 + $0x8] sm:$0xff]  ;;  %v10_v2 = vld [vmem:[%s194_s0 + $0x10] sm:$0xff]  ;;  %v176_v4 = vunpack.c.l.s4 %v156_v3  ;;  %vm139_vm2 = vcmask 1043459   ;;  %vm141_vm3 = vcmask 1045509   ;;  %vm143_vm4 = vcmask 1047559  }
   0x2   :  { %v11_v6 = vld [vmem:[%s194_s0 + $0x18] sm:$0xff]  ;;  %v16_v7 = vcombine.high %v8_v0, %v8_v0  ;;  %v17_v8 = vcombine.high %v9_v1, %v9_v1  ;;  %v18_v9 = vcombine.high %v10_v2, %v10_v2  ;;  %v25_v10 = vsel %vm24_vm0, %v8_v0, 0.0 }
   0x3   :  { %v19_v11 = vcombine.high %v11_v6, %v11_v6  ;;  %v26_v12 = vrot.slane %v25_v10, 4  ;;  %v39_v13 = vsel %vm24_vm0, %v9_v1, 0.0  ;;  %v53_v14 = vsel %vm24_vm0, %v10_v2, 0.0 }
   0x4   :  { %v32_v15 = vsel %vm24_vm0, %v16_v7, 0.0  ;;  %v40_v16 = vrot.slane %v39_v13, 4  ;;  %v46_v17 = vsel %vm24_vm0, %v17_v8, 0.0  ;;  %v54_v18 = vrot.slane %v53_v14, 4 }
   0x5   :  { %v27_v19 = vadd.f32 %v26_v12, %v25_v10  ;;  %v33_v20 = vrot.slane %v32_v15, 4  ;;  %v47_v21 = vrot.slane %v46_v17, 4  ;;  %v60_v22 = vsel %vm24_vm0, %v18_v9, 0.0 }
   0x6   :  { %v41_v23 = vadd.f32 %v40_v16, %v39_v13  ;;  %v55_v24 = vadd.f32 %v54_v18, %v53_v14  ;;  %v61_v25 = vrot.slane %v60_v22, 4  ;;  %v67_v26 = vsel %vm24_vm0, %v11_v6, 0.0 }
   0x7   :  { %v28_v27 = vrot.slane %v27_v19, 2  ;;  %v34_v28 = vadd.f32 %v33_v20, %v32_v15  ;;  %v48_v29 = vadd.f32 %v47_v21, %v46_v17  ;;  %v68_v30 = vrot.slane %v67_v26, 4 }
   0x8   :  { %v42_v31 = vrot.slane %v41_v23, 2  ;;  %v56_v32 = vrot.slane %v55_v24, 2  ;;  %v62_v33 = vadd.f32 %v61_v25, %v60_v22  ;;  %v74_v34 = vsel %vm24_vm0, %v19_v11, 0.0 }
   0x9   :  { %v29_v35 = vadd.f32 %v28_v27, %v27_v19  ;;  %v35_v36 = vrot.slane %v34_v28, 2  ;;  %v49_v37 = vrot.slane %v48_v29, 2  ;;  %v69_v38 = vadd.f32 %v68_v30, %v67_v26 }
   0xa   :  { %v43_v39 = vadd.f32 %v42_v31, %v41_v23  ;;  %v57_v40 = vadd.f32 %v56_v32, %v55_v24  ;;  %v63_v41 = vrot.slane %v62_v33, 2  ;;  %v75_v42 = vrot.slane %v74_v34, 4 }
   0xb   :  { %v30_v43 = vrot.slane %v29_v35, 1  ;;  %v36_v44 = vadd.f32 %v35_v36, %v34_v28  ;;  %v50_v45 = vadd.f32 %v49_v37, %v48_v29  ;;  %v70_v46 = vrot.slane %v69_v38, 2 }
   0xc   :  { %v44_v47 = vrot.slane %v43_v39, 1  ;;  %v58_v48 = vrot.slane %v57_v40, 1  ;;  %v64_v49 = vadd.f32 %v63_v41, %v62_v33  ;;  %v76_v50 = vadd.f32 %v75_v42, %v74_v34 }
   0xd   :  { %v31_v51 = vadd.f32 %v30_v43, %v29_v35  ;;  %v37_v52 = vrot.slane %v36_v44, 1  ;;  %v51_v53 = vrot.slane %v50_v45, 1  ;;  %v71_v54 = vadd.f32 %v70_v46, %v69_v38 }
   0xe   :  { %v45_v55 = vadd.f32 %v44_v47, %v43_v39  ;;  %v59_v56 = vadd.f32 %v58_v48, %v57_v40  ;;  %v65_v57 = vrot.slane %v64_v49, 1  ;;  %v77_v58 = vrot.slane %v76_v50, 2 }
   0xf   :  { %v38_v59 = vadd.f32 %v37_v52, %v36_v44  ;;  %v52_v60 = vadd.f32 %v51_v53, %v50_v45  ;;  %v72_v61 = vrot.slane %v71_v54, 1  ;;  %v82_v62 = vmul.f32 0.25, %v31_v51 }
  0x10   :  { %v66_v63 = vadd.f32 %v65_v57, %v64_v49  ;;  %v78_v0 = vadd.f32 %v77_v58, %v76_v50  ;;  %v84_v1 = vmul.f32 0.25, %v45_v55  ;;  %v86_v2 = vmul.f32 0.25, %v59_v56 }
  0x11   :  { %v73_v3 = vadd.f32 %v72_v61, %v71_v54  ;;  %v83_v6 = vmul.f32 0.25, %v38_v59  ;;  %v85_v7 = vmul.f32 0.25, %v52_v60  ;;  %v102_v8 = vunpack.c.0.s8 %v176_v4 }
  0x12   :  { %v79_v9 = vrot.slane %v78_v0, 1  ;;  %v87_v10 = vmul.f32 0.25, %v66_v63  ;;  %v104_v11 = vshrl.u32 %v103_v5, 7 }
  0x13   :  { %v88_v12 = vmul.f32 0.25, %v73_v3  ;;  %v98_v13 = vcombine.low %v82_v62, %v83_v6  ;;  %v99_v15 = vcombine.low %v84_v1, %v85_v7 }
  0x14   :  { %v80_v14 = vadd.f32 %v79_v9, %v78_v0  ;;  %v105_v16 = vsub.s32 %v102_v8, %v104_v11  ;;  %v115_v17 = vcombine.low %v86_v2, %v87_v10 }
  0x16   :  { %v89_v18 = vmul.f32 0.25, %v80_v14  ;;  %v106_v19 = vrot.slane %v98_v13, %v105_v16  ;;  %v113_v20 = vrot.slane %v99_v15, %v105_v16  ;;  %v123_v22 = vrot.slane %v115_v17, %v105_v16 }
  0x18   :  { %v116_v21 = vcombine.low %v88_v12, %v89_v18  ;;  %v114_v24 = vcombine.low %v106_v19, %v113_v20 }
  0x1a   :  { %v130_v23 = vrot.slane %v116_v21, %v105_v16 }
  0x1c   :  { %v131_v25 = vcombine.low %v123_v22, %v130_v23 }
  0x1e   :  { %v136_v4 = vrot.slane %v131_v25, 7 }
  0x20   :  { %v138_v26 = vsel %vm137_vm1, %v136_v4, %v114_v24 }
  0x21   :  { %v140_v5 = vsel %vm139_vm2, %v136_v4, %v138_v26 }
  0x22   :  { %v142_v27 = vsel %vm141_vm3, %v136_v4, %v140_v5 }
  0x23   :  { %v144_v28 = vsel %vm143_vm4, %v136_v4, %v142_v27 }
  0x24   :  { %146 = vst [vmem:[%s195_s1] sm:$0xff] %v144_v28 }

// kernel: _lambda_.25
= control target key start
LH: loop header
LB: loop body
LE: loop exit
PB: predicated region body
PF: predicated region fallthrough
CT: control target
= control target key end

     0   :  { %s1154_s15 = smov 0   ;;  %s1156_s16 = smov 0   ;;  %s1384_s0 = inlined_call_operand.vmem [shape: bf16[8,4608], index: 0, kind: input, shape index: {}]   ;;  %s1385_s1 = inlined_call_operand.vmem [shape: bf16[4608,512], index: 1, kind: input, shape index: {}]   ;;  %s1386_s2 = inlined_call_operand.vmem [shape: f32[1,512], index: 2, kind: input, shape index: {}]   ;;  %s1387_s3 = inlined_call_operand.vmem [shape: f32[8,512], index: 3, kind: input, shape index: {}]   ;;  %s1388_s4 = inlined_call_operand.vmem [shape: f32[8,512], index: 4, kind: output, shape index: {}]  }
   0x1   :  { %s1158_s17 = smov 0   ;;  %s1160_s18 = smov 0  }
   0x2   :  { %s1162_s19 = smov 0   ;;  %s1164_s20 = smov 0  }
   0x3   :  { %s1166_s21 = smov 0  }
   0x4 LB: > { %s26_s22 = sadd.s32 1, %s1118_s19  ;;  %s29_s23 = sadd.s32 1, %s1122_s20  ;;  %s1126_s21 = sphi %s1166_s21, %s14_s21   ;;  %s1122_s20 = sphi %s1164_s20, %s1394_s20   ;;  %s1118_s19 = sphi %s1162_s19, %s1393_s19   ;;  %s1114_s18 = sphi %s1160_s18, %s1392_s18   ;;  %s1110_s17 = sphi %s1158_s17, %s1391_s17   ;;  %s1106_s16 = sphi %s1156_s16, %s1390_s16   ;;  %s1102_s15 = sphi %s1154_s15, %s1389_s15  }
   0x5   : > { %p27_p0 = scmp.ge.s32.totalorder %s26_s22, 18  ;;  %p77_p1 = scmp.ne.s32.totalorder %s1106_s16, %s1102_s15 }
   0x6   : > { %p78_p2 = scmp.eq.s32.totalorder %s1126_s21, 0  ;;  %s70_s27 = sadd.s32 1, %s1106_s16 }
   0x7   : > { %s1396_s22 = smov (%p27_p0, %s26_s22), 0  ;;  %s1398_s23 = smov (!%p27_p0, %s29_s23), %s1122_s20 }
   0x8   : > { %p79_p3 = por %p78_p2, %p77_p1  ;;  %p31_p4 = scmp.ge.s32.totalorder %s1398_s23, 2 }
   0x9   : > { %s65_s24 = ssub.s32 %s1118_s19, %s1396_s22  ;;  %p911_p6 = scmp.ge.s32.totalorder %s1126_s21, 36 }
   0xa   : > { %s1400_s23 = smov (%p31_p4, %s1398_s23), 0 }
   0xb   : > { %s66_s25 = ssub.s32 %s1122_s20, %s1400_s23  ;;  %185 = sbr.rel (%p911_p6) target bundleno = 39 (0x27), region = 16 }
   0xc   : > { %s67_s26 = sor.u32 %s66_s25, %s65_s24 }
   0xd   : > { %p68_p5 = scmp.eq.s32.totalorder %s67_s26, 0 }
   0xf   : > { %s1205_s28 = scalar_select %p68_p5, %s1106_s16, %s70_s27  }
  0x10   : > { %201 = sbr.rel (!%p79_p3) target bundleno = 39 (0x27), region = 24  ;;  %s203_s29 = sand.u32 (%p79_p3), 1, %s1106_s16  }
  0x11   : > { %s914_s30 = sshll.u32 (%p79_p3), %s1122_s20, 1  ;;  %s912_s5 = sshll.u32 (%p79_p3), %s203_s29, 8 }
  0x12   : > { %s964_s6 = sshll.u32 (%p79_p3), %s1118_s19, 7  ;;  %s1219_s12 = scalar_lea.vmem (%p79_p3), [#allocation2], %s912_s5 }
  0x13   : > { %s209_s7 = sadd.s32 (%p79_p3), %s964_s6, %s914_s30 }
  0x14   : > { %s916_s8 = sshll.u32 (%p79_p3), %s209_s7, 2 }
  0x15   : > { %s1214_s11 = scalar_lea.vmem %s1385_s1, %s916_s8 }
  0x16   : > { %v302_v0 = vld [vmem:[%s1214_s11] sm:$0xff]  ;;  %v304_v1 = vld [vmem:[%s1214_s11 + $0x10] sm:$0xff] }
  0x17   : > { %v306_v2 = vld [vmem:[%s1214_s11 + $0x20] sm:$0xff]  ;;  %303 = vst [vmem:[%s1219_s12] sm:$0xff] %v302_v0  ;;  %305 = vst [vmem:[%s1219_s12 + $0x8] sm:$0xff] %v304_v1  ;;  %v308_v3 = vld [vmem:[%s1214_s11 + $0x30] sm:$0xff] }
  0x18   : > { %307 = vst [vmem:[%s1219_s12 + $0x10] sm:$0xff] %v306_v2  ;;  %v310_v4 = vld [vmem:[%s1214_s11 + $0x40] sm:$0xff]  ;;  %v312_v5 = vld [vmem:[%s1214_s11 + $0x50] sm:$0xff]  ;;  %309 = vst [vmem:[%s1219_s12 + $0x18] sm:$0xff] %v308_v3 }
  0x19   : > { %311 = vst [vmem:[%s1219_s12 + $0x20] sm:$0xff] %v310_v4  ;;  %313 = vst [vmem:[%s1219_s12 + $0x28] sm:$0xff] %v312_v5  ;;  %v314_v6 = vld [vmem:[%s1214_s11 + $0x60] sm:$0xff]  ;;  %v316_v7 = vld [vmem:[%s1214_s11 + $0x70] sm:$0xff] }
  0x1a   : > { %v318_v8 = vld [vmem:[%s1214_s11 + $0x80] sm:$0xff]  ;;  %315 = vst [vmem:[%s1219_s12 + $0x30] sm:$0xff] %v314_v6  ;;  %317 = vst [vmem:[%s1219_s12 + $0x38] sm:$0xff] %v316_v7  ;;  %v320_v9 = vld [vmem:[%s1214_s11 + $0x90] sm:$0xff] }
  0x1b   : > { %319 = vst [vmem:[%s1219_s12 + $0x40] sm:$0xff] %v318_v8  ;;  %v322_v10 = vld [vmem:[%s1214_s11 + $0xa0] sm:$0xff]  ;;  %v324_v11 = vld [vmem:[%s1214_s11 + $0xb0] sm:$0xff]  ;;  %321 = vst [vmem:[%s1219_s12 + $0x48] sm:$0xff] %v320_v9 }
  0x1c   : > { %323 = vst [vmem:[%s1219_s12 + $0x50] sm:$0xff] %v322_v10  ;;  %325 = vst [vmem:[%s1219_s12 + $0x58] sm:$0xff] %v324_v11  ;;  %v326_v12 = vld [vmem:[%s1214_s11 + $0xc0] sm:$0xff]  ;;  %v328_v13 = vld [vmem:[%s1214_s11 + $0xd0] sm:$0xff] }
  0x1d   : > { %v330_v14 = vld [vmem:[%s1214_s11 + $0xe0] sm:$0xff]  ;;  %327 = vst [vmem:[%s1219_s12 + $0x60] sm:$0xff] %v326_v12  ;;  %329 = vst [vmem:[%s1219_s12 + $0x68] sm:$0xff] %v328_v13  ;;  %v332_v15 = vld [vmem:[%s1214_s11 + $0xf0] sm:$0xff] }
  0x1e   : > { %331 = vst [vmem:[%s1219_s12 + $0x70] sm:$0xff] %v330_v14  ;;  %v334_v16 = vld [vmem:[%s1214_s11 + $0x100] sm:$0xff]  ;;  %v336_v17 = vld [vmem:[%s1214_s11 + $0x110] sm:$0xff]  ;;  %333 = vst [vmem:[%s1219_s12 + $0x78] sm:$0xff] %v332_v15 }
  0x1f   : > { %335 = vst [vmem:[%s1219_s12 + $0x80] sm:$0xff] %v334_v16  ;;  %337 = vst [vmem:[%s1219_s12 + $0x88] sm:$0xff] %v336_v17  ;;  %v338_v18 = vld [vmem:[%s1214_s11 + $0x120] sm:$0xff]  ;;  %v340_v19 = vld [vmem:[%s1214_s11 + $0x130] sm:$0xff] }
  0x20   : > { %v342_v20 = vld [vmem:[%s1214_s11 + $0x140] sm:$0xff]  ;;  %339 = vst [vmem:[%s1219_s12 + $0x90] sm:$0xff] %v338_v18  ;;  %341 = vst [vmem:[%s1219_s12 + $0x98] sm:$0xff] %v340_v19  ;;  %v344_v21 = vld [vmem:[%s1214_s11 + $0x150] sm:$0xff] }
  0x21   : > { %343 = vst [vmem:[%s1219_s12 + $0xa0] sm:$0xff] %v342_v20  ;;  %v346_v22 = vld [vmem:[%s1214_s11 + $0x160] sm:$0xff]  ;;  %v348_v23 = vld [vmem:[%s1214_s11 + $0x170] sm:$0xff]  ;;  %345 = vst [vmem:[%s1219_s12 + $0xa8] sm:$0xff] %v344_v21 }
  0x22   : > { %347 = vst [vmem:[%s1219_s12 + $0xb0] sm:$0xff] %v346_v22  ;;  %349 = vst [vmem:[%s1219_s12 + $0xb8] sm:$0xff] %v348_v23  ;;  %v350_v24 = vld [vmem:[%s1214_s11 + $0x180] sm:$0xff]  ;;  %v352_v25 = vld [vmem:[%s1214_s11 + $0x190] sm:$0xff] }
  0x23   : > { %v354_v26 = vld [vmem:[%s1214_s11 + $0x1a0] sm:$0xff]  ;;  %351 = vst [vmem:[%s1219_s12 + $0xc0] sm:$0xff] %v350_v24  ;;  %353 = vst [vmem:[%s1219_s12 + $0xc8] sm:$0xff] %v352_v25  ;;  %v356_v27 = vld [vmem:[%s1214_s11 + $0x1b0] sm:$0xff] }
  0x24   : > { %355 = vst [vmem:[%s1219_s12 + $0xd0] sm:$0xff] %v354_v26  ;;  %v358_v28 = vld [vmem:[%s1214_s11 + $0x1c0] sm:$0xff]  ;;  %v360_v29 = vld [vmem:[%s1214_s11 + $0x1d0] sm:$0xff]  ;;  %357 = vst [vmem:[%s1219_s12 + $0xd8] sm:$0xff] %v356_v27 }
  0x25   : > { %359 = vst [vmem:[%s1219_s12 + $0xe0] sm:$0xff] %v358_v28  ;;  %361 = vst [vmem:[%s1219_s12 + $0xe8] sm:$0xff] %v360_v29  ;;  %v362_v30 = vld [vmem:[%s1214_s11 + $0x1e0] sm:$0xff]  ;;  %v364_v31 = vld [vmem:[%s1214_s11 + $0x1f0] sm:$0xff] }
  0x26   : > { %363 = vst [vmem:[%s1219_s12 + $0xf0] sm:$0xff] %v362_v30  ;;  %365 = vst [vmem:[%s1219_s12 + $0xf8] sm:$0xff] %v364_v31 }
  0x27 PF: > { %p917_p7 = scmp.ge.s32.totalorder %s1126_s21, 1  ;;  %p391_p8 = scmp.lt.s32.totalorder %s1126_s21, 37 }
  0x29   : > { %p392_p9 = pnand %p917_p7, %p391_p8 }
  0x2a   : > { %s398_s13 = sand.u32 (!%p392_p9), 1, %s1102_s15   ;;  %s919_s14 = sshll.u32 (!%p392_p9), %s1110_s17, 1 }
  0x2b   : > { %395 = sbr.rel (%p392_p9) target bundleno = 338 (0x152), region = 70  ;;  %s918_s24 = sshll.u32 (!%p392_p9), %s398_s13, 8 }
  0x2c   : > { %p452_p10 = scmp.lt.s32.totalorder (!%p392_p9), %s919_s14, 35  ;;  %s921_s25 = sshll.u32 (!%p392_p9), %s1114_s18, 1 }
  0x2d   : > { %p462_p11 = scmp.lt.s32.totalorder (!%p392_p9), %s921_s25, 3  ;;  %s1309_s13 = scalar_lea.vmem (!%p392_p9), [#allocation2], %s918_s24 }
  0x2e   : > { %p926_p12 = scmp.ne.s32.totalorder (!%p392_p9), %s1110_s17, 0 }
  0x30   : > { %s1402_s14 = smov (!%p452_p10, %s919_s14), 35  ;;  %s1404_s25 = smov (!%p462_p11, %s921_s25), 3 }
  0x31   : > { %s920_s26 = sshll.u32 %s1402_s14, 2  ;;  %s464_s15 = scalar_lea.vmem %s1386_s2, %s1404_s25 }
  0x32   : > { %s1290_s30 = scalar_lea.vmem %s1384_s0, %s920_s26  ;;  %s923_s7 = sshll.u32 %s1404_s25, 3 }
  0x33   : > { %s1302_s18 = scalar_lea.vmem %s1387_s3, %s923_s7  ;;  %s1307_s12 = scalar_lea.vmem %s1388_s4, %s923_s7 }
  0x34   : > { %489 = sbr.rel (%p926_p12) target bundleno = 59 (0x3b), region = 78 }
  0x39   : > { %v1128_v32 = vmov 0.0  }
  0x3a   : > { %490 = vst [vmem:[%s1307_s12] sm:$0xff] %v1128_v32  ;;  %491 = vst [vmem:[%s1307_s12 + $0x8] sm:$0xff] %v1128_v32 }
  0x3b PF: > { %v1022_v33 = vld [vmem:[%s1309_s13 + $0x74] ss:$8 sps:$4 sm:$0xff]   ;;  %v1024_v34 = vld [vmem:[%s1309_s13 + $0x70] ss:$8 sps:$4 sm:$0xff]   ;;  %v1025_v35 = vld [vmem:[%s1309_s13 + $0x64] ss:$8 sps:$4 sm:$0xff]  }
  0x3c   : > { %694 = vmatprep.subr.bf16.mxu0 %v1022_v33  ;;  %v1027_v36 = vld [vmem:[%s1309_s13 + $0x60] ss:$8 sps:$4 sm:$0xff]   ;;  %v1028_v37 = vld [vmem:[%s1309_s13 + $0x54] ss:$8 sps:$4 sm:$0xff]   ;;  %v1030_v38 = vld [vmem:[%s1309_s13 + $0x50] ss:$8 sps:$4 sm:$0xff]  }
  0x3d   : > { %695 = vmatpush1.bf16.msra.mxu0 %v1024_v34  ;;  %v1031_v39 = vld [vmem:[%s1309_s13 + $0x44] ss:$8 sps:$4 sm:$0xff]   ;;  %v1033_v40 = vld [vmem:[%s1309_s13 + $0x40] ss:$8 sps:$4 sm:$0xff]   ;;  %v1034_v41 = vld [vmem:[%s1309_s13 + $0x34] ss:$8 sps:$4 sm:$0xff]  }
  0x3e   : > { %696 = vmatprep.subr.bf16.mxu0 %v1025_v35  ;;  %v1036_v42 = vld [vmem:[%s1309_s13 + $0x30] ss:$8 sps:$4 sm:$0xff]   ;;  %v1037_v43 = vld [vmem:[%s1309_s13 + $0x24] ss:$8 sps:$4 sm:$0xff]   ;;  %v1039_v44 = vld [vmem:[%s1309_s13 + $0x20] ss:$8 sps:$4 sm:$0xff]  }
  0x3f   : > { %v1040_v45 = vld [vmem:[%s1309_s13 + $0x14] ss:$8 sps:$4 sm:$0xff]   ;;  %v494_v46 = vld [vmem:[%s1290_s30] sm:$0xff]  ;;  %v1042_v48 = vld [vmem:[%s1309_s13 + $0x10] ss:$8 sps:$4 sm:$0xff]   ;;  %p961_p13 = scmp.ne.s32.totalorder %s1110_s17, 17 }
  0x40   : > { %v928_v47 = vcombine.high %v494_v46, %v494_v46  ;;  %v1043_v49 = vld [vmem:[%s1309_s13 + $0x4] ss:$8 sps:$4 sm:$0xff]   ;;  %v1045_v50 = vld [vmem:[%s1309_s13] ss:$8 sps:$4 sm:$0xff]   ;;  %v1046_v51 = vld [vmem:[%s1309_s13 + $0xf4] ss:$8 sps:$4 sm:$0xff]   ;;  %v927_v3 = vcombine.low %v494_v46, %v494_v46 }
  0x41   : > { %697 = vmatpush1.bf16.msra.mxu0 %v1027_v36  ;;  %v1048_v52 = vld [vmem:[%s1309_s13 + $0xf0] ss:$8 sps:$4 sm:$0xff]   ;;  %v1049_v53 = vld [vmem:[%s1309_s13 + $0xe4] ss:$8 sps:$4 sm:$0xff]   ;;  %v1051_v54 = vld [vmem:[%s1309_s13 + $0xe0] ss:$8 sps:$4 sm:$0xff]  }
  0x42   : > { %698 = vmatprep.subr.bf16.mxu0 %v1028_v37  ;;  %726 = vmatprep.mubr.bf16.mxu0 %v928_v47  ;;  %v1052_v55 = vld [vmem:[%s1309_s13 + $0xd4] ss:$8 sps:$4 sm:$0xff]   ;;  %v1054_v56 = vld [vmem:[%s1309_s13 + $0xd0] ss:$8 sps:$4 sm:$0xff]   ;;  %v1055_v57 = vld [vmem:[%s1309_s13 + $0xc4] ss:$8 sps:$4 sm:$0xff]  }
  0x43   : > { %v1057_v58 = vld [vmem:[%s1309_s13 + $0xc0] ss:$8 sps:$4 sm:$0xff]   ;;  %v1058_v59 = vld [vmem:[%s1309_s13 + $0xb4] ss:$8 sps:$4 sm:$0xff]   ;;  %v1060_v60 = vld [vmem:[%s1309_s13 + $0xb0] ss:$8 sps:$4 sm:$0xff]  }
  0x44   : > { %v1061_v61 = vld [vmem:[%s1309_s13 + $0xa4] ss:$8 sps:$4 sm:$0xff]   ;;  %v1063_v62 = vld [vmem:[%s1309_s13 + $0xa0] ss:$8 sps:$4 sm:$0xff]   ;;  %v1064_v63 = vld [vmem:[%s1309_s13 + $0x94] ss:$8 sps:$4 sm:$0xff]  }
  0x45   : > { %699 = vmatpush1.bf16.msra.mxu0 %v1030_v38  ;;  %v1066_v0 = vld [vmem:[%s1309_s13 + $0x90] ss:$8 sps:$4 sm:$0xff]   ;;  %v1067_v1 = vld [vmem:[%s1309_s13 + $0x84] ss:$8 sps:$4 sm:$0xff]   ;;  %v1069_v2 = vld [vmem:[%s1309_s13 + $0x80] ss:$8 sps:$4 sm:$0xff]  }
  0x46   : > { %700 = vmatprep.subr.bf16.mxu0 %v1031_v39  ;;  %v492_v4 = vld [vmem:[%s1307_s12] sm:$0xff]  ;;  %v493_v6 = vld [vmem:[%s1307_s12 + $0x8] sm:$0xff] }
  0x49   : > { %701 = vmatpush1.bf16.msra.mxu0 %v1033_v40 }
  0x4a   : > { %702 = vmatprep.subr.bf16.mxu0 %v1034_v41 }
  0x4d   : > { %703 = vmatpush1.bf16.msra.mxu0 %v1036_v42 }
  0x4e   : > { %704 = vmatprep.subr.bf16.mxu0 %v1037_v43 }
  0x51   : > { %705 = vmatpush1.bf16.msra.mxu0 %v1039_v44 }
  0x52   : > { %706 = vmatprep.subr.bf16.mxu0 %v1040_v45 }
  0x55   : > { %707 = vmatpush1.bf16.msra.mxu0 %v1042_v48 }
  0x56   : > { %708 = vmatprep.subr.bf16.mxu0 %v1043_v49 }
  0x59   : > { %709 = vmatpush1.bf16.msra.mxu0 %v1045_v50 }
  0x5a   : > { %710 = vmatprep.subr.bf16.mxu0 %v1046_v51 }
  0x5d   : > { %711 = vmatpush2.bf16.msra.mxu0 %v1048_v52 }
  0x5e   : > { %712 = vmatprep.subr.bf16.mxu0 %v1049_v53 }
  0x61   : > { %713 = vmatpush2.bf16.msra.mxu0 %v1051_v54 }
  0x62   : > { %714 = vmatprep.subr.bf16.mxu0 %v1052_v55 }
  0x65   : > { %715 = vmatpush2.bf16.msra.mxu0 %v1054_v56 }
  0x66   : > { %716 = vmatprep.subr.bf16.mxu0 %v1055_v57 }
  0x69   : > { %717 = vmatpush2.bf16.msra.mxu0 %v1057_v58 }
  0x6a   : > { %718 = vmatprep.subr.bf16.mxu0 %v1058_v59 }
  0x6d   : > { %719 = vmatpush2.bf16.msra.mxu0 %v1060_v60 }
  0x6e   : > { %720 = vmatprep.subr.bf16.mxu0 %v1061_v61 }
  0x71   : > { %721 = vmatpush2.bf16.msra.mxu0 %v1063_v62 }
  0x72   : > { %722 = vmatprep.subr.bf16.mxu0 %v1064_v63 }
  0x75   : > { %723 = vmatpush2.bf16.msra.mxu0 %v1066_v0 }
  0x76   : > { %724 = vmatprep.subr.bf16.mxu0 %v1067_v1 }
  0x79   : > { %725 = vmatpush2.bf16.msra.mxu0 %v1069_v2 }
  0x7c   : > { %727 = vmatmul.mubr.bf16.vlgmr.msra.gmra.mxu0 %v927_v3 }
 0x13c   : > { %v728_v5 = vpop.f32.mrf.mxu0 }
 0x13d   : > { %v735_v7 = vadd.f32 %v728_v5, %v492_v4 }
 0x13e   : > { %v730_v8 = vpop.f32.mrf.mxu0  ;;  %742 = sbr.rel (%p961_p13) target bundleno = 338 (0x152), region = 82 }
 0x13f   : > { %v736_v9 = vadd.f32 %v730_v8, %v493_v6  ;;  %737 = vst [vmem:[%s1307_s12] sm:$0xff] %v735_v7 }
 0x140   : > { %v732_v10 = vpop.f32.mrf.mxu0 }
 0x141   : > { %738 = vst [vmem:[%s1307_s12 + $0x8] sm:$0xff] %v736_v9 }
 0x142   : > { %v733_v11 = vpop.f32.mrf.mxu0 }
 0x143   : > { %v747_v12 = vlaneseq  ;;  %v745_v14 = vld [vmem:[%s464_s15] sm:$0x3]  ;;  %v760_v22 = vld [vmem:[%s1302_s18 + $0x8] sm:$0xff] }
 0x144   : > { %v759_v21 = vld [vmem:[%s1302_s18] sm:$0xff] }
 0x145   : > { %v748_v13 = vshrl.u32 %v747_v12, 7 }
 0x146   : > { %v743_v17 = vld [vmem:[%s1307_s12] sm:$0xff] }
 0x147   : > { %v749_v15 = vsub.s32 0, %v748_v13  ;;  %v753_v16 = vsub.s32 1, %v748_v13 }
 0x148   : > { %v744_v18 = vld [vmem:[%s1307_s12 + $0x8] sm:$0xff] }
 0x149   : > { %v750_v19 = vrot.slane %v745_v14, %v749_v15  ;;  %v754_v20 = vrot.slane %v745_v14, %v753_v16 }
 0x14b   : > { %v757_v23 = vadd.f32 %v750_v19, %v743_v17  ;;  %v758_v24 = vadd.f32 %v754_v20, %v744_v18 }
 0x14d   : > { %v761_v25 = vadd.f32 %v759_v21, %v757_v23  ;;  %v762_v26 = vadd.f32 %v760_v22, %v758_v24 }
 0x14f   : > { %v763_v27 = vmax.f32 %v761_v25, 0.0  ;;  %v764_v28 = vmax.f32 %v762_v26, 0.0 }
 0x151   : > { %765 = vst [vmem:[%s1307_s12] sm:$0xff] %v763_v27  ;;  %766 = vst [vmem:[%s1307_s12 + $0x8] sm:$0xff] %v764_v28 }
 0x152 PF: > { %s14_s21 = sadd.s32 1, %s1126_s21   ;;  %s1389_s15 = smov %s1106_s16 }
 0x153   : > { %p11_p0 = scmp.ge.s32.totalorder %s14_s21, 38   ;;  %s1390_s16 = smov %s1205_s28 }
 0x154   : > { %s1391_s17 = smov %s1118_s19  ;;  %s1392_s18 = smov %s1122_s20 }
 0x155   : > { %s1393_s19 = smov %s1396_s22  ;;  %s1394_s20 = smov %s1400_s23 }
 0x156   :  { %13 = sbr.rel (!%p11_p0) target bundleno = 4 (0x4), region = 126 }

// kernel: _lambda_.27
= control target key start
LH: loop header
LB: loop body
LE: loop exit
PB: predicated region body
PF: predicated region fallthrough
CT: control target
= control target key end

     0   :  { %s706_s12 = smov 0   ;;  %s708_s13 = smov 0   ;;  %s781_s0 = inlined_call_operand.vmem [shape: bf16[8,512], index: 0, kind: input, shape index: {}]   ;;  %s782_s1 = inlined_call_operand.vmem [shape: bf16[512,128], index: 1, kind: input, shape index: {}]   ;;  %s783_s2 = inlined_call_operand.vmem [shape: f32[1,128], index: 2, kind: input, shape index: {}]   ;;  %s784_s3 = inlined_call_operand.vmem [shape: f32[8,128], index: 3, kind: output, shape index: {}]  }
   0x1   :  { %s710_s14 = smov 0  }
   0x2 LB: > { %s25_s15 = sadd.s32 1, %s679_s13  ;;  %p567_p0 = scmp.ge.s32.totalorder %s683_s14, 1  ;;  %s683_s14 = sphi %s710_s14, %s13_s14   ;;  %s679_s13 = sphi %s708_s13, %s786_s13   ;;  %s675_s12 = sphi %s706_s12, %s785_s12  }
   0x3   : > { %p26_p1 = scmp.ge.s32.totalorder %s25_s15, 2  ;;  %p189_p2 = scmp.lt.s32.totalorder %s683_s14, 3 }
   0x5   : > { %s788_s15 = smov (%p26_p1, %s25_s15), 0  ;;  %p190_p3 = pnand %p567_p0, %p189_p2 }
   0x6   : > { %s568_s16 = sshll.u32 (!%p190_p3), %s675_s12, 1  ;;  %s570_s17 = sshll.u32 (!%p190_p3), %s675_s12, 5 }
   0x7   : > { %193 = sbr.rel (%p190_p3) target bundleno = 265 (0x109), region = 32  ;;  %p233_p4 = scmp.lt.s32.totalorder (!%p190_p3), %s568_s16, 3 }
   0x8   : > { %p241_p5 = scmp.lt.s32.totalorder (!%p190_p3), %s570_s17, 63  ;;  %p572_p6 = scmp.ne.s32.totalorder (!%p190_p3), %s675_s12, 0 }
   0xc   : > { %s790_s16 = smov (!%p233_p4, %s568_s16), 3  ;;  %s792_s17 = smov (!%p241_p5, %s570_s17), 63 }
   0xd   : > { %s569_s18 = sshll.u32 %s790_s16, 2  ;;  %s571_s22 = sshll.u32 %s792_s17, 2 }
   0xe   : > { %s238_s21 = scalar_lea.vmem %s781_s0, %s569_s18  ;;  %s734_s25 = scalar_lea.vmem %s782_s1, %s571_s22 }
   0xf   : > { %263 = sbr.rel (%p572_p6) target bundleno = 22 (0x16), region = 36 }
  0x14   : > { %v685_v0 = vmov 0.0  }
  0x15   : > { %264 = vst [vmem:[%s784_s3] sm:$0xff] %v685_v0 }
  0x16 PF: > { %v643_v1 = vld [vmem:[%s734_s25 + $0x78] sm:$0xff]   ;;  %v645_v3 = vld [vmem:[%s734_s25 + $0x70] sm:$0xff]   ;;  %v647_v5 = vld [vmem:[%s734_s25 + $0x68] sm:$0xff]   ;;  %p591_p7 = scmp.ne.s32.totalorder %s675_s12, 1 }
  0x17   : > { %v644_v2 = vld [vmem:[%s734_s25 + $0x38] sm:$0xff]   ;;  %596 = vmatprep.subr.bf16.mxu0 %v643_v1  ;;  %v646_v4 = vld [vmem:[%s734_s25 + $0x30] sm:$0xff]   ;;  %v648_v6 = vld [vmem:[%s734_s25 + $0x28] sm:$0xff]  }
  0x18   : > { %597 = vmatpush3.bf16.msra.mxu0 %v644_v2  ;;  %v649_v7 = vld [vmem:[%s734_s25 + $0x60] sm:$0xff]   ;;  %v651_v9 = vld [vmem:[%s734_s25 + $0x58] sm:$0xff]   ;;  %v653_v11 = vld [vmem:[%s734_s25 + $0x50] sm:$0xff]  }
  0x19   : > { %598 = vmatprep.subr.bf16.mxu0 %v645_v3  ;;  %v650_v8 = vld [vmem:[%s734_s25 + $0x20] sm:$0xff]   ;;  %v652_v10 = vld [vmem:[%s734_s25 + $0x18] sm:$0xff]   ;;  %v654_v14 = vld [vmem:[%s734_s25 + $0x10] sm:$0xff]  }
  0x1a   : > { %v266_v12 = vld [vmem:[%s238_s21] sm:$0xff]  ;;  %v655_v15 = vld [vmem:[%s734_s25 + $0x48] sm:$0xff]  }
  0x1b   : > { %v574_v13 = vcombine.high %v266_v12, %v266_v12  ;;  %v656_v16 = vld [vmem:[%s734_s25 + $0x8] sm:$0xff]   ;;  %v657_v17 = vld [vmem:[%s734_s25 + $0x40] sm:$0xff]   ;;  %v573_v19 = vcombine.low %v266_v12, %v266_v12 }
  0x1c   : > { %599 = vmatpush3.bf16.msra.mxu0 %v646_v4  ;;  %v658_v18 = vld [vmem:[%s734_s25] sm:$0xff]  }
  0x1d   : > { %600 = vmatprep.subr.bf16.mxu0 %v647_v5  ;;  %434 = vmatprep.mubr.bf16.mxu0 %v574_v13  ;;  %v265_v21 = vld [vmem:[%s784_s3] sm:$0xff] }
  0x20   : > { %601 = vmatpush3.bf16.msra.mxu0 %v648_v6 }
  0x21   : > { %602 = vmatprep.subr.bf16.mxu0 %v649_v7 }
  0x24   : > { %603 = vmatpush3.bf16.msra.mxu0 %v650_v8 }
  0x25   : > { %604 = vmatprep.subr.bf16.mxu0 %v651_v9 }
  0x28   : > { %605 = vmatpush3.bf16.msra.mxu0 %v652_v10 }
  0x29   : > { %606 = vmatprep.subr.bf16.mxu0 %v653_v11 }
  0x2c   : > { %607 = vmatpush3.bf16.msra.mxu0 %v654_v14 }
  0x2d   : > { %608 = vmatprep.subr.bf16.mxu0 %v655_v15 }
  0x30   : > { %609 = vmatpush3.bf16.msra.mxu0 %v656_v16 }
  0x31   : > { %610 = vmatprep.subr.bf16.mxu0 %v657_v17 }
  0x34   : > { %611 = vmatpush3.bf16.msra.mxu0 %v658_v18 }
  0x37   : > { %435 = vmatmul.mubr.bf16.vlgmr.msra.gmra.mxu0 %v573_v19 }
  0xf7   : > { %v612_v20 = vpop.f32.mrf.mxu0 }
  0xf9   : > { %v613_v22 = vpop.f32.mrf.mxu0 }
  0xfa   : > { %v614_v23 = vadd.f32 %v613_v22, %v612_v20  ;;  %447 = sbr.rel (%p591_p7) target bundleno = 265 (0x109), region = 40 }
  0xfb   : > { %v615_v24 = vpop.f32.mrf.mxu0 }
  0xfc   : > { %v442_v25 = vadd.f32 %v614_v23, %v265_v21 }
  0xfd   : > { %v616_v26 = vpop.f32.mrf.mxu0 }
  0xfe   : > { %443 = vst [vmem:[%s784_s3] sm:$0xff] %v442_v25 }
  0xff   : > { %v592_v28 = vld [vmem:[%s783_s2] ss:$0 sm:$0xff] }
 0x105   : > { %v448_v27 = vld [vmem:[%s784_s3] sm:$0xff] }
 0x106   : > { %v456_v29 = vadd.f32 %v592_v28, %v448_v27 }
 0x108   : > { %457 = vst [vmem:[%s784_s3] sm:$0xff] %v456_v29 }
 0x109 PF: > { %s13_s14 = sadd.s32 1, %s683_s14   ;;  %s785_s12 = smov %s679_s13 }
 0x10a   : > { %p10_p8 = scmp.ge.s32.totalorder %s13_s14, 4   ;;  %s786_s13 = smov %s788_s15 }
 0x10c   :  { %12 = sbr.rel (!%p10_p8) target bundleno = 2 (0x2), region = 76 }

</bundles_post_ra>
